<compile_context>
chip_gen: v6e
topology: v6e:2x2x1
jax: 0.10.0
libtpu: 0.0.40
codegen_flags: <defaults>
</compile_context>

<pallas_src>
import math

import jax
import jax.numpy as jnp
from jax import lax
from jax.experimental import pallas as pl
from jax.experimental.pallas import tpu as pltpu

F32 = jnp.float32

# ---------------- configuration (small, synthetic) ----------------
B = 2
C_IN = 3
IMG = 16
PATCH = 4
N_PATCHES = (IMG // PATCH) * (IMG // PATCH)          # 16
PD = C_IN * PATCH * PATCH                            # 48
DIM = 32                                             # transformer dim
N_HEADS = 2
DH = DIM // N_HEADS
FF = 64
DEPTH = 2
INR_IN = 2
INR_HIDDEN = 32
OUT_DIM = 3
N_GROUPS = 8
N_COORD = IMG * IMG                                  # 256
LANES = 128

# inr.param_shapes: (fan_in + 1, fan_out)
PARAM_SHAPES = {
    "wb0": (INR_IN + 1, INR_HIDDEN),
    "wb1": (INR_HIDDEN + 1, INR_HIDDEN),
    "wb2": (INR_HIDDEN + 1, OUT_DIM),
}
WTOKEN_RNG = {}
_n = 0
for _name, _shape in PARAM_SHAPES.items():
    _g = min(N_GROUPS, _shape[1])
    assert _shape[1] % _g == 0
    WTOKEN_RNG[_name] = (_n, _n + _g)
    _n += _g
N_WTOKENS = _n                                       # 19
N_TOKENS = N_PATCHES + N_WTOKENS                     # 35

# static per-hyponet-layer metadata: (name, row_lo, row_hi, fan_in, fan_out, rep)
HYPER_META = []
for _name, (_fi1, _fo) in PARAM_SHAPES.items():
    _l, _r = WTOKEN_RNG[_name]
    HYPER_META.append((_name, _l, _r, _fi1 - 1, _fo, _fo // (_r - _l)))


def _layernorm(x, g, b, eps=1e-5):
    mu = jnp.mean(x, axis=-1, keepdims=True)
    var = jnp.mean((x - mu) ** 2, axis=-1, keepdims=True)
    return (x - mu) * lax.rsqrt(var + eps) * g + b


# ---------------- host-side slab packing (static offsets, few big DMAs) ----------------
class _MatPacker:
    """Packs 2-D matrices into a (rows, 128) f32 slab; each block 8-row-aligned."""

    def __init__(self):
        self.blocks, self.offsets, self.row = [], {}, 0

    def add(self, name, arr):
        arr = jnp.asarray(arr, F32)
        r, c = arr.shape
        assert c <= LANES
        rp = -(-r // 8) * 8
        self.blocks.append(jnp.pad(arr, ((0, rp - r), (0, LANES - c))))
        self.offsets[name] = (self.row, r, c)
        self.row += rp

    def finalize(self):
        return jnp.concatenate(self.blocks, axis=0)


class _VecPacker:
    """Packs (1, n) vectors (biases / LN params) into one (rows, 128) f32 slab."""

    def __init__(self):
        self.rows, self.offsets = [], {}

    def add(self, name, arr):
        arr = jnp.asarray(arr, F32).reshape(1, -1)
        c = arr.shape[1]
        assert c <= LANES
        self.offsets[name] = (len(self.rows), c)
        self.rows.append(jnp.pad(arr, ((0, 0), (0, LANES - c))))

    def finalize(self):
        n = len(self.rows)
        pad = -(-n // 8) * 8 - n
        rows = self.rows + [jnp.zeros((1, LANES), F32)] * pad
        return jnp.concatenate(rows, axis=0)


def pack_params(params):
    matp, vecp = _MatPacker(), _VecPacker()
    matp.add("tok_w", params["tok_w"])
    vecp.add("tok_b", params["tok_b"])
    matp.add("tok_pos", params["tok_pos"])
    matp.add("wtokens", params["wtokens"])

    lane = jnp.arange(DIM)
    for li, p in enumerate(params["encoder_layers"]):
        pfx = f"enc{li}_"
        vecp.add(pfx + "ln1_g", p["ln1_g"])
        vecp.add(pfx + "ln1_b", p["ln1_b"])
        matp.add(pfx + "wq", p["wq"])
        vecp.add(pfx + "bq", p["bq"])
        for h in range(N_HEADS):
            # fold the per-head lane mask into K/V weights & biases on the host
            m = ((lane >= h * DH) & (lane < (h + 1) * DH)).astype(F32)[None, :]
            matp.add(pfx + f"wk{h}", p["wk"] * m)
            vecp.add(pfx + f"bk{h}", p["bk"] * m)
            matp.add(pfx + f"wv{h}", p["wv"] * m)
            vecp.add(pfx + f"bv{h}", p["bv"] * m)
        matp.add(pfx + "wo", p["wo"])
        vecp.add(pfx + "bo", p["bo"])
        vecp.add(pfx + "ln2_g", p["ln2_g"])
        vecp.add(pfx + "ln2_b", p["ln2_b"])
        matp.add(pfx + "w1", p["w1"])
        vecp.add(pfx + "b1", p["b1"])
        matp.add(pfx + "w2", p["w2"])
        vecp.add(pfx + "b2", p["b2"])

    for name in PARAM_SHAPES:
        pf = params["postfc"][name]
        vecp.add(f"{name}_ln_g", pf["ln_g"])
        vecp.add(f"{name}_ln_b", pf["ln_b"])
        matp.add(f"{name}_w", pf["w"])
        vecp.add(f"{name}_b", pf["b"])
        base_t = params["base"][name].T                       # (fan_out, fan_in + 1)
        matp.add(f"{name}_base_w_t", base_t[:, :-1])          # (fan_out, fan_in)
        matp.add(f"{name}_base_b_t", base_t[:, -1:])          # (fan_out, 1)

    return matp.finalize(), vecp.finalize(), matp.offsets, vecp.offsets


# ---------------- the single fused kernel (one grid step, batch unrolled) ----------------
def make_kernel(Bn, mat_off, vec_off):
    scale = 1.0 / math.sqrt(DH)

    def kernel(patches_ref, coord_ref, mat_ref, vec_ref, o_ref):
        def M(name):                                   # static slab slices (views)
            r0, r, c = mat_off[name]
            return mat_ref[r0:r0 + r, 0:c]

        def V(name):
            r0, c = vec_off[name]
            return vec_ref[r0:r0 + 1, 0:c]

        tok_w, tok_b, tok_pos, wtok = M("tok_w"), V("tok_b"), M("tok_pos"), M("wtokens")
        coord = coord_ref[...]                         # (INR_IN, N_COORD), host-precomputed

        for b in range(Bn):
            # -- tokenizer: patch embedding + positional embedding, append wtokens --
            patches = patches_ref[b]                   # (P, PD)
            dtok = jnp.dot(patches, tok_w, preferred_element_type=F32) + tok_b + tok_pos
            x = jnp.concatenate([dtok, wtok], axis=0)  # (T, D)

            # -- transformer encoder (pre-LN), DEPTH layers unrolled --
            for l in range(DEPTH):
                pfx = f"enc{l}_"
                xn = _layernorm(x, V(pfx + "ln1_g"), V(pfx + "ln1_b"))
                q = jnp.dot(xn, M(pfx + "wq"), preferred_element_type=F32) + V(pfx + "bq")
                attn = None
                for h in range(N_HEADS):
                    # K/V weights are pre-masked per head on the host -> kh/vh already
                    # live only in head-h lanes; no lane extraction, no mask multiplies.
                    kh = jnp.dot(xn, M(pfx + f"wk{h}"),
                                 preferred_element_type=F32) + V(pfx + f"bk{h}")
                    vh = jnp.dot(xn, M(pfx + f"wv{h}"),
                                 preferred_element_type=F32) + V(pfx + f"bv{h}")
                    s = lax.dot_general(q, kh, (((1,), (1,)), ((), ())),
                                        preferred_element_type=F32) * scale   # (T, T)
                    e = jnp.exp(s - jnp.max(s, axis=-1, keepdims=True))
                    pv = jnp.dot(e, vh, preferred_element_type=F32)           # (T, D)
                    inv = pl.reciprocal(jnp.sum(e, axis=-1, keepdims=True), approx=True)
                    ho = pv * inv                       # softmax denom applied post-PV
                    attn = ho if attn is None else attn + ho
                x = x + jnp.dot(attn, M(pfx + "wo"), preferred_element_type=F32) + V(pfx + "bo")
                xn2 = _layernorm(x, V(pfx + "ln2_g"), V(pfx + "ln2_b"))
                hid = jnp.maximum(
                    jnp.dot(xn2, M(pfx + "w1"), preferred_element_type=F32) + V(pfx + "b1"), 0.0)
                x = x + jnp.dot(hid, M(pfx + "w2"), preferred_element_type=F32) + V(pfx + "b2")

            trans_out = x                               # (T, D)

            # -- hypernetwork heads + hyponet MLP (feature-major / transposed layout) --
            h_feat = coord                              # (INR_IN, N_COORD)
            n_layers = len(HYPER_META)
            for li, (name, lo, hi, fan_in, fan_out, rep) in enumerate(HYPER_META):
                # read the WTOKEN outputs (offset by the data-token count); 8-aligned slices
                t = trans_out[N_PATCHES + lo:N_PATCHES + hi, :]          # (g, D)
                xg = jnp.dot(_layernorm(t, V(f"{name}_ln_g"), V(f"{name}_ln_b")),
                             M(f"{name}_w"), preferred_element_type=F32) + V(f"{name}_b")
                if rep > 1:                             # torch .repeat(1,1,rep) == sublane tile
                    xg = jnp.tile(xg, (rep, 1))         # -> (fan_out, fan_in)
                wm = M(f"{name}_base_w_t") * xg
                # F.normalize(dim=fan_in), eps=1e-12  (rsqrt -> EUP slot)
                sumsq = jnp.sum(wm * wm, axis=-1, keepdims=True)
                wn = wm * lax.rsqrt(jnp.maximum(sumsq, 1e-24))
                h_feat = jnp.dot(wn, h_feat, preferred_element_type=F32) + M(f"{name}_base_b_t")
                if li < n_layers - 1:
                    h_feat = jnp.maximum(h_feat, 0.0)

            o_ref[b] = h_feat                           # (OUT_DIM, 256) lane-dense

    return kernel


# ---------------- glue: patchify, coord grid, parameter init ----------------
def patchify(x, p):
    Bn, C, H, W = x.shape
    x = x.reshape(Bn, C, H // p, p, W // p, p)
    x = jnp.transpose(x, (0, 2, 4, 1, 3, 5))
    return x.reshape(Bn, (H // p) * (W // p), C * p * p)


def make_coord_grid(shape, rng=(-1.0, 1.0)):
    axes = []
    for s in shape:
        v = (jnp.arange(s, dtype=F32) + 0.5) / s
        axes.append(rng[0] + (rng[1] - rng[0]) * v)
    return jnp.stack(jnp.meshgrid(*axes, indexing="ij"), axis=-1)   # (H, W, len(shape))


def init_params(key):
    keys = iter(jax.random.split(key, 128))

    def dense(fan_in, fan_out):
        return jax.random.normal(next(keys), (fan_in, fan_out), F32) / math.sqrt(fan_in)

    params = {
        "tok_w": dense(PD, DIM),
        "tok_b": 0.01 * jax.random.normal(next(keys), (1, DIM), F32),
        "tok_pos": 0.02 * jax.random.normal(next(keys), (N_PATCHES, DIM), F32),
        "wtokens": jax.random.normal(next(keys), (N_WTOKENS, DIM), F32),
        "encoder_layers": [],
        "base": {},
        "postfc": {},
    }
    for _ in range(DEPTH):
        params["encoder_layers"].append(dict(
            ln1_g=jnp.ones((1, DIM), F32), ln1_b=jnp.zeros((1, DIM), F32),
            wq=dense(DIM, DIM), bq=jnp.zeros((1, DIM), F32),
            wk=dense(DIM, DIM), bk=jnp.zeros((1, DIM), F32),
            wv=dense(DIM, DIM), bv=jnp.zeros((1, DIM), F32),
            wo=dense(DIM, DIM), bo=jnp.zeros((1, DIM), F32),
            ln2_g=jnp.ones((1, DIM), F32), ln2_b=jnp.zeros((1, DIM), F32),
            w1=dense(DIM, FF), b1=jnp.zeros((1, FF), F32),
            w2=dense(FF, DIM), b2=jnp.zeros((1, DIM), F32),
        ))
    for name, (fi1, fo) in PARAM_SHAPES.items():
        params["base"][name] = dense(fi1, fo)                       # inr.init_wb (synthetic)
        fan_in = fi1 - 1
        params["postfc"][name] = dict(
            ln_g=jnp.ones((1, DIM), F32), ln_b=jnp.zeros((1, DIM), F32),
            w=dense(DIM, fan_in),
            b=0.01 * jax.random.normal(next(keys), (1, fan_in), F32),
        )
    return params


# ---------------- full forward (single pallas_call, single grid step) ----------------
def trans_inr_forward(data, params):
    Bn = data.shape[0]
    patches = patchify(data, PATCH)                                    # (B, P, PD)
    coord_t = make_coord_grid((IMG, IMG)).reshape(N_COORD, INR_IN).T   # (INR_IN, N_COORD)
    mat_slab, vec_slab, mat_off, vec_off = pack_params(params)
    kernel = make_kernel(Bn, mat_off, vec_off)

    def full_spec(shape):
        n = len(shape)
        return pl.BlockSpec(tuple(shape), lambda i, _n=n: (0,) * _n)

    out = pl.pallas_call(
        kernel,
        out_shape=jax.ShapeDtypeStruct((Bn, OUT_DIM, N_COORD), F32),
        grid=(1,),
        in_specs=[full_spec(patches.shape), full_spec(coord_t.shape),
                  full_spec(mat_slab.shape), full_spec(vec_slab.shape)],
        out_specs=full_spec((Bn, OUT_DIM, N_COORD)),
        compiler_params=pltpu.CompilerParams(dimension_semantics=("arbitrary",)),
    )(patches, coord_t, mat_slab, vec_slab)
    # lane-dense (B, C_out, H*W) -> (B, C_out, H, W): pure reshape, no transpose.
    return out.reshape(Bn, OUT_DIM, IMG, IMG)


# ---------------- pure-JAX reference (for sanity check) ----------------
def _ref_ln(x, g, b, eps=1e-5):
    mu = x.mean(-1, keepdims=True)
    var = ((x - mu) ** 2).mean(-1, keepdims=True)
    return (x - mu) * lax.rsqrt(var + eps) * g + b


def reference_forward(data, params):
    Bn = data.shape[0]
    hp = lambda a, w, b: jnp.einsum("...d,de->...e", a, w, precision="highest") + b
    patches = patchify(data, PATCH)
    dtok = hp(patches, params["tok_w"], params["tok_b"]) + params["tok_pos"][None]
    x = jnp.concatenate([dtok, jnp.broadcast_to(params["wtokens"][None], (Bn, N_WTOKENS, DIM))], 1)
    dh = DIM // N_HEADS
    for p in params["encoder_layers"]:
        xn = _ref_ln(x, p["ln1_g"], p["ln1_b"])
        q, k, v = hp(xn, p["wq"], p["bq"]), hp(xn, p["wk"], p["bk"]), hp(xn, p["wv"], p["bv"])
        outs = []
        for h in range(N_HEADS):
            sl = slice(h * dh, (h + 1) * dh)
            s = jnp.einsum("btd,bsd->bts", q[..., sl], k[..., sl], precision="highest") / math.sqrt(dh)
            pm = jax.nn.softmax(s, axis=-1)
            outs.append(jnp.einsum("bts,bsd->btd", pm, v[..., sl], precision="highest"))
        x = x + hp(jnp.concatenate(outs, -1), p["wo"], p["bo"])
        xn2 = _ref_ln(x, p["ln2_g"], p["ln2_b"])
        x = x + hp(jnp.maximum(hp(xn2, p["w1"], p["b1"]), 0.0), p["w2"], p["b2"])
    trans_out = x

    wbs = {}
    for name, (fi1, fo) in PARAM_SHAPES.items():
        l, r = WTOKEN_RNG[name]
        p = params["postfc"][name]
        # hyper heads read the wtoken outputs (data tokens come first in the sequence)
        t = _ref_ln(trans_out[:, N_PATCHES + l:N_PATCHES + r, :], p["ln_g"], p["ln_b"])
        xx = jnp.einsum("bgd,df->bgf", t, p["w"], precision="highest") + p["b"]
        xx = jnp.swapaxes(xx, -1, -2)                                 # (B, fan_in, g)
        base = params["base"][name]
        w = jnp.broadcast_to(base[None, :-1, :], (Bn, fi1 - 1, fo))
        b = jnp.broadcast_to(base[None, -1:, :], (Bn, 1, fo))
        rep = fo // xx.shape[-1]
        xr = jnp.concatenate([xx] * rep, axis=-1)
        wm = w * xr
        norm = jnp.sqrt(jnp.sum(wm * wm, axis=1, keepdims=True))
        wbs[name] = jnp.concatenate([wm / jnp.maximum(norm, 1e-12), b], axis=1)

    coord = make_coord_grid((IMG, IMG))
    h = jnp.broadcast_to(coord[None], (Bn,) + coord.shape).reshape(Bn, IMG * IMG, INR_IN)
    for i, name in enumerate(["wb0", "wb1", "wb2"]):
        wb = wbs[name]
        h = jnp.einsum("bnd,bde->bne", h, wb[:, :-1, :], precision="highest") + wb[:, -1:, :]
        if i < 2:
            h = jnp.maximum(h, 0.0)
    pred = h.reshape(Bn, IMG, IMG, OUT_DIM)
    return jnp.transpose(pred, (0, 3, 1, 2))


# ---------------- main ----------------
if __name__ == "__main__":
    key = jax.random.PRNGKey(0)
    kd, kp = jax.random.split(key)
    data = jax.random.normal(kd, (B, C_IN, IMG, IMG), F32)            # NCHW, like PyTorch
    params = init_params(kp)

    fwd = jax.jit(trans_inr_forward)
    pred = jax.block_until_ready(fwd(data, params))
    assert pred.shape == (B, OUT_DIM, IMG, IMG)
    assert bool(jnp.all(jnp.isfinite(pred)))

    ref = reference_forward(data, params)
    max_err = float(jnp.max(jnp.abs(pred - ref)))
    assert max_err < 1e-2, f"mismatch vs reference: {max_err}"

    print("KERNEL_OK")
</pallas_src>

<mosaic_0001>
module attributes {stable_mosaic.version = 11 : i64} {
  func.func @kernel(%arg0: i32, %arg1: memref<2x16x48xf32, #tpu.memory_space<vmem>>, %arg2: memref<2x256xf32, #tpu.memory_space<vmem>>, %arg3: memref<904x128xf32, #tpu.memory_space<vmem>>, %arg4: memref<40x128xf32, #tpu.memory_space<vmem>>, %arg5: memref<2x3x256xf32, #tpu.memory_space<vmem>>) attributes {dimension_semantics = [#tpu.dimension_semantics<arbitrary>], iteration_bounds = array<i64: 1>, scalar_prefetch = 0 : i64, scratch_operands = 0 : i64, tpu.core_type = #tpu.core_type<tc>, window_params = [{pipeline_mode = #tpu.pipeline_mode<synchronous>, transform_indices = @transform_0, window_bounds = array<i64: 2, 16, 48>}, {pipeline_mode = #tpu.pipeline_mode<synchronous>, transform_indices = @transform_1, window_bounds = array<i64: 2, 256>}, {pipeline_mode = #tpu.pipeline_mode<synchronous>, transform_indices = @transform_2, window_bounds = array<i64: 904, 128>}, {pipeline_mode = #tpu.pipeline_mode<synchronous>, transform_indices = @transform_3, window_bounds = array<i64: 40, 128>}, {pipeline_mode = #tpu.pipeline_mode<synchronous>, transform_indices = @transform_4, window_bounds = array<i64: 2, 3, 256>}]} {
    %c0 = arith.constant 0 : index
    %c0_0 = arith.constant 0 : index
    %0 = vector.load %arg3[%c0, %c0_0] : memref<904x128xf32, #tpu.memory_space<vmem>>, vector<48x32xf32>
    %c0_1 = arith.constant 0 : index
    %c0_2 = arith.constant 0 : index
    %1 = vector.load %arg4[%c0_1, %c0_2] : memref<40x128xf32, #tpu.memory_space<vmem>>, vector<1x32xf32>
    %c48 = arith.constant 48 : index
    %c0_3 = arith.constant 0 : index
    %2 = vector.load %arg3[%c48, %c0_3] : memref<904x128xf32, #tpu.memory_space<vmem>>, vector<16x32xf32>
    %c64 = arith.constant 64 : index
    %c0_4 = arith.constant 0 : index
    %3 = vector.load %arg3[%c64, %c0_4] : memref<904x128xf32, #tpu.memory_space<vmem>>, vector<19x32xf32>
    %c0_5 = arith.constant 0 : index
    %c0_6 = arith.constant 0 : index
    %4 = vector.load %arg2[%c0_5, %c0_6] : memref<2x256xf32, #tpu.memory_space<vmem>>, vector<2x256xf32>
    %c0_7 = arith.constant 0 : index
    %c0_8 = arith.constant 0 : index
    %c0_9 = arith.constant 0 : index
    %5 = vector.load %arg1[%c0_7, %c0_8, %c0_9] : memref<2x16x48xf32, #tpu.memory_space<vmem>>, vector<1x16x48xf32>
    %6 = vector.shape_cast %5 : vector<1x16x48xf32> to vector<16x48xf32>
    %cst = arith.constant dense<0.000000e+00> : vector<16x32xf32>
    %7 = tpu.matmul %6, %0, %cst {dimension_numbers = #tpu.dot_dimension_numbers<[1], [0], [0], [1], [0, 0, 1, 1], [], []>} : vector<16x48xf32>, vector<48x32xf32>, vector<16x32xf32> -> vector<16x32xf32>
    %8 = vector.broadcast %1 : vector<1x32xf32> to vector<16x32xf32>
    %9 = arith.addf %7, %8 : vector<16x32xf32>
    %10 = arith.addf %9, %2 : vector<16x32xf32>
    %11 = tpu.concatenate %10, %3 in 0 : vector<16x32xf32>, vector<19x32xf32> -> vector<35x32xf32>
    %c1 = arith.constant 1 : index
    %c0_10 = arith.constant 0 : index
    %12 = vector.load %arg4[%c1, %c0_10] : memref<40x128xf32, #tpu.memory_space<vmem>>, vector<1x32xf32>
    %c2 = arith.constant 2 : index
    %c0_11 = arith.constant 0 : index
    %13 = vector.load %arg4[%c2, %c0_11] : memref<40x128xf32, #tpu.memory_space<vmem>>, vector<1x32xf32>
    %cst_12 = arith.constant dense<0.000000e+00> : vector<35xf32>
    %14 = vector.multi_reduction <add>, %11, %cst_12 [1] : vector<35x32xf32> to vector<35xf32>
    %15 = vector.shape_cast %14 : vector<35xf32> to vector<35x1xf32>
    %cst_13 = arith.constant 3.200000e+01 : f32
    %16 = vector.broadcast %cst_13 : f32 to vector<35x1xf32>
    %17 = arith.divf %15, %16 : vector<35x1xf32>
    %18 = vector.broadcast %17 : vector<35x1xf32> to vector<35x32xf32>
    %19 = arith.subf %11, %18 : vector<35x32xf32>
    %20 = arith.mulf %19, %19 : vector<35x32xf32>
    %cst_14 = arith.constant dense<0.000000e+00> : vector<35xf32>
    %21 = vector.multi_reduction <add>, %20, %cst_14 [1] : vector<35x32xf32> to vector<35xf32>
    %22 = vector.shape_cast %21 : vector<35xf32> to vector<35x1xf32>
    %cst_15 = arith.constant 3.200000e+01 : f32
    %23 = vector.broadcast %cst_15 : f32 to vector<35x1xf32>
    %24 = arith.divf %22, %23 : vector<35x1xf32>
    %25 = vector.broadcast %17 : vector<35x1xf32> to vector<35x32xf32>
    %26 = arith.subf %11, %25 : vector<35x32xf32>
    %cst_16 = arith.constant 9.99999974E-6 : f32
    %27 = vector.broadcast %cst_16 : f32 to vector<35x1xf32>
    %28 = arith.addf %24, %27 : vector<35x1xf32>
    %29 = math.rsqrt %28 : vector<35x1xf32>
    %30 = vector.broadcast %29 : vector<35x1xf32> to vector<35x32xf32>
    %31 = arith.mulf %26, %30 : vector<35x32xf32>
    %32 = vector.broadcast %12 : vector<1x32xf32> to vector<35x32xf32>
    %33 = arith.mulf %31, %32 : vector<35x32xf32>
    %34 = vector.broadcast %13 : vector<1x32xf32> to vector<35x32xf32>
    %35 = arith.addf %33, %34 : vector<35x32xf32>
    %c88 = arith.constant 88 : index
    %c0_17 = arith.constant 0 : index
    %36 = vector.load %arg3[%c88, %c0_17] : memref<904x128xf32, #tpu.memory_space<vmem>>, vector<32x32xf32>
    %cst_18 = arith.constant dense<0.000000e+00> : vector<35x32xf32>
    %37 = tpu.matmul %35, %36, %cst_18 {dimension_numbers = #tpu.dot_dimension_numbers<[1], [0], [0], [1], [0, 0, 1, 1], [], []>} : vector<35x32xf32>, vector<32x32xf32>, vector<35x32xf32> -> vector<35x32xf32>
    %c3 = arith.constant 3 : index
    %c0_19 = arith.constant 0 : index
    %38 = vector.load %arg4[%c3, %c0_19] : memref<40x128xf32, #tpu.memory_space<vmem>>, vector<1x32xf32>
    %39 = vector.broadcast %38 : vector<1x32xf32> to vector<35x32xf32>
    %40 = arith.addf %37, %39 : vector<35x32xf32>
    %c120 = arith.constant 120 : index
    %c0_20 = arith.constant 0 : index
    %41 = vector.load %arg3[%c120, %c0_20] : memref<904x128xf32, #tpu.memory_space<vmem>>, vector<32x32xf32>
    %cst_21 = arith.constant dense<0.000000e+00> : vector<35x32xf32>
    %42 = tpu.matmul %35, %41, %cst_21 {dimension_numbers = #tpu.dot_dimension_numbers<[1], [0], [0], [1], [0, 0, 1, 1], [], []>} : vector<35x32xf32>, vector<32x32xf32>, vector<35x32xf32> -> vector<35x32xf32>
    %c4 = arith.constant 4 : index
    %c0_22 = arith.constant 0 : index
    %43 = vector.load %arg4[%c4, %c0_22] : memref<40x128xf32, #tpu.memory_space<vmem>>, vector<1x32xf32>
    %44 = vector.broadcast %43 : vector<1x32xf32> to vector<35x32xf32>
    %45 = arith.addf %42, %44 : vector<35x32xf32>
    %c152 = arith.constant 152 : index
    %c0_23 = arith.constant 0 : index
    %46 = vector.load %arg3[%c152, %c0_23] : memref<904x128xf32, #tpu.memory_space<vmem>>, vector<32x32xf32>
    %cst_24 = arith.constant dense<0.000000e+00> : vector<35x32xf32>
    %47 = tpu.matmul %35, %46, %cst_24 {dimension_numbers = #tpu.dot_dimension_numbers<[1], [0], [0], [1], [0, 0, 1, 1], [], []>} : vector<35x32xf32>, vector<32x32xf32>, vector<35x32xf32> -> vector<35x32xf32>
    %c5 = arith.constant 5 : index
    %c0_25 = arith.constant 0 : index
    %48 = vector.load %arg4[%c5, %c0_25] : memref<40x128xf32, #tpu.memory_space<vmem>>, vector<1x32xf32>
    %49 = vector.broadcast %48 : vector<1x32xf32> to vector<35x32xf32>
    %50 = arith.addf %47, %49 : vector<35x32xf32>
    %cst_26 = arith.constant dense<0.000000e+00> : vector<35x35xf32>
    %51 = tpu.matmul %40, %45, %cst_26 {dimension_numbers = #tpu.dot_dimension_numbers<[1], [1], [0], [0], [0, 0, 1, 0], [], []>} : vector<35x32xf32>, vector<35x32xf32>, vector<35x35xf32> -> vector<35x35xf32>
    %cst_27 = arith.constant 2.500000e-01 : f32
    %52 = vector.broadcast %cst_27 : f32 to vector<35x35xf32>
    %53 = arith.mulf %51, %52 : vector<35x35xf32>
    %cst_28 = arith.constant dense<0xFF800000> : vector<35xf32>
    %54 = vector.multi_reduction <maximumf>, %53, %cst_28 [1] : vector<35x35xf32> to vector<35xf32>
    %55 = vector.shape_cast %54 : vector<35xf32> to vector<35x1xf32>
    %56 = vector.broadcast %55 : vector<35x1xf32> to vector<35x35xf32>
    %57 = arith.subf %53, %56 : vector<35x35xf32>
    %58 = math.exp %57 : vector<35x35xf32>
    %cst_29 = arith.constant dense<0.000000e+00> : vector<35x32xf32>
    %59 = tpu.matmul %58, %50, %cst_29 {dimension_numbers = #tpu.dot_dimension_numbers<[1], [0], [0], [1], [0, 0, 1, 1], [], []>} : vector<35x35xf32>, vector<35x32xf32>, vector<35x32xf32> -> vector<35x32xf32>
    %cst_30 = arith.constant dense<0.000000e+00> : vector<35xf32>
    %60 = vector.multi_reduction <add>, %58, %cst_30 [1] : vector<35x35xf32> to vector<35xf32>
    %61 = vector.shape_cast %60 : vector<35xf32> to vector<35x1xf32>
    %62 = tpu.reciprocal %61 {approx = true} : vector<35x1xf32> -> vector<35x1xf32>
    %63 = vector.broadcast %62 : vector<35x1xf32> to vector<35x32xf32>
    %64 = arith.mulf %59, %63 : vector<35x32xf32>
    %c184 = arith.constant 184 : index
    %c0_31 = arith.constant 0 : index
    %65 = vector.load %arg3[%c184, %c0_31] : memref<904x128xf32, #tpu.memory_space<vmem>>, vector<32x32xf32>
    %cst_32 = arith.constant dense<0.000000e+00> : vector<35x32xf32>
    %66 = tpu.matmul %35, %65, %cst_32 {dimension_numbers = #tpu.dot_dimension_numbers<[1], [0], [0], [1], [0, 0, 1, 1], [], []>} : vector<35x32xf32>, vector<32x32xf32>, vector<35x32xf32> -> vector<35x32xf32>
    %c6 = arith.constant 6 : index
    %c0_33 = arith.constant 0 : index
    %67 = vector.load %arg4[%c6, %c0_33] : memref<40x128xf32, #tpu.memory_space<vmem>>, vector<1x32xf32>
    %68 = vector.broadcast %67 : vector<1x32xf32> to vector<35x32xf32>
    %69 = arith.addf %66, %68 : vector<35x32xf32>
    %c216 = arith.constant 216 : index
    %c0_34 = arith.constant 0 : index
    %70 = vector.load %arg3[%c216, %c0_34] : memref<904x128xf32, #tpu.memory_space<vmem>>, vector<32x32xf32>
    %cst_35 = arith.constant dense<0.000000e+00> : vector<35x32xf32>
    %71 = tpu.matmul %35, %70, %cst_35 {dimension_numbers = #tpu.dot_dimension_numbers<[1], [0], [0], [1], [0, 0, 1, 1], [], []>} : vector<35x32xf32>, vector<32x32xf32>, vector<35x32xf32> -> vector<35x32xf32>
    %c7 = arith.constant 7 : index
    %c0_36 = arith.constant 0 : index
    %72 = vector.load %arg4[%c7, %c0_36] : memref<40x128xf32, #tpu.memory_space<vmem>>, vector<1x32xf32>
    %73 = vector.broadcast %72 : vector<1x32xf32> to vector<35x32xf32>
    %74 = arith.addf %71, %73 : vector<35x32xf32>
    %cst_37 = arith.constant dense<0.000000e+00> : vector<35x35xf32>
    %75 = tpu.matmul %40, %69, %cst_37 {dimension_numbers = #tpu.dot_dimension_numbers<[1], [1], [0], [0], [0, 0, 1, 0], [], []>} : vector<35x32xf32>, vector<35x32xf32>, vector<35x35xf32> -> vector<35x35xf32>
    %cst_38 = arith.constant 2.500000e-01 : f32
    %76 = vector.broadcast %cst_38 : f32 to vector<35x35xf32>
    %77 = arith.mulf %75, %76 : vector<35x35xf32>
    %cst_39 = arith.constant dense<0xFF800000> : vector<35xf32>
    %78 = vector.multi_reduction <maximumf>, %77, %cst_39 [1] : vector<35x35xf32> to vector<35xf32>
    %79 = vector.shape_cast %78 : vector<35xf32> to vector<35x1xf32>
    %80 = vector.broadcast %79 : vector<35x1xf32> to vector<35x35xf32>
    %81 = arith.subf %77, %80 : vector<35x35xf32>
    %82 = math.exp %81 : vector<35x35xf32>
    %cst_40 = arith.constant dense<0.000000e+00> : vector<35x32xf32>
    %83 = tpu.matmul %82, %74, %cst_40 {dimension_numbers = #tpu.dot_dimension_numbers<[1], [0], [0], [1], [0, 0, 1, 1], [], []>} : vector<35x35xf32>, vector<35x32xf32>, vector<35x32xf32> -> vector<35x32xf32>
    %cst_41 = arith.constant dense<0.000000e+00> : vector<35xf32>
    %84 = vector.multi_reduction <add>, %82, %cst_41 [1] : vector<35x35xf32> to vector<35xf32>
    %85 = vector.shape_cast %84 : vector<35xf32> to vector<35x1xf32>
    %86 = tpu.reciprocal %85 {approx = true} : vector<35x1xf32> -> vector<35x1xf32>
    %87 = vector.broadcast %86 : vector<35x1xf32> to vector<35x32xf32>
    %88 = arith.mulf %83, %87 : vector<35x32xf32>
    %89 = arith.addf %64, %88 : vector<35x32xf32>
    %c248 = arith.constant 248 : index
    %c0_42 = arith.constant 0 : index
    %90 = vector.load %arg3[%c248, %c0_42] : memref<904x128xf32, #tpu.memory_space<vmem>>, vector<32x32xf32>
    %cst_43 = arith.constant dense<0.000000e+00> : vector<35x32xf32>
    %91 = tpu.matmul %89, %90, %cst_43 {dimension_numbers = #tpu.dot_dimension_numbers<[1], [0], [0], [1], [0, 0, 1, 1], [], []>} : vector<35x32xf32>, vector<32x32xf32>, vector<35x32xf32> -> vector<35x32xf32>
    %92 = arith.addf %11, %91 : vector<35x32xf32>
    %c8 = arith.constant 8 : index
    %c0_44 = arith.constant 0 : index
    %93 = vector.load %arg4[%c8, %c0_44] : memref<40x128xf32, #tpu.memory_space<vmem>>, vector<1x32xf32>
    %94 = vector.broadcast %93 : vector<1x32xf32> to vector<35x32xf32>
    %95 = arith.addf %92, %94 : vector<35x32xf32>
    %c9 = arith.constant 9 : index
    %c0_45 = arith.constant 0 : index
    %96 = vector.load %arg4[%c9, %c0_45] : memref<40x128xf32, #tpu.memory_space<vmem>>, vector<1x32xf32>
    %c10 = arith.constant 10 : index
    %c0_46 = arith.constant 0 : index
    %97 = vector.load %arg4[%c10, %c0_46] : memref<40x128xf32, #tpu.memory_space<vmem>>, vector<1x32xf32>
    %cst_47 = arith.constant dense<0.000000e+00> : vector<35xf32>
    %98 = vector.multi_reduction <add>, %95, %cst_47 [1] : vector<35x32xf32> to vector<35xf32>
    %99 = vector.shape_cast %98 : vector<35xf32> to vector<35x1xf32>
    %cst_48 = arith.constant 3.200000e+01 : f32
    %100 = vector.broadcast %cst_48 : f32 to vector<35x1xf32>
    %101 = arith.divf %99, %100 : vector<35x1xf32>
    %102 = vector.broadcast %101 : vector<35x1xf32> to vector<35x32xf32>
    %103 = arith.subf %95, %102 : vector<35x32xf32>
    %104 = arith.mulf %103, %103 : vector<35x32xf32>
    %cst_49 = arith.constant dense<0.000000e+00> : vector<35xf32>
    %105 = vector.multi_reduction <add>, %104, %cst_49 [1] : vector<35x32xf32> to vector<35xf32>
    %106 = vector.shape_cast %105 : vector<35xf32> to vector<35x1xf32>
    %cst_50 = arith.constant 3.200000e+01 : f32
    %107 = vector.broadcast %cst_50 : f32 to vector<35x1xf32>
    %108 = arith.divf %106, %107 : vector<35x1xf32>
    %109 = vector.broadcast %101 : vector<35x1xf32> to vector<35x32xf32>
    %110 = arith.subf %95, %109 : vector<35x32xf32>
    %cst_51 = arith.constant 9.99999974E-6 : f32
    %111 = vector.broadcast %cst_51 : f32 to vector<35x1xf32>
    %112 = arith.addf %108, %111 : vector<35x1xf32>
    %113 = math.rsqrt %112 : vector<35x1xf32>
    %114 = vector.broadcast %113 : vector<35x1xf32> to vector<35x32xf32>
    %115 = arith.mulf %110, %114 : vector<35x32xf32>
    %116 = vector.broadcast %96 : vector<1x32xf32> to vector<35x32xf32>
    %117 = arith.mulf %115, %116 : vector<35x32xf32>
    %118 = vector.broadcast %97 : vector<1x32xf32> to vector<35x32xf32>
    %119 = arith.addf %117, %118 : vector<35x32xf32>
    %c280 = arith.constant 280 : index
    %c0_52 = arith.constant 0 : index
    %120 = vector.load %arg3[%c280, %c0_52] : memref<904x128xf32, #tpu.memory_space<vmem>>, vector<32x64xf32>
    %cst_53 = arith.constant dense<0.000000e+00> : vector<35x64xf32>
    %121 = tpu.matmul %119, %120, %cst_53 {dimension_numbers = #tpu.dot_dimension_numbers<[1], [0], [0], [1], [0, 0, 1, 1], [], []>} : vector<35x32xf32>, vector<32x64xf32>, vector<35x64xf32> -> vector<35x64xf32>
    %c11 = arith.constant 11 : index
    %c0_54 = arith.constant 0 : index
    %122 = vector.load %arg4[%c11, %c0_54] : memref<40x128xf32, #tpu.memory_space<vmem>>, vector<1x64xf32>
    %123 = vector.broadcast %122 : vector<1x64xf32> to vector<35x64xf32>
    %124 = arith.addf %121, %123 : vector<35x64xf32>
    %cst_55 = arith.constant 0.000000e+00 : f32
    %125 = vector.broadcast %cst_55 : f32 to vector<35x64xf32>
    %126 = arith.maximumf %124, %125 : vector<35x64xf32>
    %c312 = arith.constant 312 : index
    %c0_56 = arith.constant 0 : index
    %127 = vector.load %arg3[%c312, %c0_56] : memref<904x128xf32, #tpu.memory_space<vmem>>, vector<64x32xf32>
    %cst_57 = arith.constant dense<0.000000e+00> : vector<35x32xf32>
    %128 = tpu.matmul %126, %127, %cst_57 {dimension_numbers = #tpu.dot_dimension_numbers<[1], [0], [0], [1], [0, 0, 1, 1], [], []>} : vector<35x64xf32>, vector<64x32xf32>, vector<35x32xf32> -> vector<35x32xf32>
    %129 = arith.addf %95, %128 : vector<35x32xf32>
    %c12 = arith.constant 12 : index
    %c0_58 = arith.constant 0 : index
    %130 = vector.load %arg4[%c12, %c0_58] : memref<40x128xf32, #tpu.memory_space<vmem>>, vector<1x32xf32>
    %131 = vector.broadcast %130 : vector<1x32xf32> to vector<35x32xf32>
    %132 = arith.addf %129, %131 : vector<35x32xf32>
    %c13 = arith.constant 13 : index
    %c0_59 = arith.constant 0 : index
    %133 = vector.load %arg4[%c13, %c0_59] : memref<40x128xf32, #tpu.memory_space<vmem>>, vector<1x32xf32>
    %c14 = arith.constant 14 : index
    %c0_60 = arith.constant 0 : index
    %134 = vector.load %arg4[%c14, %c0_60] : memref<40x128xf32, #tpu.memory_space<vmem>>, vector<1x32xf32>
    %cst_61 = arith.constant dense<0.000000e+00> : vector<35xf32>
    %135 = vector.multi_reduction <add>, %132, %cst_61 [1] : vector<35x32xf32> to vector<35xf32>
    %136 = vector.shape_cast %135 : vector<35xf32> to vector<35x1xf32>
    %cst_62 = arith.constant 3.200000e+01 : f32
    %137 = vector.broadcast %cst_62 : f32 to vector<35x1xf32>
    %138 = arith.divf %136, %137 : vector<35x1xf32>
    %139 = vector.broadcast %138 : vector<35x1xf32> to vector<35x32xf32>
    %140 = arith.subf %132, %139 : vector<35x32xf32>
    %141 = arith.mulf %140, %140 : vector<35x32xf32>
    %cst_63 = arith.constant dense<0.000000e+00> : vector<35xf32>
    %142 = vector.multi_reduction <add>, %141, %cst_63 [1] : vector<35x32xf32> to vector<35xf32>
    %143 = vector.shape_cast %142 : vector<35xf32> to vector<35x1xf32>
    %cst_64 = arith.constant 3.200000e+01 : f32
    %144 = vector.broadcast %cst_64 : f32 to vector<35x1xf32>
    %145 = arith.divf %143, %144 : vector<35x1xf32>
    %146 = vector.broadcast %138 : vector<35x1xf32> to vector<35x32xf32>
    %147 = arith.subf %132, %146 : vector<35x32xf32>
    %cst_65 = arith.constant 9.99999974E-6 : f32
    %148 = vector.broadcast %cst_65 : f32 to vector<35x1xf32>
    %149 = arith.addf %145, %148 : vector<35x1xf32>
    %150 = math.rsqrt %149 : vector<35x1xf32>
    %151 = vector.broadcast %150 : vector<35x1xf32> to vector<35x32xf32>
    %152 = arith.mulf %147, %151 : vector<35x32xf32>
    %153 = vector.broadcast %133 : vector<1x32xf32> to vector<35x32xf32>
    %154 = arith.mulf %152, %153 : vector<35x32xf32>
    %155 = vector.broadcast %134 : vector<1x32xf32> to vector<35x32xf32>
    %156 = arith.addf %154, %155 : vector<35x32xf32>
    %c376 = arith.constant 376 : index
    %c0_66 = arith.constant 0 : index
    %157 = vector.load %arg3[%c376, %c0_66] : memref<904x128xf32, #tpu.memory_space<vmem>>, vector<32x32xf32>
    %cst_67 = arith.constant dense<0.000000e+00> : vector<35x32xf32>
    %158 = tpu.matmul %156, %157, %cst_67 {dimension_numbers = #tpu.dot_dimension_numbers<[1], [0], [0], [1], [0, 0, 1, 1], [], []>} : vector<35x32xf32>, vector<32x32xf32>, vector<35x32xf32> -> vector<35x32xf32>
    %c15 = arith.constant 15 : index
    %c0_68 = arith.constant 0 : index
    %159 = vector.load %arg4[%c15, %c0_68] : memref<40x128xf32, #tpu.memory_space<vmem>>, vector<1x32xf32>
    %160 = vector.broadcast %159 : vector<1x32xf32> to vector<35x32xf32>
    %161 = arith.addf %158, %160 : vector<35x32xf32>
    %c408 = arith.constant 408 : index
    %c0_69 = arith.constant 0 : index
    %162 = vector.load %arg3[%c408, %c0_69] : memref<904x128xf32, #tpu.memory_space<vmem>>, vector<32x32xf32>
    %cst_70 = arith.constant dense<0.000000e+00> : vector<35x32xf32>
    %163 = tpu.matmul %156, %162, %cst_70 {dimension_numbers = #tpu.dot_dimension_numbers<[1], [0], [0], [1], [0, 0, 1, 1], [], []>} : vector<35x32xf32>, vector<32x32xf32>, vector<35x32xf32> -> vector<35x32xf32>
    %c16 = arith.constant 16 : index
    %c0_71 = arith.constant 0 : index
    %164 = vector.load %arg4[%c16, %c0_71] : memref<40x128xf32, #tpu.memory_space<vmem>>, vector<1x32xf32>
    %165 = vector.broadcast %164 : vector<1x32xf32> to vector<35x32xf32>
    %166 = arith.addf %163, %165 : vector<35x32xf32>
    %c440 = arith.constant 440 : index
    %c0_72 = arith.constant 0 : index
    %167 = vector.load %arg3[%c440, %c0_72] : memref<904x128xf32, #tpu.memory_space<vmem>>, vector<32x32xf32>
    %cst_73 = arith.constant dense<0.000000e+00> : vector<35x32xf32>
    %168 = tpu.matmul %156, %167, %cst_73 {dimension_numbers = #tpu.dot_dimension_numbers<[1], [0], [0], [1], [0, 0, 1, 1], [], []>} : vector<35x32xf32>, vector<32x32xf32>, vector<35x32xf32> -> vector<35x32xf32>
    %c17 = arith.constant 17 : index
    %c0_74 = arith.constant 0 : index
    %169 = vector.load %arg4[%c17, %c0_74] : memref<40x128xf32, #tpu.memory_space<vmem>>, vector<1x32xf32>
    %170 = vector.broadcast %169 : vector<1x32xf32> to vector<35x32xf32>
    %171 = arith.addf %168, %170 : vector<35x32xf32>
    %cst_75 = arith.constant dense<0.000000e+00> : vector<35x35xf32>
    %172 = tpu.matmul %161, %166, %cst_75 {dimension_numbers = #tpu.dot_dimension_numbers<[1], [1], [0], [0], [0, 0, 1, 0], [], []>} : vector<35x32xf32>, vector<35x32xf32>, vector<35x35xf32> -> vector<35x35xf32>
    %cst_76 = arith.constant 2.500000e-01 : f32
    %173 = vector.broadcast %cst_76 : f32 to vector<35x35xf32>
    %174 = arith.mulf %172, %173 : vector<35x35xf32>
    %cst_77 = arith.constant dense<0xFF800000> : vector<35xf32>
    %175 = vector.multi_reduction <maximumf>, %174, %cst_77 [1] : vector<35x35xf32> to vector<35xf32>
    %176 = vector.shape_cast %175 : vector<35xf32> to vector<35x1xf32>
    %177 = vector.broadcast %176 : vector<35x1xf32> to vector<35x35xf32>
    %178 = arith.subf %174, %177 : vector<35x35xf32>
    %179 = math.exp %178 : vector<35x35xf32>
    %cst_78 = arith.constant dense<0.000000e+00> : vector<35x32xf32>
    %180 = tpu.matmul %179, %171, %cst_78 {dimension_numbers = #tpu.dot_dimension_numbers<[1], [0], [0], [1], [0, 0, 1, 1], [], []>} : vector<35x35xf32>, vector<35x32xf32>, vector<35x32xf32> -> vector<35x32xf32>
    %cst_79 = arith.constant dense<0.000000e+00> : vector<35xf32>
    %181 = vector.multi_reduction <add>, %179, %cst_79 [1] : vector<35x35xf32> to vector<35xf32>
    %182 = vector.shape_cast %181 : vector<35xf32> to vector<35x1xf32>
    %183 = tpu.reciprocal %182 {approx = true} : vector<35x1xf32> -> vector<35x1xf32>
    %184 = vector.broadcast %183 : vector<35x1xf32> to vector<35x32xf32>
    %185 = arith.mulf %180, %184 : vector<35x32xf32>
    %c472 = arith.constant 472 : index
    %c0_80 = arith.constant 0 : index
    %186 = vector.load %arg3[%c472, %c0_80] : memref<904x128xf32, #tpu.memory_space<vmem>>, vector<32x32xf32>
    %cst_81 = arith.constant dense<0.000000e+00> : vector<35x32xf32>
    %187 = tpu.matmul %156, %186, %cst_81 {dimension_numbers = #tpu.dot_dimension_numbers<[1], [0], [0], [1], [0, 0, 1, 1], [], []>} : vector<35x32xf32>, vector<32x32xf32>, vector<35x32xf32> -> vector<35x32xf32>
    %c18 = arith.constant 18 : index
    %c0_82 = arith.constant 0 : index
    %188 = vector.load %arg4[%c18, %c0_82] : memref<40x128xf32, #tpu.memory_space<vmem>>, vector<1x32xf32>
    %189 = vector.broadcast %188 : vector<1x32xf32> to vector<35x32xf32>
    %190 = arith.addf %187, %189 : vector<35x32xf32>
    %c504 = arith.constant 504 : index
    %c0_83 = arith.constant 0 : index
    %191 = vector.load %arg3[%c504, %c0_83] : memref<904x128xf32, #tpu.memory_space<vmem>>, vector<32x32xf32>
    %cst_84 = arith.constant dense<0.000000e+00> : vector<35x32xf32>
    %192 = tpu.matmul %156, %191, %cst_84 {dimension_numbers = #tpu.dot_dimension_numbers<[1], [0], [0], [1], [0, 0, 1, 1], [], []>} : vector<35x32xf32>, vector<32x32xf32>, vector<35x32xf32> -> vector<35x32xf32>
    %c19 = arith.constant 19 : index
    %c0_85 = arith.constant 0 : index
    %193 = vector.load %arg4[%c19, %c0_85] : memref<40x128xf32, #tpu.memory_space<vmem>>, vector<1x32xf32>
    %194 = vector.broadcast %193 : vector<1x32xf32> to vector<35x32xf32>
    %195 = arith.addf %192, %194 : vector<35x32xf32>
    %cst_86 = arith.constant dense<0.000000e+00> : vector<35x35xf32>
    %196 = tpu.matmul %161, %190, %cst_86 {dimension_numbers = #tpu.dot_dimension_numbers<[1], [1], [0], [0], [0, 0, 1, 0], [], []>} : vector<35x32xf32>, vector<35x32xf32>, vector<35x35xf32> -> vector<35x35xf32>
    %cst_87 = arith.constant 2.500000e-01 : f32
    %197 = vector.broadcast %cst_87 : f32 to vector<35x35xf32>
    %198 = arith.mulf %196, %197 : vector<35x35xf32>
    %cst_88 = arith.constant dense<0xFF800000> : vector<35xf32>
    %199 = vector.multi_reduction <maximumf>, %198, %cst_88 [1] : vector<35x35xf32> to vector<35xf32>
    %200 = vector.shape_cast %199 : vector<35xf32> to vector<35x1xf32>
    %201 = vector.broadcast %200 : vector<35x1xf32> to vector<35x35xf32>
    %202 = arith.subf %198, %201 : vector<35x35xf32>
    %203 = math.exp %202 : vector<35x35xf32>
    %cst_89 = arith.constant dense<0.000000e+00> : vector<35x32xf32>
    %204 = tpu.matmul %203, %195, %cst_89 {dimension_numbers = #tpu.dot_dimension_numbers<[1], [0], [0], [1], [0, 0, 1, 1], [], []>} : vector<35x35xf32>, vector<35x32xf32>, vector<35x32xf32> -> vector<35x32xf32>
    %cst_90 = arith.constant dense<0.000000e+00> : vector<35xf32>
    %205 = vector.multi_reduction <add>, %203, %cst_90 [1] : vector<35x35xf32> to vector<35xf32>
    %206 = vector.shape_cast %205 : vector<35xf32> to vector<35x1xf32>
    %207 = tpu.reciprocal %206 {approx = true} : vector<35x1xf32> -> vector<35x1xf32>
    %208 = vector.broadcast %207 : vector<35x1xf32> to vector<35x32xf32>
    %209 = arith.mulf %204, %208 : vector<35x32xf32>
    %210 = arith.addf %185, %209 : vector<35x32xf32>
    %c536 = arith.constant 536 : index
    %c0_91 = arith.constant 0 : index
    %211 = vector.load %arg3[%c536, %c0_91] : memref<904x128xf32, #tpu.memory_space<vmem>>, vector<32x32xf32>
    %cst_92 = arith.constant dense<0.000000e+00> : vector<35x32xf32>
    %212 = tpu.matmul %210, %211, %cst_92 {dimension_numbers = #tpu.dot_dimension_numbers<[1], [0], [0], [1], [0, 0, 1, 1], [], []>} : vector<35x32xf32>, vector<32x32xf32>, vector<35x32xf32> -> vector<35x32xf32>
    %213 = arith.addf %132, %212 : vector<35x32xf32>
    %c20 = arith.constant 20 : index
    %c0_93 = arith.constant 0 : index
    %214 = vector.load %arg4[%c20, %c0_93] : memref<40x128xf32, #tpu.memory_space<vmem>>, vector<1x32xf32>
    %215 = vector.broadcast %214 : vector<1x32xf32> to vector<35x32xf32>
    %216 = arith.addf %213, %215 : vector<35x32xf32>
    %c21 = arith.constant 21 : index
    %c0_94 = arith.constant 0 : index
    %217 = vector.load %arg4[%c21, %c0_94] : memref<40x128xf32, #tpu.memory_space<vmem>>, vector<1x32xf32>
    %c22 = arith.constant 22 : index
    %c0_95 = arith.constant 0 : index
    %218 = vector.load %arg4[%c22, %c0_95] : memref<40x128xf32, #tpu.memory_space<vmem>>, vector<1x32xf32>
    %cst_96 = arith.constant dense<0.000000e+00> : vector<35xf32>
    %219 = vector.multi_reduction <add>, %216, %cst_96 [1] : vector<35x32xf32> to vector<35xf32>
    %220 = vector.shape_cast %219 : vector<35xf32> to vector<35x1xf32>
    %cst_97 = arith.constant 3.200000e+01 : f32
    %221 = vector.broadcast %cst_97 : f32 to vector<35x1xf32>
    %222 = arith.divf %220, %221 : vector<35x1xf32>
    %223 = vector.broadcast %222 : vector<35x1xf32> to vector<35x32xf32>
    %224 = arith.subf %216, %223 : vector<35x32xf32>
    %225 = arith.mulf %224, %224 : vector<35x32xf32>
    %cst_98 = arith.constant dense<0.000000e+00> : vector<35xf32>
    %226 = vector.multi_reduction <add>, %225, %cst_98 [1] : vector<35x32xf32> to vector<35xf32>
    %227 = vector.shape_cast %226 : vector<35xf32> to vector<35x1xf32>
    %cst_99 = arith.constant 3.200000e+01 : f32
    %228 = vector.broadcast %cst_99 : f32 to vector<35x1xf32>
    %229 = arith.divf %227, %228 : vector<35x1xf32>
    %230 = vector.broadcast %222 : vector<35x1xf32> to vector<35x32xf32>
    %231 = arith.subf %216, %230 : vector<35x32xf32>
    %cst_100 = arith.constant 9.99999974E-6 : f32
    %232 = vector.broadcast %cst_100 : f32 to vector<35x1xf32>
    %233 = arith.addf %229, %232 : vector<35x1xf32>
    %234 = math.rsqrt %233 : vector<35x1xf32>
    %235 = vector.broadcast %234 : vector<35x1xf32> to vector<35x32xf32>
    %236 = arith.mulf %231, %235 : vector<35x32xf32>
    %237 = vector.broadcast %217 : vector<1x32xf32> to vector<35x32xf32>
    %238 = arith.mulf %236, %237 : vector<35x32xf32>
    %239 = vector.broadcast %218 : vector<1x32xf32> to vector<35x32xf32>
    %240 = arith.addf %238, %239 : vector<35x32xf32>
    %c568 = arith.constant 568 : index
    %c0_101 = arith.constant 0 : index
    %241 = vector.load %arg3[%c568, %c0_101] : memref<904x128xf32, #tpu.memory_space<vmem>>, vector<32x64xf32>
    %cst_102 = arith.constant dense<0.000000e+00> : vector<35x64xf32>
    %242 = tpu.matmul %240, %241, %cst_102 {dimension_numbers = #tpu.dot_dimension_numbers<[1], [0], [0], [1], [0, 0, 1, 1], [], []>} : vector<35x32xf32>, vector<32x64xf32>, vector<35x64xf32> -> vector<35x64xf32>
    %c23 = arith.constant 23 : index
    %c0_103 = arith.constant 0 : index
    %243 = vector.load %arg4[%c23, %c0_103] : memref<40x128xf32, #tpu.memory_space<vmem>>, vector<1x64xf32>
    %244 = vector.broadcast %243 : vector<1x64xf32> to vector<35x64xf32>
    %245 = arith.addf %242, %244 : vector<35x64xf32>
    %cst_104 = arith.constant 0.000000e+00 : f32
    %246 = vector.broadcast %cst_104 : f32 to vector<35x64xf32>
    %247 = arith.maximumf %245, %246 : vector<35x64xf32>
    %c600 = arith.constant 600 : index
    %c0_105 = arith.constant 0 : index
    %248 = vector.load %arg3[%c600, %c0_105] : memref<904x128xf32, #tpu.memory_space<vmem>>, vector<64x32xf32>
    %cst_106 = arith.constant dense<0.000000e+00> : vector<35x32xf32>
    %249 = tpu.matmul %247, %248, %cst_106 {dimension_numbers = #tpu.dot_dimension_numbers<[1], [0], [0], [1], [0, 0, 1, 1], [], []>} : vector<35x64xf32>, vector<64x32xf32>, vector<35x32xf32> -> vector<35x32xf32>
    %250 = arith.addf %216, %249 : vector<35x32xf32>
    %c24 = arith.constant 24 : index
    %c0_107 = arith.constant 0 : index
    %251 = vector.load %arg4[%c24, %c0_107] : memref<40x128xf32, #tpu.memory_space<vmem>>, vector<1x32xf32>
    %252 = vector.broadcast %251 : vector<1x32xf32> to vector<35x32xf32>
    %253 = arith.addf %250, %252 : vector<35x32xf32>
    %254 = vector.extract_strided_slice %253 {offsets = [16, 0], sizes = [8, 32], strides = [1, 1]} : vector<35x32xf32> to vector<8x32xf32>
    %c25 = arith.constant 25 : index
    %c0_108 = arith.constant 0 : index
    %255 = vector.load %arg4[%c25, %c0_108] : memref<40x128xf32, #tpu.memory_space<vmem>>, vector<1x32xf32>
    %c26 = arith.constant 26 : index
    %c0_109 = arith.constant 0 : index
    %256 = vector.load %arg4[%c26, %c0_109] : memref<40x128xf32, #tpu.memory_space<vmem>>, vector<1x32xf32>
    %cst_110 = arith.constant dense<0.000000e+00> : vector<8xf32>
    %257 = vector.multi_reduction <add>, %254, %cst_110 [1] : vector<8x32xf32> to vector<8xf32>
    %258 = vector.shape_cast %257 : vector<8xf32> to vector<8x1xf32>
    %cst_111 = arith.constant 3.200000e+01 : f32
    %259 = vector.broadcast %cst_111 : f32 to vector<8x1xf32>
    %260 = arith.divf %258, %259 : vector<8x1xf32>
    %261 = vector.broadcast %260 : vector<8x1xf32> to vector<8x32xf32>
    %262 = arith.subf %254, %261 : vector<8x32xf32>
    %263 = arith.mulf %262, %262 : vector<8x32xf32>
    %cst_112 = arith.constant dense<0.000000e+00> : vector<8xf32>
    %264 = vector.multi_reduction <add>, %263, %cst_112 [1] : vector<8x32xf32> to vector<8xf32>
    %265 = vector.shape_cast %264 : vector<8xf32> to vector<8x1xf32>
    %cst_113 = arith.constant 3.200000e+01 : f32
    %266 = vector.broadcast %cst_113 : f32 to vector<8x1xf32>
    %267 = arith.divf %265, %266 : vector<8x1xf32>
    %268 = vector.broadcast %260 : vector<8x1xf32> to vector<8x32xf32>
    %269 = arith.subf %254, %268 : vector<8x32xf32>
    %cst_114 = arith.constant 9.99999974E-6 : f32
    %270 = vector.broadcast %cst_114 : f32 to vector<8x1xf32>
    %271 = arith.addf %267, %270 : vector<8x1xf32>
    %272 = math.rsqrt %271 : vector<8x1xf32>
    %273 = vector.broadcast %272 : vector<8x1xf32> to vector<8x32xf32>
    %274 = arith.mulf %269, %273 : vector<8x32xf32>
    %275 = vector.broadcast %255 : vector<1x32xf32> to vector<8x32xf32>
    %276 = arith.mulf %274, %275 : vector<8x32xf32>
    %277 = vector.broadcast %256 : vector<1x32xf32> to vector<8x32xf32>
    %278 = arith.addf %276, %277 : vector<8x32xf32>
    %c664 = arith.constant 664 : index
    %c0_115 = arith.constant 0 : index
    %279 = vector.load %arg3[%c664, %c0_115] : memref<904x128xf32, #tpu.memory_space<vmem>>, vector<32x2xf32>
    %cst_116 = arith.constant dense<0.000000e+00> : vector<8x2xf32>
    %280 = tpu.matmul %278, %279, %cst_116 {dimension_numbers = #tpu.dot_dimension_numbers<[1], [0], [0], [1], [0, 0, 1, 1], [], []>} : vector<8x32xf32>, vector<32x2xf32>, vector<8x2xf32> -> vector<8x2xf32>
    %c27 = arith.constant 27 : index
    %c0_117 = arith.constant 0 : index
    %281 = vector.load %arg4[%c27, %c0_117] : memref<40x128xf32, #tpu.memory_space<vmem>>, vector<1x2xf32>
    %282 = vector.broadcast %281 : vector<1x2xf32> to vector<8x2xf32>
    %283 = arith.addf %280, %282 : vector<8x2xf32>
    %284 = tpu.concatenate %283, %283, %283, %283 in 0 : vector<8x2xf32>, vector<8x2xf32>, vector<8x2xf32>, vector<8x2xf32> -> vector<32x2xf32>
    %c696 = arith.constant 696 : index
    %c0_118 = arith.constant 0 : index
    %285 = vector.load %arg3[%c696, %c0_118] : memref<904x128xf32, #tpu.memory_space<vmem>>, vector<32x2xf32>
    %286 = arith.mulf %285, %284 : vector<32x2xf32>
    %287 = arith.mulf %286, %286 : vector<32x2xf32>
    %cst_119 = arith.constant dense<0.000000e+00> : vector<32xf32>
    %288 = vector.multi_reduction <add>, %287, %cst_119 [1] : vector<32x2xf32> to vector<32xf32>
    %289 = vector.shape_cast %288 : vector<32xf32> to vector<32x1xf32>
    %cst_120 = arith.constant 1.000000e-24 : f32
    %290 = vector.broadcast %cst_120 : f32 to vector<32x1xf32>
    %291 = arith.maximumf %289, %290 : vector<32x1xf32>
    %292 = math.rsqrt %291 : vector<32x1xf32>
    %293 = vector.broadcast %292 : vector<32x1xf32> to vector<32x2xf32>
    %294 = arith.mulf %286, %293 : vector<32x2xf32>
    %cst_121 = arith.constant dense<0.000000e+00> : vector<32x256xf32>
    %295 = tpu.matmul %294, %4, %cst_121 {dimension_numbers = #tpu.dot_dimension_numbers<[1], [0], [0], [1], [0, 0, 1, 1], [], []>} : vector<32x2xf32>, vector<2x256xf32>, vector<32x256xf32> -> vector<32x256xf32>
    %c728 = arith.constant 728 : index
    %c0_122 = arith.constant 0 : index
    %296 = vector.load %arg3[%c728, %c0_122] : memref<904x128xf32, #tpu.memory_space<vmem>>, vector<32x1xf32>
    %297 = vector.broadcast %296 : vector<32x1xf32> to vector<32x256xf32>
    %298 = arith.addf %295, %297 : vector<32x256xf32>
    %cst_123 = arith.constant 0.000000e+00 : f32
    %299 = vector.broadcast %cst_123 : f32 to vector<32x256xf32>
    %300 = arith.maximumf %298, %299 : vector<32x256xf32>
    %301 = vector.extract_strided_slice %253 {offsets = [24, 0], sizes = [8, 32], strides = [1, 1]} : vector<35x32xf32> to vector<8x32xf32>
    %c28 = arith.constant 28 : index
    %c0_124 = arith.constant 0 : index
    %302 = vector.load %arg4[%c28, %c0_124] : memref<40x128xf32, #tpu.memory_space<vmem>>, vector<1x32xf32>
    %c29 = arith.constant 29 : index
    %c0_125 = arith.constant 0 : index
    %303 = vector.load %arg4[%c29, %c0_125] : memref<40x128xf32, #tpu.memory_space<vmem>>, vector<1x32xf32>
    %cst_126 = arith.constant dense<0.000000e+00> : vector<8xf32>
    %304 = vector.multi_reduction <add>, %301, %cst_126 [1] : vector<8x32xf32> to vector<8xf32>
    %305 = vector.shape_cast %304 : vector<8xf32> to vector<8x1xf32>
    %cst_127 = arith.constant 3.200000e+01 : f32
    %306 = vector.broadcast %cst_127 : f32 to vector<8x1xf32>
    %307 = arith.divf %305, %306 : vector<8x1xf32>
    %308 = vector.broadcast %307 : vector<8x1xf32> to vector<8x32xf32>
    %309 = arith.subf %301, %308 : vector<8x32xf32>
    %310 = arith.mulf %309, %309 : vector<8x32xf32>
    %cst_128 = arith.constant dense<0.000000e+00> : vector<8xf32>
    %311 = vector.multi_reduction <add>, %310, %cst_128 [1] : vector<8x32xf32> to vector<8xf32>
    %312 = vector.shape_cast %311 : vector<8xf32> to vector<8x1xf32>
    %cst_129 = arith.constant 3.200000e+01 : f32
    %313 = vector.broadcast %cst_129 : f32 to vector<8x1xf32>
    %314 = arith.divf %312, %313 : vector<8x1xf32>
    %315 = vector.broadcast %307 : vector<8x1xf32> to vector<8x32xf32>
    %316 = arith.subf %301, %315 : vector<8x32xf32>
    %cst_130 = arith.constant 9.99999974E-6 : f32
    %317 = vector.broadcast %cst_130 : f32 to vector<8x1xf32>
    %318 = arith.addf %314, %317 : vector<8x1xf32>
    %319 = math.rsqrt %318 : vector<8x1xf32>
    %320 = vector.broadcast %319 : vector<8x1xf32> to vector<8x32xf32>
    %321 = arith.mulf %316, %320 : vector<8x32xf32>
    %322 = vector.broadcast %302 : vector<1x32xf32> to vector<8x32xf32>
    %323 = arith.mulf %321, %322 : vector<8x32xf32>
    %324 = vector.broadcast %303 : vector<1x32xf32> to vector<8x32xf32>
    %325 = arith.addf %323, %324 : vector<8x32xf32>
    %c760 = arith.constant 760 : index
    %c0_131 = arith.constant 0 : index
    %326 = vector.load %arg3[%c760, %c0_131] : memref<904x128xf32, #tpu.memory_space<vmem>>, vector<32x32xf32>
    %cst_132 = arith.constant dense<0.000000e+00> : vector<8x32xf32>
    %327 = tpu.matmul %325, %326, %cst_132 {dimension_numbers = #tpu.dot_dimension_numbers<[1], [0], [0], [1], [0, 0, 1, 1], [], []>} : vector<8x32xf32>, vector<32x32xf32>, vector<8x32xf32> -> vector<8x32xf32>
    %c30 = arith.constant 30 : index
    %c0_133 = arith.constant 0 : index
    %328 = vector.load %arg4[%c30, %c0_133] : memref<40x128xf32, #tpu.memory_space<vmem>>, vector<1x32xf32>
    %329 = vector.broadcast %328 : vector<1x32xf32> to vector<8x32xf32>
    %330 = arith.addf %327, %329 : vector<8x32xf32>
    %331 = tpu.concatenate %330, %330, %330, %330 in 0 : vector<8x32xf32>, vector<8x32xf32>, vector<8x32xf32>, vector<8x32xf32> -> vector<32x32xf32>
    %c792 = arith.constant 792 : index
    %c0_134 = arith.constant 0 : index
    %332 = vector.load %arg3[%c792, %c0_134] : memref<904x128xf32, #tpu.memory_space<vmem>>, vector<32x32xf32>
    %333 = arith.mulf %332, %331 : vector<32x32xf32>
    %334 = arith.mulf %333, %333 : vector<32x32xf32>
    %cst_135 = arith.constant dense<0.000000e+00> : vector<32xf32>
    %335 = vector.multi_reduction <add>, %334, %cst_135 [1] : vector<32x32xf32> to vector<32xf32>
    %336 = vector.shape_cast %335 : vector<32xf32> to vector<32x1xf32>
    %cst_136 = arith.constant 1.000000e-24 : f32
    %337 = vector.broadcast %cst_136 : f32 to vector<32x1xf32>
    %338 = arith.maximumf %336, %337 : vector<32x1xf32>
    %339 = math.rsqrt %338 : vector<32x1xf32>
    %340 = vector.broadcast %339 : vector<32x1xf32> to vector<32x32xf32>
    %341 = arith.mulf %333, %340 : vector<32x32xf32>
    %cst_137 = arith.constant dense<0.000000e+00> : vector<32x256xf32>
    %342 = tpu.matmul %341, %300, %cst_137 {dimension_numbers = #tpu.dot_dimension_numbers<[1], [0], [0], [1], [0, 0, 1, 1], [], []>} : vector<32x32xf32>, vector<32x256xf32>, vector<32x256xf32> -> vector<32x256xf32>
    %c824 = arith.constant 824 : index
    %c0_138 = arith.constant 0 : index
    %343 = vector.load %arg3[%c824, %c0_138] : memref<904x128xf32, #tpu.memory_space<vmem>>, vector<32x1xf32>
    %344 = vector.broadcast %343 : vector<32x1xf32> to vector<32x256xf32>
    %345 = arith.addf %342, %344 : vector<32x256xf32>
    %cst_139 = arith.constant 0.000000e+00 : f32
    %346 = vector.broadcast %cst_139 : f32 to vector<32x256xf32>
    %347 = arith.maximumf %345, %346 : vector<32x256xf32>
    %348 = vector.extract_strided_slice %253 {offsets = [32, 0], sizes = [3, 32], strides = [1, 1]} : vector<35x32xf32> to vector<3x32xf32>
    %c31 = arith.constant 31 : index
    %c0_140 = arith.constant 0 : index
    %349 = vector.load %arg4[%c31, %c0_140] : memref<40x128xf32, #tpu.memory_space<vmem>>, vector<1x32xf32>
    %c32 = arith.constant 32 : index
    %c0_141 = arith.constant 0 : index
    %350 = vector.load %arg4[%c32, %c0_141] : memref<40x128xf32, #tpu.memory_space<vmem>>, vector<1x32xf32>
    %cst_142 = arith.constant dense<0.000000e+00> : vector<3xf32>
    %351 = vector.multi_reduction <add>, %348, %cst_142 [1] : vector<3x32xf32> to vector<3xf32>
    %352 = vector.shape_cast %351 : vector<3xf32> to vector<3x1xf32>
    %cst_143 = arith.constant 3.200000e+01 : f32
    %353 = vector.broadcast %cst_143 : f32 to vector<3x1xf32>
    %354 = arith.divf %352, %353 : vector<3x1xf32>
    %355 = vector.broadcast %354 : vector<3x1xf32> to vector<3x32xf32>
    %356 = arith.subf %348, %355 : vector<3x32xf32>
    %357 = arith.mulf %356, %356 : vector<3x32xf32>
    %cst_144 = arith.constant dense<0.000000e+00> : vector<3xf32>
    %358 = vector.multi_reduction <add>, %357, %cst_144 [1] : vector<3x32xf32> to vector<3xf32>
    %359 = vector.shape_cast %358 : vector<3xf32> to vector<3x1xf32>
    %cst_145 = arith.constant 3.200000e+01 : f32
    %360 = vector.broadcast %cst_145 : f32 to vector<3x1xf32>
    %361 = arith.divf %359, %360 : vector<3x1xf32>
    %362 = vector.broadcast %354 : vector<3x1xf32> to vector<3x32xf32>
    %363 = arith.subf %348, %362 : vector<3x32xf32>
    %cst_146 = arith.constant 9.99999974E-6 : f32
    %364 = vector.broadcast %cst_146 : f32 to vector<3x1xf32>
    %365 = arith.addf %361, %364 : vector<3x1xf32>
    %366 = math.rsqrt %365 : vector<3x1xf32>
    %367 = vector.broadcast %366 : vector<3x1xf32> to vector<3x32xf32>
    %368 = arith.mulf %363, %367 : vector<3x32xf32>
    %369 = vector.broadcast %349 : vector<1x32xf32> to vector<3x32xf32>
    %370 = arith.mulf %368, %369 : vector<3x32xf32>
    %371 = vector.broadcast %350 : vector<1x32xf32> to vector<3x32xf32>
    %372 = arith.addf %370, %371 : vector<3x32xf32>
    %c856 = arith.constant 856 : index
    %c0_147 = arith.constant 0 : index
    %373 = vector.load %arg3[%c856, %c0_147] : memref<904x128xf32, #tpu.memory_space<vmem>>, vector<32x32xf32>
    %cst_148 = arith.constant dense<0.000000e+00> : vector<3x32xf32>
    %374 = tpu.matmul %372, %373, %cst_148 {dimension_numbers = #tpu.dot_dimension_numbers<[1], [0], [0], [1], [0, 0, 1, 1], [], []>} : vector<3x32xf32>, vector<32x32xf32>, vector<3x32xf32> -> vector<3x32xf32>
    %c33 = arith.constant 33 : index
    %c0_149 = arith.constant 0 : index
    %375 = vector.load %arg4[%c33, %c0_149] : memref<40x128xf32, #tpu.memory_space<vmem>>, vector<1x32xf32>
    %376 = vector.broadcast %375 : vector<1x32xf32> to vector<3x32xf32>
    %377 = arith.addf %374, %376 : vector<3x32xf32>
    %c888 = arith.constant 888 : index
    %c0_150 = arith.constant 0 : index
    %378 = vector.load %arg3[%c888, %c0_150] : memref<904x128xf32, #tpu.memory_space<vmem>>, vector<3x32xf32>
    %379 = arith.mulf %378, %377 : vector<3x32xf32>
    %380 = arith.mulf %379, %379 : vector<3x32xf32>
    %cst_151 = arith.constant dense<0.000000e+00> : vector<3xf32>
    %381 = vector.multi_reduction <add>, %380, %cst_151 [1] : vector<3x32xf32> to vector<3xf32>
    %382 = vector.shape_cast %381 : vector<3xf32> to vector<3x1xf32>
    %cst_152 = arith.constant 1.000000e-24 : f32
    %383 = vector.broadcast %cst_152 : f32 to vector<3x1xf32>
    %384 = arith.maximumf %382, %383 : vector<3x1xf32>
    %385 = math.rsqrt %384 : vector<3x1xf32>
    %386 = vector.broadcast %385 : vector<3x1xf32> to vector<3x32xf32>
    %387 = arith.mulf %379, %386 : vector<3x32xf32>
    %cst_153 = arith.constant dense<0.000000e+00> : vector<3x256xf32>
    %388 = tpu.matmul %387, %347, %cst_153 {dimension_numbers = #tpu.dot_dimension_numbers<[1], [0], [0], [1], [0, 0, 1, 1], [], []>} : vector<3x32xf32>, vector<32x256xf32>, vector<3x256xf32> -> vector<3x256xf32>
    %c896 = arith.constant 896 : index
    %c0_154 = arith.constant 0 : index
    %389 = vector.load %arg3[%c896, %c0_154] : memref<904x128xf32, #tpu.memory_space<vmem>>, vector<3x1xf32>
    %390 = vector.broadcast %389 : vector<3x1xf32> to vector<3x256xf32>
    %391 = arith.addf %388, %390 : vector<3x256xf32>
    %c0_155 = arith.constant 0 : index
    %c0_156 = arith.constant 0 : index
    %c0_157 = arith.constant 0 : index
    %392 = vector.load %arg5[%c0_155, %c0_156, %c0_157] : memref<2x3x256xf32, #tpu.memory_space<vmem>>, vector<1x3x256xf32>
    %393 = vector.shape_cast %392 : vector<1x3x256xf32> to vector<3x256xf32>
    %394 = vector.shape_cast %391 : vector<3x256xf32> to vector<1x3x256xf32>
    tpu.vector_store %arg5[%c0_155, %c0_156, %c0_157], %394 {strides = array<i32>} : memref<2x3x256xf32, #tpu.memory_space<vmem>>, vector<1x3x256xf32>,
    %c1_158 = arith.constant 1 : index
    %c0_159 = arith.constant 0 : index
    %c0_160 = arith.constant 0 : index
    %395 = vector.load %arg1[%c1_158, %c0_159, %c0_160] : memref<2x16x48xf32, #tpu.memory_space<vmem>>, vector<1x16x48xf32>
    %396 = vector.shape_cast %395 : vector<1x16x48xf32> to vector<16x48xf32>
    %cst_161 = arith.constant dense<0.000000e+00> : vector<16x32xf32>
    %397 = tpu.matmul %396, %0, %cst_161 {dimension_numbers = #tpu.dot_dimension_numbers<[1], [0], [0], [1], [0, 0, 1, 1], [], []>} : vector<16x48xf32>, vector<48x32xf32>, vector<16x32xf32> -> vector<16x32xf32>
    %398 = vector.broadcast %1 : vector<1x32xf32> to vector<16x32xf32>
    %399 = arith.addf %397, %398 : vector<16x32xf32>
    %400 = arith.addf %399, %2 : vector<16x32xf32>
    %401 = tpu.concatenate %400, %3 in 0 : vector<16x32xf32>, vector<19x32xf32> -> vector<35x32xf32>
    %c1_162 = arith.constant 1 : index
    %c0_163 = arith.constant 0 : index
    %402 = vector.load %arg4[%c1_162, %c0_163] : memref<40x128xf32, #tpu.memory_space<vmem>>, vector<1x32xf32>
    %c2_164 = arith.constant 2 : index
    %c0_165 = arith.constant 0 : index
    %403 = vector.load %arg4[%c2_164, %c0_165] : memref<40x128xf32, #tpu.memory_space<vmem>>, vector<1x32xf32>
    %cst_166 = arith.constant dense<0.000000e+00> : vector<35xf32>
    %404 = vector.multi_reduction <add>, %401, %cst_166 [1] : vector<35x32xf32> to vector<35xf32>
    %405 = vector.shape_cast %404 : vector<35xf32> to vector<35x1xf32>
    %cst_167 = arith.constant 3.200000e+01 : f32
    %406 = vector.broadcast %cst_167 : f32 to vector<35x1xf32>
    %407 = arith.divf %405, %406 : vector<35x1xf32>
    %408 = vector.broadcast %407 : vector<35x1xf32> to vector<35x32xf32>
    %409 = arith.subf %401, %408 : vector<35x32xf32>
    %410 = arith.mulf %409, %409 : vector<35x32xf32>
    %cst_168 = arith.constant dense<0.000000e+00> : vector<35xf32>
    %411 = vector.multi_reduction <add>, %410, %cst_168 [1] : vector<35x32xf32> to vector<35xf32>
    %412 = vector.shape_cast %411 : vector<35xf32> to vector<35x1xf32>
    %cst_169 = arith.constant 3.200000e+01 : f32
    %413 = vector.broadcast %cst_169 : f32 to vector<35x1xf32>
    %414 = arith.divf %412, %413 : vector<35x1xf32>
    %415 = vector.broadcast %407 : vector<35x1xf32> to vector<35x32xf32>
    %416 = arith.subf %401, %415 : vector<35x32xf32>
    %cst_170 = arith.constant 9.99999974E-6 : f32
    %417 = vector.broadcast %cst_170 : f32 to vector<35x1xf32>
    %418 = arith.addf %414, %417 : vector<35x1xf32>
    %419 = math.rsqrt %418 : vector<35x1xf32>
    %420 = vector.broadcast %419 : vector<35x1xf32> to vector<35x32xf32>
    %421 = arith.mulf %416, %420 : vector<35x32xf32>
    %422 = vector.broadcast %402 : vector<1x32xf32> to vector<35x32xf32>
    %423 = arith.mulf %421, %422 : vector<35x32xf32>
    %424 = vector.broadcast %403 : vector<1x32xf32> to vector<35x32xf32>
    %425 = arith.addf %423, %424 : vector<35x32xf32>
    %c88_171 = arith.constant 88 : index
    %c0_172 = arith.constant 0 : index
    %426 = vector.load %arg3[%c88_171, %c0_172] : memref<904x128xf32, #tpu.memory_space<vmem>>, vector<32x32xf32>
    %cst_173 = arith.constant dense<0.000000e+00> : vector<35x32xf32>
    %427 = tpu.matmul %425, %426, %cst_173 {dimension_numbers = #tpu.dot_dimension_numbers<[1], [0], [0], [1], [0, 0, 1, 1], [], []>} : vector<35x32xf32>, vector<32x32xf32>, vector<35x32xf32> -> vector<35x32xf32>
    %c3_174 = arith.constant 3 : index
    %c0_175 = arith.constant 0 : index
    %428 = vector.load %arg4[%c3_174, %c0_175] : memref<40x128xf32, #tpu.memory_space<vmem>>, vector<1x32xf32>
    %429 = vector.broadcast %428 : vector<1x32xf32> to vector<35x32xf32>
    %430 = arith.addf %427, %429 : vector<35x32xf32>
    %c120_176 = arith.constant 120 : index
    %c0_177 = arith.constant 0 : index
    %431 = vector.load %arg3[%c120_176, %c0_177] : memref<904x128xf32, #tpu.memory_space<vmem>>, vector<32x32xf32>
    %cst_178 = arith.constant dense<0.000000e+00> : vector<35x32xf32>
    %432 = tpu.matmul %425, %431, %cst_178 {dimension_numbers = #tpu.dot_dimension_numbers<[1], [0], [0], [1], [0, 0, 1, 1], [], []>} : vector<35x32xf32>, vector<32x32xf32>, vector<35x32xf32> -> vector<35x32xf32>
    %c4_179 = arith.constant 4 : index
    %c0_180 = arith.constant 0 : index
    %433 = vector.load %arg4[%c4_179, %c0_180] : memref<40x128xf32, #tpu.memory_space<vmem>>, vector<1x32xf32>
    %434 = vector.broadcast %433 : vector<1x32xf32> to vector<35x32xf32>
    %435 = arith.addf %432, %434 : vector<35x32xf32>
    %c152_181 = arith.constant 152 : index
    %c0_182 = arith.constant 0 : index
    %436 = vector.load %arg3[%c152_181, %c0_182] : memref<904x128xf32, #tpu.memory_space<vmem>>, vector<32x32xf32>
    %cst_183 = arith.constant dense<0.000000e+00> : vector<35x32xf32>
    %437 = tpu.matmul %425, %436, %cst_183 {dimension_numbers = #tpu.dot_dimension_numbers<[1], [0], [0], [1], [0, 0, 1, 1], [], []>} : vector<35x32xf32>, vector<32x32xf32>, vector<35x32xf32> -> vector<35x32xf32>
    %c5_184 = arith.constant 5 : index
    %c0_185 = arith.constant 0 : index
    %438 = vector.load %arg4[%c5_184, %c0_185] : memref<40x128xf32, #tpu.memory_space<vmem>>, vector<1x32xf32>
    %439 = vector.broadcast %438 : vector<1x32xf32> to vector<35x32xf32>
    %440 = arith.addf %437, %439 : vector<35x32xf32>
    %cst_186 = arith.constant dense<0.000000e+00> : vector<35x35xf32>
    %441 = tpu.matmul %430, %435, %cst_186 {dimension_numbers = #tpu.dot_dimension_numbers<[1], [1], [0], [0], [0, 0, 1, 0], [], []>} : vector<35x32xf32>, vector<35x32xf32>, vector<35x35xf32> -> vector<35x35xf32>
    %cst_187 = arith.constant 2.500000e-01 : f32
    %442 = vector.broadcast %cst_187 : f32 to vector<35x35xf32>
    %443 = arith.mulf %441, %442 : vector<35x35xf32>
    %cst_188 = arith.constant dense<0xFF800000> : vector<35xf32>
    %444 = vector.multi_reduction <maximumf>, %443, %cst_188 [1] : vector<35x35xf32> to vector<35xf32>
    %445 = vector.shape_cast %444 : vector<35xf32> to vector<35x1xf32>
    %446 = vector.broadcast %445 : vector<35x1xf32> to vector<35x35xf32>
    %447 = arith.subf %443, %446 : vector<35x35xf32>
    %448 = math.exp %447 : vector<35x35xf32>
    %cst_189 = arith.constant dense<0.000000e+00> : vector<35x32xf32>
    %449 = tpu.matmul %448, %440, %cst_189 {dimension_numbers = #tpu.dot_dimension_numbers<[1], [0], [0], [1], [0, 0, 1, 1], [], []>} : vector<35x35xf32>, vector<35x32xf32>, vector<35x32xf32> -> vector<35x32xf32>
    %cst_190 = arith.constant dense<0.000000e+00> : vector<35xf32>
    %450 = vector.multi_reduction <add>, %448, %cst_190 [1] : vector<35x35xf32> to vector<35xf32>
    %451 = vector.shape_cast %450 : vector<35xf32> to vector<35x1xf32>
    %452 = tpu.reciprocal %451 {approx = true} : vector<35x1xf32> -> vector<35x1xf32>
    %453 = vector.broadcast %452 : vector<35x1xf32> to vector<35x32xf32>
    %454 = arith.mulf %449, %453 : vector<35x32xf32>
    %c184_191 = arith.constant 184 : index
    %c0_192 = arith.constant 0 : index
    %455 = vector.load %arg3[%c184_191, %c0_192] : memref<904x128xf32, #tpu.memory_space<vmem>>, vector<32x32xf32>
    %cst_193 = arith.constant dense<0.000000e+00> : vector<35x32xf32>
    %456 = tpu.matmul %425, %455, %cst_193 {dimension_numbers = #tpu.dot_dimension_numbers<[1], [0], [0], [1], [0, 0, 1, 1], [], []>} : vector<35x32xf32>, vector<32x32xf32>, vector<35x32xf32> -> vector<35x32xf32>
    %c6_194 = arith.constant 6 : index
    %c0_195 = arith.constant 0 : index
    %457 = vector.load %arg4[%c6_194, %c0_195] : memref<40x128xf32, #tpu.memory_space<vmem>>, vector<1x32xf32>
    %458 = vector.broadcast %457 : vector<1x32xf32> to vector<35x32xf32>
    %459 = arith.addf %456, %458 : vector<35x32xf32>
    %c216_196 = arith.constant 216 : index
    %c0_197 = arith.constant 0 : index
    %460 = vector.load %arg3[%c216_196, %c0_197] : memref<904x128xf32, #tpu.memory_space<vmem>>, vector<32x32xf32>
    %cst_198 = arith.constant dense<0.000000e+00> : vector<35x32xf32>
    %461 = tpu.matmul %425, %460, %cst_198 {dimension_numbers = #tpu.dot_dimension_numbers<[1], [0], [0], [1], [0, 0, 1, 1], [], []>} : vector<35x32xf32>, vector<32x32xf32>, vector<35x32xf32> -> vector<35x32xf32>
    %c7_199 = arith.constant 7 : index
    %c0_200 = arith.constant 0 : index
    %462 = vector.load %arg4[%c7_199, %c0_200] : memref<40x128xf32, #tpu.memory_space<vmem>>, vector<1x32xf32>
    %463 = vector.broadcast %462 : vector<1x32xf32> to vector<35x32xf32>
    %464 = arith.addf %461, %463 : vector<35x32xf32>
    %cst_201 = arith.constant dense<0.000000e+00> : vector<35x35xf32>
    %465 = tpu.matmul %430, %459, %cst_201 {dimension_numbers = #tpu.dot_dimension_numbers<[1], [1], [0], [0], [0, 0, 1, 0], [], []>} : vector<35x32xf32>, vector<35x32xf32>, vector<35x35xf32> -> vector<35x35xf32>
    %cst_202 = arith.constant 2.500000e-01 : f32
    %466 = vector.broadcast %cst_202 : f32 to vector<35x35xf32>
    %467 = arith.mulf %465, %466 : vector<35x35xf32>
    %cst_203 = arith.constant dense<0xFF800000> : vector<35xf32>
    %468 = vector.multi_reduction <maximumf>, %467, %cst_203 [1] : vector<35x35xf32> to vector<35xf32>
    %469 = vector.shape_cast %468 : vector<35xf32> to vector<35x1xf32>
    %470 = vector.broadcast %469 : vector<35x1xf32> to vector<35x35xf32>
    %471 = arith.subf %467, %470 : vector<35x35xf32>
    %472 = math.exp %471 : vector<35x35xf32>
    %cst_204 = arith.constant dense<0.000000e+00> : vector<35x32xf32>
    %473 = tpu.matmul %472, %464, %cst_204 {dimension_numbers = #tpu.dot_dimension_numbers<[1], [0], [0], [1], [0, 0, 1, 1], [], []>} : vector<35x35xf32>, vector<35x32xf32>, vector<35x32xf32> -> vector<35x32xf32>
    %cst_205 = arith.constant dense<0.000000e+00> : vector<35xf32>
    %474 = vector.multi_reduction <add>, %472, %cst_205 [1] : vector<35x35xf32> to vector<35xf32>
    %475 = vector.shape_cast %474 : vector<35xf32> to vector<35x1xf32>
    %476 = tpu.reciprocal %475 {approx = true} : vector<35x1xf32> -> vector<35x1xf32>
    %477 = vector.broadcast %476 : vector<35x1xf32> to vector<35x32xf32>
    %478 = arith.mulf %473, %477 : vector<35x32xf32>
    %479 = arith.addf %454, %478 : vector<35x32xf32>
    %c248_206 = arith.constant 248 : index
    %c0_207 = arith.constant 0 : index
    %480 = vector.load %arg3[%c248_206, %c0_207] : memref<904x128xf32, #tpu.memory_space<vmem>>, vector<32x32xf32>
    %cst_208 = arith.constant dense<0.000000e+00> : vector<35x32xf32>
    %481 = tpu.matmul %479, %480, %cst_208 {dimension_numbers = #tpu.dot_dimension_numbers<[1], [0], [0], [1], [0, 0, 1, 1], [], []>} : vector<35x32xf32>, vector<32x32xf32>, vector<35x32xf32> -> vector<35x32xf32>
    %482 = arith.addf %401, %481 : vector<35x32xf32>
    %c8_209 = arith.constant 8 : index
    %c0_210 = arith.constant 0 : index
    %483 = vector.load %arg4[%c8_209, %c0_210] : memref<40x128xf32, #tpu.memory_space<vmem>>, vector<1x32xf32>
    %484 = vector.broadcast %483 : vector<1x32xf32> to vector<35x32xf32>
    %485 = arith.addf %482, %484 : vector<35x32xf32>
    %c9_211 = arith.constant 9 : index
    %c0_212 = arith.constant 0 : index
    %486 = vector.load %arg4[%c9_211, %c0_212] : memref<40x128xf32, #tpu.memory_space<vmem>>, vector<1x32xf32>
    %c10_213 = arith.constant 10 : index
    %c0_214 = arith.constant 0 : index
    %487 = vector.load %arg4[%c10_213, %c0_214] : memref<40x128xf32, #tpu.memory_space<vmem>>, vector<1x32xf32>
    %cst_215 = arith.constant dense<0.000000e+00> : vector<35xf32>
    %488 = vector.multi_reduction <add>, %485, %cst_215 [1] : vector<35x32xf32> to vector<35xf32>
    %489 = vector.shape_cast %488 : vector<35xf32> to vector<35x1xf32>
    %cst_216 = arith.constant 3.200000e+01 : f32
    %490 = vector.broadcast %cst_216 : f32 to vector<35x1xf32>
    %491 = arith.divf %489, %490 : vector<35x1xf32>
    %492 = vector.broadcast %491 : vector<35x1xf32> to vector<35x32xf32>
    %493 = arith.subf %485, %492 : vector<35x32xf32>
    %494 = arith.mulf %493, %493 : vector<35x32xf32>
    %cst_217 = arith.constant dense<0.000000e+00> : vector<35xf32>
    %495 = vector.multi_reduction <add>, %494, %cst_217 [1] : vector<35x32xf32> to vector<35xf32>
    %496 = vector.shape_cast %495 : vector<35xf32> to vector<35x1xf32>
    %cst_218 = arith.constant 3.200000e+01 : f32
    %497 = vector.broadcast %cst_218 : f32 to vector<35x1xf32>
    %498 = arith.divf %496, %497 : vector<35x1xf32>
    %499 = vector.broadcast %491 : vector<35x1xf32> to vector<35x32xf32>
    %500 = arith.subf %485, %499 : vector<35x32xf32>
    %cst_219 = arith.constant 9.99999974E-6 : f32
    %501 = vector.broadcast %cst_219 : f32 to vector<35x1xf32>
    %502 = arith.addf %498, %501 : vector<35x1xf32>
    %503 = math.rsqrt %502 : vector<35x1xf32>
    %504 = vector.broadcast %503 : vector<35x1xf32> to vector<35x32xf32>
    %505 = arith.mulf %500, %504 : vector<35x32xf32>
    %506 = vector.broadcast %486 : vector<1x32xf32> to vector<35x32xf32>
    %507 = arith.mulf %505, %506 : vector<35x32xf32>
    %508 = vector.broadcast %487 : vector<1x32xf32> to vector<35x32xf32>
    %509 = arith.addf %507, %508 : vector<35x32xf32>
    %c280_220 = arith.constant 280 : index
    %c0_221 = arith.constant 0 : index
    %510 = vector.load %arg3[%c280_220, %c0_221] : memref<904x128xf32, #tpu.memory_space<vmem>>, vector<32x64xf32>
    %cst_222 = arith.constant dense<0.000000e+00> : vector<35x64xf32>
    %511 = tpu.matmul %509, %510, %cst_222 {dimension_numbers = #tpu.dot_dimension_numbers<[1], [0], [0], [1], [0, 0, 1, 1], [], []>} : vector<35x32xf32>, vector<32x64xf32>, vector<35x64xf32> -> vector<35x64xf32>
    %c11_223 = arith.constant 11 : index
    %c0_224 = arith.constant 0 : index
    %512 = vector.load %arg4[%c11_223, %c0_224] : memref<40x128xf32, #tpu.memory_space<vmem>>, vector<1x64xf32>
    %513 = vector.broadcast %512 : vector<1x64xf32> to vector<35x64xf32>
    %514 = arith.addf %511, %513 : vector<35x64xf32>
    %cst_225 = arith.constant 0.000000e+00 : f32
    %515 = vector.broadcast %cst_225 : f32 to vector<35x64xf32>
    %516 = arith.maximumf %514, %515 : vector<35x64xf32>
    %c312_226 = arith.constant 312 : index
    %c0_227 = arith.constant 0 : index
    %517 = vector.load %arg3[%c312_226, %c0_227] : memref<904x128xf32, #tpu.memory_space<vmem>>, vector<64x32xf32>
    %cst_228 = arith.constant dense<0.000000e+00> : vector<35x32xf32>
    %518 = tpu.matmul %516, %517, %cst_228 {dimension_numbers = #tpu.dot_dimension_numbers<[1], [0], [0], [1], [0, 0, 1, 1], [], []>} : vector<35x64xf32>, vector<64x32xf32>, vector<35x32xf32> -> vector<35x32xf32>
    %519 = arith.addf %485, %518 : vector<35x32xf32>
    %c12_229 = arith.constant 12 : index
    %c0_230 = arith.constant 0 : index
    %520 = vector.load %arg4[%c12_229, %c0_230] : memref<40x128xf32, #tpu.memory_space<vmem>>, vector<1x32xf32>
    %521 = vector.broadcast %520 : vector<1x32xf32> to vector<35x32xf32>
    %522 = arith.addf %519, %521 : vector<35x32xf32>
    %c13_231 = arith.constant 13 : index
    %c0_232 = arith.constant 0 : index
    %523 = vector.load %arg4[%c13_231, %c0_232] : memref<40x128xf32, #tpu.memory_space<vmem>>, vector<1x32xf32>
    %c14_233 = arith.constant 14 : index
    %c0_234 = arith.constant 0 : index
    %524 = vector.load %arg4[%c14_233, %c0_234] : memref<40x128xf32, #tpu.memory_space<vmem>>, vector<1x32xf32>
    %cst_235 = arith.constant dense<0.000000e+00> : vector<35xf32>
    %525 = vector.multi_reduction <add>, %522, %cst_235 [1] : vector<35x32xf32> to vector<35xf32>
    %526 = vector.shape_cast %525 : vector<35xf32> to vector<35x1xf32>
    %cst_236 = arith.constant 3.200000e+01 : f32
    %527 = vector.broadcast %cst_236 : f32 to vector<35x1xf32>
    %528 = arith.divf %526, %527 : vector<35x1xf32>
    %529 = vector.broadcast %528 : vector<35x1xf32> to vector<35x32xf32>
    %530 = arith.subf %522, %529 : vector<35x32xf32>
    %531 = arith.mulf %530, %530 : vector<35x32xf32>
    %cst_237 = arith.constant dense<0.000000e+00> : vector<35xf32>
    %532 = vector.multi_reduction <add>, %531, %cst_237 [1] : vector<35x32xf32> to vector<35xf32>
    %533 = vector.shape_cast %532 : vector<35xf32> to vector<35x1xf32>
    %cst_238 = arith.constant 3.200000e+01 : f32
    %534 = vector.broadcast %cst_238 : f32 to vector<35x1xf32>
    %535 = arith.divf %533, %534 : vector<35x1xf32>
    %536 = vector.broadcast %528 : vector<35x1xf32> to vector<35x32xf32>
    %537 = arith.subf %522, %536 : vector<35x32xf32>
    %cst_239 = arith.constant 9.99999974E-6 : f32
    %538 = vector.broadcast %cst_239 : f32 to vector<35x1xf32>
    %539 = arith.addf %535, %538 : vector<35x1xf32>
    %540 = math.rsqrt %539 : vector<35x1xf32>
    %541 = vector.broadcast %540 : vector<35x1xf32> to vector<35x32xf32>
    %542 = arith.mulf %537, %541 : vector<35x32xf32>
    %543 = vector.broadcast %523 : vector<1x32xf32> to vector<35x32xf32>
    %544 = arith.mulf %542, %543 : vector<35x32xf32>
    %545 = vector.broadcast %524 : vector<1x32xf32> to vector<35x32xf32>
    %546 = arith.addf %544, %545 : vector<35x32xf32>
    %c376_240 = arith.constant 376 : index
    %c0_241 = arith.constant 0 : index
    %547 = vector.load %arg3[%c376_240, %c0_241] : memref<904x128xf32, #tpu.memory_space<vmem>>, vector<32x32xf32>
    %cst_242 = arith.constant dense<0.000000e+00> : vector<35x32xf32>
    %548 = tpu.matmul %546, %547, %cst_242 {dimension_numbers = #tpu.dot_dimension_numbers<[1], [0], [0], [1], [0, 0, 1, 1], [], []>} : vector<35x32xf32>, vector<32x32xf32>, vector<35x32xf32> -> vector<35x32xf32>
    %c15_243 = arith.constant 15 : index
    %c0_244 = arith.constant 0 : index
    %549 = vector.load %arg4[%c15_243, %c0_244] : memref<40x128xf32, #tpu.memory_space<vmem>>, vector<1x32xf32>
    %550 = vector.broadcast %549 : vector<1x32xf32> to vector<35x32xf32>
    %551 = arith.addf %548, %550 : vector<35x32xf32>
    %c408_245 = arith.constant 408 : index
    %c0_246 = arith.constant 0 : index
    %552 = vector.load %arg3[%c408_245, %c0_246] : memref<904x128xf32, #tpu.memory_space<vmem>>, vector<32x32xf32>
    %cst_247 = arith.constant dense<0.000000e+00> : vector<35x32xf32>
    %553 = tpu.matmul %546, %552, %cst_247 {dimension_numbers = #tpu.dot_dimension_numbers<[1], [0], [0], [1], [0, 0, 1, 1], [], []>} : vector<35x32xf32>, vector<32x32xf32>, vector<35x32xf32> -> vector<35x32xf32>
    %c16_248 = arith.constant 16 : index
    %c0_249 = arith.constant 0 : index
    %554 = vector.load %arg4[%c16_248, %c0_249] : memref<40x128xf32, #tpu.memory_space<vmem>>, vector<1x32xf32>
    %555 = vector.broadcast %554 : vector<1x32xf32> to vector<35x32xf32>
    %556 = arith.addf %553, %555 : vector<35x32xf32>
    %c440_250 = arith.constant 440 : index
    %c0_251 = arith.constant 0 : index
    %557 = vector.load %arg3[%c440_250, %c0_251] : memref<904x128xf32, #tpu.memory_space<vmem>>, vector<32x32xf32>
    %cst_252 = arith.constant dense<0.000000e+00> : vector<35x32xf32>
    %558 = tpu.matmul %546, %557, %cst_252 {dimension_numbers = #tpu.dot_dimension_numbers<[1], [0], [0], [1], [0, 0, 1, 1], [], []>} : vector<35x32xf32>, vector<32x32xf32>, vector<35x32xf32> -> vector<35x32xf32>
    %c17_253 = arith.constant 17 : index
    %c0_254 = arith.constant 0 : index
    %559 = vector.load %arg4[%c17_253, %c0_254] : memref<40x128xf32, #tpu.memory_space<vmem>>, vector<1x32xf32>
    %560 = vector.broadcast %559 : vector<1x32xf32> to vector<35x32xf32>
    %561 = arith.addf %558, %560 : vector<35x32xf32>
    %cst_255 = arith.constant dense<0.000000e+00> : vector<35x35xf32>
    %562 = tpu.matmul %551, %556, %cst_255 {dimension_numbers = #tpu.dot_dimension_numbers<[1], [1], [0], [0], [0, 0, 1, 0], [], []>} : vector<35x32xf32>, vector<35x32xf32>, vector<35x35xf32> -> vector<35x35xf32>
    %cst_256 = arith.constant 2.500000e-01 : f32
    %563 = vector.broadcast %cst_256 : f32 to vector<35x35xf32>
    %564 = arith.mulf %562, %563 : vector<35x35xf32>
    %cst_257 = arith.constant dense<0xFF800000> : vector<35xf32>
    %565 = vector.multi_reduction <maximumf>, %564, %cst_257 [1] : vector<35x35xf32> to vector<35xf32>
    %566 = vector.shape_cast %565 : vector<35xf32> to vector<35x1xf32>
    %567 = vector.broadcast %566 : vector<35x1xf32> to vector<35x35xf32>
    %568 = arith.subf %564, %567 : vector<35x35xf32>
    %569 = math.exp %568 : vector<35x35xf32>
    %cst_258 = arith.constant dense<0.000000e+00> : vector<35x32xf32>
    %570 = tpu.matmul %569, %561, %cst_258 {dimension_numbers = #tpu.dot_dimension_numbers<[1], [0], [0], [1], [0, 0, 1, 1], [], []>} : vector<35x35xf32>, vector<35x32xf32>, vector<35x32xf32> -> vector<35x32xf32>
    %cst_259 = arith.constant dense<0.000000e+00> : vector<35xf32>
    %571 = vector.multi_reduction <add>, %569, %cst_259 [1] : vector<35x35xf32> to vector<35xf32>
    %572 = vector.shape_cast %571 : vector<35xf32> to vector<35x1xf32>
    %573 = tpu.reciprocal %572 {approx = true} : vector<35x1xf32> -> vector<35x1xf32>
    %574 = vector.broadcast %573 : vector<35x1xf32> to vector<35x32xf32>
    %575 = arith.mulf %570, %574 : vector<35x32xf32>
    %c472_260 = arith.constant 472 : index
    %c0_261 = arith.constant 0 : index
    %576 = vector.load %arg3[%c472_260, %c0_261] : memref<904x128xf32, #tpu.memory_space<vmem>>, vector<32x32xf32>
    %cst_262 = arith.constant dense<0.000000e+00> : vector<35x32xf32>
    %577 = tpu.matmul %546, %576, %cst_262 {dimension_numbers = #tpu.dot_dimension_numbers<[1], [0], [0], [1], [0, 0, 1, 1], [], []>} : vector<35x32xf32>, vector<32x32xf32>, vector<35x32xf32> -> vector<35x32xf32>
    %c18_263 = arith.constant 18 : index
    %c0_264 = arith.constant 0 : index
    %578 = vector.load %arg4[%c18_263, %c0_264] : memref<40x128xf32, #tpu.memory_space<vmem>>, vector<1x32xf32>
    %579 = vector.broadcast %578 : vector<1x32xf32> to vector<35x32xf32>
    %580 = arith.addf %577, %579 : vector<35x32xf32>
    %c504_265 = arith.constant 504 : index
    %c0_266 = arith.constant 0 : index
    %581 = vector.load %arg3[%c504_265, %c0_266] : memref<904x128xf32, #tpu.memory_space<vmem>>, vector<32x32xf32>
    %cst_267 = arith.constant dense<0.000000e+00> : vector<35x32xf32>
    %582 = tpu.matmul %546, %581, %cst_267 {dimension_numbers = #tpu.dot_dimension_numbers<[1], [0], [0], [1], [0, 0, 1, 1], [], []>} : vector<35x32xf32>, vector<32x32xf32>, vector<35x32xf32> -> vector<35x32xf32>
    %c19_268 = arith.constant 19 : index
    %c0_269 = arith.constant 0 : index
    %583 = vector.load %arg4[%c19_268, %c0_269] : memref<40x128xf32, #tpu.memory_space<vmem>>, vector<1x32xf32>
    %584 = vector.broadcast %583 : vector<1x32xf32> to vector<35x32xf32>
    %585 = arith.addf %582, %584 : vector<35x32xf32>
    %cst_270 = arith.constant dense<0.000000e+00> : vector<35x35xf32>
    %586 = tpu.matmul %551, %580, %cst_270 {dimension_numbers = #tpu.dot_dimension_numbers<[1], [1], [0], [0], [0, 0, 1, 0], [], []>} : vector<35x32xf32>, vector<35x32xf32>, vector<35x35xf32> -> vector<35x35xf32>
    %cst_271 = arith.constant 2.500000e-01 : f32
    %587 = vector.broadcast %cst_271 : f32 to vector<35x35xf32>
    %588 = arith.mulf %586, %587 : vector<35x35xf32>
    %cst_272 = arith.constant dense<0xFF800000> : vector<35xf32>
    %589 = vector.multi_reduction <maximumf>, %588, %cst_272 [1] : vector<35x35xf32> to vector<35xf32>
    %590 = vector.shape_cast %589 : vector<35xf32> to vector<35x1xf32>
    %591 = vector.broadcast %590 : vector<35x1xf32> to vector<35x35xf32>
    %592 = arith.subf %588, %591 : vector<35x35xf32>
    %593 = math.exp %592 : vector<35x35xf32>
    %cst_273 = arith.constant dense<0.000000e+00> : vector<35x32xf32>
    %594 = tpu.matmul %593, %585, %cst_273 {dimension_numbers = #tpu.dot_dimension_numbers<[1], [0], [0], [1], [0, 0, 1, 1], [], []>} : vector<35x35xf32>, vector<35x32xf32>, vector<35x32xf32> -> vector<35x32xf32>
    %cst_274 = arith.constant dense<0.000000e+00> : vector<35xf32>
    %595 = vector.multi_reduction <add>, %593, %cst_274 [1] : vector<35x35xf32> to vector<35xf32>
    %596 = vector.shape_cast %595 : vector<35xf32> to vector<35x1xf32>
    %597 = tpu.reciprocal %596 {approx = true} : vector<35x1xf32> -> vector<35x1xf32>
    %598 = vector.broadcast %597 : vector<35x1xf32> to vector<35x32xf32>
    %599 = arith.mulf %594, %598 : vector<35x32xf32>
    %600 = arith.addf %575, %599 : vector<35x32xf32>
    %c536_275 = arith.constant 536 : index
    %c0_276 = arith.constant 0 : index
    %601 = vector.load %arg3[%c536_275, %c0_276] : memref<904x128xf32, #tpu.memory_space<vmem>>, vector<32x32xf32>
    %cst_277 = arith.constant dense<0.000000e+00> : vector<35x32xf32>
    %602 = tpu.matmul %600, %601, %cst_277 {dimension_numbers = #tpu.dot_dimension_numbers<[1], [0], [0], [1], [0, 0, 1, 1], [], []>} : vector<35x32xf32>, vector<32x32xf32>, vector<35x32xf32> -> vector<35x32xf32>
    %603 = arith.addf %522, %602 : vector<35x32xf32>
    %c20_278 = arith.constant 20 : index
    %c0_279 = arith.constant 0 : index
    %604 = vector.load %arg4[%c20_278, %c0_279] : memref<40x128xf32, #tpu.memory_space<vmem>>, vector<1x32xf32>
    %605 = vector.broadcast %604 : vector<1x32xf32> to vector<35x32xf32>
    %606 = arith.addf %603, %605 : vector<35x32xf32>
    %c21_280 = arith.constant 21 : index
    %c0_281 = arith.constant 0 : index
    %607 = vector.load %arg4[%c21_280, %c0_281] : memref<40x128xf32, #tpu.memory_space<vmem>>, vector<1x32xf32>
    %c22_282 = arith.constant 22 : index
    %c0_283 = arith.constant 0 : index
    %608 = vector.load %arg4[%c22_282, %c0_283] : memref<40x128xf32, #tpu.memory_space<vmem>>, vector<1x32xf32>
    %cst_284 = arith.constant dense<0.000000e+00> : vector<35xf32>
    %609 = vector.multi_reduction <add>, %606, %cst_284 [1] : vector<35x32xf32> to vector<35xf32>
    %610 = vector.shape_cast %609 : vector<35xf32> to vector<35x1xf32>
    %cst_285 = arith.constant 3.200000e+01 : f32
    %611 = vector.broadcast %cst_285 : f32 to vector<35x1xf32>
    %612 = arith.divf %610, %611 : vector<35x1xf32>
    %613 = vector.broadcast %612 : vector<35x1xf32> to vector<35x32xf32>
    %614 = arith.subf %606, %613 : vector<35x32xf32>
    %615 = arith.mulf %614, %614 : vector<35x32xf32>
    %cst_286 = arith.constant dense<0.000000e+00> : vector<35xf32>
    %616 = vector.multi_reduction <add>, %615, %cst_286 [1] : vector<35x32xf32> to vector<35xf32>
    %617 = vector.shape_cast %616 : vector<35xf32> to vector<35x1xf32>
    %cst_287 = arith.constant 3.200000e+01 : f32
    %618 = vector.broadcast %cst_287 : f32 to vector<35x1xf32>
    %619 = arith.divf %617, %618 : vector<35x1xf32>
    %620 = vector.broadcast %612 : vector<35x1xf32> to vector<35x32xf32>
    %621 = arith.subf %606, %620 : vector<35x32xf32>
    %cst_288 = arith.constant 9.99999974E-6 : f32
    %622 = vector.broadcast %cst_288 : f32 to vector<35x1xf32>
    %623 = arith.addf %619, %622 : vector<35x1xf32>
    %624 = math.rsqrt %623 : vector<35x1xf32>
    %625 = vector.broadcast %624 : vector<35x1xf32> to vector<35x32xf32>
    %626 = arith.mulf %621, %625 : vector<35x32xf32>
    %627 = vector.broadcast %607 : vector<1x32xf32> to vector<35x32xf32>
    %628 = arith.mulf %626, %627 : vector<35x32xf32>
    %629 = vector.broadcast %608 : vector<1x32xf32> to vector<35x32xf32>
    %630 = arith.addf %628, %629 : vector<35x32xf32>
    %c568_289 = arith.constant 568 : index
    %c0_290 = arith.constant 0 : index
    %631 = vector.load %arg3[%c568_289, %c0_290] : memref<904x128xf32, #tpu.memory_space<vmem>>, vector<32x64xf32>
    %cst_291 = arith.constant dense<0.000000e+00> : vector<35x64xf32>
    %632 = tpu.matmul %630, %631, %cst_291 {dimension_numbers = #tpu.dot_dimension_numbers<[1], [0], [0], [1], [0, 0, 1, 1], [], []>} : vector<35x32xf32>, vector<32x64xf32>, vector<35x64xf32> -> vector<35x64xf32>
    %c23_292 = arith.constant 23 : index
    %c0_293 = arith.constant 0 : index
    %633 = vector.load %arg4[%c23_292, %c0_293] : memref<40x128xf32, #tpu.memory_space<vmem>>, vector<1x64xf32>
    %634 = vector.broadcast %633 : vector<1x64xf32> to vector<35x64xf32>
    %635 = arith.addf %632, %634 : vector<35x64xf32>
    %cst_294 = arith.constant 0.000000e+00 : f32
    %636 = vector.broadcast %cst_294 : f32 to vector<35x64xf32>
    %637 = arith.maximumf %635, %636 : vector<35x64xf32>
    %c600_295 = arith.constant 600 : index
    %c0_296 = arith.constant 0 : index
    %638 = vector.load %arg3[%c600_295, %c0_296] : memref<904x128xf32, #tpu.memory_space<vmem>>, vector<64x32xf32>
    %cst_297 = arith.constant dense<0.000000e+00> : vector<35x32xf32>
    %639 = tpu.matmul %637, %638, %cst_297 {dimension_numbers = #tpu.dot_dimension_numbers<[1], [0], [0], [1], [0, 0, 1, 1], [], []>} : vector<35x64xf32>, vector<64x32xf32>, vector<35x32xf32> -> vector<35x32xf32>
    %640 = arith.addf %606, %639 : vector<35x32xf32>
    %c24_298 = arith.constant 24 : index
    %c0_299 = arith.constant 0 : index
    %641 = vector.load %arg4[%c24_298, %c0_299] : memref<40x128xf32, #tpu.memory_space<vmem>>, vector<1x32xf32>
    %642 = vector.broadcast %641 : vector<1x32xf32> to vector<35x32xf32>
    %643 = arith.addf %640, %642 : vector<35x32xf32>
    %644 = vector.extract_strided_slice %643 {offsets = [16, 0], sizes = [8, 32], strides = [1, 1]} : vector<35x32xf32> to vector<8x32xf32>
    %c25_300 = arith.constant 25 : index
    %c0_301 = arith.constant 0 : index
    %645 = vector.load %arg4[%c25_300, %c0_301] : memref<40x128xf32, #tpu.memory_space<vmem>>, vector<1x32xf32>
    %c26_302 = arith.constant 26 : index
    %c0_303 = arith.constant 0 : index
    %646 = vector.load %arg4[%c26_302, %c0_303] : memref<40x128xf32, #tpu.memory_space<vmem>>, vector<1x32xf32>
    %cst_304 = arith.constant dense<0.000000e+00> : vector<8xf32>
    %647 = vector.multi_reduction <add>, %644, %cst_304 [1] : vector<8x32xf32> to vector<8xf32>
    %648 = vector.shape_cast %647 : vector<8xf32> to vector<8x1xf32>
    %cst_305 = arith.constant 3.200000e+01 : f32
    %649 = vector.broadcast %cst_305 : f32 to vector<8x1xf32>
    %650 = arith.divf %648, %649 : vector<8x1xf32>
    %651 = vector.broadcast %650 : vector<8x1xf32> to vector<8x32xf32>
    %652 = arith.subf %644, %651 : vector<8x32xf32>
    %653 = arith.mulf %652, %652 : vector<8x32xf32>
    %cst_306 = arith.constant dense<0.000000e+00> : vector<8xf32>
    %654 = vector.multi_reduction <add>, %653, %cst_306 [1] : vector<8x32xf32> to vector<8xf32>
    %655 = vector.shape_cast %654 : vector<8xf32> to vector<8x1xf32>
    %cst_307 = arith.constant 3.200000e+01 : f32
    %656 = vector.broadcast %cst_307 : f32 to vector<8x1xf32>
    %657 = arith.divf %655, %656 : vector<8x1xf32>
    %658 = vector.broadcast %650 : vector<8x1xf32> to vector<8x32xf32>
    %659 = arith.subf %644, %658 : vector<8x32xf32>
    %cst_308 = arith.constant 9.99999974E-6 : f32
    %660 = vector.broadcast %cst_308 : f32 to vector<8x1xf32>
    %661 = arith.addf %657, %660 : vector<8x1xf32>
    %662 = math.rsqrt %661 : vector<8x1xf32>
    %663 = vector.broadcast %662 : vector<8x1xf32> to vector<8x32xf32>
    %664 = arith.mulf %659, %663 : vector<8x32xf32>
    %665 = vector.broadcast %645 : vector<1x32xf32> to vector<8x32xf32>
    %666 = arith.mulf %664, %665 : vector<8x32xf32>
    %667 = vector.broadcast %646 : vector<1x32xf32> to vector<8x32xf32>
    %668 = arith.addf %666, %667 : vector<8x32xf32>
    %c664_309 = arith.constant 664 : index
    %c0_310 = arith.constant 0 : index
    %669 = vector.load %arg3[%c664_309, %c0_310] : memref<904x128xf32, #tpu.memory_space<vmem>>, vector<32x2xf32>
    %cst_311 = arith.constant dense<0.000000e+00> : vector<8x2xf32>
    %670 = tpu.matmul %668, %669, %cst_311 {dimension_numbers = #tpu.dot_dimension_numbers<[1], [0], [0], [1], [0, 0, 1, 1], [], []>} : vector<8x32xf32>, vector<32x2xf32>, vector<8x2xf32> -> vector<8x2xf32>
    %c27_312 = arith.constant 27 : index
    %c0_313 = arith.constant 0 : index
    %671 = vector.load %arg4[%c27_312, %c0_313] : memref<40x128xf32, #tpu.memory_space<vmem>>, vector<1x2xf32>
    %672 = vector.broadcast %671 : vector<1x2xf32> to vector<8x2xf32>
    %673 = arith.addf %670, %672 : vector<8x2xf32>
    %674 = tpu.concatenate %673, %673, %673, %673 in 0 : vector<8x2xf32>, vector<8x2xf32>, vector<8x2xf32>, vector<8x2xf32> -> vector<32x2xf32>
    %c696_314 = arith.constant 696 : index
    %c0_315 = arith.constant 0 : index
    %675 = vector.load %arg3[%c696_314, %c0_315] : memref<904x128xf32, #tpu.memory_space<vmem>>, vector<32x2xf32>
    %676 = arith.mulf %675, %674 : vector<32x2xf32>
    %677 = arith.mulf %676, %676 : vector<32x2xf32>
    %cst_316 = arith.constant dense<0.000000e+00> : vector<32xf32>
    %678 = vector.multi_reduction <add>, %677, %cst_316 [1] : vector<32x2xf32> to vector<32xf32>
    %679 = vector.shape_cast %678 : vector<32xf32> to vector<32x1xf32>
    %cst_317 = arith.constant 1.000000e-24 : f32
    %680 = vector.broadcast %cst_317 : f32 to vector<32x1xf32>
    %681 = arith.maximumf %679, %680 : vector<32x1xf32>
    %682 = math.rsqrt %681 : vector<32x1xf32>
    %683 = vector.broadcast %682 : vector<32x1xf32> to vector<32x2xf32>
    %684 = arith.mulf %676, %683 : vector<32x2xf32>
    %cst_318 = arith.constant dense<0.000000e+00> : vector<32x256xf32>
    %685 = tpu.matmul %684, %4, %cst_318 {dimension_numbers = #tpu.dot_dimension_numbers<[1], [0], [0], [1], [0, 0, 1, 1], [], []>} : vector<32x2xf32>, vector<2x256xf32>, vector<32x256xf32> -> vector<32x256xf32>
    %c728_319 = arith.constant 728 : index
    %c0_320 = arith.constant 0 : index
    %686 = vector.load %arg3[%c728_319, %c0_320] : memref<904x128xf32, #tpu.memory_space<vmem>>, vector<32x1xf32>
    %687 = vector.broadcast %686 : vector<32x1xf32> to vector<32x256xf32>
    %688 = arith.addf %685, %687 : vector<32x256xf32>
    %cst_321 = arith.constant 0.000000e+00 : f32
    %689 = vector.broadcast %cst_321 : f32 to vector<32x256xf32>
    %690 = arith.maximumf %688, %689 : vector<32x256xf32>
    %691 = vector.extract_strided_slice %643 {offsets = [24, 0], sizes = [8, 32], strides = [1, 1]} : vector<35x32xf32> to vector<8x32xf32>
    %c28_322 = arith.constant 28 : index
    %c0_323 = arith.constant 0 : index
    %692 = vector.load %arg4[%c28_322, %c0_323] : memref<40x128xf32, #tpu.memory_space<vmem>>, vector<1x32xf32>
    %c29_324 = arith.constant 29 : index
    %c0_325 = arith.constant 0 : index
    %693 = vector.load %arg4[%c29_324, %c0_325] : memref<40x128xf32, #tpu.memory_space<vmem>>, vector<1x32xf32>
    %cst_326 = arith.constant dense<0.000000e+00> : vector<8xf32>
    %694 = vector.multi_reduction <add>, %691, %cst_326 [1] : vector<8x32xf32> to vector<8xf32>
    %695 = vector.shape_cast %694 : vector<8xf32> to vector<8x1xf32>
    %cst_327 = arith.constant 3.200000e+01 : f32
    %696 = vector.broadcast %cst_327 : f32 to vector<8x1xf32>
    %697 = arith.divf %695, %696 : vector<8x1xf32>
    %698 = vector.broadcast %697 : vector<8x1xf32> to vector<8x32xf32>
    %699 = arith.subf %691, %698 : vector<8x32xf32>
    %700 = arith.mulf %699, %699 : vector<8x32xf32>
    %cst_328 = arith.constant dense<0.000000e+00> : vector<8xf32>
    %701 = vector.multi_reduction <add>, %700, %cst_328 [1] : vector<8x32xf32> to vector<8xf32>
    %702 = vector.shape_cast %701 : vector<8xf32> to vector<8x1xf32>
    %cst_329 = arith.constant 3.200000e+01 : f32
    %703 = vector.broadcast %cst_329 : f32 to vector<8x1xf32>
    %704 = arith.divf %702, %703 : vector<8x1xf32>
    %705 = vector.broadcast %697 : vector<8x1xf32> to vector<8x32xf32>
    %706 = arith.subf %691, %705 : vector<8x32xf32>
    %cst_330 = arith.constant 9.99999974E-6 : f32
    %707 = vector.broadcast %cst_330 : f32 to vector<8x1xf32>
    %708 = arith.addf %704, %707 : vector<8x1xf32>
    %709 = math.rsqrt %708 : vector<8x1xf32>
    %710 = vector.broadcast %709 : vector<8x1xf32> to vector<8x32xf32>
    %711 = arith.mulf %706, %710 : vector<8x32xf32>
    %712 = vector.broadcast %692 : vector<1x32xf32> to vector<8x32xf32>
    %713 = arith.mulf %711, %712 : vector<8x32xf32>
    %714 = vector.broadcast %693 : vector<1x32xf32> to vector<8x32xf32>
    %715 = arith.addf %713, %714 : vector<8x32xf32>
    %c760_331 = arith.constant 760 : index
    %c0_332 = arith.constant 0 : index
    %716 = vector.load %arg3[%c760_331, %c0_332] : memref<904x128xf32, #tpu.memory_space<vmem>>, vector<32x32xf32>
    %cst_333 = arith.constant dense<0.000000e+00> : vector<8x32xf32>
    %717 = tpu.matmul %715, %716, %cst_333 {dimension_numbers = #tpu.dot_dimension_numbers<[1], [0], [0], [1], [0, 0, 1, 1], [], []>} : vector<8x32xf32>, vector<32x32xf32>, vector<8x32xf32> -> vector<8x32xf32>
    %c30_334 = arith.constant 30 : index
    %c0_335 = arith.constant 0 : index
    %718 = vector.load %arg4[%c30_334, %c0_335] : memref<40x128xf32, #tpu.memory_space<vmem>>, vector<1x32xf32>
    %719 = vector.broadcast %718 : vector<1x32xf32> to vector<8x32xf32>
    %720 = arith.addf %717, %719 : vector<8x32xf32>
    %721 = tpu.concatenate %720, %720, %720, %720 in 0 : vector<8x32xf32>, vector<8x32xf32>, vector<8x32xf32>, vector<8x32xf32> -> vector<32x32xf32>
    %c792_336 = arith.constant 792 : index
    %c0_337 = arith.constant 0 : index
    %722 = vector.load %arg3[%c792_336, %c0_337] : memref<904x128xf32, #tpu.memory_space<vmem>>, vector<32x32xf32>
    %723 = arith.mulf %722, %721 : vector<32x32xf32>
    %724 = arith.mulf %723, %723 : vector<32x32xf32>
    %cst_338 = arith.constant dense<0.000000e+00> : vector<32xf32>
    %725 = vector.multi_reduction <add>, %724, %cst_338 [1] : vector<32x32xf32> to vector<32xf32>
    %726 = vector.shape_cast %725 : vector<32xf32> to vector<32x1xf32>
    %cst_339 = arith.constant 1.000000e-24 : f32
    %727 = vector.broadcast %cst_339 : f32 to vector<32x1xf32>
    %728 = arith.maximumf %726, %727 : vector<32x1xf32>
    %729 = math.rsqrt %728 : vector<32x1xf32>
    %730 = vector.broadcast %729 : vector<32x1xf32> to vector<32x32xf32>
    %731 = arith.mulf %723, %730 : vector<32x32xf32>
    %cst_340 = arith.constant dense<0.000000e+00> : vector<32x256xf32>
    %732 = tpu.matmul %731, %690, %cst_340 {dimension_numbers = #tpu.dot_dimension_numbers<[1], [0], [0], [1], [0, 0, 1, 1], [], []>} : vector<32x32xf32>, vector<32x256xf32>, vector<32x256xf32> -> vector<32x256xf32>
    %c824_341 = arith.constant 824 : index
    %c0_342 = arith.constant 0 : index
    %733 = vector.load %arg3[%c824_341, %c0_342] : memref<904x128xf32, #tpu.memory_space<vmem>>, vector<32x1xf32>
    %734 = vector.broadcast %733 : vector<32x1xf32> to vector<32x256xf32>
    %735 = arith.addf %732, %734 : vector<32x256xf32>
    %cst_343 = arith.constant 0.000000e+00 : f32
    %736 = vector.broadcast %cst_343 : f32 to vector<32x256xf32>
    %737 = arith.maximumf %735, %736 : vector<32x256xf32>
    %738 = vector.extract_strided_slice %643 {offsets = [32, 0], sizes = [3, 32], strides = [1, 1]} : vector<35x32xf32> to vector<3x32xf32>
    %c31_344 = arith.constant 31 : index
    %c0_345 = arith.constant 0 : index
    %739 = vector.load %arg4[%c31_344, %c0_345] : memref<40x128xf32, #tpu.memory_space<vmem>>, vector<1x32xf32>
    %c32_346 = arith.constant 32 : index
    %c0_347 = arith.constant 0 : index
    %740 = vector.load %arg4[%c32_346, %c0_347] : memref<40x128xf32, #tpu.memory_space<vmem>>, vector<1x32xf32>
    %cst_348 = arith.constant dense<0.000000e+00> : vector<3xf32>
    %741 = vector.multi_reduction <add>, %738, %cst_348 [1] : vector<3x32xf32> to vector<3xf32>
    %742 = vector.shape_cast %741 : vector<3xf32> to vector<3x1xf32>
    %cst_349 = arith.constant 3.200000e+01 : f32
    %743 = vector.broadcast %cst_349 : f32 to vector<3x1xf32>
    %744 = arith.divf %742, %743 : vector<3x1xf32>
    %745 = vector.broadcast %744 : vector<3x1xf32> to vector<3x32xf32>
    %746 = arith.subf %738, %745 : vector<3x32xf32>
    %747 = arith.mulf %746, %746 : vector<3x32xf32>
    %cst_350 = arith.constant dense<0.000000e+00> : vector<3xf32>
    %748 = vector.multi_reduction <add>, %747, %cst_350 [1] : vector<3x32xf32> to vector<3xf32>
    %749 = vector.shape_cast %748 : vector<3xf32> to vector<3x1xf32>
    %cst_351 = arith.constant 3.200000e+01 : f32
    %750 = vector.broadcast %cst_351 : f32 to vector<3x1xf32>
    %751 = arith.divf %749, %750 : vector<3x1xf32>
    %752 = vector.broadcast %744 : vector<3x1xf32> to vector<3x32xf32>
    %753 = arith.subf %738, %752 : vector<3x32xf32>
    %cst_352 = arith.constant 9.99999974E-6 : f32
    %754 = vector.broadcast %cst_352 : f32 to vector<3x1xf32>
    %755 = arith.addf %751, %754 : vector<3x1xf32>
    %756 = math.rsqrt %755 : vector<3x1xf32>
    %757 = vector.broadcast %756 : vector<3x1xf32> to vector<3x32xf32>
    %758 = arith.mulf %753, %757 : vector<3x32xf32>
    %759 = vector.broadcast %739 : vector<1x32xf32> to vector<3x32xf32>
    %760 = arith.mulf %758, %759 : vector<3x32xf32>
    %761 = vector.broadcast %740 : vector<1x32xf32> to vector<3x32xf32>
    %762 = arith.addf %760, %761 : vector<3x32xf32>
    %c856_353 = arith.constant 856 : index
    %c0_354 = arith.constant 0 : index
    %763 = vector.load %arg3[%c856_353, %c0_354] : memref<904x128xf32, #tpu.memory_space<vmem>>, vector<32x32xf32>
    %cst_355 = arith.constant dense<0.000000e+00> : vector<3x32xf32>
    %764 = tpu.matmul %762, %763, %cst_355 {dimension_numbers = #tpu.dot_dimension_numbers<[1], [0], [0], [1], [0, 0, 1, 1], [], []>} : vector<3x32xf32>, vector<32x32xf32>, vector<3x32xf32> -> vector<3x32xf32>
    %c33_356 = arith.constant 33 : index
    %c0_357 = arith.constant 0 : index
    %765 = vector.load %arg4[%c33_356, %c0_357] : memref<40x128xf32, #tpu.memory_space<vmem>>, vector<1x32xf32>
    %766 = vector.broadcast %765 : vector<1x32xf32> to vector<3x32xf32>
    %767 = arith.addf %764, %766 : vector<3x32xf32>
    %c888_358 = arith.constant 888 : index
    %c0_359 = arith.constant 0 : index
    %768 = vector.load %arg3[%c888_358, %c0_359] : memref<904x128xf32, #tpu.memory_space<vmem>>, vector<3x32xf32>
    %769 = arith.mulf %768, %767 : vector<3x32xf32>
    %770 = arith.mulf %769, %769 : vector<3x32xf32>
    %cst_360 = arith.constant dense<0.000000e+00> : vector<3xf32>
    %771 = vector.multi_reduction <add>, %770, %cst_360 [1] : vector<3x32xf32> to vector<3xf32>
    %772 = vector.shape_cast %771 : vector<3xf32> to vector<3x1xf32>
    %cst_361 = arith.constant 1.000000e-24 : f32
    %773 = vector.broadcast %cst_361 : f32 to vector<3x1xf32>
    %774 = arith.maximumf %772, %773 : vector<3x1xf32>
    %775 = math.rsqrt %774 : vector<3x1xf32>
    %776 = vector.broadcast %775 : vector<3x1xf32> to vector<3x32xf32>
    %777 = arith.mulf %769, %776 : vector<3x32xf32>
    %cst_362 = arith.constant dense<0.000000e+00> : vector<3x256xf32>
    %778 = tpu.matmul %777, %737, %cst_362 {dimension_numbers = #tpu.dot_dimension_numbers<[1], [0], [0], [1], [0, 0, 1, 1], [], []>} : vector<3x32xf32>, vector<32x256xf32>, vector<3x256xf32> -> vector<3x256xf32>
    %c896_363 = arith.constant 896 : index
    %c0_364 = arith.constant 0 : index
    %779 = vector.load %arg3[%c896_363, %c0_364] : memref<904x128xf32, #tpu.memory_space<vmem>>, vector<3x1xf32>
    %780 = vector.broadcast %779 : vector<3x1xf32> to vector<3x256xf32>
    %781 = arith.addf %778, %780 : vector<3x256xf32>
    %c1_365 = arith.constant 1 : index
    %c0_366 = arith.constant 0 : index
    %c0_367 = arith.constant 0 : index
    %782 = vector.load %arg5[%c1_365, %c0_366, %c0_367] : memref<2x3x256xf32, #tpu.memory_space<vmem>>, vector<1x3x256xf32>
    %783 = vector.shape_cast %782 : vector<1x3x256xf32> to vector<3x256xf32>
    %784 = vector.shape_cast %781 : vector<3x256xf32> to vector<1x3x256xf32>
    tpu.vector_store %arg5[%c1_365, %c0_366, %c0_367], %784 {strides = array<i32>} : memref<2x3x256xf32, #tpu.memory_space<vmem>>, vector<1x3x256xf32>,
    return
  }
  func.func @transform_0(%arg0: i32) -> (i32, i32, i32) {
    %c0_i32 = arith.constant 0 : i32
    %c0_i32_0 = arith.constant 0 : i32
    %c0_i32_1 = arith.constant 0 : i32
    %c0_i32_2 = arith.constant 0 : i32
    return %c0_i32, %c0_i32_0, %c0_i32_1 : i32, i32, i32
  }
  func.func @transform_1(%arg0: i32) -> (i32, i32) {
    %c0_i32 = arith.constant 0 : i32
    %c0_i32_0 = arith.constant 0 : i32
    %c0_i32_1 = arith.constant 0 : i32
    return %c0_i32, %c0_i32_0 : i32, i32
  }
  func.func @transform_2(%arg0: i32) -> (i32, i32) {
    %c0_i32 = arith.constant 0 : i32
    %c0_i32_0 = arith.constant 0 : i32
    %c0_i32_1 = arith.constant 0 : i32
    return %c0_i32, %c0_i32_0 : i32, i32
  }
  func.func @transform_3(%arg0: i32) -> (i32, i32) {
    %c0_i32 = arith.constant 0 : i32
    %c0_i32_0 = arith.constant 0 : i32
    %c0_i32_1 = arith.constant 0 : i32
    return %c0_i32, %c0_i32_0 : i32, i32
  }
  func.func @transform_4(%arg0: i32) -> (i32, i32, i32) {
    %c0_i32 = arith.constant 0 : i32
    %c0_i32_0 = arith.constant 0 : i32
    %c0_i32_1 = arith.constant 0 : i32
    %c0_i32_2 = arith.constant 0 : i32
    return %c0_i32, %c0_i32_0, %c0_i32_1 : i32, i32, i32
  }
}

</mosaic_0001>

<bundles_post_ra>
// kernel: trans_inr_forward.1
= control target key start
LH: loop header
LB: loop body
LE: loop exit
PB: predicated region body
PF: predicated region fallthrough
CT: control target
= control target key end

     0   :  { %vm36_vm0 = vcmask 392192   ;;  %vm122_vm1 = vcmask 261120   ;;  %vm135_vm2 = vcmask 256000   ;;  %v10624_v52 = vmov 0.0   ;;  %s13718_s2 = inlined_call_operand.vmem [shape: f32[904,128], index: 2, kind: input, shape index: {}]   ;;  %s13719_s0 = inlined_call_operand.vmem [shape: f32[2,16,48], index: 0, kind: input, shape index: {}]   ;;  %s13720_s3 = inlined_call_operand.vmem [shape: f32[40,128], index: 3, kind: input, shape index: {}]   ;;  %s13721_s1 = inlined_call_operand.vmem [shape: f32[2,256], index: 1, kind: input, shape index: {}]   ;;  %s13722_s4 = inlined_call_operand.vmem [shape: f32[2,3,256], index: 4, kind: output, shape index: {}]  }
   0x1   :  { %v22_v0 = vld [vmem:[%s13718_s2 + $0x28] sm:$0xff]  ;;  %v21_v1 = vld [vmem:[%s13718_s2 + $0x20] sm:$0xff]  ;;  %v20_v2 = vld [vmem:[%s13718_s2 + $0x18] sm:$0xff]  ;;  %9072 = vmatprep.subr.mxu1 %v10624_v52  ;;  %vm10625_vm3 = vmmov 0   ;;  %vm692_vm4 = vcmask 1042432   ;;  %vm645_vm5 = vcmask 285696  }
   0x2   :  { %9057 = vmatprep.subr.mxu0 %v22_v0  ;;  %v30_v3 = vld [vmem:[%s13719_s0] sm:$0xff]  ;;  %v19_v4 = vld [vmem:[%s13718_s2 + $0x10] sm:$0xff]  ;;  %v18_v5 = vld [vmem:[%s13718_s2 + $0x8] sm:$0xff]  ;;  %9080 = vmatprep.mubr.msk.f32.mxu1 %vm10625_vm3, %v10624_v52  ;;  %vm658_vm6 = vcmask 280576   ;;  %vm1623_vm7 = vcmask 523264   ;;  %vm3474_vm8 = vcmask 15360  }
   0x3   :  { %9058 = vmatpush3.msra.mxu0 %v22_v0  ;;  %9069 = vmatprep.mubr.msk.f32.mxu0 %vm36_vm0, %v30_v3  ;;  %v17_v6 = vld [vmem:[%s13718_s2] sm:$0xff]  ;;  %v31_v7 = vld [vmem:[%s13719_s0 + $0x8] sm:$0xff]  ;;  %v24_v14 = vld [vmem:[%s13718_s2 + $0x30] sm:$0xff]  ;;  %vm3544_vm9 = vcmask 1041408  }
   0x4   :  { %9059 = vmatprep.subr.mxu0 %v21_v1  ;;  %v26_v8 = vld [vmem:[%s13718_s2 + $0x40] sm:$0xff]  ;;  %v27_v10 = vld [vmem:[%s13718_s2 + $0x48] sm:$0xff]  ;;  %v25_v18 = vld [vmem:[%s13718_s2 + $0x38] sm:$0xff] }
   0x5   :  { %9060 = vmatpush3.msra.mxu0 %v21_v1  ;;  %v129_v9 = vsel %vm122_vm1, %v26_v8, 0.0  ;;  %v132_v11 = vsel %vm122_vm1, %v27_v10, 0.0  ;;  %v8156_v13 = vld [vmem:[%s13720_s3] ss:$0 sm:$0xff]  ;;  %v28_v22 = vld [vmem:[%s13718_s2 + $0x50] sm:$0x7] }
   0x6   :  { %9061 = vmatprep.subr.mxu0 %v20_v2  ;;  %130 = vadd.xlane.f32.xlu1 %v129_v9  ;;  %v136_v24 = vsel %vm135_vm2, %v28_v22, 0.0  ;;  %v211_v50 = vld [vmem:[%s13718_s2 + $0x70] sm:$0xff]  ;;  %v210_v53 = vld [vmem:[%s13718_s2 + $0x68] sm:$0xff]  ;;  %v209_v55 = vld [vmem:[%s13718_s2 + $0x60] sm:$0xff] }
   0x7   :  { %9062 = vmatpush3.msra.mxu0 %v20_v2  ;;  %v325_v51 = vld [vmem:[%s13718_s2 + $0x90] sm:$0xff]  ;;  %v324_v54 = vld [vmem:[%s13718_s2 + $0x88] sm:$0xff]  ;;  %9073 = vmatpush3.msra.mxu1 %v211_v50  ;;  %v323_v56 = vld [vmem:[%s13718_s2 + $0x80] sm:$0xff] }
   0x8   :  { %9063 = vmatprep.subr.mxu0 %v19_v4  ;;  %9074 = vmatprep.subr.mxu1 %v10624_v52  ;;  %v208_v57 = vld [vmem:[%s13718_s2 + $0x58] sm:$0xff] }
   0x9   :  { %9064 = vmatpush3.msra.mxu0 %v19_v4  ;;  %9075 = vmatpush3.msra.mxu1 %v210_v53  ;;  %v322_v58 = vld [vmem:[%s13718_s2 + $0x78] sm:$0xff] }
   0xa   :  { %9065 = vmatprep.subr.mxu0 %v18_v5  ;;  %133 = vadd.xlane.f32.xlu1 %v132_v11  ;;  %v8159_v11 = vld [vmem:[%s13720_s3 + $0x1] ss:$0 sm:$0xff] }
   0xb   :  { %9066 = vmatpush3.msra.mxu0 %v18_v5  ;;  %9076 = vmatprep.subr.mxu1 %v10624_v52 }
   0xc   :  { %9067 = vmatprep.subr.mxu0 %v17_v6  ;;  %9077 = vmatpush3.msra.mxu1 %v209_v55  ;;  %v8167_v55 = vld [vmem:[%s13720_s3 + $0x4] ss:$0 sm:$0xff] }
   0xd   :  { %9068 = vmatpush3.msra.mxu0 %v17_v6  ;;  %9078 = vmatprep.subr.mxu1 %v10624_v52 }
   0xe   :  { %9070 = vmatmul.mubr.msk.f32.vlgmr.msra.gmra.mxu0 %vm36_vm0, %v31_v7  ;;  %9095 = vmatprep.subr.mxu0 %v10624_v52 }
   0xf   :  { %9096 = vmatpush3.msra.mxu0 %v325_v51  ;;  %9079 = vmatpush3.msra.mxu1 %v208_v57 }
  0x10   :  { %9097 = vmatprep.subr.mxu0 %v10624_v52  ;;  %9103 = vmatprep.mubr.msk.f32.mxu0 %vm10625_vm3, %v10624_v52 }
  0x11   :  { %9098 = vmatpush3.msra.mxu0 %v324_v54  ;;  %9118 = vmatprep.subr.mxu1 %v10624_v52 }
  0x12   :  { %9099 = vmatprep.subr.mxu0 %v10624_v52 }
  0x13   :  { %9100 = vmatpush3.msra.mxu0 %v323_v56 }
  0x14   :  { %9101 = vmatprep.subr.mxu0 %v10624_v52 }
  0x15   :  { %9102 = vmatpush3.msra.mxu0 %v322_v58 }
  0x16   :  { %9141 = vmatprep.subr.mxu0 %v10624_v52 }
  0x8f   :  { %v131_v25 = vpop.xlane.xlu1 %130 }
  0x90   :  { %v142_v26 = vmul.f32 0.03125, %v131_v25 }
  0x92   :  { %v10707_v30 = vsub.f32 %v26_v8, %v142_v26 }
  0x93   :  { %v134_v27 = vpop.xlane.xlu1 %133 }
  0x94   :  { %v143_v31 = vmul.f32 0.03125, %v134_v27  ;;  %v152_v37 = vmul.f32 %v10707_v30, %v10707_v30 }
  0x96   :  { %v10712_v35 = vsub.f32 %v27_v10, %v143_v31  ;;  %v161_v42 = vsel %vm122_vm1, %v152_v37, 0.0 }
  0x98   :  { %v153_v44 = vmul.f32 %v10712_v35, %v10712_v35 }
  0x9a   :  { %v164_v47 = vsel %vm122_vm1, %v153_v44, 0.0 }
  0xce   :  { %v9071_v12 = vpop.f32.mrf.mxu0 }
  0xcf   :  { %v115_v16 = vadd.f32 %v9071_v12, %v8156_v13 }
  0xd0   :  { %v109_v15 = vpop.f32.mrf.mxu0 }
  0xd1   :  { %v110_v17 = vadd.f32 %v8156_v13, %v109_v15  ;;  %v10697_v20 = vadd.f32 %v115_v16, %v25_v18  ;;  %v8160_v13 = vld [vmem:[%s13720_s3 + $0x2] ss:$0 sm:$0xff] }
  0xd3   :  { %v10695_v19 = vadd.f32 %v110_v17, %v24_v14  ;;  %v126_v23 = vsel %vm122_vm1, %v10697_v20, 0.0 }
  0xd5   :  { %v123_v21 = vsel %vm122_vm1, %v10695_v19, 0.0 }
  0xd6   :  { %124 = vadd.xlane.f32.xlu0 %v123_v21 }
  0xda   :  { %127 = vadd.xlane.f32.xlu0 %v126_v23 }
  0xde   :  { %137 = vadd.xlane.f32.xlu0 %v136_v24  ;;  %v423_v24 = vld [vmem:[%s13718_s2 + $0xa8] sm:$0xff] }
 0x15f   :  { %v125_v28 = vpop.xlane.xlu0 %124 }
 0x160   :  { %v140_v29 = vmul.f32 0.03125, %v125_v28 }
 0x162   :  { %v10710_v32 = vsub.f32 %v10695_v19, %v140_v29 }
 0x163   :  { %v128_v33 = vpop.xlane.xlu0 %127 }
 0x164   :  { %v141_v34 = vmul.f32 0.03125, %v128_v33  ;;  %v150_v36 = vmul.f32 %v10710_v32, %v10710_v32 }
 0x166   :  { %v10719_v38 = vsub.f32 %v10697_v20, %v141_v34  ;;  %v155_v39 = vsel %vm122_vm1, %v150_v36, 0.0  ;;  %v421_v34 = vld [vmem:[%s13718_s2 + $0x98] sm:$0xff] }
 0x167   :  { %156 = vadd.xlane.f32.xlu1 %v155_v39  ;;  %v138_v40 = vpop.xlane.xlu0 %137 }
 0x168   :  { %v144_v41 = vmul.f32 0.03125, %v138_v40  ;;  %v151_v43 = vmul.f32 %v10719_v38, %v10719_v38 }
 0x16a   :  { %v10727_v45 = vsub.f32 %v28_v22, %v144_v41  ;;  %v158_v46 = vsel %vm122_vm1, %v151_v43, 0.0  ;;  %v424_v22 = vld [vmem:[%s13718_s2 + $0xb0] sm:$0xff] }
 0x16b   :  { %162 = vadd.xlane.f32.xlu1 %v161_v42  ;;  %159 = vadd.xlane.f32.xlu0 %v158_v46 }
 0x16c   :  { %v154_v48 = vmul.f32 %v10727_v45, %v10727_v45 }
 0x16e   :  { %v167_v49 = vsel %vm135_vm2, %v154_v48, 0.0 }
 0x16f   :  { %165 = vadd.xlane.f32.xlu0 %v164_v47  ;;  %168 = vadd.xlane.f32.xlu1 %v167_v49 }
 0x1f0   :  { %v157_v59 = vpop.xlane.xlu1 %156 }
 0x1f1   :  { %v170_v60 = vmul.f32 0.03125, %v157_v59 }
 0x1f3   :  { %v175_v61 = vadd.f32 1e-05, %v170_v60 }
 0x1f4   :  { %v163_v62 = vpop.xlane.xlu1 %162  ;;  %v160_v63 = vpop.xlane.xlu0 %159 }
 0x1f5   :  { %10326 = vrsqrt.f32 %v175_v61  ;;  %v172_v0 = vmul.f32 0.03125, %v163_v62  ;;  %v171_v1 = vmul.f32 0.03125, %v160_v63 }
 0x1f7   :  { %v177_v2 = vadd.f32 1e-05, %v172_v0  ;;  %v176_v3 = vadd.f32 1e-05, %v171_v1 }
 0x1f8   :  { %v169_v4 = vpop.xlane.xlu1 %168  ;;  %v166_v5 = vpop.xlane.xlu0 %165 }
 0x1f9   :  { %10328 = vrsqrt.f32 %v177_v2  ;;  %v174_v6 = vmul.f32 0.03125, %v169_v4  ;;  %v173_v7 = vmul.f32 0.03125, %v166_v5 }
 0x1fa   :  { %10330 = vrsqrt.f32 %v176_v3 }
 0x1fb   :  { %v178_v8 = vadd.f32 1e-05, %v173_v7  ;;  %v179_v9 = vadd.f32 1e-05, %v174_v6  ;;  %v8161_v7 = vld [vmem:[%s13720_s3 + $0x3] ss:$0 sm:$0xff] }
 0x1fd   :  { %10332 = vrsqrt.f32 %v178_v8 }
 0x1fe   :  { %10334 = vrsqrt.f32 %v179_v9 }
 0x202   :  { %v10327_v10 = vpop.eup %10326 }
 0x203   :  { %v185_v12 = vmul.f32 %v10327_v10, %v10710_v32 }
 0x205   :  { %v194_v14 = vmul.f32 %v8159_v11, %v185_v12 }
 0x206   :  { %v10329_v15 = vpop.eup %10328 }
 0x207   :  { %v10331_v16 = vpop.eup %10330  ;;  %v10779_v17 = vadd.f32 %v8160_v13, %v194_v14  ;;  %v10783_v21 = vmul.f32 %v10329_v15, %v10707_v30  ;;  %v422_v30 = vld [vmem:[%s13718_s2 + $0xa0] sm:$0xff] }
 0x208   :  { %v186_v18 = vmul.f32 %v10331_v16, %v10719_v38 }
 0x209   :  { %9081 = vmatmul.mubr.msk.f32.vlgmr.msra.gmra.mxu1 %vm122_vm1, %v10779_v17  ;;  %9104 = vmatmul.mubr.msk.f32.vlgmr.msra.gmra.mxu0 %vm122_vm1, %v10779_v17  ;;  %v196_v27 = vmul.f32 %v8159_v11, %v10783_v21 }
 0x20a   :  { %9083 = vmatprep.mubr.msk.f32.mxu1 %vm10625_vm3, %v10624_v52  ;;  %9106 = vmatprep.mubr.msk.f32.mxu0 %vm10625_vm3, %v10624_v52  ;;  %v195_v23 = vmul.f32 %v8159_v11, %v186_v18  ;;  %v10333_v25 = vpop.eup %10332 }
 0x20b   :  { %9119 = vmatpush3.msra.mxu1 %v424_v22  ;;  %v10803_v28 = vmul.f32 %v10333_v25, %v10712_v35  ;;  %v10335_v29 = vpop.eup %10334  ;;  %v10817_v31 = vadd.f32 %v8160_v13, %v196_v27  ;;  %v813_v22 = vld [vmem:[%s13718_s2 + $0xc8] sm:$0xff] }
 0x20c   :  { %v10799_v26 = vadd.f32 %v8160_v13, %v195_v23  ;;  %9120 = vmatprep.subr.mxu1 %v10624_v52  ;;  %v10821_v33 = vmul.f32 %v10335_v29, %v10727_v45  ;;  %v812_v29 = vld [vmem:[%s13718_s2 + $0xc0] sm:$0xff] }
 0x20d   :  { %9121 = vmatpush3.msra.mxu1 %v423_v24  ;;  %v197_v32 = vmul.f32 %v8159_v11, %v10803_v28 }
 0x20e   :  { %9084 = vmatmul.mubr.msk.f32.gmra.mxu1 %vm122_vm1, %v10799_v26  ;;  %9107 = vmatmul.mubr.msk.f32.gmra.mxu0 %vm122_vm1, %v10799_v26  ;;  %v198_v36 = vmul.f32 %v8159_v11, %v10821_v33  ;;  %v8173_v11 = vld [vmem:[%s13720_s3 + $0x5] ss:$0 sm:$0xff] }
 0x20f   :  { %9086 = vmatprep.mubr.msk.f32.mxu1 %vm10625_vm3, %v10624_v52  ;;  %9109 = vmatprep.mubr.msk.f32.mxu0 %vm10625_vm3, %v10624_v52  ;;  %v10835_v35 = vadd.f32 %v8160_v13, %v197_v32  ;;  %v811_v32 = vld [vmem:[%s13718_s2 + $0xb8] sm:$0xff] }
 0x210   :  { %9122 = vmatprep.subr.mxu1 %v10624_v52  ;;  %v10847_v37 = vadd.f32 %v8160_v13, %v198_v36  ;;  %v814_v13 = vld [vmem:[%s13718_s2 + $0xd0] sm:$0xff] }
 0x211   :  { %9123 = vmatpush3.msra.mxu1 %v422_v30 }
 0x212   :  { %9087 = vmatmul.mubr.msk.f32.gmra.mxu1 %vm122_vm1, %v10817_v31  ;;  %9110 = vmatmul.mubr.msk.f32.gmra.mxu0 %vm122_vm1, %v10817_v31 }
 0x213   :  { %9089 = vmatprep.mubr.msk.f32.mxu1 %vm10625_vm3, %v10624_v52  ;;  %9112 = vmatprep.mubr.msk.f32.mxu0 %vm10625_vm3, %v10624_v52 }
 0x214   :  { %9124 = vmatprep.subr.mxu1 %v10624_v52 }
 0x215   :  { %9125 = vmatpush3.msra.mxu1 %v421_v34 }
 0x216   :  { %9090 = vmatmul.mubr.msk.f32.gmra.mxu1 %vm122_vm1, %v10835_v35  ;;  %9113 = vmatmul.mubr.msk.f32.gmra.mxu0 %vm122_vm1, %v10835_v35 }
 0x217   :  { %9092 = vmatprep.mubr.msk.f32.mxu1 %vm10625_vm3, %v10624_v52  ;;  %9115 = vmatprep.mubr.msk.f32.mxu0 %vm10625_vm3, %v10624_v52 }
 0x218   :  { %9166 = vmatprep.subr.mxu1 %v10624_v52 }
 0x21a   :  { %9093 = vmatmul.mubr.msk.f32.gmra.mxu1 %vm122_vm1, %v10847_v37  ;;  %9116 = vmatmul.mubr.msk.f32.gmra.mxu0 %vm122_vm1, %v10847_v37 }
 0x21b   :  { %9126 = vmatprep.mubr.msk.f32.mxu1 %vm10625_vm3, %v10624_v52  ;;  %9151 = vmatprep.mubr.msk.f32.mxu0 %vm10625_vm3, %v10624_v52 }
 0x21e   :  { %9127 = vmatmul.mubr.msk.f32.vlgmr.msra.gmra.mxu1 %vm122_vm1, %v10779_v17 }
 0x21f   :  { %9129 = vmatprep.mubr.msk.f32.mxu1 %vm10625_vm3, %v10624_v52 }
 0x222   :  { %9130 = vmatmul.mubr.msk.f32.gmra.mxu1 %vm122_vm1, %v10799_v26 }
 0x223   :  { %9132 = vmatprep.mubr.msk.f32.mxu1 %vm10625_vm3, %v10624_v52 }
 0x226   :  { %9133 = vmatmul.mubr.msk.f32.gmra.mxu1 %vm122_vm1, %v10817_v31 }
 0x227   :  { %9135 = vmatprep.mubr.msk.f32.mxu1 %vm10625_vm3, %v10624_v52 }
 0x22a   :  { %9136 = vmatmul.mubr.msk.f32.gmra.mxu1 %vm122_vm1, %v10835_v35 }
 0x22b   :  { %9138 = vmatprep.mubr.msk.f32.mxu1 %vm10625_vm3, %v10624_v52 }
 0x22e   :  { %9139 = vmatmul.mubr.msk.f32.gmra.mxu1 %vm122_vm1, %v10847_v37 }
 0x22f   :  { %9176 = vmatprep.mubr.msk.f32.mxu1 %vm10625_vm3, %v10624_v52 }
 0x2c9   :  { %v298_v38 = vpop.f32.mrf.mxu1  ;;  %v397_v39 = vpop.f32.mrf.mxu0 }
 0x2ca   :  { %v398_v8 = vadd.f32 %v8167_v55, %v397_v39  ;;  %v10897_v10 = vadd.f32 %v8161_v7, %v298_v38 }
 0x2cb   :  { %v9082_v40 = vpop.f32.mrf.mxu1  ;;  %v9105_v41 = vpop.f32.mrf.mxu0 }
 0x2ce   :  { %v303_v42 = vpop.f32.mrf.mxu1  ;;  %v402_v43 = vpop.f32.mrf.mxu0 }
 0x2cf   :  { %v403_v4 = vadd.f32 %v8167_v55, %v402_v43  ;;  %v10909_v18 = vadd.f32 %v8161_v7, %v303_v42 }
 0x2d0   :  { %v9085_v44 = vpop.f32.mrf.mxu1  ;;  %v9108_v45 = vpop.f32.mrf.mxu0 }
 0x2d2   :  { %v308_v46 = vpop.f32.mrf.mxu1  ;;  %v407_v47 = vpop.f32.mrf.mxu0 }
 0x2d3   :  { %v408_v1 = vadd.f32 %v8167_v55, %v407_v47  ;;  %v10921_v25 = vadd.f32 %v8161_v7, %v308_v46 }
 0x2d4   :  { %v9088_v48 = vpop.f32.mrf.mxu1  ;;  %v9111_v49 = vpop.f32.mrf.mxu0 }
 0x2d6   :  { %v10878_v50 = vpop.f32.mrf.mxu1  ;;  %v412_v51 = vpop.f32.mrf.mxu0 }
 0x2d7   :  { %v413_v62 = vadd.f32 %v8167_v55, %v412_v51  ;;  %v10936_v30 = vadd.f32 %v8161_v7, %v10878_v50 }
 0x2d8   :  { %v9091_v53 = vpop.f32.mrf.mxu1  ;;  %v9114_v54 = vpop.f32.mrf.mxu0 }
 0x2da   :  { %v10883_v56 = vpop.f32.mrf.mxu1  ;;  %v417_v57 = vpop.f32.mrf.mxu0 }
 0x2db   :  { %v418_v58 = vadd.f32 %v8167_v55, %v417_v57  ;;  %v10948_v34 = vadd.f32 %v8161_v7, %v10883_v56 }
 0x2dc   :  { %v9094_v59 = vpop.f32.mrf.mxu1  ;;  %v9117_v60 = vpop.f32.mrf.mxu0 }
 0x2dd   :  { %9142 = vmatpush3.xpose.msk.msra.mxu0 %vm122_vm1, %v418_v58 }
 0x2de   :  { %v496_v61 = vpop.f32.mrf.mxu1  ;;  %9143 = vmatprep.subr.mxu0 %v10624_v52 }
 0x2df   :  { %v497_v27 = vadd.f32 %v8173_v11, %v496_v61 }
 0x2e0   :  { %v9128_v63 = vpop.f32.mrf.mxu1 }
 0x2e1   :  { %9144 = vmatpush3.xpose.msk.msra.mxu0 %vm122_vm1, %v413_v62 }
 0x2e2   :  { %v501_v0 = vpop.f32.mrf.mxu1  ;;  %9145 = vmatprep.subr.mxu0 %v10624_v52 }
 0x2e3   :  { %v502_v24 = vadd.f32 %v8173_v11, %v501_v0 }
 0x2e4   :  { %v9131_v2 = vpop.f32.mrf.mxu1 }
 0x2e5   :  { %9146 = vmatpush3.xpose.msk.msra.mxu0 %vm122_vm1, %v408_v1  ;;  %v8195_v2 = vld [vmem:[%s13720_s3 + $0x6] ss:$0 sm:$0xff] }
 0x2e6   :  { %v506_v3 = vpop.f32.mrf.mxu1  ;;  %9147 = vmatprep.subr.mxu0 %v10624_v52 }
 0x2e7   :  { %v507_v23 = vadd.f32 %v8173_v11, %v506_v3 }
 0x2e8   :  { %v9134_v5 = vpop.f32.mrf.mxu1 }
 0x2e9   :  { %9148 = vmatpush3.xpose.msk.msra.mxu0 %vm122_vm1, %v403_v4 }
 0x2ea   :  { %v511_v6 = vpop.f32.mrf.mxu1  ;;  %9149 = vmatprep.subr.mxu0 %v10624_v52 }
 0x2eb   :  { %v512_v16 = vadd.f32 %v8173_v11, %v511_v6 }
 0x2ec   :  { %v9137_v9 = vpop.f32.mrf.mxu1 }
 0x2ed   :  { %9150 = vmatpush3.xpose.msk.msra.mxu0 %vm122_vm1, %v398_v8 }
 0x2ee   :  { %v516_v12 = vpop.f32.mrf.mxu1  ;;  %9191 = vmatprep.subr.mxu0 %v10624_v52 }
 0x2ef   :  { %v517_v14 = vadd.f32 %v8173_v11, %v516_v12 }
 0x2f0   :  { %v9140_v15 = vpop.f32.mrf.mxu1  ;;  %9152 = vmatmul.mubr.msk.f32.vlgmr.msra.gmra.mxu0 %vm122_vm1, %v10897_v10 }
 0x2f1   :  { %9167 = vmatpush3.msk.msra.mxu1 %vm692_vm4, %v517_v14  ;;  %9192 = vmatpush3.msra.mxu0 %v814_v13 }
 0x2f2   :  { %9168 = vmatprep.subr.mxu1 %v10624_v52  ;;  %9154 = vmatprep.mubr.msk.f32.mxu0 %vm10625_vm3, %v10624_v52 }
 0x2f3   :  { %9169 = vmatpush3.msra.mxu1 %v512_v16  ;;  %9193 = vmatprep.subr.mxu0 %v10624_v52 }
 0x2f4   :  { %9155 = vmatmul.mubr.msk.f32.gmra.mxu0 %vm122_vm1, %v10909_v18  ;;  %9170 = vmatprep.subr.mxu1 %v10624_v52 }
 0x2f5   :  { %9171 = vmatpush3.msra.mxu1 %v507_v23  ;;  %9194 = vmatpush3.msra.mxu0 %v813_v22 }
 0x2f6   :  { %9172 = vmatprep.subr.mxu1 %v10624_v52  ;;  %9157 = vmatprep.mubr.msk.f32.mxu0 %vm10625_vm3, %v10624_v52 }
 0x2f7   :  { %9173 = vmatpush3.msra.mxu1 %v502_v24  ;;  %9195 = vmatprep.subr.mxu0 %v10624_v52 }
 0x2f8   :  { %9158 = vmatmul.mubr.msk.f32.gmra.mxu0 %vm122_vm1, %v10921_v25  ;;  %9174 = vmatprep.subr.mxu1 %v10624_v52 }
 0x2f9   :  { %9175 = vmatpush3.msra.mxu1 %v497_v27  ;;  %9160 = vmatprep.mubr.msk.f32.mxu0 %vm10625_vm3, %v10624_v52 }
 0x2fa   :  { %9196 = vmatpush3.msra.mxu0 %v812_v29  ;;  %9214 = vmatprep.subr.mxu1 %v10624_v52 }
 0x2fb   :  { %9197 = vmatprep.subr.mxu0 %v10624_v52 }
 0x2fc   :  { %9161 = vmatmul.mubr.msk.f32.gmra.mxu0 %vm122_vm1, %v10936_v30 }
 0x2fd   :  { %9163 = vmatprep.mubr.msk.f32.mxu0 %vm10625_vm3, %v10624_v52  ;;  %9198 = vmatpush3.msra.mxu0 %v811_v32 }
 0x2fe   :  { %9237 = vmatprep.subr.mxu0 %v10624_v52 }
 0x300   :  { %9164 = vmatmul.mubr.msk.f32.gmra.mxu0 %vm122_vm1, %v10948_v34 }
 0x301   :  { %9199 = vmatprep.mubr.msk.f32.mxu0 %vm10625_vm3, %v10624_v52 }
 0x304   :  { %9200 = vmatmul.mubr.msk.f32.vlgmr.msra.gmra.mxu0 %vm122_vm1, %v10779_v17 }
 0x305   :  { %9202 = vmatprep.mubr.msk.f32.mxu0 %vm10625_vm3, %v10624_v52 }
 0x308   :  { %9203 = vmatmul.mubr.msk.f32.gmra.mxu0 %vm122_vm1, %v10799_v26 }
 0x309   :  { %9205 = vmatprep.mubr.msk.f32.mxu0 %vm10625_vm3, %v10624_v52 }
 0x30c   :  { %9206 = vmatmul.mubr.msk.f32.gmra.mxu0 %vm122_vm1, %v10817_v31 }
 0x30d   :  { %9208 = vmatprep.mubr.msk.f32.mxu0 %vm10625_vm3, %v10624_v52 }
 0x310   :  { %9209 = vmatmul.mubr.msk.f32.gmra.mxu0 %vm122_vm1, %v10835_v35 }
 0x311   :  { %9211 = vmatprep.mubr.msk.f32.mxu0 %vm10625_vm3, %v10624_v52 }
 0x314   :  { %9212 = vmatmul.mubr.msk.f32.gmra.mxu0 %vm122_vm1, %v10847_v37 }
 0x315   :  { %9247 = vmatprep.mubr.msk.f32.mxu0 %vm10625_vm3, %v10624_v52 }
 0x3b0   :  { %v616_v36 = vpop.f32.mrf.mxu0 }
 0x3b1   :  { %v10975_v38 = vmul.f32 0.25, %v616_v36  ;;  %v912_v36 = vld [vmem:[%s13718_s2 + $0xe8] sm:$0xff] }
 0x3b2   :  { %v9153_v39 = vpop.f32.mrf.mxu0 }
 0x3b3   :  { %v646_v40 = vsel %vm645_vm5, %v10975_v38, -inf }
 0x3b4   :  { %647 = vmax.xlane.f32.xlu0 %v646_v40  ;;  %v621_v41 = vpop.f32.mrf.mxu0  ;;  %v910_v40 = vld [vmem:[%s13718_s2 + $0xd8] sm:$0xff] }
 0x3b5   :  { %v641_v42 = vmul.f32 0.25, %v621_v41 }
 0x3b6   :  { %v9156_v43 = vpop.f32.mrf.mxu0 }
 0x3b7   :  { %v649_v44 = vsel %vm645_vm5, %v641_v42, -inf }
 0x3b8   :  { %650 = vmax.xlane.f32.xlu1 %v649_v44  ;;  %v626_v45 = vpop.f32.mrf.mxu0 }
 0x3b9   :  { %v642_v46 = vmul.f32 0.25, %v626_v45 }
 0x3ba   :  { %v9159_v47 = vpop.f32.mrf.mxu0 }
 0x3bb   :  { %v652_v48 = vsel %vm645_vm5, %v642_v46, -inf }
 0x3bc   :  { %653 = vmax.xlane.f32.xlu0 %v652_v48  ;;  %v631_v49 = vpop.f32.mrf.mxu0 }
 0x3bd   :  { %v643_v50 = vmul.f32 0.25, %v631_v49 }
 0x3be   :  { %v9162_v51 = vpop.f32.mrf.mxu0 }
 0x3bf   :  { %v655_v53 = vsel %vm645_vm5, %v643_v50, -inf }
 0x3c0   :  { %656 = vmax.xlane.f32.xlu1 %v655_v53  ;;  %v636_v54 = vpop.f32.mrf.mxu0 }
 0x3c1   :  { %v644_v55 = vmul.f32 0.25, %v636_v54 }
 0x3c2   :  { %v9165_v56 = vpop.f32.mrf.mxu0 }
 0x3c3   :  { %v659_v57 = vsel %vm658_vm6, %v644_v55, -inf }
 0x3c4   :  { %660 = vmax.xlane.f32.xlu0 %v659_v57  ;;  %v886_v58 = vpop.f32.mrf.mxu0 }
 0x3c5   :  { %v887_v9 = vadd.f32 %v8195_v2, %v886_v58 }
 0x3c6   :  { %v9201_v59 = vpop.f32.mrf.mxu0 }
 0x3c8   :  { %v891_v60 = vpop.f32.mrf.mxu0 }
 0x3c9   :  { %v892_v8 = vadd.f32 %v8195_v2, %v891_v60 }
 0x3ca   :  { %v9204_v61 = vpop.f32.mrf.mxu0 }
 0x3cc   :  { %v896_v62 = vpop.f32.mrf.mxu0 }
 0x3cd   :  { %v897_v7 = vadd.f32 %v8195_v2, %v896_v62 }
 0x3ce   :  { %v9207_v63 = vpop.f32.mrf.mxu0 }
 0x3d0   :  { %v901_v0 = vpop.f32.mrf.mxu0 }
 0x3d1   :  { %v902_v6 = vadd.f32 %v8195_v2, %v901_v0 }
 0x3d2   :  { %v9210_v1 = vpop.f32.mrf.mxu0 }
 0x3d4   :  { %v906_v3 = vpop.f32.mrf.mxu0 }
 0x3d5   :  { %v907_v4 = vadd.f32 %v8195_v2, %v906_v3 }
 0x3d6   :  { %v9213_v5 = vpop.f32.mrf.mxu0 }
 0x3d7   :  { %9238 = vmatpush3.xpose.msk.msra.mxu0 %vm122_vm1, %v907_v4 }
 0x3d8   :  { %9239 = vmatprep.subr.mxu0 %v10624_v52 }
 0x3db   :  { %9240 = vmatpush3.xpose.msk.msra.mxu0 %vm122_vm1, %v902_v6 }
 0x3dc   :  { %9241 = vmatprep.subr.mxu0 %v10624_v52 }
 0x3df   :  { %9242 = vmatpush3.xpose.msk.msra.mxu0 %vm122_vm1, %v897_v7 }
 0x3e0   :  { %9243 = vmatprep.subr.mxu0 %v10624_v52 }
 0x3e3   :  { %9244 = vmatpush3.xpose.msk.msra.mxu0 %vm122_vm1, %v892_v8 }
 0x3e4   :  { %9245 = vmatprep.subr.mxu0 %v10624_v52 }
 0x3e7   :  { %9246 = vmatpush3.xpose.msk.msra.mxu0 %vm122_vm1, %v887_v9 }
 0x3e8   :  { %9287 = vmatprep.subr.mxu0 %v10624_v52 }
 0x3ea   :  { %9248 = vmatmul.mubr.msk.f32.vlgmr.msra.gmra.mxu0 %vm122_vm1, %v10897_v10 }
 0x3eb   :  { %9250 = vmatprep.mubr.msk.f32.mxu0 %vm10625_vm3, %v10624_v52 }
 0x3ee   :  { %9251 = vmatmul.mubr.msk.f32.gmra.mxu0 %vm122_vm1, %v10909_v18 }
 0x3ef   :  { %9253 = vmatprep.mubr.msk.f32.mxu0 %vm10625_vm3, %v10624_v52 }
 0x3f2   :  { %9254 = vmatmul.mubr.msk.f32.gmra.mxu0 %vm122_vm1, %v10921_v25 }
 0x3f3   :  { %9256 = vmatprep.mubr.msk.f32.mxu0 %vm10625_vm3, %v10624_v52 }
 0x3f6   :  { %9257 = vmatmul.mubr.msk.f32.gmra.mxu0 %vm122_vm1, %v10936_v30  ;;  %v913_v30 = vld [vmem:[%s13718_s2 + $0xf0] sm:$0xff] }
 0x3f7   :  { %9259 = vmatprep.mubr.msk.f32.mxu0 %vm10625_vm3, %v10624_v52 }
 0x3fa   :  { %9260 = vmatmul.mubr.msk.f32.gmra.mxu0 %vm122_vm1, %v10948_v34 }
 0x3fb   :  { %9295 = vmatprep.mubr.msk.f32.mxu0 %vm10625_vm3, %v10624_v52 }
 0x43d   :  { %v648_v10 = vpop.xlane.xlu0 %647 }
 0x43e   :  { %v662_v11 = vsub.f32 %v10975_v38, %v648_v10  ;;  %v911_v38 = vld [vmem:[%s13718_s2 + $0xe0] sm:$0xff] }
 0x440   :  { %v667_v12 = vmul.f32 1.442695, %v662_v11 }
 0x441   :  { %v651_v13 = vpop.xlane.xlu1 %650 }
 0x442   :  { %10336 = vpow2.f32 %v667_v12  ;;  %v663_v14 = vsub.f32 %v641_v42, %v651_v13 }
 0x444   :  { %v669_v15 = vmul.f32 1.442695, %v663_v14 }
 0x445   :  { %v654_v16 = vpop.xlane.xlu0 %653 }
 0x446   :  { %10338 = vpow2.f32 %v669_v15  ;;  %v664_v18 = vsub.f32 %v642_v46, %v654_v16 }
 0x448   :  { %v671_v22 = vmul.f32 1.442695, %v664_v18 }
 0x449   :  { %v657_v23 = vpop.xlane.xlu1 %656 }
 0x44a   :  { %10340 = vpow2.f32 %v671_v22  ;;  %v665_v24 = vsub.f32 %v643_v50, %v657_v23  ;;  %v8201_v23 = vld [vmem:[%s13720_s3 + $0x7] ss:$0 sm:$0xff] }
 0x44c   :  { %v673_v25 = vmul.f32 1.442695, %v665_v24 }
 0x44d   :  { %v661_v27 = vpop.xlane.xlu0 %660 }
 0x44e   :  { %10342 = vpow2.f32 %v673_v25  ;;  %v666_v29 = vsub.f32 %v644_v55, %v661_v27 }
 0x44f   :  { %v10337_v32 = vpop.eup %10336 }
 0x450   :  { %v675_v34 = vmul.f32 1.442695, %v666_v29  ;;  %9177 = vmatmul.mubr.msk.f32.vlgmr.msra.gmra.mxu1 %vm645_vm5, %v10337_v32  ;;  %v786_v59 = vsel %vm645_vm5, %v10337_v32, 0.0 }
 0x451   :  { %9179 = vmatprep.mubr.msk.f32.mxu1 %vm10625_vm3, %v10624_v52  ;;  %9215 = vmatpush3.msra.mxu1 %v913_v30 }
 0x452   :  { %10344 = vpow2.f32 %v675_v34  ;;  %9216 = vmatprep.subr.mxu1 %v10624_v52 }
 0x453   :  { %v10339_v39 = vpop.eup %10338  ;;  %9217 = vmatpush3.msra.mxu1 %v912_v36 }
 0x454   :  { %9180 = vmatmul.mubr.msk.f32.gmra.mxu1 %vm645_vm5, %v10339_v39  ;;  %9218 = vmatprep.subr.mxu1 %v10624_v52  ;;  %v789_v61 = vsel %vm645_vm5, %v10339_v39, 0.0 }
 0x455   :  { %9182 = vmatprep.mubr.msk.f32.mxu1 %vm10625_vm3, %v10624_v52  ;;  %9219 = vmatpush3.msra.mxu1 %v911_v38 }
 0x456   :  { %9220 = vmatprep.subr.mxu1 %v10624_v52 }
 0x457   :  { %v10341_v41 = vpop.eup %10340  ;;  %9221 = vmatpush3.msra.mxu1 %v910_v40 }
 0x458   :  { %9183 = vmatmul.mubr.msk.f32.gmra.mxu1 %vm645_vm5, %v10341_v41  ;;  %9262 = vmatprep.subr.mxu1 %v10624_v52  ;;  %v792_v62 = vsel %vm645_vm5, %v10341_v41, 0.0 }
 0x459   :  { %9185 = vmatprep.mubr.msk.f32.mxu1 %vm10625_vm3, %v10624_v52 }
 0x45b   :  { %v10343_v42 = vpop.eup %10342 }
 0x45c   :  { %9186 = vmatmul.mubr.msk.f32.gmra.mxu1 %vm645_vm5, %v10343_v42  ;;  %v795_v63 = vsel %vm645_vm5, %v10343_v42, 0.0 }
 0x45d   :  { %9188 = vmatprep.mubr.msk.f32.mxu1 %vm10625_vm3, %v10624_v52 }
 0x45f   :  { %v10345_v43 = vpop.eup %10344 }
 0x460   :  { %9189 = vmatmul.mubr.msk.f32.gmra.mxu1 %vm645_vm5, %v10345_v43  ;;  %v798_v0 = vsel %vm658_vm6, %v10345_v43, 0.0 }
 0x461   :  { %9222 = vmatprep.mubr.msk.f32.mxu1 %vm10625_vm3, %v10624_v52 }
 0x464   :  { %9223 = vmatmul.mubr.msk.f32.vlgmr.msra.gmra.mxu1 %vm122_vm1, %v10779_v17 }
 0x465   :  { %9225 = vmatprep.mubr.msk.f32.mxu1 %vm10625_vm3, %v10624_v52 }
 0x468   :  { %9226 = vmatmul.mubr.msk.f32.gmra.mxu1 %vm122_vm1, %v10799_v26 }
 0x469   :  { %9228 = vmatprep.mubr.msk.f32.mxu1 %vm10625_vm3, %v10624_v52 }
 0x46c   :  { %9229 = vmatmul.mubr.msk.f32.gmra.mxu1 %vm122_vm1, %v10817_v31 }
 0x46d   :  { %9231 = vmatprep.mubr.msk.f32.mxu1 %vm10625_vm3, %v10624_v52 }
 0x470   :  { %9232 = vmatmul.mubr.msk.f32.gmra.mxu1 %vm122_vm1, %v10835_v35 }
 0x471   :  { %9234 = vmatprep.mubr.msk.f32.mxu1 %vm10625_vm3, %v10624_v52 }
 0x474   :  { %9235 = vmatmul.mubr.msk.f32.gmra.mxu1 %vm122_vm1, %v10847_v37 }
 0x475   :  { %9272 = vmatprep.mubr.msk.f32.mxu1 %vm10625_vm3, %v10624_v52 }
 0x4aa   :  { %v1090_v17 = vpop.f32.mrf.mxu0 }
 0x4ab   :  { %v11068_v26 = vmul.f32 0.25, %v1090_v17 }
 0x4ac   :  { %v9249_v44 = vpop.f32.mrf.mxu0 }
 0x4ad   :  { %v1119_v31 = vsel %vm645_vm5, %v11068_v26, -inf }
 0x4ae   :  { %1120 = vmax.xlane.f32.xlu1 %v1119_v31  ;;  %v1095_v45 = vpop.f32.mrf.mxu0 }
 0x4af   :  { %v11072_v46 = vmul.f32 0.25, %v1095_v45 }
 0x4b0   :  { %v9252_v35 = vpop.f32.mrf.mxu0 }
 0x4b1   :  { %v1122_v47 = vsel %vm645_vm5, %v11072_v46, -inf }
 0x4b2   :  { %1123 = vmax.xlane.f32.xlu0 %v1122_v47  ;;  %v1100_v37 = vpop.f32.mrf.mxu0 }
 0x4b3   :  { %v11076_v48 = vmul.f32 0.25, %v1100_v37 }
 0x4b4   :  { %v9255_v49 = vpop.f32.mrf.mxu0 }
 0x4b5   :  { %v1125_v50 = vsel %vm645_vm5, %v11076_v48, -inf }
 0x4b6   :  { %1126 = vmax.xlane.f32.xlu1 %v1125_v50  ;;  %v1105_v51 = vpop.f32.mrf.mxu0 }
 0x4b7   :  { %v11080_v53 = vmul.f32 0.25, %v1105_v51 }
 0x4b8   :  { %v9258_v54 = vpop.f32.mrf.mxu0 }
 0x4b9   :  { %v1128_v55 = vsel %vm645_vm5, %v11080_v53, -inf }
 0x4ba   :  { %1129 = vmax.xlane.f32.xlu0 %v1128_v55  ;;  %v1110_v56 = vpop.f32.mrf.mxu0 }
 0x4bb   :  { %v11084_v57 = vmul.f32 0.25, %v1110_v56 }
 0x4bc   :  { %v9261_v58 = vpop.f32.mrf.mxu0 }
 0x4bd   :  { %v1131_v60 = vsel %vm658_vm6, %v11084_v57, -inf  ;;  %v1290_v58 = vld [vmem:[%s13718_s2 + $0x110] sm:$0xff] }
 0x4be   :  { %787 = vadd.xlane.f32.xlu0 %v786_v59  ;;  %1132 = vmax.xlane.f32.xlu1 %v1131_v60  ;;  %v1289_v59 = vld [vmem:[%s13718_s2 + $0x108] sm:$0xff]  ;;  %v1288_v60 = vld [vmem:[%s13718_s2 + $0x100] sm:$0xff] }
 0x4bf   :  { %9288 = vmatpush3.msra.mxu0 %v1290_v58 }
 0x4c0   :  { %9289 = vmatprep.subr.mxu0 %v10624_v52 }
 0x4c1   :  { %9290 = vmatpush3.msra.mxu0 %v1289_v59 }
 0x4c2   :  { %790 = vadd.xlane.f32.xlu0 %v789_v61  ;;  %9291 = vmatprep.subr.mxu0 %v10624_v52  ;;  %v1287_v61 = vld [vmem:[%s13718_s2 + $0xf8] sm:$0xff] }
 0x4c3   :  { %9292 = vmatpush3.msra.mxu0 %v1288_v60  ;;  %v10608_v60 = vld [vmem:[%s13718_s2 + $0x40] sm:$0xff] }
 0x4c4   :  { %9293 = vmatprep.subr.mxu0 %v10624_v52 }
 0x4c5   :  { %9294 = vmatpush3.msra.mxu0 %v1287_v61 }
 0x4c6   :  { %793 = vadd.xlane.f32.xlu0 %v792_v62  ;;  %9333 = vmatprep.subr.mxu0 %v10624_v52 }
 0x4ca   :  { %796 = vadd.xlane.f32.xlu0 %v795_v63 }
 0x4ce   :  { %799 = vadd.xlane.f32.xlu0 %v798_v0 }
 0x510   :  { %v11093_v1 = vpop.f32.mrf.mxu1 }
 0x512   :  { %v9178_v2 = vpop.f32.mrf.mxu1 }
 0x514   :  { %v11095_v3 = vpop.f32.mrf.mxu1 }
 0x516   :  { %v9181_v4 = vpop.f32.mrf.mxu1 }
 0x518   :  { %v11097_v5 = vpop.f32.mrf.mxu1 }
 0x51a   :  { %v9184_v6 = vpop.f32.mrf.mxu1 }
 0x51c   :  { %v11099_v7 = vpop.f32.mrf.mxu1 }
 0x51e   :  { %v9187_v8 = vpop.f32.mrf.mxu1 }
 0x520   :  { %v11101_v9 = vpop.f32.mrf.mxu1 }
 0x522   :  { %v9190_v10 = vpop.f32.mrf.mxu1 }
 0x524   :  { %v985_v11 = vpop.f32.mrf.mxu1 }
 0x525   :  { %v986_v41 = vadd.f32 %v8201_v23, %v985_v11 }
 0x526   :  { %v9224_v12 = vpop.f32.mrf.mxu1 }
 0x528   :  { %v990_v13 = vpop.f32.mrf.mxu1 }
 0x529   :  { %v991_v38 = vadd.f32 %v8201_v23, %v990_v13 }
 0x52a   :  { %v9227_v14 = vpop.f32.mrf.mxu1 }
 0x52c   :  { %v995_v15 = vpop.f32.mrf.mxu1 }
 0x52d   :  { %v996_v34 = vadd.f32 %v8201_v23, %v995_v15 }
 0x52e   :  { %v9230_v16 = vpop.f32.mrf.mxu1 }
 0x530   :  { %v1000_v18 = vpop.f32.mrf.mxu1 }
 0x531   :  { %v1001_v29 = vadd.f32 %v8201_v23, %v1000_v18 }
 0x532   :  { %v9233_v22 = vpop.f32.mrf.mxu1 }
 0x534   :  { %v1005_v24 = vpop.f32.mrf.mxu1 }
 0x535   :  { %v1006_v25 = vadd.f32 %v8201_v23, %v1005_v24 }
 0x536   :  { %v9236_v27 = vpop.f32.mrf.mxu1 }
 0x537   :  { %v1121_v30 = vpop.xlane.xlu1 %1120  ;;  %9263 = vmatpush3.msk.msra.mxu1 %vm692_vm4, %v1006_v25 }
 0x538   :  { %v1134_v32 = vsub.f32 %v11068_v26, %v1121_v30  ;;  %9264 = vmatprep.subr.mxu1 %v10624_v52 }
 0x539   :  { %9265 = vmatpush3.msra.mxu1 %v1001_v29 }
 0x53a   :  { %v1139_v36 = vmul.f32 1.442695, %v1134_v32  ;;  %9266 = vmatprep.subr.mxu1 %v10624_v52 }
 0x53b   :  { %v1124_v39 = vpop.xlane.xlu0 %1123  ;;  %9267 = vmatpush3.msra.mxu1 %v996_v34 }
 0x53c   :  { %10346 = vpow2.f32 %v1139_v36  ;;  %v1135_v40 = vsub.f32 %v11072_v46, %v1124_v39  ;;  %9268 = vmatprep.subr.mxu1 %v10624_v52 }
 0x53d   :  { %9269 = vmatpush3.msra.mxu1 %v991_v38 }
 0x53e   :  { %v1141_v42 = vmul.f32 1.442695, %v1135_v40  ;;  %9270 = vmatprep.subr.mxu1 %v10624_v52 }
 0x53f   :  { %v1127_v43 = vpop.xlane.xlu1 %1126  ;;  %9271 = vmatpush3.msra.mxu1 %v986_v41 }
 0x540   :  { %10348 = vpow2.f32 %v1141_v42  ;;  %v1136_v17 = vsub.f32 %v11076_v48, %v1127_v43  ;;  %9310 = vmatprep.subr.mxu1 %v10624_v52 }
 0x542   :  { %v1143_v26 = vmul.f32 1.442695, %v1136_v17 }
 0x543   :  { %v1130_v44 = vpop.xlane.xlu0 %1129 }
 0x544   :  { %10350 = vpow2.f32 %v1143_v26  ;;  %v1137_v31 = vsub.f32 %v11080_v53, %v1130_v44 }
 0x546   :  { %v1145_v45 = vmul.f32 1.442695, %v1137_v31 }
 0x547   :  { %v1133_v46 = vpop.xlane.xlu1 %1132  ;;  %v788_v62 = vpop.xlane.xlu0 %787 }
 0x548   :  { %10352 = vpow2.f32 %v1145_v45  ;;  %v1138_v35 = vsub.f32 %v11084_v57, %v1133_v46 }
 0x549   :  { %v10347_v47 = vpop.eup %10346 }
 0x54a   :  { %v1147_v37 = vmul.f32 1.442695, %v1138_v35  ;;  %9273 = vmatmul.mubr.msk.f32.vlgmr.msra.gmra.mxu1 %vm645_vm5, %v10347_v47  ;;  %v1257_v49 = vsel %vm645_vm5, %v10347_v47, 0.0 }
 0x54b   :  { %1258 = vadd.xlane.f32.xlu1 %v1257_v49  ;;  %9275 = vmatprep.mubr.msk.f32.mxu1 %vm10625_vm3, %v10624_v52  ;;  %v791_v0 = vpop.xlane.xlu0 %790 }
 0x54c   :  { %10354 = vpow2.f32 %v1147_v37 }
 0x54d   :  { %v10349_v48 = vpop.eup %10348  ;;  %10356 = vrcp.f32 %v788_v62 }
 0x54e   :  { %9276 = vmatmul.mubr.msk.f32.gmra.mxu1 %vm645_vm5, %v10349_v48  ;;  %v1260_v50 = vsel %vm645_vm5, %v10349_v48, 0.0 }
 0x54f   :  { %1261 = vadd.xlane.f32.xlu1 %v1260_v50  ;;  %9278 = vmatprep.mubr.msk.f32.mxu1 %vm10625_vm3, %v10624_v52  ;;  %v794_v4 = vpop.xlane.xlu0 %793  ;;  %v8228_v50 = vld [vmem:[%s13720_s3 + $0x8] ss:$0 sm:$0xff] }
 0x551   :  { %v10351_v51 = vpop.eup %10350 }
 0x552   :  { %9279 = vmatmul.mubr.msk.f32.gmra.mxu1 %vm645_vm5, %v10351_v51  ;;  %v1263_v53 = vsel %vm645_vm5, %v10351_v51, 0.0 }
 0x553   :  { %1264 = vadd.xlane.f32.xlu1 %v1263_v53  ;;  %9281 = vmatprep.mubr.msk.f32.mxu1 %vm10625_vm3, %v10624_v52  ;;  %v797_v8 = vpop.xlane.xlu0 %796 }
 0x555   :  { %v10353_v54 = vpop.eup %10352 }
 0x556   :  { %9282 = vmatmul.mubr.msk.f32.gmra.mxu1 %vm645_vm5, %v10353_v54  ;;  %v1266_v55 = vsel %vm645_vm5, %v10353_v54, 0.0 }
 0x557   :  { %1267 = vadd.xlane.f32.xlu1 %v1266_v55  ;;  %9284 = vmatprep.mubr.msk.f32.mxu1 %vm10625_vm3, %v10624_v52  ;;  %v800_v12 = vpop.xlane.xlu0 %799 }
 0x559   :  { %v10355_v56 = vpop.eup %10354 }
 0x55a   :  { %9285 = vmatmul.mubr.msk.f32.gmra.mxu1 %vm645_vm5, %v10355_v56  ;;  %v1269_v57 = vsel %vm658_vm6, %v10355_v56, 0.0  ;;  %v10357_v11 = vpop.eup %10356 }
 0x55b   :  { %1270 = vadd.xlane.f32.xlu1 %v1269_v57  ;;  %9318 = vmatprep.mubr.msk.f32.mxu1 %vm10625_vm3, %v10624_v52  ;;  %v806_v16 = vmul.f32 %v10357_v11, %v11093_v1  ;;  %v10610_v11 = vld [vmem:[%s13718_s2 + $0x50] sm:$0x7] }
 0x5d4   :  { %v1259_v63 = vpop.xlane.xlu1 %1258 }
 0x5d5   :  { %10358 = vrcp.f32 %v1259_v63 }
 0x5d6   :  { %10360 = vrcp.f32 %v791_v0  ;;  %v10609_v0 = vld [vmem:[%s13718_s2 + $0x48] sm:$0xff] }
 0x5d8   :  { %v1262_v2 = vpop.xlane.xlu1 %1261 }
 0x5d9   :  { %10362 = vrcp.f32 %v1262_v2 }
 0x5da   :  { %10364 = vrcp.f32 %v794_v4 }
 0x5dc   :  { %v1265_v6 = vpop.xlane.xlu1 %1264 }
 0x5dd   :  { %10366 = vrcp.f32 %v1265_v6 }
 0x5de   :  { %10368 = vrcp.f32 %v797_v8 }
 0x5e0   :  { %v1268_v10 = vpop.xlane.xlu1 %1267 }
 0x5e1   :  { %10370 = vrcp.f32 %v1268_v10 }
 0x5e2   :  { %v10359_v13 = vpop.eup %10358  ;;  %10372 = vrcp.f32 %v800_v12 }
 0x5e3   :  { %v10361_v22 = vpop.eup %10360 }
 0x5e4   :  { %v1271_v14 = vpop.xlane.xlu1 %1270  ;;  %v807_v29 = vmul.f32 %v10361_v22, %v11095_v3 }
 0x5e5   :  { %10374 = vrcp.f32 %v1271_v14 }
 0x5e6   :  { %v10363_v25 = vpop.eup %10362 }
 0x5e7   :  { %v10365_v32 = vpop.eup %10364 }
 0x5e8   :  { %v808_v39 = vmul.f32 %v10365_v32, %v11097_v5 }
 0x5ea   :  { %v10367_v38 = vpop.eup %10366 }
 0x5eb   :  { %v10369_v41 = vpop.eup %10368 }
 0x5ec   :  { %v809_v26 = vmul.f32 %v10369_v41, %v11099_v7 }
 0x5ee   :  { %v10371_v43 = vpop.eup %10370 }
 0x5ef   :  { %v10373_v31 = vpop.eup %10372 }
 0x5f0   :  { %v810_v47 = vmul.f32 %v10373_v31, %v11101_v9 }
 0x5f2   :  { %v10375_v46 = vpop.eup %10374 }
 0x60a   :  { %v1233_v15 = vpop.f32.mrf.mxu1 }
 0x60b   :  { %v1277_v18 = vmul.f32 %v10359_v13, %v1233_v15 }
 0x60c   :  { %v9274_v23 = vpop.f32.mrf.mxu1 }
 0x60d   :  { %v1282_v24 = vadd.f32 %v1277_v18, %v806_v16 }
 0x60e   :  { %v1238_v27 = vpop.f32.mrf.mxu1 }
 0x60f   :  { %v1278_v30 = vmul.f32 %v10363_v25, %v1238_v27  ;;  %9296 = vmatmul.mubr.msk.f32.vlgmr.msra.gmra.mxu0 %vm122_vm1, %v1282_v24 }
 0x610   :  { %v9277_v34 = vpop.f32.mrf.mxu1  ;;  %9298 = vmatprep.mubr.msk.f32.mxu0 %vm10625_vm3, %v10624_v52 }
 0x611   :  { %v1283_v36 = vadd.f32 %v1278_v30, %v807_v29 }
 0x612   :  { %v1243_v1 = vpop.f32.mrf.mxu1 }
 0x613   :  { %v1279_v40 = vmul.f32 %v10367_v38, %v1243_v1  ;;  %9299 = vmatmul.mubr.msk.f32.gmra.mxu0 %vm122_vm1, %v1283_v36 }
 0x614   :  { %v9280_v42 = vpop.f32.mrf.mxu1  ;;  %9301 = vmatprep.mubr.msk.f32.mxu0 %vm10625_vm3, %v10624_v52 }
 0x615   :  { %v1284_v3 = vadd.f32 %v1279_v40, %v808_v39 }
 0x616   :  { %v1248_v17 = vpop.f32.mrf.mxu1 }
 0x617   :  { %v1280_v44 = vmul.f32 %v10371_v43, %v1248_v17  ;;  %9302 = vmatmul.mubr.msk.f32.gmra.mxu0 %vm122_vm1, %v1284_v3 }
 0x618   :  { %v9283_v45 = vpop.f32.mrf.mxu1  ;;  %9304 = vmatprep.mubr.msk.f32.mxu0 %vm10625_vm3, %v10624_v52 }
 0x619   :  { %v1285_v5 = vadd.f32 %v1280_v44, %v809_v26 }
 0x61a   :  { %v1253_v35 = vpop.f32.mrf.mxu1 }
 0x61b   :  { %v1281_v37 = vmul.f32 %v10375_v46, %v1253_v35  ;;  %9305 = vmatmul.mubr.msk.f32.gmra.mxu0 %vm122_vm1, %v1285_v5  ;;  %v1499_v46 = vld [vmem:[%s13718_s2 + $0x130] sm:$0xff]  ;;  %v1498_v35 = vld [vmem:[%s13718_s2 + $0x128] sm:$0xff] }
 0x61c   :  { %v9286_v49 = vpop.f32.mrf.mxu1  ;;  %9307 = vmatprep.mubr.msk.f32.mxu0 %vm10625_vm3, %v10624_v52  ;;  %9311 = vmatpush3.msra.mxu1 %v1499_v46 }
 0x61d   :  { %v1286_v7 = vadd.f32 %v1281_v37, %v810_v47  ;;  %9312 = vmatprep.subr.mxu1 %v10624_v52  ;;  %v1497_v47 = vld [vmem:[%s13718_s2 + $0x120] sm:$0xff]  ;;  %v1496_v37 = vld [vmem:[%s13718_s2 + $0x118] sm:$0xff]  ;;  %v1622_v49 = vld [vmem:[%s13718_s2 + $0x170] sm:$0xff] }
 0x61e   :  { %9313 = vmatpush3.msra.mxu1 %v1498_v35  ;;  %9334 = vmatpush3.msra.mxu0 %v1622_v49 }
 0x61f   :  { %9308 = vmatmul.mubr.msk.f32.gmra.mxu0 %vm122_vm1, %v1286_v7  ;;  %9314 = vmatprep.subr.mxu1 %v10624_v52  ;;  %v1621_v7 = vld [vmem:[%s13718_s2 + $0x168] sm:$0xff] }
 0x620   :  { %9349 = vmatprep.mubr.msk.f32.mxu0 %vm10625_vm3, %v10624_v52  ;;  %9315 = vmatpush3.msra.mxu1 %v1497_v47 }
 0x621   :  { %9316 = vmatprep.subr.mxu1 %v10624_v52  ;;  %9335 = vmatprep.subr.mxu0 %v10624_v52 }
 0x622   :  { %9317 = vmatpush3.msra.mxu1 %v1496_v37  ;;  %9336 = vmatpush3.msra.mxu0 %v1621_v7 }
 0x623   :  { %9364 = vmatprep.subr.mxu1 %v10624_v52  ;;  %9337 = vmatprep.subr.mxu0 %v10624_v52 }
 0x6cf   :  { %v1372_v48 = vpop.f32.mrf.mxu0 }
 0x6d0   :  { %v1396_v9 = vadd.f32 %v1372_v48, %v10695_v19  ;;  %v1620_v48 = vld [vmem:[%s13718_s2 + $0x160] sm:$0xff] }
 0x6d1   :  { %v9297_v51 = vpop.f32.mrf.mxu0  ;;  %9338 = vmatpush3.msra.mxu0 %v1620_v48 }
 0x6d2   :  { %v11177_v53 = vadd.f32 %v8228_v50, %v1396_v9  ;;  %9339 = vmatprep.subr.mxu0 %v10624_v52  ;;  %v1618_v9 = vld [vmem:[%s13718_s2 + $0x150] sm:$0xff]  ;;  %v1617_v51 = vld [vmem:[%s13718_s2 + $0x148] sm:$0xff] }
 0x6d3   :  { %v1377_v54 = vpop.f32.mrf.mxu0 }
 0x6d4   :  { %v1397_v55 = vadd.f32 %v1377_v54, %v10697_v20  ;;  %v1413_v56 = vsel %vm122_vm1, %v11177_v53, 0.0 }
 0x6d5   :  { %1414 = vadd.xlane.f32.xlu0 %v1413_v56  ;;  %v9300_v57 = vpop.f32.mrf.mxu0 }
 0x6d6   :  { %v11182_v58 = vadd.f32 %v8228_v50, %v1397_v55 }
 0x6d7   :  { %v1382_v59 = vpop.f32.mrf.mxu0 }
 0x6d8   :  { %v1398_v61 = vadd.f32 %v10608_v60, %v1382_v59  ;;  %v1416_v19 = vsel %vm122_vm1, %v11182_v58, 0.0 }
 0x6d9   :  { %1417 = vadd.xlane.f32.xlu1 %v1416_v19  ;;  %v9303_v62 = vpop.f32.mrf.mxu0 }
 0x6da   :  { %v11189_v63 = vadd.f32 %v8228_v50, %v1398_v61 }
 0x6db   :  { %v1387_v20 = vpop.f32.mrf.mxu0 }
 0x6dc   :  { %v1399_v2 = vadd.f32 %v10609_v0, %v1387_v20  ;;  %v1419_v4 = vsel %vm122_vm1, %v11189_v63, 0.0 }
 0x6dd   :  { %1420 = vadd.xlane.f32.xlu0 %v1419_v4  ;;  %v9306_v6 = vpop.f32.mrf.mxu0 }
 0x6de   :  { %v11196_v8 = vadd.f32 %v8228_v50, %v1399_v2 }
 0x6df   :  { %v1392_v10 = vpop.f32.mrf.mxu0 }
 0x6e0   :  { %v1400_v12 = vadd.f32 %v10610_v11, %v1392_v10  ;;  %v1422_v13 = vsel %vm122_vm1, %v11196_v8, 0.0  ;;  %v8229_v11 = vld [vmem:[%s13720_s3 + $0x9] ss:$0 sm:$0xff] }
 0x6e1   :  { %1423 = vadd.xlane.f32.xlu1 %v1422_v13  ;;  %v9309_v14 = vpop.f32.mrf.mxu0 }
 0x6e2   :  { %v11203_v15 = vadd.f32 %v8228_v50, %v1400_v12  ;;  %v1619_v50 = vld [vmem:[%s13718_s2 + $0x158] sm:$0xff]  ;;  %v8230_v14 = vld [vmem:[%s13720_s3 + $0xa] ss:$0 sm:$0xff] }
 0x6e3   :  { %9340 = vmatpush3.msra.mxu0 %v1619_v50 }
 0x6e4   :  { %v1425_v16 = vsel %vm135_vm2, %v11203_v15, 0.0  ;;  %9341 = vmatprep.subr.mxu0 %v10624_v52 }
 0x6e5   :  { %1426 = vadd.xlane.f32.xlu0 %v1425_v16  ;;  %9342 = vmatpush3.msra.mxu0 %v1618_v9 }
 0x6e6   :  { %9343 = vmatprep.subr.mxu0 %v10624_v52 }
 0x6e7   :  { %9344 = vmatpush3.msra.mxu0 %v1617_v51 }
 0x6e8   :  { %9345 = vmatprep.subr.mxu0 %v10624_v52 }
 0x75e   :  { %v1415_v18 = vpop.xlane.xlu0 %1414 }
 0x75f   :  { %v1428_v22 = vmul.f32 0.03125, %v1415_v18 }
 0x761   :  { %v11208_v23 = vsub.f32 %v11177_v53, %v1428_v22 }
 0x762   :  { %v1418_v24 = vpop.xlane.xlu1 %1417 }
 0x763   :  { %v1429_v25 = vmul.f32 0.03125, %v1418_v24  ;;  %v1438_v27 = vmul.f32 %v11208_v23, %v11208_v23 }
 0x765   :  { %v11213_v29 = vsub.f32 %v11182_v58, %v1429_v25  ;;  %v1443_v30 = vsel %vm122_vm1, %v1438_v27, 0.0 }
 0x766   :  { %v1421_v32 = vpop.xlane.xlu0 %1420  ;;  %1444 = vadd.xlane.f32.xlu1 %v1443_v30 }
 0x767   :  { %v1430_v34 = vmul.f32 0.03125, %v1421_v32  ;;  %v1439_v36 = vmul.f32 %v11213_v29, %v11213_v29 }
 0x769   :  { %v11219_v38 = vsub.f32 %v11189_v63, %v1430_v34  ;;  %v1446_v1 = vsel %vm122_vm1, %v1439_v36, 0.0 }
 0x76a   :  { %v1424_v39 = vpop.xlane.xlu1 %1423  ;;  %1447 = vadd.xlane.f32.xlu0 %v1446_v1 }
 0x76b   :  { %v1431_v40 = vmul.f32 0.03125, %v1424_v39  ;;  %v1440_v41 = vmul.f32 %v11219_v38, %v11219_v38 }
 0x76d   :  { %v11225_v42 = vsub.f32 %v11196_v8, %v1431_v40  ;;  %v1449_v3 = vsel %vm122_vm1, %v1440_v41, 0.0 }
 0x76e   :  { %1450 = vadd.xlane.f32.xlu1 %v1449_v3  ;;  %v1427_v43 = vpop.xlane.xlu0 %1426 }
 0x76f   :  { %v1432_v17 = vmul.f32 0.03125, %v1427_v43  ;;  %v1441_v26 = vmul.f32 %v11225_v42, %v11225_v42  ;;  %v1615_v43 = vld [vmem:[%s13718_s2 + $0x138] sm:$0xff] }
 0x771   :  { %v11231_v44 = vsub.f32 %v11203_v15, %v1432_v17  ;;  %v1452_v31 = vsel %vm122_vm1, %v1441_v26, 0.0  ;;  %v8231_v17 = vld [vmem:[%s13720_s3 + $0xb] ss:$0 sm:$0xff] }
 0x772   :  { %1453 = vadd.xlane.f32.xlu0 %v1452_v31 }
 0x773   :  { %v1442_v45 = vmul.f32 %v11231_v44, %v11231_v44 }
 0x775   :  { %v1455_v5 = vsel %vm135_vm2, %v1442_v45, 0.0 }
 0x776   :  { %1456 = vadd.xlane.f32.xlu1 %v1455_v5 }
 0x7ef   :  { %v1445_v54 = vpop.xlane.xlu1 %1444 }
 0x7f0   :  { %v1458_v55 = vmul.f32 0.03125, %v1445_v54 }
 0x7f2   :  { %v1463_v56 = vadd.f32 1e-05, %v1458_v55 }
 0x7f3   :  { %v1448_v57 = vpop.xlane.xlu0 %1447 }
 0x7f4   :  { %10376 = vrsqrt.f32 %v1463_v56  ;;  %v1459_v59 = vmul.f32 0.03125, %v1448_v57 }
 0x7f6   :  { %v1464_v60 = vadd.f32 1e-05, %v1459_v59 }
 0x7f7   :  { %v1451_v61 = vpop.xlane.xlu1 %1450 }
 0x7f8   :  { %10378 = vrsqrt.f32 %v1464_v60  ;;  %v1460_v19 = vmul.f32 0.03125, %v1451_v61  ;;  %v8242_v61 = vld [vmem:[%s13720_s3 + $0xc] ss:$0 sm:$0xff] }
 0x7fa   :  { %v1465_v62 = vadd.f32 1e-05, %v1460_v19 }
 0x7fb   :  { %v1454_v20 = vpop.xlane.xlu0 %1453 }
 0x7fc   :  { %10380 = vrsqrt.f32 %v1465_v62  ;;  %v1461_v0 = vmul.f32 0.03125, %v1454_v20 }
 0x7fe   :  { %v1466_v2 = vadd.f32 1e-05, %v1461_v0 }
 0x7ff   :  { %v1457_v4 = vpop.xlane.xlu1 %1456 }
 0x800   :  { %10382 = vrsqrt.f32 %v1466_v2  ;;  %v1462_v6 = vmul.f32 0.03125, %v1457_v4 }
 0x801   :  { %v10377_v10 = vpop.eup %10376 }
 0x802   :  { %v1473_v12 = vmul.f32 %v10377_v10, %v11208_v23  ;;  %v1467_v13 = vadd.f32 1e-05, %v1462_v6 }
 0x804   :  { %v1482_v16 = vmul.f32 %v8229_v11, %v1473_v12  ;;  %10384 = vrsqrt.f32 %v1467_v13 }
 0x805   :  { %v10379_v18 = vpop.eup %10378 }
 0x806   :  { %v1491_v22 = vadd.f32 %v8230_v14, %v1482_v16  ;;  %v1474_v24 = vmul.f32 %v10379_v18, %v11213_v29 }
 0x808   :  { %9319 = vmatmul.mubr.msk.f32.vlgmr.msra.gmra.mxu1 %vm122_vm1, %v1491_v22  ;;  %v1483_v25 = vmul.f32 %v8229_v11, %v1474_v24 }
 0x809   :  { %v10381_v27 = vpop.eup %10380  ;;  %9321 = vmatprep.mubr.msk.f32.mxu1 %vm10625_vm3, %v10624_v52 }
 0x80a   :  { %v1492_v30 = vadd.f32 %v8230_v14, %v1483_v25  ;;  %v1475_v23 = vmul.f32 %v10381_v27, %v11219_v38 }
 0x80c   :  { %9322 = vmatmul.mubr.msk.f32.gmra.mxu1 %vm122_vm1, %v1492_v30  ;;  %v1484_v32 = vmul.f32 %v8229_v11, %v1475_v23 }
 0x80d   :  { %v10383_v34 = vpop.eup %10382  ;;  %9324 = vmatprep.mubr.msk.f32.mxu1 %vm10625_vm3, %v10624_v52 }
 0x80e   :  { %v1493_v36 = vadd.f32 %v8230_v14, %v1484_v32  ;;  %v1476_v29 = vmul.f32 %v10383_v34, %v11225_v42  ;;  %v1616_v42 = vld [vmem:[%s13718_s2 + $0x140] sm:$0xff] }
 0x80f   :  { %9346 = vmatpush3.msra.mxu0 %v1616_v42 }
 0x810   :  { %9325 = vmatmul.mubr.msk.f32.gmra.mxu1 %vm122_vm1, %v1493_v36  ;;  %v1485_v1 = vmul.f32 %v8229_v11, %v1476_v29  ;;  %9347 = vmatprep.subr.mxu0 %v10624_v52 }
 0x811   :  { %v10385_v39 = vpop.eup %10384  ;;  %9327 = vmatprep.mubr.msk.f32.mxu1 %vm10625_vm3, %v10624_v52  ;;  %9348 = vmatpush3.msra.mxu0 %v1615_v43 }
 0x812   :  { %v1494_v40 = vadd.f32 %v8230_v14, %v1485_v1  ;;  %v1477_v38 = vmul.f32 %v10385_v39, %v11231_v44  ;;  %9387 = vmatprep.subr.mxu0 %v10624_v52 }
 0x814   :  { %9328 = vmatmul.mubr.msk.f32.gmra.mxu1 %vm122_vm1, %v1494_v40  ;;  %v1486_v41 = vmul.f32 %v8229_v11, %v1477_v38 }
 0x815   :  { %9330 = vmatprep.mubr.msk.f32.mxu1 %vm10625_vm3, %v10624_v52 }
 0x816   :  { %v1495_v3 = vadd.f32 %v8230_v14, %v1486_v41 }
 0x818   :  { %9331 = vmatmul.mubr.msk.f32.gmra.mxu1 %vm122_vm1, %v1495_v3 }
 0x819   :  { %9372 = vmatprep.mubr.msk.f32.mxu1 %vm10625_vm3, %v10624_v52 }
 0x8c8   :  { %v1586_v26 = vpop.f32.mrf.mxu1 }
 0x8c9   :  { %v1587_v44 = vadd.f32 %v8231_v17, %v1586_v26 }
 0x8ca   :  { %v9320_v31 = vpop.f32.mrf.mxu1 }
 0x8cb   :  { %v1610_v45 = vmax.f32 %v1587_v44, 0.0 }
 0x8cc   :  { %v1591_v5 = vpop.f32.mrf.mxu1 }
 0x8cd   :  { %v1592_v46 = vadd.f32 %v8231_v17, %v1591_v5  ;;  %9350 = vmatmul.mubr.msk.f32.vlgmr.msra.gmra.mxu0 %vm1623_vm7, %v1610_v45 }
 0x8ce   :  { %v9323_v35 = vpop.f32.mrf.mxu1  ;;  %9352 = vmatprep.mubr.msk.f32.mxu0 %vm10625_vm3, %v10624_v52 }
 0x8cf   :  { %v1611_v47 = vmax.f32 %v1592_v46, 0.0 }
 0x8d0   :  { %v1596_v37 = vpop.f32.mrf.mxu1 }
 0x8d1   :  { %v1597_v49 = vadd.f32 %v8231_v17, %v1596_v37  ;;  %9353 = vmatmul.mubr.msk.f32.gmra.mxu0 %vm1623_vm7, %v1611_v47 }
 0x8d2   :  { %v9326_v7 = vpop.f32.mrf.mxu1  ;;  %9355 = vmatprep.mubr.msk.f32.mxu0 %vm10625_vm3, %v10624_v52 }
 0x8d3   :  { %v1612_v48 = vmax.f32 %v1597_v49, 0.0 }
 0x8d4   :  { %v1601_v50 = vpop.f32.mrf.mxu1 }
 0x8d5   :  { %v1602_v9 = vadd.f32 %v8231_v17, %v1601_v50  ;;  %9356 = vmatmul.mubr.msk.f32.gmra.mxu0 %vm1623_vm7, %v1612_v48  ;;  %v1946_v48 = vld [vmem:[%s13718_s2 + $0x1b0] sm:$0xff] }
 0x8d6   :  { %v9329_v51 = vpop.f32.mrf.mxu1  ;;  %9358 = vmatprep.mubr.msk.f32.mxu0 %vm10625_vm3, %v10624_v52  ;;  %v1832_v50 = vld [vmem:[%s13718_s2 + $0x190] sm:$0xff]  ;;  %9388 = vmatpush3.msra.mxu0 %v1946_v48 }
 0x8d7   :  { %v1613_v54 = vmax.f32 %v1602_v9, 0.0  ;;  %9365 = vmatpush3.msra.mxu1 %v1832_v50  ;;  %9389 = vmatprep.subr.mxu0 %v10624_v52  ;;  %v1945_v9 = vld [vmem:[%s13718_s2 + $0x1a8] sm:$0xff] }
 0x8d8   :  { %v1606_v55 = vpop.f32.mrf.mxu1  ;;  %9366 = vmatprep.subr.mxu1 %v10624_v52  ;;  %v1831_v51 = vld [vmem:[%s13718_s2 + $0x188] sm:$0xff]  ;;  %9390 = vmatpush3.msra.mxu0 %v1945_v9 }
 0x8d9   :  { %v1607_v56 = vadd.f32 %v8231_v17, %v1606_v55  ;;  %9359 = vmatmul.mubr.msk.f32.gmra.mxu0 %vm1623_vm7, %v1613_v54  ;;  %v1944_v54 = vld [vmem:[%s13718_s2 + $0x1a0] sm:$0xff]  ;;  %9367 = vmatpush3.msra.mxu1 %v1831_v51 }
 0x8da   :  { %v9332_v57 = vpop.f32.mrf.mxu1  ;;  %9361 = vmatprep.mubr.msk.f32.mxu0 %vm10625_vm3, %v10624_v52  ;;  %v1830_v55 = vld [vmem:[%s13718_s2 + $0x180] sm:$0xff]  ;;  %9391 = vmatprep.subr.mxu0 %v10624_v52 }
 0x8db   :  { %v1614_v59 = vmax.f32 %v1607_v56, 0.0  ;;  %9368 = vmatprep.subr.mxu1 %v10624_v52  ;;  %v1943_v56 = vld [vmem:[%s13718_s2 + $0x198] sm:$0xff]  ;;  %9392 = vmatpush3.msra.mxu0 %v1944_v54 }
 0x8dc   :  { %v1829_v57 = vld [vmem:[%s13718_s2 + $0x178] sm:$0xff]  ;;  %9369 = vmatpush3.msra.mxu1 %v1830_v55  ;;  %9393 = vmatprep.subr.mxu0 %v10624_v52 }
 0x8dd   :  { %9362 = vmatmul.mubr.msk.f32.gmra.mxu0 %vm1623_vm7, %v1614_v59  ;;  %9370 = vmatprep.subr.mxu1 %v10624_v52 }
 0x8de   :  { %9395 = vmatprep.mubr.msk.f32.mxu0 %vm10625_vm3, %v10624_v52  ;;  %9394 = vmatpush3.msra.mxu0 %v1943_v56 }
 0x8df   :  { %9371 = vmatpush3.msra.mxu1 %v1829_v57  ;;  %9433 = vmatprep.subr.mxu0 %v10624_v52 }
 0x8e0   :  { %9410 = vmatprep.subr.mxu1 %v10624_v52 }
 0x98d   :  { %v1705_v60 = vpop.f32.mrf.mxu0 }
 0x98e   :  { %v1729_v19 = vadd.f32 %v1705_v60, %v11177_v53 }
 0x98f   :  { %v9351_v62 = vpop.f32.mrf.mxu0 }
 0x990   :  { %v11333_v20 = vadd.f32 %v8242_v61, %v1729_v19 }
 0x991   :  { %v1710_v0 = vpop.f32.mrf.mxu0 }
 0x992   :  { %v1730_v2 = vadd.f32 %v1710_v0, %v11182_v58  ;;  %v1746_v4 = vsel %vm122_vm1, %v11333_v20, 0.0 }
 0x993   :  { %1747 = vadd.xlane.f32.xlu0 %v1746_v4  ;;  %v9354_v6 = vpop.f32.mrf.mxu0 }
 0x994   :  { %v11338_v10 = vadd.f32 %v8242_v61, %v1730_v2 }
 0x995   :  { %v1715_v11 = vpop.f32.mrf.mxu0 }
 0x996   :  { %v1731_v12 = vadd.f32 %v1715_v11, %v11189_v63  ;;  %v1749_v13 = vsel %vm122_vm1, %v11338_v10, 0.0 }
 0x997   :  { %1750 = vadd.xlane.f32.xlu1 %v1749_v13  ;;  %v9357_v53 = vpop.f32.mrf.mxu0 }
 0x998   :  { %v11343_v14 = vadd.f32 %v8242_v61, %v1731_v12 }
 0x999   :  { %v1720_v16 = vpop.f32.mrf.mxu0 }
 0x99a   :  { %v1732_v58 = vadd.f32 %v1720_v16, %v11196_v8  ;;  %v1752_v18 = vsel %vm122_vm1, %v11343_v14, 0.0 }
 0x99b   :  { %1753 = vadd.xlane.f32.xlu0 %v1752_v18  ;;  %v9360_v22 = vpop.f32.mrf.mxu0  ;;  %v8243_v18 = vld [vmem:[%s13720_s3 + $0xd] ss:$0 sm:$0xff] }
 0x99c   :  { %v11348_v24 = vadd.f32 %v8242_v61, %v1732_v58 }
 0x99d   :  { %v1725_v25 = vpop.f32.mrf.mxu0 }
 0x99e   :  { %v1733_v63 = vadd.f32 %v1725_v25, %v11203_v15  ;;  %v1755_v27 = vsel %vm122_vm1, %v11348_v24, 0.0 }
 0x99f   :  { %1756 = vadd.xlane.f32.xlu1 %v1755_v27  ;;  %v9363_v30 = vpop.f32.mrf.mxu0 }
 0x9a0   :  { %v11353_v23 = vadd.f32 %v8242_v61, %v1733_v63  ;;  %v8244_v63 = vld [vmem:[%s13720_s3 + $0xe] ss:$0 sm:$0xff] }
 0x9a2   :  { %v1758_v8 = vsel %vm135_vm2, %v11353_v23, 0.0 }
 0x9a3   :  { %1759 = vadd.xlane.f32.xlu0 %v1758_v8 }
 0xa1c   :  { %v1748_v32 = vpop.xlane.xlu0 %1747 }
 0xa1d   :  { %v1761_v34 = vmul.f32 0.03125, %v1748_v32 }
 0xa1f   :  { %v11358_v36 = vsub.f32 %v11333_v20, %v1761_v34  ;;  %v2045_v34 = vld [vmem:[%s13718_s2 + $0x1d0] sm:$0xff] }
 0xa20   :  { %v1751_v29 = vpop.xlane.xlu1 %1750 }
 0xa21   :  { %v1762_v1 = vmul.f32 0.03125, %v1751_v29  ;;  %v1771_v15 = vmul.f32 %v11358_v36, %v11358_v36 }
 0xa23   :  { %v11363_v39 = vsub.f32 %v11338_v10, %v1762_v1  ;;  %v1776_v40 = vsel %vm122_vm1, %v1771_v15, 0.0 }
 0xa24   :  { %v1754_v38 = vpop.xlane.xlu0 %1753  ;;  %1777 = vadd.xlane.f32.xlu1 %v1776_v40 }
 0xa25   :  { %v1763_v41 = vmul.f32 0.03125, %v1754_v38  ;;  %v1772_v3 = vmul.f32 %v11363_v39, %v11363_v39 }
 0xa27   :  { %v11369_v42 = vsub.f32 %v11343_v14, %v1763_v41  ;;  %v1779_v43 = vsel %vm122_vm1, %v1772_v3, 0.0 }
 0xa28   :  { %v1757_v17 = vpop.xlane.xlu1 %1756  ;;  %1780 = vadd.xlane.f32.xlu0 %v1779_v43 }
 0xa29   :  { %v1764_v26 = vmul.f32 0.03125, %v1757_v17  ;;  %v1773_v44 = vmul.f32 %v11369_v42, %v11369_v42 }
 0xa2b   :  { %v11375_v31 = vsub.f32 %v11348_v24, %v1764_v26  ;;  %v1782_v45 = vsel %vm122_vm1, %v1773_v44, 0.0 }
 0xa2c   :  { %1783 = vadd.xlane.f32.xlu1 %v1782_v45  ;;  %v1760_v5 = vpop.xlane.xlu0 %1759 }
 0xa2d   :  { %v1765_v46 = vmul.f32 0.03125, %v1760_v5  ;;  %v1774_v35 = vmul.f32 %v11375_v31, %v11375_v31 }
 0xa2f   :  { %v11381_v47 = vsub.f32 %v11353_v23, %v1765_v46  ;;  %v1785_v37 = vsel %vm122_vm1, %v1774_v35, 0.0 }
 0xa30   :  { %1786 = vadd.xlane.f32.xlu0 %v1785_v37 }
 0xa31   :  { %v1775_v49 = vmul.f32 %v11381_v47, %v11381_v47 }
 0xa33   :  { %v1788_v7 = vsel %vm135_vm2, %v1775_v49, 0.0 }
 0xa34   :  { %1789 = vadd.xlane.f32.xlu1 %v1788_v7 }
 0xaad   :  { %v1778_v59 = vpop.xlane.xlu1 %1777 }
 0xaae   :  { %v1791_v60 = vmul.f32 0.03125, %v1778_v59 }
 0xab0   :  { %v1796_v61 = vadd.f32 1e-05, %v1791_v60 }
 0xab1   :  { %v1781_v19 = vpop.xlane.xlu0 %1780 }
 0xab2   :  { %10386 = vrsqrt.f32 %v1796_v61  ;;  %v1792_v62 = vmul.f32 0.03125, %v1781_v19  ;;  %v8251_v61 = vld [vmem:[%s13720_s3 + $0x10] ss:$0 sm:$0xff] }
 0xab4   :  { %v1797_v0 = vadd.f32 1e-05, %v1792_v62 }
 0xab5   :  { %v1784_v2 = vpop.xlane.xlu1 %1783 }
 0xab6   :  { %10388 = vrsqrt.f32 %v1797_v0  ;;  %v1793_v4 = vmul.f32 0.03125, %v1784_v2 }
 0xab8   :  { %v1798_v6 = vadd.f32 1e-05, %v1793_v4 }
 0xab9   :  { %v1787_v11 = vpop.xlane.xlu0 %1786 }
 0xaba   :  { %10390 = vrsqrt.f32 %v1798_v6  ;;  %v1794_v12 = vmul.f32 0.03125, %v1787_v11 }
 0xabc   :  { %v1799_v13 = vadd.f32 1e-05, %v1794_v12 }
 0xabd   :  { %v1790_v53 = vpop.xlane.xlu1 %1789 }
 0xabe   :  { %10392 = vrsqrt.f32 %v1799_v13  ;;  %v1795_v16 = vmul.f32 0.03125, %v1790_v53 }
 0xabf   :  { %v10387_v58 = vpop.eup %10386 }
 0xac0   :  { %v1806_v22 = vmul.f32 %v10387_v58, %v11358_v36  ;;  %v1800_v25 = vadd.f32 1e-05, %v1795_v16 }
 0xac2   :  { %v1815_v27 = vmul.f32 %v8243_v18, %v1806_v22  ;;  %10394 = vrsqrt.f32 %v1800_v25 }
 0xac3   :  { %v10389_v30 = vpop.eup %10388 }
 0xac4   :  { %v11426_v8 = vadd.f32 %v8244_v63, %v1815_v27  ;;  %v1807_v32 = vmul.f32 %v10389_v30, %v11363_v39  ;;  %v2044_v39 = vld [vmem:[%s13718_s2 + $0x1c8] sm:$0xff] }
 0xac6   :  { %9373 = vmatmul.mubr.msk.f32.vlgmr.msra.gmra.mxu1 %vm122_vm1, %v11426_v8  ;;  %9396 = vmatmul.mubr.msk.f32.vlgmr.msra.gmra.mxu0 %vm122_vm1, %v11426_v8  ;;  %v1816_v36 = vmul.f32 %v8243_v18, %v1807_v32 }
 0xac7   :  { %v10391_v29 = vpop.eup %10390  ;;  %9375 = vmatprep.mubr.msk.f32.mxu1 %vm10625_vm3, %v10624_v52  ;;  %9398 = vmatprep.mubr.msk.f32.mxu0 %vm10625_vm3, %v10624_v52 }
 0xac8   :  { %v11440_v1 = vadd.f32 %v8244_v63, %v1816_v36  ;;  %v1808_v15 = vmul.f32 %v10391_v29, %v11369_v42  ;;  %9411 = vmatpush3.msra.mxu1 %v2045_v34  ;;  %v2043_v42 = vld [vmem:[%s13718_s2 + $0x1c0] sm:$0xff]  ;;  %v8257_v34 = vld [vmem:[%s13720_s3 + $0x11] ss:$0 sm:$0xff] }
 0xac9   :  { %9412 = vmatprep.subr.mxu1 %v10624_v52  ;;  %v2432_v29 = vld [vmem:[%s13718_s2 + $0x1f0] sm:$0xff] }
 0xaca   :  { %9376 = vmatmul.mubr.msk.f32.gmra.mxu1 %vm122_vm1, %v11440_v1  ;;  %9399 = vmatmul.mubr.msk.f32.gmra.mxu0 %vm122_vm1, %v11440_v1  ;;  %v1817_v40 = vmul.f32 %v8243_v18, %v1808_v15 }
 0xacb   :  { %v10393_v38 = vpop.eup %10392  ;;  %9378 = vmatprep.mubr.msk.f32.mxu1 %vm10625_vm3, %v10624_v52  ;;  %9401 = vmatprep.mubr.msk.f32.mxu0 %vm10625_vm3, %v10624_v52 }
 0xacc   :  { %v11455_v41 = vadd.f32 %v8244_v63, %v1817_v40  ;;  %v1809_v3 = vmul.f32 %v10393_v38, %v11375_v31  ;;  %9413 = vmatpush3.msra.mxu1 %v2044_v39  ;;  %v2042_v31 = vld [vmem:[%s13718_s2 + $0x1b8] sm:$0xff] }
 0xacd   :  { %9414 = vmatprep.subr.mxu1 %v10624_v52 }
 0xace   :  { %9379 = vmatmul.mubr.msk.f32.gmra.mxu1 %vm122_vm1, %v11455_v41  ;;  %9402 = vmatmul.mubr.msk.f32.gmra.mxu0 %vm122_vm1, %v11455_v41  ;;  %v1818_v43 = vmul.f32 %v8243_v18, %v1809_v3  ;;  %v2431_v3 = vld [vmem:[%s13718_s2 + $0x1e8] sm:$0xff] }
 0xacf   :  { %v10395_v17 = vpop.eup %10394  ;;  %9381 = vmatprep.mubr.msk.f32.mxu1 %vm10625_vm3, %v10624_v52  ;;  %9404 = vmatprep.mubr.msk.f32.mxu0 %vm10625_vm3, %v10624_v52 }
 0xad0   :  { %v11470_v26 = vadd.f32 %v8244_v63, %v1818_v43  ;;  %v1810_v44 = vmul.f32 %v10395_v17, %v11381_v47  ;;  %9415 = vmatpush3.msra.mxu1 %v2043_v42 }
 0xad1   :  { %9416 = vmatprep.subr.mxu1 %v10624_v52 }
 0xad2   :  { %9382 = vmatmul.mubr.msk.f32.gmra.mxu1 %vm122_vm1, %v11470_v26  ;;  %9405 = vmatmul.mubr.msk.f32.gmra.mxu0 %vm122_vm1, %v11470_v26  ;;  %v1819_v45 = vmul.f32 %v8243_v18, %v1810_v44 }
 0xad3   :  { %9384 = vmatprep.mubr.msk.f32.mxu1 %vm10625_vm3, %v10624_v52  ;;  %9407 = vmatprep.mubr.msk.f32.mxu0 %vm10625_vm3, %v10624_v52 }
 0xad4   :  { %v11485_v5 = vadd.f32 %v8244_v63, %v1819_v45  ;;  %9417 = vmatpush3.msra.mxu1 %v2042_v31  ;;  %v8245_v63 = vld [vmem:[%s13720_s3 + $0xf] ss:$0 sm:$0xff]  ;;  %v2430_v31 = vld [vmem:[%s13718_s2 + $0x1e0] sm:$0xff] }
 0xad5   :  { %9458 = vmatprep.subr.mxu1 %v10624_v52 }
 0xad6   :  { %9385 = vmatmul.mubr.msk.f32.gmra.mxu1 %vm122_vm1, %v11485_v5  ;;  %9408 = vmatmul.mubr.msk.f32.gmra.mxu0 %vm122_vm1, %v11485_v5 }
 0xad7   :  { %9418 = vmatprep.mubr.msk.f32.mxu1 %vm10625_vm3, %v10624_v52  ;;  %9443 = vmatprep.mubr.msk.f32.mxu0 %vm10625_vm3, %v10624_v52 }
 0xada   :  { %9419 = vmatmul.mubr.msk.f32.vlgmr.msra.gmra.mxu1 %vm122_vm1, %v11426_v8 }
 0xadb   :  { %9421 = vmatprep.mubr.msk.f32.mxu1 %vm10625_vm3, %v10624_v52 }
 0xade   :  { %9422 = vmatmul.mubr.msk.f32.gmra.mxu1 %vm122_vm1, %v11440_v1 }
 0xadf   :  { %9424 = vmatprep.mubr.msk.f32.mxu1 %vm10625_vm3, %v10624_v52 }
 0xae2   :  { %9425 = vmatmul.mubr.msk.f32.gmra.mxu1 %vm122_vm1, %v11455_v41 }
 0xae3   :  { %9427 = vmatprep.mubr.msk.f32.mxu1 %vm10625_vm3, %v10624_v52 }
 0xae6   :  { %9428 = vmatmul.mubr.msk.f32.gmra.mxu1 %vm122_vm1, %v11470_v26 }
 0xae7   :  { %9430 = vmatprep.mubr.msk.f32.mxu1 %vm10625_vm3, %v10624_v52 }
 0xaea   :  { %9431 = vmatmul.mubr.msk.f32.gmra.mxu1 %vm122_vm1, %v11485_v5 }
 0xaeb   :  { %9468 = vmatprep.mubr.msk.f32.mxu1 %vm10625_vm3, %v10624_v52 }
 0xb86   :  { %v1919_v46 = vpop.f32.mrf.mxu1  ;;  %v2018_v35 = vpop.f32.mrf.mxu0 }
 0xb87   :  { %v2019_v27 = vadd.f32 %v8251_v61, %v2018_v35  ;;  %v11535_v32 = vadd.f32 %v8245_v63, %v1919_v46  ;;  %v2429_v46 = vld [vmem:[%s13718_s2 + $0x1d8] sm:$0xff] }
 0xb88   :  { %v9374_v47 = vpop.f32.mrf.mxu1  ;;  %v9397_v37 = vpop.f32.mrf.mxu0 }
 0xb8a   :  { %v1924_v49 = vpop.f32.mrf.mxu1  ;;  %v2023_v7 = vpop.f32.mrf.mxu0 }
 0xb8b   :  { %v2024_v18 = vadd.f32 %v8251_v61, %v2023_v7  ;;  %v11547_v38 = vadd.f32 %v8245_v63, %v1924_v49 }
 0xb8c   :  { %v9377_v48 = vpop.f32.mrf.mxu1  ;;  %v9400_v50 = vpop.f32.mrf.mxu0 }
 0xb8e   :  { %v1929_v9 = vpop.f32.mrf.mxu1  ;;  %v2028_v51 = vpop.f32.mrf.mxu0 }
 0xb8f   :  { %v2029_v53 = vadd.f32 %v8251_v61, %v2028_v51  ;;  %v11559_v17 = vadd.f32 %v8245_v63, %v1929_v9 }
 0xb90   :  { %v9380_v54 = vpop.f32.mrf.mxu1  ;;  %v9403_v55 = vpop.f32.mrf.mxu0 }
 0xb92   :  { %v11516_v56 = vpop.f32.mrf.mxu1  ;;  %v2033_v57 = vpop.f32.mrf.mxu0 }
 0xb93   :  { %v2034_v11 = vadd.f32 %v8251_v61, %v2033_v57  ;;  %v11574_v45 = vadd.f32 %v8245_v63, %v11516_v56 }
 0xb94   :  { %v9383_v59 = vpop.f32.mrf.mxu1  ;;  %v9406_v60 = vpop.f32.mrf.mxu0 }
 0xb96   :  { %v11521_v19 = vpop.f32.mrf.mxu1  ;;  %v2038_v62 = vpop.f32.mrf.mxu0 }
 0xb97   :  { %v2039_v0 = vadd.f32 %v8251_v61, %v2038_v62  ;;  %v11586_v35 = vadd.f32 %v8245_v63, %v11521_v19 }
 0xb98   :  { %v9386_v2 = vpop.f32.mrf.mxu1  ;;  %v9409_v4 = vpop.f32.mrf.mxu0 }
 0xb99   :  { %9434 = vmatpush3.xpose.msk.msra.mxu0 %vm122_vm1, %v2039_v0 }
 0xb9a   :  { %v2117_v6 = vpop.f32.mrf.mxu1  ;;  %9435 = vmatprep.subr.mxu0 %v10624_v52 }
 0xb9b   :  { %v2118_v44 = vadd.f32 %v8257_v34, %v2117_v6 }
 0xb9c   :  { %v9420_v12 = vpop.f32.mrf.mxu1 }
 0xb9d   :  { %9436 = vmatpush3.xpose.msk.msra.mxu0 %vm122_vm1, %v2034_v11 }
 0xb9e   :  { %v2122_v13 = vpop.f32.mrf.mxu1  ;;  %9437 = vmatprep.subr.mxu0 %v10624_v52 }
 0xb9f   :  { %v2123_v43 = vadd.f32 %v8257_v34, %v2122_v13 }
 0xba0   :  { %v9423_v16 = vpop.f32.mrf.mxu1 }
 0xba1   :  { %9438 = vmatpush3.xpose.msk.msra.mxu0 %vm122_vm1, %v2029_v53 }
 0xba2   :  { %v2127_v58 = vpop.f32.mrf.mxu1  ;;  %9439 = vmatprep.subr.mxu0 %v10624_v52 }
 0xba3   :  { %v2128_v42 = vadd.f32 %v8257_v34, %v2127_v58 }
 0xba4   :  { %v9426_v22 = vpop.f32.mrf.mxu1 }
 0xba5   :  { %9440 = vmatpush3.xpose.msk.msra.mxu0 %vm122_vm1, %v2024_v18  ;;  %v8279_v22 = vld [vmem:[%s13720_s3 + $0x12] ss:$0 sm:$0xff] }
 0xba6   :  { %v2132_v25 = vpop.f32.mrf.mxu1  ;;  %9441 = vmatprep.subr.mxu0 %v10624_v52 }
 0xba7   :  { %v2133_v40 = vadd.f32 %v8257_v34, %v2132_v25 }
 0xba8   :  { %v9429_v30 = vpop.f32.mrf.mxu1 }
 0xba9   :  { %9442 = vmatpush3.xpose.msk.msra.mxu0 %vm122_vm1, %v2019_v27 }
 0xbaa   :  { %v2137_v36 = vpop.f32.mrf.mxu1  ;;  %9483 = vmatprep.subr.mxu0 %v10624_v52 }
 0xbab   :  { %v2138_v15 = vadd.f32 %v8257_v34, %v2137_v36 }
 0xbac   :  { %v9432_v39 = vpop.f32.mrf.mxu1  ;;  %9444 = vmatmul.mubr.msk.f32.vlgmr.msra.gmra.mxu0 %vm122_vm1, %v11535_v32 }
 0xbad   :  { %9459 = vmatpush3.msk.msra.mxu1 %vm692_vm4, %v2138_v15  ;;  %9484 = vmatpush3.msra.mxu0 %v2432_v29 }
 0xbae   :  { %9460 = vmatprep.subr.mxu1 %v10624_v52  ;;  %9446 = vmatprep.mubr.msk.f32.mxu0 %vm10625_vm3, %v10624_v52 }
 0xbaf   :  { %9461 = vmatpush3.msra.mxu1 %v2133_v40  ;;  %9485 = vmatprep.subr.mxu0 %v10624_v52 }
 0xbb0   :  { %9447 = vmatmul.mubr.msk.f32.gmra.mxu0 %vm122_vm1, %v11547_v38  ;;  %9462 = vmatprep.subr.mxu1 %v10624_v52 }
 0xbb1   :  { %9463 = vmatpush3.msra.mxu1 %v2128_v42  ;;  %9486 = vmatpush3.msra.mxu0 %v2431_v3 }
 0xbb2   :  { %9464 = vmatprep.subr.mxu1 %v10624_v52  ;;  %9449 = vmatprep.mubr.msk.f32.mxu0 %vm10625_vm3, %v10624_v52 }
 0xbb3   :  { %9465 = vmatpush3.msra.mxu1 %v2123_v43  ;;  %9487 = vmatprep.subr.mxu0 %v10624_v52 }
 0xbb4   :  { %9450 = vmatmul.mubr.msk.f32.gmra.mxu0 %vm122_vm1, %v11559_v17  ;;  %9466 = vmatprep.subr.mxu1 %v10624_v52 }
 0xbb5   :  { %9467 = vmatpush3.msra.mxu1 %v2118_v44  ;;  %9452 = vmatprep.mubr.msk.f32.mxu0 %vm10625_vm3, %v10624_v52 }
 0xbb6   :  { %9488 = vmatpush3.msra.mxu0 %v2430_v31  ;;  %9506 = vmatprep.subr.mxu1 %v10624_v52 }
 0xbb7   :  { %9489 = vmatprep.subr.mxu0 %v10624_v52 }
 0xbb8   :  { %9453 = vmatmul.mubr.msk.f32.gmra.mxu0 %vm122_vm1, %v11574_v45 }
 0xbb9   :  { %9455 = vmatprep.mubr.msk.f32.mxu0 %vm10625_vm3, %v10624_v52  ;;  %9490 = vmatpush3.msra.mxu0 %v2429_v46 }
 0xbba   :  { %9529 = vmatprep.subr.mxu0 %v10624_v52 }
 0xbbc   :  { %9456 = vmatmul.mubr.msk.f32.gmra.mxu0 %vm122_vm1, %v11586_v35 }
 0xbbd   :  { %9491 = vmatprep.mubr.msk.f32.mxu0 %vm10625_vm3, %v10624_v52 }
 0xbc0   :  { %9492 = vmatmul.mubr.msk.f32.vlgmr.msra.gmra.mxu0 %vm122_vm1, %v11426_v8 }
 0xbc1   :  { %9494 = vmatprep.mubr.msk.f32.mxu0 %vm10625_vm3, %v10624_v52 }
 0xbc4   :  { %9495 = vmatmul.mubr.msk.f32.gmra.mxu0 %vm122_vm1, %v11440_v1 }
 0xbc5   :  { %9497 = vmatprep.mubr.msk.f32.mxu0 %vm10625_vm3, %v10624_v52 }
 0xbc8   :  { %9498 = vmatmul.mubr.msk.f32.gmra.mxu0 %vm122_vm1, %v11455_v41 }
 0xbc9   :  { %9500 = vmatprep.mubr.msk.f32.mxu0 %vm10625_vm3, %v10624_v52 }
 0xbcc   :  { %9501 = vmatmul.mubr.msk.f32.gmra.mxu0 %vm122_vm1, %v11470_v26 }
 0xbcd   :  { %9503 = vmatprep.mubr.msk.f32.mxu0 %vm10625_vm3, %v10624_v52 }
 0xbd0   :  { %9504 = vmatmul.mubr.msk.f32.gmra.mxu0 %vm122_vm1, %v11485_v5 }
 0xbd1   :  { %9539 = vmatprep.mubr.msk.f32.mxu0 %vm10625_vm3, %v10624_v52 }
 0xc6c   :  { %v2237_v47 = vpop.f32.mrf.mxu0 }
 0xc6d   :  { %v2261_v37 = vmul.f32 0.25, %v2237_v47  ;;  %v2531_v47 = vld [vmem:[%s13718_s2 + $0x210] sm:$0xff] }
 0xc6e   :  { %v9445_v49 = vpop.f32.mrf.mxu0 }
 0xc6f   :  { %v2266_v7 = vsel %vm645_vm5, %v2261_v37, -inf }
 0xc70   :  { %2267 = vmax.xlane.f32.xlu0 %v2266_v7  ;;  %v2242_v48 = vpop.f32.mrf.mxu0  ;;  %v2530_v7 = vld [vmem:[%s13718_s2 + $0x208] sm:$0xff] }
 0xc71   :  { %v2262_v50 = vmul.f32 0.25, %v2242_v48  ;;  %v2529_v48 = vld [vmem:[%s13718_s2 + $0x200] sm:$0xff] }
 0xc72   :  { %v9448_v9 = vpop.f32.mrf.mxu0 }
 0xc73   :  { %v2269_v51 = vsel %vm645_vm5, %v2262_v50, -inf  ;;  %v2528_v9 = vld [vmem:[%s13718_s2 + $0x1f8] sm:$0xff] }
 0xc74   :  { %2270 = vmax.xlane.f32.xlu1 %v2269_v51  ;;  %v2247_v54 = vpop.f32.mrf.mxu0 }
 0xc75   :  { %v2263_v55 = vmul.f32 0.25, %v2247_v54 }
 0xc76   :  { %v9451_v56 = vpop.f32.mrf.mxu0 }
 0xc77   :  { %v2272_v57 = vsel %vm645_vm5, %v2263_v55, -inf }
 0xc78   :  { %2273 = vmax.xlane.f32.xlu0 %v2272_v57  ;;  %v2252_v59 = vpop.f32.mrf.mxu0 }
 0xc79   :  { %v2264_v60 = vmul.f32 0.25, %v2252_v59 }
 0xc7a   :  { %v9454_v61 = vpop.f32.mrf.mxu0 }
 0xc7b   :  { %v2275_v19 = vsel %vm645_vm5, %v2264_v60, -inf }
 0xc7c   :  { %2276 = vmax.xlane.f32.xlu1 %v2275_v19  ;;  %v2257_v62 = vpop.f32.mrf.mxu0 }
 0xc7d   :  { %v2265_v0 = vmul.f32 0.25, %v2257_v62 }
 0xc7e   :  { %v9457_v2 = vpop.f32.mrf.mxu0 }
 0xc7f   :  { %v2278_v4 = vsel %vm658_vm6, %v2265_v0, -inf }
 0xc80   :  { %2279 = vmax.xlane.f32.xlu0 %v2278_v4  ;;  %v2504_v6 = vpop.f32.mrf.mxu0 }
 0xc81   :  { %v2505_v29 = vadd.f32 %v8279_v22, %v2504_v6 }
 0xc82   :  { %v9493_v11 = vpop.f32.mrf.mxu0 }
 0xc84   :  { %v2509_v12 = vpop.f32.mrf.mxu0 }
 0xc85   :  { %v2510_v36 = vadd.f32 %v8279_v22, %v2509_v12 }
 0xc86   :  { %v9496_v13 = vpop.f32.mrf.mxu0 }
 0xc88   :  { %v2514_v53 = vpop.f32.mrf.mxu0 }
 0xc89   :  { %v2515_v34 = vadd.f32 %v8279_v22, %v2514_v53 }
 0xc8a   :  { %v9499_v16 = vpop.f32.mrf.mxu0 }
 0xc8c   :  { %v2519_v58 = vpop.f32.mrf.mxu0 }
 0xc8d   :  { %v2520_v30 = vadd.f32 %v8279_v22, %v2519_v58 }
 0xc8e   :  { %v9502_v18 = vpop.f32.mrf.mxu0 }
 0xc90   :  { %v2524_v25 = vpop.f32.mrf.mxu0 }
 0xc91   :  { %v2525_v63 = vadd.f32 %v8279_v22, %v2524_v25 }
 0xc92   :  { %v9505_v27 = vpop.f32.mrf.mxu0 }
 0xc93   :  { %9530 = vmatpush3.xpose.msk.msra.mxu0 %vm122_vm1, %v2525_v63 }
 0xc94   :  { %9531 = vmatprep.subr.mxu0 %v10624_v52 }
 0xc97   :  { %9532 = vmatpush3.xpose.msk.msra.mxu0 %vm122_vm1, %v2520_v30 }
 0xc98   :  { %9533 = vmatprep.subr.mxu0 %v10624_v52 }
 0xc9b   :  { %9534 = vmatpush3.xpose.msk.msra.mxu0 %vm122_vm1, %v2515_v34 }
 0xc9c   :  { %9535 = vmatprep.subr.mxu0 %v10624_v52 }
 0xc9f   :  { %9536 = vmatpush3.xpose.msk.msra.mxu0 %vm122_vm1, %v2510_v36 }
 0xca0   :  { %9537 = vmatprep.subr.mxu0 %v10624_v52 }
 0xca3   :  { %9538 = vmatpush3.xpose.msk.msra.mxu0 %vm122_vm1, %v2505_v29 }
 0xca4   :  { %9579 = vmatprep.subr.mxu0 %v10624_v52 }
 0xca6   :  { %9540 = vmatmul.mubr.msk.f32.vlgmr.msra.gmra.mxu0 %vm122_vm1, %v11535_v32 }
 0xca7   :  { %9542 = vmatprep.mubr.msk.f32.mxu0 %vm10625_vm3, %v10624_v52 }
 0xcaa   :  { %9543 = vmatmul.mubr.msk.f32.gmra.mxu0 %vm122_vm1, %v11547_v38 }
 0xcab   :  { %9545 = vmatprep.mubr.msk.f32.mxu0 %vm10625_vm3, %v10624_v52 }
 0xcae   :  { %9546 = vmatmul.mubr.msk.f32.gmra.mxu0 %vm122_vm1, %v11559_v17 }
 0xcaf   :  { %9548 = vmatprep.mubr.msk.f32.mxu0 %vm10625_vm3, %v10624_v52 }
 0xcb2   :  { %9549 = vmatmul.mubr.msk.f32.gmra.mxu0 %vm122_vm1, %v11574_v45 }
 0xcb3   :  { %9551 = vmatprep.mubr.msk.f32.mxu0 %vm10625_vm3, %v10624_v52 }
 0xcb6   :  { %9552 = vmatmul.mubr.msk.f32.gmra.mxu0 %vm122_vm1, %v11586_v35 }
 0xcb7   :  { %9587 = vmatprep.mubr.msk.f32.mxu0 %vm10625_vm3, %v10624_v52 }
 0xcf9   :  { %v2268_v32 = vpop.xlane.xlu0 %2267 }
 0xcfa   :  { %v2281_v15 = vsub.f32 %v2261_v37, %v2268_v32 }
 0xcfc   :  { %v2286_v39 = vmul.f32 1.442695, %v2281_v15 }
 0xcfd   :  { %v2271_v40 = vpop.xlane.xlu1 %2270 }
 0xcfe   :  { %10396 = vpow2.f32 %v2286_v39  ;;  %v2282_v38 = vsub.f32 %v2262_v50, %v2271_v40 }
 0xd00   :  { %v2288_v3 = vmul.f32 1.442695, %v2282_v38 }
 0xd01   :  { %v2274_v42 = vpop.xlane.xlu0 %2273 }
 0xd02   :  { %10398 = vpow2.f32 %v2288_v3  ;;  %v2283_v43 = vsub.f32 %v2263_v55, %v2274_v42 }
 0xd04   :  { %v2290_v17 = vmul.f32 1.442695, %v2283_v43 }
 0xd05   :  { %v2277_v44 = vpop.xlane.xlu1 %2276 }
 0xd06   :  { %10400 = vpow2.f32 %v2290_v17  ;;  %v2284_v31 = vsub.f32 %v2264_v60, %v2277_v44  ;;  %v8285_v17 = vld [vmem:[%s13720_s3 + $0x13] ss:$0 sm:$0xff] }
 0xd08   :  { %v2292_v45 = vmul.f32 1.442695, %v2284_v31 }
 0xd09   :  { %v2280_v46 = vpop.xlane.xlu0 %2279 }
 0xd0a   :  { %10402 = vpow2.f32 %v2292_v45  ;;  %v2285_v35 = vsub.f32 %v2265_v0, %v2280_v46 }
 0xd0b   :  { %v10397_v37 = vpop.eup %10396 }
 0xd0c   :  { %v2294_v49 = vmul.f32 1.442695, %v2285_v35  ;;  %9469 = vmatmul.mubr.msk.f32.vlgmr.msra.gmra.mxu1 %vm645_vm5, %v10397_v37 }
 0xd0d   :  { %9471 = vmatprep.mubr.msk.f32.mxu1 %vm10625_vm3, %v10624_v52  ;;  %9507 = vmatpush3.msra.mxu1 %v2531_v47 }
 0xd0e   :  { %10404 = vpow2.f32 %v2294_v49  ;;  %9508 = vmatprep.subr.mxu1 %v10624_v52 }
 0xd0f   :  { %v10399_v50 = vpop.eup %10398  ;;  %9509 = vmatpush3.msra.mxu1 %v2530_v7 }
 0xd10   :  { %9472 = vmatmul.mubr.msk.f32.gmra.mxu1 %vm645_vm5, %v10399_v50  ;;  %9510 = vmatprep.subr.mxu1 %v10624_v52  ;;  %v2407_v6 = vsel %vm645_vm5, %v10399_v50, 0.0 }
 0xd11   :  { %9474 = vmatprep.mubr.msk.f32.mxu1 %vm10625_vm3, %v10624_v52  ;;  %9511 = vmatpush3.msra.mxu1 %v2529_v48 }
 0xd12   :  { %9512 = vmatprep.subr.mxu1 %v10624_v52 }
 0xd13   :  { %v10401_v51 = vpop.eup %10400  ;;  %9513 = vmatpush3.msra.mxu1 %v2528_v9 }
 0xd14   :  { %9475 = vmatmul.mubr.msk.f32.gmra.mxu1 %vm645_vm5, %v10401_v51  ;;  %9554 = vmatprep.subr.mxu1 %v10624_v52  ;;  %v2410_v53 = vsel %vm645_vm5, %v10401_v51, 0.0 }
 0xd15   :  { %9477 = vmatprep.mubr.msk.f32.mxu1 %vm10625_vm3, %v10624_v52 }
 0xd17   :  { %v11676_v54 = vpop.eup %10402 }
 0xd18   :  { %9478 = vmatmul.mubr.msk.f32.gmra.mxu1 %vm645_vm5, %v11676_v54 }
 0xd19   :  { %9480 = vmatprep.mubr.msk.f32.mxu1 %vm10625_vm3, %v10624_v52 }
 0xd1b   :  { %v11682_v55 = vpop.eup %10404 }
 0xd1c   :  { %9481 = vmatmul.mubr.msk.f32.gmra.mxu1 %vm645_vm5, %v11682_v55 }
 0xd1d   :  { %9514 = vmatprep.mubr.msk.f32.mxu1 %vm10625_vm3, %v10624_v52 }
 0xd20   :  { %9515 = vmatmul.mubr.msk.f32.vlgmr.msra.gmra.mxu1 %vm122_vm1, %v11426_v8 }
 0xd21   :  { %9517 = vmatprep.mubr.msk.f32.mxu1 %vm10625_vm3, %v10624_v52 }
 0xd24   :  { %9518 = vmatmul.mubr.msk.f32.gmra.mxu1 %vm122_vm1, %v11440_v1 }
 0xd25   :  { %9520 = vmatprep.mubr.msk.f32.mxu1 %vm10625_vm3, %v10624_v52 }
 0xd28   :  { %9521 = vmatmul.mubr.msk.f32.gmra.mxu1 %vm122_vm1, %v11455_v41 }
 0xd29   :  { %9523 = vmatprep.mubr.msk.f32.mxu1 %vm10625_vm3, %v10624_v52 }
 0xd2c   :  { %9524 = vmatmul.mubr.msk.f32.gmra.mxu1 %vm122_vm1, %v11470_v26 }
 0xd2d   :  { %9526 = vmatprep.mubr.msk.f32.mxu1 %vm10625_vm3, %v10624_v52 }
 0xd30   :  { %9527 = vmatmul.mubr.msk.f32.gmra.mxu1 %vm122_vm1, %v11485_v5  ;;  %v2404_v5 = vsel %vm645_vm5, %v10397_v37, 0.0 }
 0xd31   :  { %9564 = vmatprep.mubr.msk.f32.mxu1 %vm10625_vm3, %v10624_v52 }
 0xd66   :  { %v2708_v8 = vpop.f32.mrf.mxu0 }
 0xd67   :  { %v2732_v1 = vmul.f32 0.25, %v2708_v8 }
 0xd68   :  { %v9541_v56 = vpop.f32.mrf.mxu0 }
 0xd69   :  { %v2737_v41 = vsel %vm645_vm5, %v2732_v1, -inf }
 0xd6a   :  { %2738 = vmax.xlane.f32.xlu1 %v2737_v41  ;;  %v2713_v57 = vpop.f32.mrf.mxu0 }
 0xd6b   :  { %v2733_v59 = vmul.f32 0.25, %v2713_v57 }
 0xd6c   :  { %v9544_v60 = vpop.f32.mrf.mxu0 }
 0xd6d   :  { %v2740_v26 = vsel %vm645_vm5, %v2733_v59, -inf }
 0xd6e   :  { %2741 = vmax.xlane.f32.xlu0 %v2740_v26  ;;  %v2718_v61 = vpop.f32.mrf.mxu0 }
 0xd6f   :  { %v11710_v19 = vmul.f32 0.25, %v2718_v61 }
 0xd70   :  { %v9547_v62 = vpop.f32.mrf.mxu0 }
 0xd71   :  { %v2743_v0 = vsel %vm645_vm5, %v11710_v19, -inf }
 0xd72   :  { %2405 = vadd.xlane.f32.xlu0 %v2404_v5  ;;  %2744 = vmax.xlane.f32.xlu1 %v2743_v0  ;;  %v2723_v2 = vpop.f32.mrf.mxu0 }
 0xd73   :  { %v11718_v13 = vmul.f32 0.25, %v2723_v2 }
 0xd74   :  { %v9550_v4 = vpop.f32.mrf.mxu0 }
 0xd75   :  { %v2746_v16 = vsel %vm645_vm5, %v11718_v13, -inf }
 0xd76   :  { %2408 = vadd.xlane.f32.xlu0 %v2407_v6  ;;  %v11716_v11 = vpop.f32.mrf.mxu0  ;;  %v2413_v6 = vsel %vm645_vm5, %v11676_v54, 0.0  ;;  %v2906_v54 = vld [vmem:[%s13718_s2 + $0x220] sm:$0xff] }
 0xd78   :  { %v9553_v12 = vpop.f32.mrf.mxu0 }
 0xd7a   :  { %2411 = vadd.xlane.f32.xlu0 %v2410_v53  ;;  %v2908_v53 = vld [vmem:[%s13718_s2 + $0x230] sm:$0xff] }
 0xd7b   :  { %9580 = vmatpush3.msra.mxu0 %v2908_v53 }
 0xd7c   :  { %9581 = vmatprep.subr.mxu0 %v10624_v52 }
 0xd7e   :  { %2747 = vmax.xlane.f32.xlu0 %v2746_v16  ;;  %v2907_v16 = vld [vmem:[%s13718_s2 + $0x228] sm:$0xff] }
 0xd7f   :  { %9582 = vmatpush3.msra.mxu0 %v2907_v16 }
 0xd80   :  { %9583 = vmatprep.subr.mxu0 %v10624_v52 }
 0xd81   :  { %9584 = vmatpush3.msra.mxu0 %v2906_v54 }
 0xd82   :  { %9585 = vmatprep.subr.mxu0 %v10624_v52 }
 0xdcc   :  { %v11723_v58 = vpop.f32.mrf.mxu1 }
 0xdce   :  { %v9470_v18 = vpop.f32.mrf.mxu1 }
 0xdcf   :  { %v2905_v18 = vld [vmem:[%s13718_s2 + $0x218] sm:$0xff] }
 0xdd0   :  { %v11725_v22 = vpop.f32.mrf.mxu1  ;;  %9586 = vmatpush3.msra.mxu0 %v2905_v18 }
 0xdd1   :  { %9625 = vmatprep.subr.mxu0 %v10624_v52 }
 0xdd2   :  { %v9473_v25 = vpop.f32.mrf.mxu1 }
 0xdd4   :  { %v11727_v63 = vpop.f32.mrf.mxu1 }
 0xdd6   :  { %v9476_v27 = vpop.f32.mrf.mxu1 }
 0xdd8   :  { %v11729_v30 = vpop.f32.mrf.mxu1 }
 0xdda   :  { %v9479_v34 = vpop.f32.mrf.mxu1 }
 0xddc   :  { %v11731_v36 = vpop.f32.mrf.mxu1 }
 0xdde   :  { %v9482_v29 = vpop.f32.mrf.mxu1 }
 0xde0   :  { %v2603_v32 = vpop.f32.mrf.mxu1 }
 0xde1   :  { %v2604_v9 = vadd.f32 %v8285_v17, %v2603_v32 }
 0xde2   :  { %v9516_v15 = vpop.f32.mrf.mxu1 }
 0xde4   :  { %v2608_v39 = vpop.f32.mrf.mxu1 }
 0xde5   :  { %v2609_v7 = vadd.f32 %v8285_v17, %v2608_v39 }
 0xde6   :  { %v9519_v40 = vpop.f32.mrf.mxu1 }
 0xde8   :  { %v2613_v38 = vpop.f32.mrf.mxu1 }
 0xde9   :  { %v2614_v37 = vadd.f32 %v8285_v17, %v2613_v38 }
 0xdea   :  { %v9522_v3 = vpop.f32.mrf.mxu1 }
 0xdec   :  { %v2618_v42 = vpop.f32.mrf.mxu1 }
 0xded   :  { %v2619_v46 = vadd.f32 %v8285_v17, %v2618_v42 }
 0xdee   :  { %v9525_v43 = vpop.f32.mrf.mxu1 }
 0xdf0   :  { %v2623_v44 = vpop.f32.mrf.mxu1 }
 0xdf1   :  { %v2624_v31 = vadd.f32 %v8285_v17, %v2623_v44 }
 0xdf2   :  { %v9528_v45 = vpop.f32.mrf.mxu1 }
 0xdf3   :  { %v2739_v35 = vpop.xlane.xlu1 %2738  ;;  %9555 = vmatpush3.msk.msra.mxu1 %vm692_vm4, %v2624_v31 }
 0xdf4   :  { %v2752_v47 = vsub.f32 %v2732_v1, %v2739_v35  ;;  %9556 = vmatprep.subr.mxu1 %v10624_v52 }
 0xdf5   :  { %9557 = vmatpush3.msra.mxu1 %v2619_v46 }
 0xdf6   :  { %v2757_v49 = vmul.f32 1.442695, %v2752_v47  ;;  %9558 = vmatprep.subr.mxu1 %v10624_v52 }
 0xdf7   :  { %v2742_v48 = vpop.xlane.xlu0 %2741  ;;  %9559 = vmatpush3.msra.mxu1 %v2614_v37 }
 0xdf8   :  { %10406 = vpow2.f32 %v2757_v49  ;;  %v2753_v50 = vsub.f32 %v2733_v59, %v2742_v48  ;;  %9560 = vmatprep.subr.mxu1 %v10624_v52 }
 0xdf9   :  { %9561 = vmatpush3.msra.mxu1 %v2609_v7 }
 0xdfa   :  { %v2759_v51 = vmul.f32 1.442695, %v2753_v50  ;;  %9562 = vmatprep.subr.mxu1 %v10624_v52 }
 0xdfb   :  { %v2406_v8 = vpop.xlane.xlu0 %2405  ;;  %v2745_v1 = vpop.xlane.xlu1 %2744  ;;  %9563 = vmatpush3.msra.mxu1 %v2604_v9 }
 0xdfc   :  { %10408 = vpow2.f32 %v2759_v51  ;;  %v2754_v56 = vsub.f32 %v11710_v19, %v2745_v1  ;;  %9602 = vmatprep.subr.mxu1 %v10624_v52 }
 0xdfe   :  { %v2761_v41 = vmul.f32 1.442695, %v2754_v56 }
 0xdff   :  { %v2409_v57 = vpop.xlane.xlu0 %2408 }
 0xe00   :  { %10410 = vpow2.f32 %v2761_v41 }
 0xe03   :  { %v2412_v60 = vpop.xlane.xlu0 %2411 }
 0xe05   :  { %v10407_v59 = vpop.eup %10406 }
 0xe06   :  { %9565 = vmatmul.mubr.msk.f32.vlgmr.msra.gmra.mxu1 %vm645_vm5, %v10407_v59  ;;  %v2875_v26 = vsel %vm645_vm5, %v10407_v59, 0.0 }
 0xe07   :  { %2876 = vadd.xlane.f32.xlu1 %v2875_v26  ;;  %v2748_v61 = vpop.xlane.xlu0 %2747  ;;  %9567 = vmatprep.mubr.msk.f32.mxu1 %vm10625_vm3, %v10624_v52 }
 0xe08   :  { %v2755_v62 = vsub.f32 %v11718_v13, %v2748_v61 }
 0xe09   :  { %v10409_v5 = vpop.eup %10408 }
 0xe0a   :  { %v2763_v19 = vmul.f32 1.442695, %v2755_v62  ;;  %9568 = vmatmul.mubr.msk.f32.gmra.mxu1 %vm645_vm5, %v10409_v5  ;;  %v2878_v0 = vsel %vm645_vm5, %v10409_v5, 0.0 }
 0xe0b   :  { %2879 = vadd.xlane.f32.xlu1 %v2878_v0  ;;  %9570 = vmatprep.mubr.msk.f32.mxu1 %vm10625_vm3, %v10624_v52 }
 0xe0c   :  { %10412 = vpow2.f32 %v2763_v19 }
 0xe0d   :  { %v10411_v2 = vpop.eup %10410  ;;  %10414 = vrcp.f32 %v2406_v8 }
 0xe0e   :  { %9571 = vmatmul.mubr.msk.f32.gmra.mxu1 %vm645_vm5, %v10411_v2  ;;  %v2881_v4 = vsel %vm645_vm5, %v10411_v2, 0.0 }
 0xe0f   :  { %2882 = vadd.xlane.f32.xlu1 %v2881_v4  ;;  %9573 = vmatprep.mubr.msk.f32.mxu1 %vm10625_vm3, %v10624_v52 }
 0xe13   :  { %2414 = vadd.xlane.f32.xlu1 %v2413_v6 }
 0xe19   :  { %v10413_v12 = vpop.eup %10412 }
 0xe1a   :  { %9574 = vmatmul.mubr.msk.f32.gmra.mxu1 %vm645_vm5, %v10413_v12  ;;  %v2884_v13 = vsel %vm645_vm5, %v10413_v12, 0.0  ;;  %v10415_v29 = vpop.eup %10414 }
 0xe1b   :  { %2885 = vadd.xlane.f32.xlu0 %v2884_v13  ;;  %9576 = vmatprep.mubr.msk.f32.mxu1 %vm10625_vm3, %v10624_v52  ;;  %v2424_v39 = vmul.f32 %v10415_v29, %v11723_v58  ;;  %v2736_v13 = vmul.f32 0.25, %v11716_v11 }
 0xe1d   :  { %v2749_v53 = vsel %vm658_vm6, %v2736_v13, -inf }
 0xe90   :  { %v2877_v25 = vpop.xlane.xlu1 %2876 }
 0xe91   :  { %10416 = vrcp.f32 %v2877_v25 }
 0xe92   :  { %10418 = vrcp.f32 %v2409_v57 }
 0xe94   :  { %v2880_v27 = vpop.xlane.xlu1 %2879 }
 0xe95   :  { %10420 = vrcp.f32 %v2880_v27 }
 0xe96   :  { %10422 = vrcp.f32 %v2412_v60  ;;  %v11797_v60 = vld [vmem:[%s13720_s3 + $0x14] ss:$0 sm:$0xff] }
 0xe98   :  { %v2883_v34 = vpop.xlane.xlu1 %2882 }
 0xe99   :  { %10424 = vrcp.f32 %v2883_v34 }
 0xe9c   :  { %v2415_v3 = vpop.xlane.xlu1 %2414 }
 0xe9d   :  { %10426 = vrcp.f32 %v2415_v3 }
 0xe9e   :  { %v10417_v32 = vpop.eup %10416 }
 0xe9f   :  { %v10419_v38 = vpop.eup %10418 }
 0xea0   :  { %v2425_v45 = vmul.f32 %v10419_v38, %v11725_v22 }
 0xea2   :  { %v10421_v17 = vpop.eup %10420 }
 0xea3   :  { %v10423_v35 = vpop.eup %10422 }
 0xea4   :  { %v2886_v44 = vpop.xlane.xlu0 %2885  ;;  %v2426_v7 = vmul.f32 %v10423_v35, %v11727_v63  ;;  %v2416_v35 = vsel %vm658_vm6, %v11682_v55, 0.0  ;;  %v3116_v55 = vld [vmem:[%s13718_s2 + $0x248] sm:$0xff] }
 0xea5   :  { %10428 = vrcp.f32 %v2886_v44 }
 0xea6   :  { %v10425_v37 = vpop.eup %10424 }
 0xeaa   :  { %v10427_v9 = vpop.eup %10426 }
 0xeab   :  { %v2427_v1 = vmul.f32 %v10427_v9, %v11729_v30 }
 0xeb2   :  { %v10429_v51 = vpop.eup %10428 }
 0xec6   :  { %v2851_v15 = vpop.f32.mrf.mxu1 }
 0xec7   :  { %v2895_v40 = vmul.f32 %v10417_v32, %v2851_v15 }
 0xec8   :  { %v9566_v42 = vpop.f32.mrf.mxu1 }
 0xec9   :  { %v2900_v43 = vadd.f32 %v2895_v40, %v2424_v39 }
 0xeca   :  { %v2856_v31 = vpop.f32.mrf.mxu1 }
 0xecb   :  { %v2896_v46 = vmul.f32 %v10421_v17, %v2856_v31  ;;  %9588 = vmatmul.mubr.msk.f32.vlgmr.msra.gmra.mxu0 %vm122_vm1, %v2900_v43 }
 0xecc   :  { %v9569_v47 = vpop.f32.mrf.mxu1  ;;  %9590 = vmatprep.mubr.msk.f32.mxu0 %vm10625_vm3, %v10624_v52 }
 0xecd   :  { %v2901_v58 = vadd.f32 %v2896_v46, %v2425_v45 }
 0xece   :  { %v2861_v49 = vpop.f32.mrf.mxu1 }
 0xecf   :  { %v2897_v48 = vmul.f32 %v10425_v37, %v2861_v49  ;;  %9591 = vmatmul.mubr.msk.f32.gmra.mxu0 %vm122_vm1, %v2901_v58  ;;  %v3117_v37 = vld [vmem:[%s13718_s2 + $0x250] sm:$0xff]  ;;  %v3115_v49 = vld [vmem:[%s13718_s2 + $0x240] sm:$0xff] }
 0xed0   :  { %v9572_v50 = vpop.f32.mrf.mxu1  ;;  %9593 = vmatprep.mubr.msk.f32.mxu0 %vm10625_vm3, %v10624_v52  ;;  %9603 = vmatpush3.msra.mxu1 %v3117_v37  ;;  %v11931_v37 = vld [vmem:[%s13720_s3 + $0x17] ss:$0 sm:$0xff] }
 0xed1   :  { %v2902_v22 = vadd.f32 %v2897_v48, %v2426_v7  ;;  %9604 = vmatprep.subr.mxu1 %v10624_v52  ;;  %v3114_v7 = vld [vmem:[%s13718_s2 + $0x238] sm:$0xff] }
 0xed2   :  { %9605 = vmatpush3.msra.mxu1 %v3116_v55 }
 0xed3   :  { %9594 = vmatmul.mubr.msk.f32.gmra.mxu0 %vm122_vm1, %v2902_v22  ;;  %9606 = vmatprep.subr.mxu1 %v10624_v52 }
 0xed4   :  { %9596 = vmatprep.mubr.msk.f32.mxu0 %vm10625_vm3, %v10624_v52  ;;  %9607 = vmatpush3.msra.mxu1 %v3115_v49 }
 0xed5   :  { %9608 = vmatprep.subr.mxu1 %v10624_v52 }
 0xed6   :  { %9609 = vmatpush3.msra.mxu1 %v3114_v7 }
 0xed7   :  { %9656 = vmatprep.subr.mxu1 %v10624_v52 }
 0xeda   :  { %v2866_v8 = vpop.f32.mrf.mxu1 }
 0xedb   :  { %v2898_v56 = vmul.f32 %v10429_v51, %v2866_v8 }
 0xedc   :  { %v9575_v63 = vpop.f32.mrf.mxu1 }
 0xedd   :  { %v2903_v41 = vadd.f32 %v2898_v56, %v2427_v1 }
 0xedf   :  { %9597 = vmatmul.mubr.msk.f32.gmra.mxu0 %vm122_vm1, %v2903_v41 }
 0xee0   :  { %9599 = vmatprep.mubr.msk.f32.mxu0 %vm10625_vm3, %v10624_v52 }
 0xf8b   :  { %v2990_v57 = vpop.f32.mrf.mxu0 }
 0xf8c   :  { %v3014_v59 = vadd.f32 %v2990_v57, %v11333_v20 }
 0xf8d   :  { %v9589_v26 = vpop.f32.mrf.mxu0 }
 0xf8e   :  { %v3024_v61 = vadd.f32 %v11797_v60, %v3014_v59 }
 0xf8f   :  { %v2995_v30 = vpop.f32.mrf.mxu0 }
 0xf90   :  { %v3015_v62 = vadd.f32 %v2995_v30, %v11338_v10  ;;  %v3031_v5 = vsel %vm122_vm1, %v3024_v61, 0.0 }
 0xf91   :  { %3032 = vadd.xlane.f32.xlu1 %v3031_v5  ;;  %v9592_v19 = vpop.f32.mrf.mxu0 }
 0xf92   :  { %v3025_v0 = vadd.f32 %v11797_v60, %v3015_v62  ;;  %v11862_v62 = vld [vmem:[%s13720_s3 + $0x15] ss:$0 sm:$0xff]  ;;  %v11868_v19 = vld [vmem:[%s13720_s3 + $0x16] ss:$0 sm:$0xff] }
 0xf93   :  { %v3000_v2 = vpop.f32.mrf.mxu0 }
 0xf94   :  { %v3016_v4 = vadd.f32 %v3000_v2, %v11343_v14  ;;  %v3034_v6 = vsel %vm122_vm1, %v3025_v0, 0.0 }
 0xf95   :  { %3035 = vadd.xlane.f32.xlu0 %v3034_v6  ;;  %v9595_v12 = vpop.f32.mrf.mxu0 }
 0xf96   :  { %v11807_v20 = vadd.f32 %v11797_v60, %v3016_v4 }
 0xf98   :  { %v3037_v10 = vsel %vm122_vm1, %v11807_v20, 0.0 }
 0xf99   :  { %3038 = vadd.xlane.f32.xlu1 %v3037_v10 }
 0xf9d   :  { %2750 = vmax.xlane.f32.xlu1 %v2749_v53 }
 0xf9f   :  { %v3005_v16 = vpop.f32.mrf.mxu0 }
 0xfa0   :  { %v3017_v11 = vadd.f32 %v3005_v16, %v11348_v24 }
 0xfa1   :  { %v9598_v54 = vpop.f32.mrf.mxu0 }
 0xfa2   :  { %v11824_v3 = vadd.f32 %v11797_v60, %v3017_v11 }
 0xfa4   :  { %v3040_v46 = vsel %vm122_vm1, %v11824_v3, 0.0 }
0x101a   :  { %v3033_v18 = vpop.xlane.xlu1 %3032 }
0x101b   :  { %v3046_v14 = vmul.f32 0.03125, %v3033_v18  ;;  %v3240_v18 = vld [vmem:[%s13718_s2 + $0x290] sm:$0xff] }
0x101c   :  { %9626 = vmatpush3.msra.mxu0 %v3240_v18 }
0x101d   :  { %v11813_v25 = vsub.f32 %v3024_v61, %v3046_v14  ;;  %v3239_v14 = vld [vmem:[%s13718_s2 + $0x288] sm:$0xff]  ;;  %9627 = vmatprep.subr.mxu0 %v10624_v52 }
0x101e   :  { %v3036_v27 = vpop.xlane.xlu0 %3035  ;;  %9628 = vmatpush3.msra.mxu0 %v3239_v14 }
0x101f   :  { %v3047_v34 = vmul.f32 0.03125, %v3036_v27  ;;  %v3056_v29 = vmul.f32 %v11813_v25, %v11813_v25  ;;  %9629 = vmatprep.subr.mxu0 %v10624_v52  ;;  %v3237_v27 = vld [vmem:[%s13718_s2 + $0x278] sm:$0xff] }
0x1021   :  { %v11818_v32 = vsub.f32 %v3025_v0, %v3047_v34  ;;  %v3061_v15 = vsel %vm122_vm1, %v3056_v29, 0.0  ;;  %v3236_v34 = vld [vmem:[%s13718_s2 + $0x270] sm:$0xff]  ;;  %v3235_v29 = vld [vmem:[%s13718_s2 + $0x268] sm:$0xff] }
0x1022   :  { %3062 = vadd.xlane.f32.xlu0 %v3061_v15  ;;  %v3039_v39 = vpop.xlane.xlu1 %3038 }
0x1023   :  { %v3048_v40 = vmul.f32 0.03125, %v3039_v39  ;;  %v3057_v38 = vmul.f32 %v11818_v32, %v11818_v32 }
0x1025   :  { %v3053_v42 = vsub.f32 %v11807_v20, %v3048_v40  ;;  %v3064_v43 = vsel %vm122_vm1, %v3057_v38, 0.0 }
0x1026   :  { %3065 = vadd.xlane.f32.xlu0 %v3064_v43  ;;  %v2751_v17 = vpop.xlane.xlu1 %2750 }
0x1027   :  { %v2756_v24 = vsub.f32 %v2736_v13, %v2751_v17  ;;  %v3058_v44 = vmul.f32 %v3053_v42, %v3053_v42 }
0x1029   :  { %v2765_v31 = vmul.f32 1.442695, %v2756_v24  ;;  %v3067_v45 = vsel %vm122_vm1, %v3058_v44, 0.0  ;;  %v3234_v24 = vld [vmem:[%s13718_s2 + $0x260] sm:$0xff]  ;;  %v3233_v44 = vld [vmem:[%s13718_s2 + $0x258] sm:$0xff] }
0x102a   :  { %3068 = vadd.xlane.f32.xlu1 %v3067_v45  ;;  %3041 = vadd.xlane.f32.xlu0 %v3040_v46 }
0x102b   :  { %10430 = vpow2.f32 %v2765_v31 }
0x102e   :  { %2417 = vadd.xlane.f32.xlu1 %v2416_v35 }
0x1038   :  { %v10431_v47 = vpop.eup %10430 }
0x1039   :  { %9577 = vmatmul.mubr.msk.f32.gmra.mxu1 %vm645_vm5, %v10431_v47  ;;  %v2887_v58 = vsel %vm658_vm6, %v10431_v47, 0.0 }
0x103a   :  { %2888 = vadd.xlane.f32.xlu0 %v2887_v58  ;;  %9610 = vmatprep.mubr.msk.f32.mxu1 %vm10625_vm3, %v10624_v52 }
0x10ab   :  { %v3063_v48 = vpop.xlane.xlu0 %3062 }
0x10ac   :  { %v3076_v50 = vmul.f32 0.03125, %v3063_v48 }
0x10ae   :  { %v3081_v22 = vadd.f32 1e-05, %v3076_v50 }
0x10af   :  { %v3066_v9 = vpop.xlane.xlu0 %3065 }
0x10b0   :  { %10432 = vrsqrt.f32 %v3081_v22  ;;  %v3077_v51 = vmul.f32 0.03125, %v3066_v9 }
0x10b2   :  { %v3082_v8 = vadd.f32 1e-05, %v3077_v51 }
0x10b3   :  { %v3069_v1 = vpop.xlane.xlu1 %3068  ;;  %v3042_v56 = vpop.xlane.xlu0 %3041 }
0x10b4   :  { %10434 = vrsqrt.f32 %v3082_v8  ;;  %v3078_v63 = vmul.f32 0.03125, %v3069_v1  ;;  %v3049_v41 = vmul.f32 0.03125, %v3042_v56 }
0x10b6   :  { %v3083_v57 = vadd.f32 1e-05, %v3078_v63  ;;  %v11854_v59 = vsub.f32 %v11824_v3, %v3049_v41 }
0x10b7   :  { %v2418_v11 = vpop.xlane.xlu1 %2417 }
0x10b8   :  { %10436 = vrsqrt.f32 %v3083_v57  ;;  %v3059_v26 = vmul.f32 %v11854_v59, %v11854_v59 }
0x10b9   :  { %10438 = vrcp.f32 %v2418_v11 }
0x10ba   :  { %v3070_v61 = vsel %vm122_vm1, %v3059_v26, 0.0 }
0x10bb   :  { %3071 = vadd.xlane.f32.xlu1 %v3070_v61 }
0x10bd   :  { %v10433_v30 = vpop.eup %10432 }
0x10be   :  { %v3091_v5 = vmul.f32 %v10433_v30, %v11813_v25  ;;  %v3238_v25 = vld [vmem:[%s13718_s2 + $0x280] sm:$0xff] }
0x10bf   :  { %9630 = vmatpush3.msra.mxu0 %v3238_v25 }
0x10c0   :  { %v3100_v0 = vmul.f32 %v11862_v62, %v3091_v5  ;;  %9631 = vmatprep.subr.mxu0 %v10624_v52 }
0x10c1   :  { %v10435_v2 = vpop.eup %10434  ;;  %9632 = vmatpush3.msra.mxu0 %v3237_v27 }
0x10c2   :  { %v3109_v4 = vadd.f32 %v11868_v19, %v3100_v0  ;;  %v3092_v6 = vmul.f32 %v10435_v2, %v11818_v32  ;;  %9633 = vmatprep.subr.mxu0 %v10624_v52 }
0x10c3   :  { %9634 = vmatpush3.msra.mxu0 %v3236_v34  ;;  %v2889_v32 = vpop.xlane.xlu0 %2888 }
0x10c4   :  { %9611 = vmatmul.mubr.msk.f32.vlgmr.msra.gmra.mxu1 %vm122_vm1, %v3109_v4  ;;  %v3101_v12 = vmul.f32 %v11862_v62, %v3092_v6  ;;  %9635 = vmatprep.subr.mxu0 %v10624_v52  ;;  %10440 = vrcp.f32 %v2889_v32 }
0x10c5   :  { %v10437_v13 = vpop.eup %10436  ;;  %9613 = vmatprep.mubr.msk.f32.mxu1 %vm10625_vm3, %v10624_v52  ;;  %9636 = vmatpush3.msra.mxu0 %v3235_v29 }
0x10c6   :  { %v3110_v10 = vadd.f32 %v11868_v19, %v3101_v12  ;;  %v3093_v53 = vmul.f32 %v10437_v13, %v3053_v42  ;;  %9637 = vmatprep.subr.mxu0 %v10624_v52  ;;  %v10439_v15 = vpop.eup %10438 }
0x10c7   :  { %v2428_v38 = vmul.f32 %v10439_v15, %v11731_v36  ;;  %9638 = vmatpush3.msra.mxu0 %v3234_v24 }
0x10c8   :  { %9614 = vmatmul.mubr.msk.f32.gmra.mxu1 %vm122_vm1, %v3110_v10  ;;  %v3102_v16 = vmul.f32 %v11862_v62, %v3093_v53  ;;  %9639 = vmatprep.subr.mxu0 %v10624_v52 }
0x10c9   :  { %9616 = vmatprep.mubr.msk.f32.mxu1 %vm10625_vm3, %v10624_v52  ;;  %9640 = vmatpush3.msra.mxu0 %v3233_v44 }
0x10ca   :  { %v3111_v54 = vadd.f32 %v11868_v19, %v3102_v16  ;;  %9667 = vmatprep.subr.mxu0 %v10624_v52  ;;  %v11959_v16 = vld [vmem:[%s13720_s3 + $0x18] ss:$0 sm:$0xff] }
0x10cc   :  { %9617 = vmatmul.mubr.msk.f32.gmra.mxu1 %vm122_vm1, %v3111_v54 }
0x10cd   :  { %9619 = vmatprep.mubr.msk.f32.mxu1 %vm10625_vm3, %v10624_v52 }
0x10d1   :  { %v10441_v39 = vpop.eup %10440 }
0x10f9   :  { %v2871_v40 = vpop.f32.mrf.mxu1 }
0x10fa   :  { %v2899_v42 = vmul.f32 %v10441_v39, %v2871_v40 }
0x10fb   :  { %v9578_v43 = vpop.f32.mrf.mxu1 }
0x10fc   :  { %v2904_v17 = vadd.f32 %v2899_v42, %v2428_v38 }
0x10fe   :  { %9600 = vmatmul.mubr.msk.f32.gmra.mxu0 %vm122_vm1, %v2904_v17 }
0x10ff   :  { %9641 = vmatprep.mubr.msk.f32.mxu0 %vm10625_vm3, %v10624_v52 }
0x1144   :  { %v3072_v36 = vpop.xlane.xlu1 %3071 }
0x1145   :  { %v3079_v31 = vmul.f32 0.03125, %v3072_v36 }
0x1147   :  { %v3084_v45 = vadd.f32 1e-05, %v3079_v31 }
0x1149   :  { %10442 = vrsqrt.f32 %v3084_v45 }
0x1156   :  { %v10443_v46 = vpop.eup %10442 }
0x1157   :  { %v3094_v35 = vmul.f32 %v10443_v46, %v11854_v59 }
0x1159   :  { %v3103_v47 = vmul.f32 %v11862_v62, %v3094_v35  ;;  %v3382_v35 = vld [vmem:[%s13718_s2 + $0x2a8] sm:$0xff] }
0x115b   :  { %v3112_v58 = vadd.f32 %v11868_v19, %v3103_v47 }
0x115d   :  { %9620 = vmatmul.mubr.msk.f32.gmra.mxu1 %vm122_vm1, %v3112_v58 }
0x115e   :  { %9622 = vmatprep.mubr.msk.f32.mxu1 %vm10625_vm3, %v10624_v52 }
0x1184   :  { %v3204_v55 = vpop.f32.mrf.mxu1 }
0x1185   :  { %v3205_v49 = vadd.f32 %v11931_v37, %v3204_v55 }
0x1186   :  { %v9612_v7 = vpop.f32.mrf.mxu1 }
0x1187   :  { %v3228_v48 = vmax.f32 %v3205_v49, 0.0 }
0x1188   :  { %v3209_v50 = vpop.f32.mrf.mxu1 }
0x1189   :  { %v3210_v22 = vadd.f32 %v11931_v37, %v3209_v50  ;;  %9642 = vmatmul.mubr.msk.f32.vlgmr.msra.gmra.mxu0 %vm1623_vm7, %v3228_v48 }
0x118a   :  { %v9615_v9 = vpop.f32.mrf.mxu1  ;;  %9644 = vmatprep.mubr.msk.f32.mxu0 %vm10625_vm3, %v10624_v52 }
0x118b   :  { %v3229_v51 = vmax.f32 %v3210_v22, 0.0 }
0x118c   :  { %v3214_v8 = vpop.f32.mrf.mxu1 }
0x118d   :  { %v3215_v1 = vadd.f32 %v11931_v37, %v3214_v8  ;;  %9645 = vmatmul.mubr.msk.f32.gmra.mxu0 %vm1623_vm7, %v3229_v51  ;;  %v8327_v51 = vld [vmem:[%s13720_s3 + $0x19] ss:$0 sm:$0xff] }
0x118e   :  { %v9618_v56 = vpop.f32.mrf.mxu1  ;;  %9647 = vmatprep.mubr.msk.f32.mxu0 %vm10625_vm3, %v10624_v52 }
0x118f   :  { %v3230_v63 = vmax.f32 %v3215_v1, 0.0  ;;  %v8328_v1 = vld [vmem:[%s13720_s3 + $0x1a] ss:$0 sm:$0xff] }
0x1191   :  { %9648 = vmatmul.mubr.msk.f32.gmra.mxu0 %vm1623_vm7, %v3230_v63 }
0x1192   :  { %9650 = vmatprep.mubr.msk.f32.mxu0 %vm10625_vm3, %v10624_v52 }
0x11be   :  { %v3010_v41 = vpop.f32.mrf.mxu0 }
0x11bf   :  { %v3018_v57 = vadd.f32 %v3010_v41, %v11353_v23  ;;  %v3674_v41 = vld [vmem:[%s13718_s2 + $0x310] sm:$0xff] }
0x11c0   :  { %v9601_v59 = vpop.f32.mrf.mxu0  ;;  %9668 = vmatpush3.msra.mxu0 %v3674_v41 }
0x11c1   :  { %v11947_v26 = vadd.f32 %v11797_v60, %v3018_v57  ;;  %9669 = vmatprep.subr.mxu0 %v10624_v52  ;;  %v3673_v57 = vld [vmem:[%s13718_s2 + $0x308] sm:$0xff]  ;;  %v3672_v59 = vld [vmem:[%s13718_s2 + $0x300] sm:$0xff] }
0x11c2   :  { %9670 = vmatpush3.msra.mxu0 %v3673_v57 }
0x11c3   :  { %v3043_v61 = vsel %vm135_vm2, %v11947_v26, 0.0  ;;  %9671 = vmatprep.subr.mxu0 %v10624_v52 }
0x11c4   :  { %3044 = vadd.xlane.f32.xlu0 %v3043_v61  ;;  %9672 = vmatpush3.msra.mxu0 %v3672_v59  ;;  %v3671_v61 = vld [vmem:[%s13718_s2 + $0x2f8] sm:$0xff] }
0x11c5   :  { %9673 = vmatprep.subr.mxu0 %v10624_v52 }
0x11c6   :  { %9674 = vmatpush3.msra.mxu0 %v3671_v61 }
0x121d   :  { %v3219_v30 = vpop.f32.mrf.mxu1 }
0x121e   :  { %v3220_v5 = vadd.f32 %v11931_v37, %v3219_v30 }
0x121f   :  { %v9621_v0 = vpop.f32.mrf.mxu1 }
0x1220   :  { %v3231_v2 = vmax.f32 %v3220_v5, 0.0 }
0x1222   :  { %9651 = vmatmul.mubr.msk.f32.gmra.mxu0 %vm1623_vm7, %v3231_v2 }
0x1223   :  { %9653 = vmatprep.mubr.msk.f32.mxu0 %vm10625_vm3, %v10624_v52 }
0x1249   :  { %v3322_v4 = vpop.f32.mrf.mxu0 }
0x124b   :  { %v9643_v23 = vpop.f32.mrf.mxu0 }
0x124d   :  { %v3045_v6 = vpop.xlane.xlu0 %3044  ;;  %v3326_v12 = vpop.f32.mrf.mxu0 }
0x124e   :  { %v3050_v60 = vmul.f32 0.03125, %v3045_v6 }
0x124f   :  { %v9646_v13 = vpop.f32.mrf.mxu0 }
0x1250   :  { %v3055_v10 = vsub.f32 %v11947_v26, %v3050_v60  ;;  %v8338_v60 = vld [vmem:[%s13720_s3 + $0x1c] ss:$0 sm:$0xff] }
0x1251   :  { %v3330_v53 = vpop.f32.mrf.mxu0 }
0x1252   :  { %v3344_v54 = vadd.f32 %v3330_v53, %v11807_v20  ;;  %v3060_v18 = vmul.f32 %v3055_v10, %v3055_v10 }
0x1253   :  { %v9649_v14 = vpop.f32.mrf.mxu0 }
0x1254   :  { %v3073_v25 = vsel %vm135_vm2, %v3060_v18, 0.0  ;;  %v3352_v27 = vadd.f32 %v11959_v16, %v3344_v54  ;;  %v8329_v54 = vld [vmem:[%s13720_s3 + $0x1b] ss:$0 sm:$0xff]  ;;  %v3463_v18 = vld [vmem:[%s13718_s2 + $0x2c0] sm:$0xff] }
0x1255   :  { %3074 = vadd.xlane.f32.xlu0 %v3073_v25  ;;  %v3462_v25 = vld [vmem:[%s13718_s2 + $0x2b8] sm:$0xff] }
0x1256   :  { %v3357_v34 = vsel %vm122_vm1, %v3352_v27, 0.0 }
0x1257   :  { %3358 = vadd.xlane.f32.xlu1 %v3357_v34  ;;  %v3464_v34 = vld [vmem:[%s13718_s2 + $0x2c8] sm:$0xff] }
0x12de   :  { %v3075_v29 = vpop.xlane.xlu0 %3074 }
0x12df   :  { %v3080_v11 = vmul.f32 0.03125, %v3075_v29 }
0x12e0   :  { %v3359_v32 = vpop.xlane.xlu1 %3358 }
0x12e1   :  { %v3085_v15 = vadd.f32 1e-05, %v3080_v11  ;;  %v3360_v39 = vmul.f32 0.03125, %v3359_v32 }
0x12e2   :  { %v3335_v40 = vpop.f32.mrf.mxu0 }
0x12e3   :  { %10444 = vrsqrt.f32 %v3085_v15  ;;  %v3361_v38 = vsub.f32 %v3352_v27, %v3360_v39  ;;  %v3345_v20 = vadd.f32 %v3335_v40, %v11824_v3  ;;  %v3383_v3 = vld [vmem:[%s13718_s2 + $0x2b0] sm:$0xff] }
0x12e4   :  { %v9652_v42 = vpop.f32.mrf.mxu0  ;;  %9657 = vmatpush3.msra.mxu1 %v3383_v3  ;;  %v3465_v27 = vld [vmem:[%s13718_s2 + $0x2d0] sm:$0xff] }
0x12e5   :  { %v3362_v43 = vmul.f32 %v3361_v38, %v3361_v38  ;;  %v3353_v17 = vadd.f32 %v11959_v16, %v3345_v20  ;;  %9658 = vmatprep.subr.mxu1 %v10624_v52 }
0x12e6   :  { %9659 = vmatpush3.msra.mxu1 %v3382_v35 }
0x12e7   :  { %v3363_v24 = vsel %vm122_vm1, %v3362_v43, 0.0  ;;  %v3648_v44 = vsel %vm122_vm1, %v3353_v17, 0.0  ;;  %9660 = vmatprep.subr.mxu1 %v10624_v52 }
0x12e8   :  { %3364 = vadd.xlane.f32.xlu1 %v3363_v24  ;;  %3649 = vadd.xlane.f32.xlu0 %v3648_v44 }
0x12f0   :  { %v10445_v36 = vpop.eup %10444 }
0x12f1   :  { %v3095_v31 = vmul.f32 %v10445_v36, %v3055_v10 }
0x12f3   :  { %v3104_v45 = vmul.f32 %v11862_v62, %v3095_v31  ;;  %v3381_v62 = vld [vmem:[%s13718_s2 + $0x2a0] sm:$0xff] }
0x12f4   :  { %9661 = vmatpush3.msra.mxu1 %v3381_v62  ;;  %v8331_v31 = vld.sshfl [vmem:[%s13721_s1] sm:$0x33 pattern:$0x76325410]  ;;  %v8340_v62 = vld [vmem:[%s13720_s3 + $0x1e] ss:$0 sm:$0xff] }
0x12f5   :  { %v3113_v46 = vadd.f32 %v11868_v19, %v3104_v45  ;;  %v3380_v19 = vld [vmem:[%s13718_s2 + $0x298] sm:$0xff]  ;;  %9662 = vmatprep.subr.mxu1 %v10624_v52  ;;  %v12059_v45 = vcombine.high %v8331_v31, %v8331_v31 }
0x12f6   :  { %9663 = vmatpush3.msra.mxu1 %v3380_v19 }
0x12f7   :  { %9623 = vmatmul.mubr.msk.f32.gmra.mxu1 %vm122_vm1, %v3113_v46  ;;  %8332 = vmatprep.subr.msk.mxu1 %vm3544_vm9, %v12059_v45  ;;  %v10626_v46 = vmov 0  }
0x12f8   :  { %9664 = vmatprep.mubr.msk.f32.mxu1 %vm10625_vm3, %v10624_v52  ;;  %10325 = vset.pattern.permute.xlu1 %v10626_v46 }
0x12f9   :  { %10324 = vset.pattern.permute.xlu0 %v10626_v46 }
0x1371   :  { %v3365_v47 = vpop.xlane.xlu1 %3364  ;;  %v3650_v58 = vpop.xlane.xlu0 %3649 }
0x1372   :  { %v3366_v55 = vmul.f32 0.03125, %v3365_v47  ;;  %v3651_v49 = vmul.f32 0.03125, %v3650_v58  ;;  %v3754_v58 = vld [vmem:[%s13718_s2 + $0x320] sm:$0xff] }
0x1374   :  { %v3367_v7 = vadd.f32 1e-05, %v3366_v55  ;;  %v3652_v48 = vsub.f32 %v3353_v17, %v3651_v49  ;;  %v3753_v55 = vld [vmem:[%s13718_s2 + $0x318] sm:$0xff]  ;;  %v3755_v49 = vld [vmem:[%s13718_s2 + $0x328] sm:$0xff] }
0x1376   :  { %10446 = vrsqrt.f32 %v3367_v7  ;;  %v3653_v50 = vmul.f32 %v3652_v48, %v3652_v48 }
0x1378   :  { %v3654_v22 = vsel %vm122_vm1, %v3653_v50, 0.0 }
0x1379   :  { %3655 = vadd.xlane.f32.xlu1 %v3654_v22 }
0x1383   :  { %v10447_v9 = vpop.eup %10446 }
0x1384   :  { %v3369_v8 = vmul.f32 %v10447_v9, %v3361_v38 }
0x1386   :  { %v3374_v56 = vmul.f32 %v8327_v51, %v3369_v8 }
0x1388   :  { %v3379_v63 = vadd.f32 %v8328_v1, %v3374_v56 }
0x138a   :  { %9665 = vmatmul.mubr.msk.f32.vlgmr.msra.gmra.mxu1 %vm122_vm1, %v3379_v63 }
0x138b   :  { %3613 = vmatprep.mubr.f32.mxu1 %v10624_v52  ;;  %8333 = vmatpush1.msk.msra.mxu1 %vm3544_vm9, %v8331_v31 }
0x138c   :  { %9678 = vmatprep.subr.mxu1 %v10624_v52 }
0x13b7   :  { %v3224_v30 = vpop.f32.mrf.mxu1 }
0x13b8   :  { %v3225_v5 = vadd.f32 %v11931_v37, %v3224_v30  ;;  %v8339_v37 = vld [vmem:[%s13720_s3 + $0x1d] ss:$0 sm:$0xff] }
0x13b9   :  { %v9624_v0 = vpop.f32.mrf.mxu1 }
0x13ba   :  { %v3232_v2 = vmax.f32 %v3225_v5, 0.0 }
0x13bc   :  { %9654 = vmatmul.mubr.msk.f32.gmra.mxu0 %vm1623_vm7, %v3232_v2 }
0x13bd   :  { %9675 = vmatprep.mubr.msk.f32.mxu0 %vm10625_vm3, %v10624_v52 }
0x1402   :  { %v3656_v4 = vpop.xlane.xlu1 %3655 }
0x1403   :  { %v3657_v23 = vmul.f32 0.03125, %v3656_v4 }
0x1405   :  { %v3658_v6 = vadd.f32 1e-05, %v3657_v23 }
0x1407   :  { %10448 = vrsqrt.f32 %v3658_v6 }
0x1414   :  { %v10449_v12 = vpop.eup %10448 }
0x1415   :  { %v3660_v13 = vmul.f32 %v10449_v12, %v3652_v48 }
0x1417   :  { %v3665_v10 = vmul.f32 %v8338_v60, %v3660_v13  ;;  %v3501_v60 = vld [vmem:[%s13718_s2 + $0x2e8] sm:$0xff] }
0x1419   :  { %v3670_v53 = vadd.f32 %v8339_v37, %v3665_v10  ;;  %v3500_v10 = vld [vmem:[%s13718_s2 + $0x2e0] sm:$0xff] }
0x141b   :  { %9676 = vmatmul.mubr.msk.f32.vlgmr.msra.gmra.mxu0 %vm122_vm1, %v3670_v53 }
0x141c   :  { %3889 = vmatprep.mubr.f32.mxu0 %v10624_v52 }
0x144a   :  { %v3458_v14 = vpop.f32.mrf.mxu1 }
0x144b   :  { %v3459_v29 = vadd.f32 %v8329_v54, %v3458_v14  ;;  %v3756_v14 = vld [vmem:[%s13718_s2 + $0x330] sm:$0xff] }
0x144c   :  { %v9666_v11 = vpop.f32.mrf.mxu1 }
0x144d   :  { %v12040_v32 = vmul.f32 %v3463_v18, %v3459_v29  ;;  %v3466_v15 = vmul.f32 %v3462_v25, %v3459_v29  ;;  %v12042_v39 = vmul.f32 %v3465_v27, %v3459_v29  ;;  %v12044_v40 = vmul.f32 %v3464_v34, %v3459_v29  ;;  %v3502_v18 = vld [vmem:[%s13718_s2 + $0x2f0] sm:$0xff]  ;;  %v3499_v29 = vld [vmem:[%s13718_s2 + $0x2d8] sm:$0xff] }
0x144f   :  { %v3471_v38 = vmul.f32 %v12040_v32, %v12040_v32  ;;  %v3470_v20 = vmul.f32 %v3466_v15, %v3466_v15  ;;  %v3473_v17 = vmul.f32 %v12042_v39, %v12042_v39  ;;  %v3472_v24 = vmul.f32 %v12044_v40, %v12044_v40 }
0x1451   :  { %v3478_v42 = vsel %vm3474_vm8, %v3471_v38, 0.0  ;;  %v3475_v43 = vsel %vm3474_vm8, %v3470_v20, 0.0  ;;  %v3484_v44 = vsel %vm3474_vm8, %v3473_v17, 0.0  ;;  %v3481_v36 = vsel %vm3474_vm8, %v3472_v24, 0.0 }
0x1452   :  { %3479 = vadd.xlane.f32.xlu1 %v3478_v42  ;;  %3476 = vadd.xlane.f32.xlu0 %v3475_v43 }
0x1456   :  { %3485 = vadd.xlane.f32.xlu1 %v3484_v44  ;;  %3482 = vadd.xlane.f32.xlu0 %v3481_v36 }
0x147c   :  { %v3340_v3 = vpop.f32.mrf.mxu0 }
0x147d   :  { %v3346_v11 = vadd.f32 %v3340_v3, %v11947_v26 }
0x147e   :  { %v9655_v35 = vpop.f32.mrf.mxu0 }
0x14db   :  { %v3749_v19 = vpop.f32.mrf.mxu0  ;;  %v3480_v47 = vpop.xlane.xlu1 %3479 }
0x14dc   :  { %v3750_v7 = vadd.f32 %v8340_v62, %v3749_v19  ;;  %v3477_v48 = vpop.xlane.xlu0 %3476  ;;  %v3488_v50 = vmax.f32 %v3480_v47, 1e-24 }
0x14dd   :  { %v3487_v22 = vmax.f32 %v3477_v48, 1e-24  ;;  %v9677_v9 = vpop.f32.mrf.mxu0 }
0x14de   :  { %v12077_v51 = vmul.f32 %v3754_v58, %v3750_v7  ;;  %v12079_v8 = vmul.f32 %v3753_v55, %v3750_v7  ;;  %v12081_v1 = vmul.f32 %v3755_v49, %v3750_v7  ;;  %v12116_v25 = vmul.f32 %v3756_v14, %v3750_v7  ;;  %v8352_v14 = vld [vmem:[%s13719_s0 + $0x18] sm:$0xff] }
0x14df   :  { %10450 = vrsqrt.f32 %v3487_v22  ;;  %v3486_v59 = vpop.xlane.xlu1 %3485 }
0x14e0   :  { %v3483_v56 = vpop.xlane.xlu0 %3482  ;;  %v3762_v63 = vmul.f32 %v12077_v51, %v12077_v51  ;;  %v3761_v41 = vmul.f32 %v12079_v8, %v12079_v8  ;;  %10452 = vrsqrt.f32 %v3488_v50  ;;  %v3763_v5 = vmul.f32 %v12081_v1, %v12081_v1 }
0x14e1   :  { %v3489_v57 = vmax.f32 %v3483_v56, 1e-24  ;;  %v3490_v0 = vmax.f32 %v3486_v59, 1e-24  ;;  %v3764_v27 = vmul.f32 %v12116_v25, %v12116_v25 }
0x14e2   :  { %v3768_v61 = vsel %vm122_vm1, %v3762_v63, 0.0  ;;  %v3765_v30 = vsel %vm122_vm1, %v3761_v41, 0.0  ;;  %v3771_v2 = vsel %vm122_vm1, %v3763_v5, 0.0 }
0x14e3   :  { %3769 = vadd.xlane.f32.xlu1 %v3768_v61  ;;  %3766 = vadd.xlane.f32.xlu0 %v3765_v30  ;;  %10454 = vrsqrt.f32 %v3489_v57  ;;  %v3774_v34 = vsel %vm122_vm1, %v3764_v27, 0.0 }
0x14e4   :  { %10456 = vrsqrt.f32 %v3490_v0 }
0x14e7   :  { %3772 = vadd.xlane.f32.xlu0 %v3771_v2 }
0x14ec   :  { %v10451_v4 = vpop.eup %10450 }
0x14ed   :  { %v3495_v23 = vmul.f32 %v10451_v4, %v3466_v15  ;;  %v10453_v6 = vpop.eup %10452 }
0x14ee   :  { %v3496_v12 = vmul.f32 %v10453_v6, %v12040_v32  ;;  %v12126_v32 = vadd.f32 %v11959_v16, %v3346_v11  ;;  %v10611_v6 = vld [vmem:[%s13718_s2 + $0x28] sm:$0xff] }
0x14ef   :  { %8334 = vmatmul.mubr.msk.f32.vlgmr.msra.gmra.mxu1 %vm3474_vm8, %v3495_v23 }
0x14f0   :  { %3619 = vmatprep.mubr.f32.mxu1 %v10624_v52  ;;  %v10455_v13 = vpop.eup %10454  ;;  %v3924_v15 = vsel %vm135_vm2, %v12126_v32, 0.0 }
0x14f1   :  { %v3497_v37 = vmul.f32 %v10455_v13, %v12044_v40  ;;  %v10457_v53 = vpop.eup %10456  ;;  %v10613_v13 = vld [vmem:[%s13718_s2 + $0x18] sm:$0xff] }
0x14f2   :  { %v3498_v54 = vmul.f32 %v10457_v53, %v12042_v39  ;;  %v10615_v53 = vld [vmem:[%s13718_s2 + $0x8] sm:$0xff] }
0x14f3   :  { %8335 = vmatmul.mubr.msk.f32.gmra.mxu1 %vm3474_vm8, %v3496_v12  ;;  %v10612_v12 = vld [vmem:[%s13718_s2 + $0x20] sm:$0xff] }
0x14f4   :  { %3515 = vperm.xlu1 %10325, %v3501_v60   ;;  %3625 = vmatprep.mubr.f32.mxu1 %v10624_v52 }
0x14f7   :  { %8336 = vmatmul.mubr.msk.f32.gmra.mxu1 %vm3474_vm8, %v3497_v37 }
0x14f8   :  { %3510 = vperm.xlu1 %10325, %v3500_v10   ;;  %3631 = vmatprep.mubr.f32.mxu1 %v10624_v52  ;;  %v10614_v10 = vld [vmem:[%s13718_s2 + $0x10] sm:$0xff] }
0x14fb   :  { %8337 = vmatmul.mubr.msk.f32.gmra.mxu1 %vm3474_vm8, %v3498_v54 }
0x14fc   :  { %9686 = vmatprep.mubr.msk.f32.mxu1 %vm10625_vm3, %v10624_v52 }
0x14fd   :  { %3520 = vperm.xlu0 %10324, %v3502_v18   ;;  %v8351_v18 = vld [vmem:[%s13719_s0 + $0x10] sm:$0xff] }
0x151c   :  { %3775 = vadd.xlane.f32.xlu1 %v3774_v34 }
0x152d   :  { %3505 = vperm.xlu1 %10325, %v3499_v29  }
0x1551   :  { %3925 = vadd.xlane.f32.xlu1 %v3924_v15  ;;  %v3950_v15 = vld [vmem:[%s13718_s2 + $0x370] sm:$0xff] }
0x1552   :  { %9679 = vmatpush3.msra.mxu1 %v3950_v15 }
0x1553   :  { %9680 = vmatprep.subr.mxu1 %v10624_v52 }
0x156c   :  { %v3770_v39 = vpop.xlane.xlu1 %3769  ;;  %v3767_v38 = vpop.xlane.xlu0 %3766 }
0x156d   :  { %v3777_v17 = vmax.f32 %v3767_v38, 1e-24  ;;  %v3778_v46 = vmax.f32 %v3770_v39, 1e-24  ;;  %v3949_v39 = vld [vmem:[%s13718_s2 + $0x368] sm:$0xff] }
0x156e   :  { %9681 = vmatpush3.msra.mxu1 %v3949_v39 }
0x156f   :  { %10458 = vrsqrt.f32 %v3777_v17  ;;  %9682 = vmatprep.subr.mxu1 %v10624_v52  ;;  %v8346_v17 = vld [vmem:[%s13720_s3 + $0x1f] ss:$0 sm:$0xff] }
0x1570   :  { %v3516_v20 = vpop.permute.xlu1 %3515  ;;  %v3773_v44 = vpop.xlane.xlu0 %3772  ;;  %10460 = vrsqrt.f32 %v3778_v46 }
0x1571   :  { %v3779_v62 = vmax.f32 %v3773_v44, 1e-24  ;;  %v8347_v44 = vld [vmem:[%s13720_s3 + $0x20] ss:$0 sm:$0xff] }
0x1573   :  { %10462 = vrsqrt.f32 %v3779_v62 }
0x1574   :  { %v3511_v36 = vpop.permute.xlu1 %3510 }
0x1578   :  { %v3521_v16 = vpop.permute.xlu0 %3520 }
0x157c   :  { %v10459_v30 = vpop.eup %10458 }
0x157d   :  { %v3785_v4 = vmul.f32 %v10459_v30, %v12079_v8  ;;  %v10461_v23 = vpop.eup %10460 }
0x157e   :  { %v3786_v8 = vmul.f32 %v10461_v23, %v12077_v51 }
0x1580   :  { %v10463_v60 = vpop.eup %10462 }
0x1581   :  { %v3787_v37 = vmul.f32 %v10463_v60, %v12081_v1  ;;  %v10616_v1 = vld [vmem:[%s13718_s2] sm:$0xff]  ;;  %v4029_v60 = vld [vmem:[%s13718_s2 + $0x378] sm:$0x7] }
0x15a5   :  { %v3776_v3 = vpop.xlane.xlu1 %3775 }
0x15a6   :  { %v3780_v7 = vmax.f32 %v3776_v3, 1e-24 }
0x15a8   :  { %10464 = vrsqrt.f32 %v3780_v7 }
0x15a9   :  { %v3506_v22 = vpop.permute.xlu1 %3505 }
0x15af   :  { %v3615_v40 = vpop.f32.mrf.mxu1 }
0x15b0   :  { %v3616_v57 = vadd.f32 %v3615_v40, %v3506_v22  ;;  %v3947_v40 = vld [vmem:[%s13718_s2 + $0x358] sm:$0xff] }
0x15b1   :  { %v3617_v42 = vpop.f32.mrf.mxu1 }
0x15b2   :  { %v3618_v63 = vadd.f32 %v3617_v42, %v3506_v22  ;;  %v3638_v2 = vmax.f32 %v3616_v57, 0.0 }
0x15b3   :  { %v3621_v43 = vpop.f32.mrf.mxu1 }
0x15b4   :  { %v3622_v9 = vadd.f32 %v3621_v43, %v3511_v36  ;;  %v3639_v0 = vmax.f32 %v3618_v63, 0.0 }
0x15b5   :  { %v3623_v24 = vpop.f32.mrf.mxu1  ;;  %v10465_v51 = vpop.eup %10464 }
0x15b6   :  { %v3624_v48 = vadd.f32 %v3623_v24, %v3511_v36  ;;  %v3640_v5 = vmax.f32 %v3622_v9, 0.0  ;;  %v3788_v54 = vmul.f32 %v10465_v51, %v12116_v25  ;;  %v10619_v9 = vld [vmem:[%s13718_s2 + $0x38] sm:$0xff] }
0x15b7   :  { %v3627_v31 = vpop.f32.mrf.mxu1 }
0x15b8   :  { %v3628_v49 = vadd.f32 %v3627_v31, %v3516_v20  ;;  %v3641_v61 = vmax.f32 %v3624_v48, 0.0 }
0x15b9   :  { %v3629_v26 = vpop.f32.mrf.mxu1 }
0x15ba   :  { %v3630_v58 = vadd.f32 %v3629_v26, %v3516_v20  ;;  %v3642_v59 = vmax.f32 %v3628_v49, 0.0  ;;  %v10617_v49 = vld [vmem:[%s13720_s3] ss:$0 sm:$0xff] }
0x15bb   :  { %v3633_v35 = vpop.f32.mrf.mxu1 }
0x15bc   :  { %v3634_v19 = vadd.f32 %v3633_v35, %v3521_v16  ;;  %v3643_v41 = vmax.f32 %v3630_v58, 0.0 }
0x15bd   :  { %v3635_v47 = vpop.f32.mrf.mxu1 }
0x15be   :  { %v3636_v55 = vadd.f32 %v3635_v47, %v3521_v16  ;;  %v3644_v56 = vmax.f32 %v3634_v19, 0.0 }
0x15c0   :  { %v3645_v50 = vmax.f32 %v3636_v55, 0.0 }
0x15c2   :  { %3849 = vmatprep.subr.mxu0 %v3645_v50  ;;  %v10618_v50 = vld [vmem:[%s13718_s2 + $0x30] sm:$0xff] }
0x15c3   :  { %3850 = vmatpush1.msra.mxu0 %v3644_v56 }
0x15c4   :  { %3851 = vmatprep.subr.mxu0 %v3643_v41 }
0x15c5   :  { %3852 = vmatpush1.msra.mxu0 %v3642_v59 }
0x15c6   :  { %3853 = vmatprep.subr.mxu0 %v3641_v61 }
0x15c7   :  { %3854 = vmatpush1.msra.mxu0 %v3640_v5 }
0x15c8   :  { %3855 = vmatprep.subr.mxu0 %v3639_v0 }
0x15c9   :  { %3856 = vmatpush1.msra.mxu0 %v3638_v2 }
0x15ca   :  { %8342 = vmatmul.mubr.msk.f32.vlgmr.msra.gmra.mxu0 %vm122_vm1, %v3785_v4  ;;  %9689 = vmatprep.subr.mxu0 %v10611_v6 }
0x15cb   :  { %9690 = vmatpush3.msra.mxu0 %v10611_v6  ;;  %3895 = vmatprep.mubr.f32.mxu0 %v10624_v52 }
0x15cc   :  { %9691 = vmatprep.subr.mxu0 %v10612_v12 }
0x15cd   :  { %9692 = vmatpush3.msra.mxu0 %v10612_v12  ;;  %v8348_v12 = vld [vmem:[%s13720_s3 + $0x21] ss:$0 sm:$0xff] }
0x15ce   :  { %8343 = vmatmul.mubr.msk.f32.gmra.mxu0 %vm122_vm1, %v3786_v8  ;;  %9693 = vmatprep.subr.mxu0 %v10613_v13 }
0x15cf   :  { %3901 = vmatprep.mubr.f32.mxu0 %v10624_v52  ;;  %9694 = vmatpush3.msra.mxu0 %v10613_v13 }
0x15d0   :  { %9695 = vmatprep.subr.mxu0 %v10614_v10 }
0x15d1   :  { %9696 = vmatpush3.msra.mxu0 %v10614_v10 }
0x15d2   :  { %8344 = vmatmul.mubr.msk.f32.gmra.mxu0 %vm122_vm1, %v3787_v37  ;;  %9697 = vmatprep.subr.mxu0 %v10615_v53  ;;  %v3792_v37 = vld [vmem:[%s13718_s2 + $0x350] sm:$0xff] }
0x15d3   :  { %3907 = vmatprep.mubr.f32.mxu0 %v10624_v52  ;;  %9698 = vmatpush3.msra.mxu0 %v10615_v53  ;;  %v3790_v53 = vld [vmem:[%s13718_s2 + $0x340] sm:$0xff] }
0x15d4   :  { %9699 = vmatprep.subr.mxu0 %v10616_v1 }
0x15d5   :  { %9700 = vmatpush3.msra.mxu0 %v10616_v1 }
0x15d6   :  { %8345 = vmatmul.mubr.msk.f32.gmra.mxu0 %vm122_vm1, %v3788_v54  ;;  %9727 = vmatprep.subr.mxu0 %v10624_v52 }
0x15d7   :  { %9701 = vmatprep.mubr.msk.f32.mxu0 %vm36_vm0, %v8351_v18  ;;  %v3789_v18 = vld [vmem:[%s13718_s2 + $0x338] sm:$0xff] }
0x15da   :  { %9702 = vmatmul.mubr.msk.f32.vlgmr.msra.gmra.mxu0 %vm36_vm0, %v8352_v14  ;;  %v3926_v25 = vpop.xlane.xlu1 %3925  ;;  %v4372_v14 = vld [vmem:[%s13718_s2 + $0x90] sm:$0xff] }
0x15db   :  { %v3927_v27 = vmul.f32 0.03125, %v3926_v25  ;;  %9735 = vmatprep.mubr.msk.f32.mxu0 %vm10625_vm3, %v10624_v52  ;;  %9728 = vmatpush3.msra.mxu0 %v4372_v14  ;;  %v4371_v25 = vld [vmem:[%s13718_s2 + $0x88] sm:$0xff] }
0x15dc   :  { %9729 = vmatprep.subr.mxu0 %v10624_v52 }
0x15dd   :  { %v3928_v34 = vsub.f32 %v12126_v32, %v3927_v27  ;;  %v3948_v32 = vld [vmem:[%s13718_s2 + $0x360] sm:$0xff]  ;;  %9730 = vmatpush3.msra.mxu0 %v4371_v25 }
0x15de   :  { %9683 = vmatpush3.msra.mxu1 %v3948_v32  ;;  %9731 = vmatprep.subr.mxu0 %v10624_v52  ;;  %v4370_v27 = vld [vmem:[%s13718_s2 + $0x80] sm:$0xff] }
0x15df   :  { %v3929_v29 = vmul.f32 %v3928_v34, %v3928_v34  ;;  %9684 = vmatprep.subr.mxu1 %v10624_v52  ;;  %9732 = vmatpush3.msra.mxu0 %v4370_v27 }
0x15e0   :  { %9685 = vmatpush3.msra.mxu1 %v3947_v40  ;;  %9733 = vmatprep.subr.mxu0 %v10624_v52 }
0x15e1   :  { %v3930_v11 = vsel %vm135_vm2, %v3929_v29, 0.0  ;;  %v3791_v29 = vld [vmem:[%s13718_s2 + $0x348] sm:$0xff] }
0x15e2   :  { %3931 = vadd.xlane.f32.xlu0 %v3930_v11 }
0x166b   :  { %v3932_v38 = vpop.xlane.xlu0 %3931 }
0x166c   :  { %v3933_v20 = vmul.f32 0.03125, %v3932_v38 }
0x166e   :  { %v3934_v42 = vadd.f32 1e-05, %v3933_v20 }
0x1670   :  { %10466 = vrsqrt.f32 %v3934_v42 }
0x167d   :  { %v10467_v43 = vpop.eup %10466 }
0x167e   :  { %v3936_v24 = vmul.f32 %v10467_v43, %v3928_v34  ;;  %v4369_v34 = vld [vmem:[%s13718_s2 + $0x78] sm:$0xff] }
0x167f   :  { %9734 = vmatpush3.msra.mxu0 %v4369_v34 }
0x1680   :  { %v3941_v36 = vmul.f32 %v8346_v17, %v3936_v24  ;;  %9773 = vmatprep.subr.mxu0 %v10624_v52 }
0x1682   :  { %v3946_v31 = vadd.f32 %v8347_v44, %v3941_v36 }
0x1684   :  { %9687 = vmatmul.mubr.msk.f32.vlgmr.msra.gmra.mxu1 %vm122_vm1, %v3946_v31  ;;  %v8355_v31 = vld [vmem:[%s13720_s3 + $0x1] ss:$0 sm:$0xff] }
0x1685   :  { %4111 = vmatprep.mubr.f32.mxu1 %v10624_v52 }
0x168a   :  { %v12195_v46 = vpop.f32.mrf.mxu0 }
0x168c   :  { %v12197_v26 = vpop.f32.mrf.mxu0 }
0x168e   :  { %v12199_v16 = vpop.f32.mrf.mxu0 }
0x1690   :  { %v12201_v3 = vpop.f32.mrf.mxu0 }
0x1692   :  { %v12203_v35 = vpop.f32.mrf.mxu0 }
0x1694   :  { %v12205_v62 = vpop.f32.mrf.mxu0 }
0x1696   :  { %v12207_v19 = vpop.f32.mrf.mxu0 }
0x1698   :  { %v12209_v47 = vpop.f32.mrf.mxu0 }
0x169a   :  { %v9703_v58 = vpop.f32.mrf.mxu0 }
0x169b   :  { %v4204_v7 = vadd.f32 %v10617_v49, %v9703_v58 }
0x169c   :  { %v4198_v55 = vpop.f32.mrf.mxu0 }
0x169d   :  { %v4199_v48 = vadd.f32 %v10617_v49, %v4198_v55  ;;  %v12222_v56 = vadd.f32 %v10619_v9, %v4204_v7  ;;  %v8356_v49 = vld [vmem:[%s13720_s3 + $0x2] ss:$0 sm:$0xff] }
0x169f   :  { %v12217_v22 = vadd.f32 %v10618_v50, %v4199_v48  ;;  %v4214_v41 = vsel %vm122_vm1, %v12222_v56, 0.0 }
0x16a1   :  { %v4211_v63 = vsel %vm122_vm1, %v12217_v22, 0.0 }
0x16a2   :  { %4212 = vadd.xlane.f32.xlu1 %v4211_v63 }
0x16a6   :  { %4215 = vadd.xlane.f32.xlu1 %v4214_v41  ;;  %v4243_v41 = vmul.f32 %v8355_v31, %v10783_v21 }
0x172b   :  { %v4213_v57 = vpop.xlane.xlu1 %4212 }
0x172c   :  { %v4217_v59 = vmul.f32 0.03125, %v4213_v57  ;;  %v12292_v57 = vadd.f32 %v8356_v49, %v4243_v41 }
0x172e   :  { %v4219_v61 = vsub.f32 %v12217_v22, %v4217_v59  ;;  %v4244_v59 = vmul.f32 %v8355_v31, %v10803_v28  ;;  %v4245_v28 = vmul.f32 %v8355_v31, %v10821_v33 }
0x172f   :  { %v4216_v30 = vpop.xlane.xlu1 %4215 }
0x1730   :  { %v4218_v5 = vmul.f32 0.03125, %v4216_v30  ;;  %v4221_v0 = vmul.f32 %v4219_v61, %v4219_v61 }
0x1732   :  { %v4220_v2 = vsub.f32 %v12222_v56, %v4218_v5  ;;  %v4223_v4 = vsel %vm122_vm1, %v4221_v0, 0.0 }
0x1733   :  { %4224 = vadd.xlane.f32.xlu1 %v4223_v4  ;;  %v12303_v4 = vadd.f32 %v8356_v49, %v4244_v59 }
0x1734   :  { %v4222_v23 = vmul.f32 %v4220_v2, %v4220_v2 }
0x1736   :  { %v4226_v6 = vsel %vm122_vm1, %v4222_v23, 0.0 }
0x1737   :  { %4227 = vadd.xlane.f32.xlu1 %v4226_v6 }
0x1744   :  { %v4025_v8 = vpop.f32.mrf.mxu1 }
0x1745   :  { %v4026_v13 = vadd.f32 %v8348_v12, %v4025_v8 }
0x1746   :  { %v9688_v10 = vpop.f32.mrf.mxu1 }
0x1747   :  { %v12241_v51 = vmul.f32 %v4029_v60, %v4026_v13  ;;  %v4258_v60 = vld [vmem:[%s13718_s2 + $0x70] sm:$0xff]  ;;  %v4257_v13 = vld [vmem:[%s13718_s2 + $0x68] sm:$0xff]  ;;  %v4255_v10 = vld [vmem:[%s13718_s2 + $0x58] sm:$0xff] }
0x1748   :  { %3810 = vperm.xlu1 %10325, %v3792_v37   ;;  %v4256_v37 = vld [vmem:[%s13718_s2 + $0x60] sm:$0xff] }
0x1749   :  { %v4031_v54 = vmul.f32 %v12241_v51, %v12241_v51 }
0x174b   :  { %v4032_v1 = vsel %vm135_vm2, %v4031_v54, 0.0  ;;  %v4469_v54 = vld [vmem:[%s13718_s2 + $0xa0] sm:$0xff] }
0x174c   :  { %3800 = vperm.xlu1 %10325, %v3790_v53   ;;  %4033 = vadd.xlane.f32.xlu0 %v4032_v1  ;;  %v4470_v53 = vld [vmem:[%s13718_s2 + $0xa8] sm:$0xff]  ;;  %v4468_v1 = vld [vmem:[%s13718_s2 + $0x98] sm:$0xff] }
0x1750   :  { %3795 = vperm.xlu1 %10325, %v3789_v18  }
0x1762   :  { %3805 = vperm.xlu0 %10324, %v3791_v29  }
0x17bc   :  { %v4225_v11 = vpop.xlane.xlu1 %4224 }
0x17bd   :  { %v4229_v15 = vmul.f32 0.03125, %v4225_v11 }
0x17bf   :  { %v4231_v39 = vadd.f32 1e-05, %v4229_v15 }
0x17c0   :  { %v4228_v32 = vpop.xlane.xlu1 %4227 }
0x17c1   :  { %10468 = vrsqrt.f32 %v4231_v39  ;;  %v4230_v40 = vmul.f32 0.03125, %v4228_v32  ;;  %v8363_v39 = vld [vmem:[%s13720_s3 + $0x4] ss:$0 sm:$0xff] }
0x17c3   :  { %v4232_v38 = vadd.f32 1e-05, %v4230_v40 }
0x17c4   :  { %v3811_v20 = vpop.permute.xlu1 %3810 }
0x17c5   :  { %10470 = vrsqrt.f32 %v4232_v38  ;;  %v3910_v42 = vadd.f32 %v12207_v19, %v3811_v20  ;;  %v3912_v43 = vadd.f32 %v12209_v47, %v3811_v20 }
0x17c7   :  { %v3920_v17 = vmax.f32 %v3910_v42, 0.0  ;;  %v3921_v24 = vmax.f32 %v3912_v43, 0.0 }
0x17c8   :  { %v3801_v9 = vpop.permute.xlu1 %3800 }
0x17c9   :  { %4071 = vmatprep.subr.mxu1 %v3921_v24  ;;  %v3900_v5 = vadd.f32 %v12201_v3, %v3801_v9 }
0x17ca   :  { %4072 = vmatpush1.msra.mxu1 %v3920_v17 }
0x17cb   :  { %v3917_v3 = vmax.f32 %v3900_v5, 0.0  ;;  %v4855_v5 = vld [vmem:[%s13718_s2 + $0xb8] sm:$0xff] }
0x17ce   :  { %v10469_v44 = vpop.eup %10468 }
0x17cf   :  { %v4235_v36 = vmul.f32 %v10469_v44, %v4219_v61  ;;  %v3796_v61 = vpop.permute.xlu1 %3795 }
0x17d0   :  { %v3894_v23 = vadd.f32 %v12197_v26, %v3796_v61  ;;  %v3892_v8 = vadd.f32 %v12195_v46, %v3796_v61  ;;  %v4856_v61 = vld [vmem:[%s13718_s2 + $0xc0] sm:$0xff] }
0x17d1   :  { %v4241_v58 = vmul.f32 %v8355_v31, %v4235_v36 }
0x17d2   :  { %v10471_v55 = vpop.eup %10470  ;;  %v3915_v33 = vmax.f32 %v3894_v23, 0.0  ;;  %v3914_v26 = vmax.f32 %v3892_v8, 0.0 }
0x17d3   :  { %v12279_v7 = vadd.f32 %v8356_v49, %v4241_v58  ;;  %v4236_v19 = vmul.f32 %v10471_v55, %v4220_v2  ;;  %v3898_v2 = vadd.f32 %v12199_v16, %v3801_v9  ;;  %v12312_v16 = vadd.f32 %v8356_v49, %v4245_v28  ;;  %v8357_v55 = vld [vmem:[%s13720_s3 + $0x3] ss:$0 sm:$0xff]  ;;  %v4857_v9 = vld [vmem:[%s13718_s2 + $0xc8] sm:$0xff] }
0x17d5   :  { %9736 = vmatmul.mubr.msk.f32.vlgmr.msra.gmra.mxu0 %vm122_vm1, %v12279_v7  ;;  %v4034_v47 = vpop.xlane.xlu0 %4033  ;;  %v4242_v48 = vmul.f32 %v8355_v31, %v4236_v19 }
0x17d6   :  { %v4035_v50 = vmax.f32 %v4034_v47, 1e-24  ;;  %9738 = vmatprep.mubr.msk.f32.mxu0 %vm10625_vm3, %v10624_v52 }
0x17d7   :  { %v12285_v63 = vadd.f32 %v8356_v49, %v4242_v48  ;;  %v4858_v48 = vld [vmem:[%s13718_s2 + $0xd0] sm:$0xff] }
0x17d8   :  { %10472 = vrsqrt.f32 %v4035_v50 }
0x17d9   :  { %9739 = vmatmul.mubr.msk.f32.gmra.mxu0 %vm122_vm1, %v12285_v63 }
0x17da   :  { %9741 = vmatprep.mubr.msk.f32.mxu0 %vm10625_vm3, %v10624_v52 }
0x17dd   :  { %9742 = vmatmul.mubr.msk.f32.gmra.mxu0 %vm122_vm1, %v12292_v57  ;;  %v3806_v30 = vpop.permute.xlu0 %3805 }
0x17de   :  { %v3904_v21 = vadd.f32 %v12203_v35, %v3806_v30  ;;  %v3906_v0 = vadd.f32 %v12205_v62, %v3806_v30  ;;  %9744 = vmatprep.mubr.msk.f32.mxu0 %vm10625_vm3, %v10624_v52  ;;  %v3916_v35 = vmax.f32 %v3898_v2, 0.0 }
0x17e0   :  { %v3918_v6 = vmax.f32 %v3904_v21, 0.0  ;;  %v3919_v12 = vmax.f32 %v3906_v0, 0.0 }
0x17e1   :  { %9745 = vmatmul.mubr.msk.f32.gmra.mxu0 %vm122_vm1, %v12303_v4 }
0x17e2   :  { %4073 = vmatprep.subr.mxu1 %v3919_v12  ;;  %9747 = vmatprep.mubr.msk.f32.mxu0 %vm10625_vm3, %v10624_v52 }
0x17e3   :  { %4074 = vmatpush1.msra.mxu1 %v3918_v6 }
0x17e4   :  { %4075 = vmatprep.subr.mxu1 %v3917_v3 }
0x17e5   :  { %v10473_v62 = vpop.eup %10472  ;;  %9748 = vmatmul.mubr.msk.f32.gmra.mxu0 %vm122_vm1, %v12312_v16  ;;  %4076 = vmatpush1.msra.mxu1 %v3916_v35 }
0x17e6   :  { %v4037_v46 = vmul.f32 %v10473_v62, %v12241_v51  ;;  %4077 = vmatprep.subr.mxu1 %v3915_v33  ;;  %9783 = vmatprep.mubr.msk.f32.mxu0 %vm10625_vm3, %v10624_v52  ;;  %v4471_v51 = vld [vmem:[%s13718_s2 + $0xb0] sm:$0xff] }
0x17e7   :  { %4078 = vmatpush1.msra.mxu1 %v3914_v26 }
0x17e8   :  { %8350 = vmatmul.mubr.msk.f32.vlgmr.msra.gmra.mxu1 %vm122_vm1, %v4037_v46  ;;  %9704 = vmatprep.subr.mxu1 %v10624_v52  ;;  %v8369_v46 = vld [vmem:[%s13720_s3 + $0x5] ss:$0 sm:$0xff] }
0x17e9   :  { %9705 = vmatpush3.msra.mxu1 %v4258_v60  ;;  %9712 = vmatprep.mubr.msk.f32.mxu1 %vm10625_vm3, %v10624_v52 }
0x17ea   :  { %9706 = vmatprep.subr.mxu1 %v10624_v52 }
0x17eb   :  { %9707 = vmatpush3.msra.mxu1 %v4257_v13 }
0x17ec   :  { %9708 = vmatprep.subr.mxu1 %v10624_v52 }
0x17ed   :  { %9709 = vmatpush3.msra.mxu1 %v4256_v37 }
0x17ee   :  { %9710 = vmatprep.subr.mxu1 %v10624_v52 }
0x17ef   :  { %9711 = vmatpush3.msra.mxu1 %v4255_v10 }
0x17f0   :  { %9713 = vmatmul.mubr.msk.f32.vlgmr.msra.gmra.mxu1 %vm122_vm1, %v12279_v7  ;;  %9750 = vmatprep.subr.mxu1 %v10624_v52 }
0x17f1   :  { %9715 = vmatprep.mubr.msk.f32.mxu1 %vm10625_vm3, %v10624_v52  ;;  %9751 = vmatpush3.msra.mxu1 %v4471_v51 }
0x17f2   :  { %9752 = vmatprep.subr.mxu1 %v10624_v52 }
0x17f3   :  { %9753 = vmatpush3.msra.mxu1 %v4470_v53 }
0x17f4   :  { %9716 = vmatmul.mubr.msk.f32.gmra.mxu1 %vm122_vm1, %v12285_v63  ;;  %9754 = vmatprep.subr.mxu1 %v10624_v52 }
0x17f5   :  { %9718 = vmatprep.mubr.msk.f32.mxu1 %vm10625_vm3, %v10624_v52  ;;  %9755 = vmatpush3.msra.mxu1 %v4469_v54 }
0x17f6   :  { %9756 = vmatprep.subr.mxu1 %v10624_v52 }
0x17f7   :  { %9757 = vmatpush3.msra.mxu1 %v4468_v1 }
0x17f8   :  { %9719 = vmatmul.mubr.msk.f32.gmra.mxu1 %vm122_vm1, %v12292_v57  ;;  %9798 = vmatprep.subr.mxu1 %v10624_v52 }
0x17f9   :  { %9721 = vmatprep.mubr.msk.f32.mxu1 %vm10625_vm3, %v10624_v52 }
0x17fc   :  { %9722 = vmatmul.mubr.msk.f32.gmra.mxu1 %vm122_vm1, %v12303_v4 }
0x17fd   :  { %9724 = vmatprep.mubr.msk.f32.mxu1 %vm10625_vm3, %v10624_v52 }
0x1800   :  { %9725 = vmatmul.mubr.msk.f32.gmra.mxu1 %vm122_vm1, %v12312_v16 }
0x1801   :  { %9758 = vmatprep.mubr.msk.f32.mxu1 %vm10625_vm3, %v10624_v52 }
0x1804   :  { %9759 = vmatmul.mubr.msk.f32.vlgmr.msra.gmra.mxu1 %vm122_vm1, %v12279_v7 }
0x1805   :  { %9761 = vmatprep.mubr.msk.f32.mxu1 %vm10625_vm3, %v10624_v52 }
0x1808   :  { %9762 = vmatmul.mubr.msk.f32.gmra.mxu1 %vm122_vm1, %v12285_v63 }
0x1809   :  { %9764 = vmatprep.mubr.msk.f32.mxu1 %vm10625_vm3, %v10624_v52 }
0x180c   :  { %9765 = vmatmul.mubr.msk.f32.gmra.mxu1 %vm122_vm1, %v12292_v57 }
0x180d   :  { %9767 = vmatprep.mubr.msk.f32.mxu1 %vm10625_vm3, %v10624_v52 }
0x1810   :  { %9768 = vmatmul.mubr.msk.f32.gmra.mxu1 %vm122_vm1, %v12303_v4 }
0x1811   :  { %9770 = vmatprep.mubr.msk.f32.mxu1 %vm10625_vm3, %v10624_v52 }
0x1814   :  { %9771 = vmatmul.mubr.msk.f32.gmra.mxu1 %vm122_vm1, %v12312_v16 }
0x1815   :  { %9808 = vmatprep.mubr.msk.f32.mxu1 %vm10625_vm3, %v10624_v52 }
0x1895   :  { %v4444_v18 = vpop.f32.mrf.mxu0 }
0x1896   :  { %v4445_v58 = vadd.f32 %v8363_v39, %v4444_v18 }
0x1897   :  { %v9737_v14 = vpop.f32.mrf.mxu0 }
0x1899   :  { %v4449_v25 = vpop.f32.mrf.mxu0 }
0x189a   :  { %v4450_v44 = vadd.f32 %v8363_v39, %v4449_v25 }
0x189b   :  { %v9740_v27 = vpop.f32.mrf.mxu0 }
0x189d   :  { %v4454_v34 = vpop.f32.mrf.mxu0 }
0x189e   :  { %v4455_v43 = vadd.f32 %v8363_v39, %v4454_v34 }
0x189f   :  { %v9743_v29 = vpop.f32.mrf.mxu0 }
0x18a1   :  { %v4459_v11 = vpop.f32.mrf.mxu0 }
0x18a2   :  { %v4460_v20 = vadd.f32 %v8363_v39, %v4459_v11 }
0x18a3   :  { %v9746_v15 = vpop.f32.mrf.mxu0 }
0x18a5   :  { %v4464_v32 = vpop.f32.mrf.mxu0 }
0x18a6   :  { %v4465_v40 = vadd.f32 %v8363_v39, %v4464_v32 }
0x18a7   :  { %v9749_v38 = vpop.f32.mrf.mxu0 }
0x18a8   :  { %9774 = vmatpush3.xpose.msk.msra.mxu0 %vm122_vm1, %v4465_v40  ;;  %v12400_v42 = vpop.f32.mrf.mxu1 }
0x18a9   :  { %9775 = vmatprep.subr.mxu0 %v10624_v52 }
0x18aa   :  { %v12404_v17 = vpop.f32.mrf.mxu1 }
0x18ac   :  { %9776 = vmatpush3.xpose.msk.msra.mxu0 %vm122_vm1, %v4460_v20 }
0x18ad   :  { %9777 = vmatprep.subr.mxu0 %v10624_v52 }
0x18b0   :  { %9778 = vmatpush3.xpose.msk.msra.mxu0 %vm122_vm1, %v4455_v43  ;;  %v4345_v24 = vpop.f32.mrf.mxu1 }
0x18b1   :  { %9779 = vmatprep.subr.mxu0 %v10624_v52  ;;  %v12414_v47 = vadd.f32 %v8357_v55, %v4345_v24 }
0x18b2   :  { %v9714_v36 = vpop.f32.mrf.mxu1 }
0x18b4   :  { %9780 = vmatpush3.xpose.msk.msra.mxu0 %vm122_vm1, %v4450_v44  ;;  %v4350_v31 = vpop.f32.mrf.mxu1 }
0x18b5   :  { %9781 = vmatprep.subr.mxu0 %v10624_v52  ;;  %v12427_v59 = vadd.f32 %v8357_v55, %v4350_v31 }
0x18b6   :  { %v9717_v49 = vpop.f32.mrf.mxu1 }
0x18b8   :  { %9782 = vmatpush3.xpose.msk.msra.mxu0 %vm122_vm1, %v4445_v58  ;;  %v4355_v19 = vpop.f32.mrf.mxu1 }
0x18b9   :  { %9823 = vmatprep.subr.mxu0 %v10624_v52  ;;  %v12441_v0 = vadd.f32 %v8357_v55, %v4355_v19 }
0x18ba   :  { %v9720_v50 = vpop.f32.mrf.mxu1 }
0x18bb   :  { %9784 = vmatmul.mubr.msk.f32.vlgmr.msra.gmra.mxu0 %vm122_vm1, %v12414_v47 }
0x18bc   :  { %9824 = vmatpush3.msra.mxu0 %v4858_v48  ;;  %v4360_v41 = vpop.f32.mrf.mxu1  ;;  %9786 = vmatprep.mubr.msk.f32.mxu0 %vm10625_vm3, %v10624_v52 }
0x18bd   :  { %9825 = vmatprep.subr.mxu0 %v10624_v52  ;;  %v12449_v23 = vadd.f32 %v8357_v55, %v4360_v41 }
0x18be   :  { %v9723_v30 = vpop.f32.mrf.mxu1  ;;  %9826 = vmatpush3.msra.mxu0 %v4857_v9 }
0x18bf   :  { %9787 = vmatmul.mubr.msk.f32.gmra.mxu0 %vm122_vm1, %v12427_v59  ;;  %9827 = vmatprep.subr.mxu0 %v10624_v52  ;;  %v8391_v30 = vld [vmem:[%s13720_s3 + $0x6] ss:$0 sm:$0xff] }
0x18c0   :  { %v4365_v21 = vpop.f32.mrf.mxu1  ;;  %9789 = vmatprep.mubr.msk.f32.mxu0 %vm10625_vm3, %v10624_v52  ;;  %9828 = vmatpush3.msra.mxu0 %v4856_v61 }
0x18c1   :  { %9829 = vmatprep.subr.mxu0 %v10624_v52  ;;  %v12455_v8 = vadd.f32 %v8357_v55, %v4365_v21 }
0x18c2   :  { %v9726_v2 = vpop.f32.mrf.mxu1  ;;  %9830 = vmatpush3.msra.mxu0 %v4855_v5 }
0x18c3   :  { %9790 = vmatmul.mubr.msk.f32.gmra.mxu0 %vm122_vm1, %v12441_v0  ;;  %9869 = vmatprep.subr.mxu0 %v10624_v52 }
0x18c4   :  { %v4543_v28 = vpop.f32.mrf.mxu1  ;;  %9792 = vmatprep.mubr.msk.f32.mxu0 %vm10625_vm3, %v10624_v52 }
0x18c5   :  { %v4544_v54 = vadd.f32 %v8369_v46, %v4543_v28 }
0x18c6   :  { %v9760_v6 = vpop.f32.mrf.mxu1 }
0x18c7   :  { %9793 = vmatmul.mubr.msk.f32.gmra.mxu0 %vm122_vm1, %v12449_v23 }
0x18c8   :  { %v4548_v12 = vpop.f32.mrf.mxu1  ;;  %9795 = vmatprep.mubr.msk.f32.mxu0 %vm10625_vm3, %v10624_v52 }
0x18c9   :  { %v4549_v53 = vadd.f32 %v8369_v46, %v4548_v12 }
0x18ca   :  { %v9763_v3 = vpop.f32.mrf.mxu1 }
0x18cb   :  { %9796 = vmatmul.mubr.msk.f32.gmra.mxu0 %vm122_vm1, %v12455_v8 }
0x18cc   :  { %v4553_v35 = vpop.f32.mrf.mxu1  ;;  %9831 = vmatprep.mubr.msk.f32.mxu0 %vm10625_vm3, %v10624_v52 }
0x18cd   :  { %v4554_v51 = vadd.f32 %v8369_v46, %v4553_v35 }
0x18ce   :  { %v9766_v33 = vpop.f32.mrf.mxu1 }
0x18cf   :  { %9832 = vmatmul.mubr.msk.f32.vlgmr.msra.gmra.mxu0 %vm122_vm1, %v12279_v7 }
0x18d0   :  { %v4558_v62 = vpop.f32.mrf.mxu1  ;;  %9834 = vmatprep.mubr.msk.f32.mxu0 %vm10625_vm3, %v10624_v52 }
0x18d1   :  { %v4559_v10 = vadd.f32 %v8369_v46, %v4558_v62 }
0x18d2   :  { %v9769_v26 = vpop.f32.mrf.mxu1 }
0x18d3   :  { %9835 = vmatmul.mubr.msk.f32.gmra.mxu0 %vm122_vm1, %v12285_v63 }
0x18d4   :  { %v4563_v60 = vpop.f32.mrf.mxu1  ;;  %9837 = vmatprep.mubr.msk.f32.mxu0 %vm10625_vm3, %v10624_v52 }
0x18d5   :  { %v4564_v13 = vadd.f32 %v8369_v46, %v4563_v60 }
0x18d6   :  { %v9772_v37 = vpop.f32.mrf.mxu1 }
0x18d7   :  { %9838 = vmatmul.mubr.msk.f32.gmra.mxu0 %vm122_vm1, %v12292_v57  ;;  %9799 = vmatpush3.msk.msra.mxu1 %vm692_vm4, %v4564_v13 }
0x18d8   :  { %9800 = vmatprep.subr.mxu1 %v10624_v52  ;;  %9840 = vmatprep.mubr.msk.f32.mxu0 %vm10625_vm3, %v10624_v52 }
0x18d9   :  { %9801 = vmatpush3.msra.mxu1 %v4559_v10 }
0x18da   :  { %9802 = vmatprep.subr.mxu1 %v10624_v52 }
0x18db   :  { %9841 = vmatmul.mubr.msk.f32.gmra.mxu0 %vm122_vm1, %v12303_v4  ;;  %9803 = vmatpush3.msra.mxu1 %v4554_v51  ;;  %v4957_v51 = vld [vmem:[%s13718_s2 + $0xf0] sm:$0xff] }
0x18dc   :  { %9804 = vmatprep.subr.mxu1 %v10624_v52  ;;  %9843 = vmatprep.mubr.msk.f32.mxu0 %vm10625_vm3, %v10624_v52 }
0x18dd   :  { %9805 = vmatpush3.msra.mxu1 %v4549_v53 }
0x18de   :  { %9806 = vmatprep.subr.mxu1 %v10624_v52 }
0x18df   :  { %9844 = vmatmul.mubr.msk.f32.gmra.mxu0 %vm122_vm1, %v12312_v16  ;;  %9807 = vmatpush3.msra.mxu1 %v4544_v54 }
0x18e0   :  { %9879 = vmatprep.mubr.msk.f32.mxu0 %vm10625_vm3, %v10624_v52  ;;  %9846 = vmatprep.subr.mxu1 %v10624_v52 }
0x197b   :  { %v4663_v1 = vpop.f32.mrf.mxu0 }
0x197c   :  { %v4687_v18 = vmul.f32 0.25, %v4663_v1  ;;  %v4956_v1 = vld [vmem:[%s13718_s2 + $0xe8] sm:$0xff] }
0x197d   :  { %v9785_v14 = vpop.f32.mrf.mxu0 }
0x197e   :  { %v4692_v25 = vsel %vm645_vm5, %v4687_v18, -inf }
0x197f   :  { %4693 = vmax.xlane.f32.xlu0 %v4692_v25  ;;  %v4668_v27 = vpop.f32.mrf.mxu0  ;;  %v4954_v25 = vld [vmem:[%s13718_s2 + $0xd8] sm:$0xff] }
0x1980   :  { %v4688_v34 = vmul.f32 0.25, %v4668_v27 }
0x1981   :  { %v9788_v29 = vpop.f32.mrf.mxu0 }
0x1982   :  { %v4695_v11 = vsel %vm645_vm5, %v4688_v34, -inf }
0x1983   :  { %4696 = vmax.xlane.f32.xlu1 %v4695_v11  ;;  %v4673_v15 = vpop.f32.mrf.mxu0 }
0x1984   :  { %v4689_v39 = vmul.f32 0.25, %v4673_v15 }
0x1985   :  { %v9791_v32 = vpop.f32.mrf.mxu0 }
0x1986   :  { %v4698_v40 = vsel %vm645_vm5, %v4689_v39, -inf }
0x1987   :  { %4699 = vmax.xlane.f32.xlu0 %v4698_v40  ;;  %v4678_v38 = vpop.f32.mrf.mxu0 }
0x1988   :  { %v4690_v20 = vmul.f32 0.25, %v4678_v38 }
0x1989   :  { %v9794_v43 = vpop.f32.mrf.mxu0 }
0x198a   :  { %v4701_v24 = vsel %vm645_vm5, %v4690_v20, -inf }
0x198b   :  { %4702 = vmax.xlane.f32.xlu0 %v4701_v24  ;;  %v4683_v44 = vpop.f32.mrf.mxu0 }
0x198c   :  { %v4691_v36 = vmul.f32 0.25, %v4683_v44 }
0x198d   :  { %v9797_v31 = vpop.f32.mrf.mxu0 }
0x198e   :  { %v4704_v58 = vsel %vm658_vm6, %v4691_v36, -inf }
0x198f   :  { %4705 = vmax.xlane.f32.xlu1 %v4704_v58  ;;  %v4930_v55 = vpop.f32.mrf.mxu0 }
0x1990   :  { %v4931_v3 = vadd.f32 %v8391_v30, %v4930_v55 }
0x1991   :  { %v9833_v49 = vpop.f32.mrf.mxu0 }
0x1993   :  { %v4935_v19 = vpop.f32.mrf.mxu0 }
0x1994   :  { %v4936_v12 = vadd.f32 %v8391_v30, %v4935_v19 }
0x1995   :  { %v9836_v48 = vpop.f32.mrf.mxu0 }
0x1997   :  { %v4940_v50 = vpop.f32.mrf.mxu0 }
0x1998   :  { %v4941_v6 = vadd.f32 %v8391_v30, %v4940_v50 }
0x1999   :  { %v9839_v9 = vpop.f32.mrf.mxu0 }
0x199b   :  { %v4945_v41 = vpop.f32.mrf.mxu0 }
0x199c   :  { %v4946_v28 = vadd.f32 %v8391_v30, %v4945_v41 }
0x199d   :  { %v9842_v61 = vpop.f32.mrf.mxu0 }
0x199f   :  { %v4950_v5 = vpop.f32.mrf.mxu0 }
0x19a0   :  { %v4951_v21 = vadd.f32 %v8391_v30, %v4950_v5 }
0x19a1   :  { %v9845_v2 = vpop.f32.mrf.mxu0 }
0x19a2   :  { %9870 = vmatpush3.xpose.msk.msra.mxu0 %vm122_vm1, %v4951_v21 }
0x19a3   :  { %9871 = vmatprep.subr.mxu0 %v10624_v52 }
0x19a6   :  { %9872 = vmatpush3.xpose.msk.msra.mxu0 %vm122_vm1, %v4946_v28 }
0x19a7   :  { %9873 = vmatprep.subr.mxu0 %v10624_v52 }
0x19aa   :  { %9874 = vmatpush3.xpose.msk.msra.mxu0 %vm122_vm1, %v4941_v6 }
0x19ab   :  { %9875 = vmatprep.subr.mxu0 %v10624_v52 }
0x19ae   :  { %9876 = vmatpush3.xpose.msk.msra.mxu0 %vm122_vm1, %v4936_v12 }
0x19af   :  { %9877 = vmatprep.subr.mxu0 %v10624_v52 }
0x19b2   :  { %9878 = vmatpush3.xpose.msk.msra.mxu0 %vm122_vm1, %v4931_v3 }
0x19b3   :  { %9919 = vmatprep.subr.mxu0 %v10624_v52 }
0x19b5   :  { %9880 = vmatmul.mubr.msk.f32.vlgmr.msra.gmra.mxu0 %vm122_vm1, %v12414_v47 }
0x19b6   :  { %9882 = vmatprep.mubr.msk.f32.mxu0 %vm10625_vm3, %v10624_v52 }
0x19b9   :  { %9883 = vmatmul.mubr.msk.f32.gmra.mxu0 %vm122_vm1, %v12427_v59 }
0x19ba   :  { %9885 = vmatprep.mubr.msk.f32.mxu0 %vm10625_vm3, %v10624_v52 }
0x19bd   :  { %9886 = vmatmul.mubr.msk.f32.gmra.mxu0 %vm122_vm1, %v12441_v0 }
0x19be   :  { %9888 = vmatprep.mubr.msk.f32.mxu0 %vm10625_vm3, %v10624_v52 }
0x19c1   :  { %9889 = vmatmul.mubr.msk.f32.gmra.mxu0 %vm122_vm1, %v12449_v23 }
0x19c2   :  { %9891 = vmatprep.mubr.msk.f32.mxu0 %vm10625_vm3, %v10624_v52 }
0x19c5   :  { %9892 = vmatmul.mubr.msk.f32.gmra.mxu0 %vm122_vm1, %v12455_v8 }
0x19c6   :  { %9927 = vmatprep.mubr.msk.f32.mxu0 %vm10625_vm3, %v10624_v52 }
0x1a08   :  { %v4694_v47 = vpop.xlane.xlu0 %4693 }
0x1a09   :  { %v4707_v59 = vsub.f32 %v4687_v18, %v4694_v47  ;;  %v4955_v18 = vld [vmem:[%s13718_s2 + $0xe0] sm:$0xff] }
0x1a0b   :  { %v4712_v35 = vmul.f32 1.442695, %v4707_v59 }
0x1a0c   :  { %v4697_v33 = vpop.xlane.xlu1 %4696 }
0x1a0d   :  { %10474 = vpow2.f32 %v4712_v35  ;;  %v4708_v0 = vsub.f32 %v4688_v34, %v4697_v33 }
0x1a0f   :  { %v4714_v62 = vmul.f32 1.442695, %v4708_v0 }
0x1a10   :  { %v4700_v26 = vpop.xlane.xlu0 %4699 }
0x1a11   :  { %10476 = vpow2.f32 %v4714_v62  ;;  %v4709_v46 = vsub.f32 %v4689_v39, %v4700_v26 }
0x1a13   :  { %v4716_v23 = vmul.f32 1.442695, %v4709_v46 }
0x1a14   :  { %v4703_v60 = vpop.xlane.xlu0 %4702 }
0x1a15   :  { %10478 = vpow2.f32 %v4716_v23  ;;  %v4710_v13 = vsub.f32 %v4690_v20, %v4703_v60  ;;  %v8397_v60 = vld [vmem:[%s13720_s3 + $0x7] ss:$0 sm:$0xff] }
0x1a17   :  { %v4718_v37 = vmul.f32 1.442695, %v4710_v13 }
0x1a18   :  { %v4706_v10 = vpop.xlane.xlu1 %4705 }
0x1a19   :  { %10480 = vpow2.f32 %v4718_v37  ;;  %v4711_v8 = vsub.f32 %v4691_v36, %v4706_v10 }
0x1a1a   :  { %v10475_v53 = vpop.eup %10474 }
0x1a1b   :  { %v4720_v54 = vmul.f32 1.442695, %v4711_v8  ;;  %9809 = vmatmul.mubr.msk.f32.vlgmr.msra.gmra.mxu1 %vm645_vm5, %v10475_v53  ;;  %v4830_v49 = vsel %vm645_vm5, %v10475_v53, 0.0 }
0x1a1c   :  { %9811 = vmatprep.mubr.msk.f32.mxu1 %vm10625_vm3, %v10624_v52  ;;  %9847 = vmatpush3.msra.mxu1 %v4957_v51 }
0x1a1d   :  { %10482 = vpow2.f32 %v4720_v54  ;;  %9848 = vmatprep.subr.mxu1 %v10624_v52 }
0x1a1e   :  { %v10477_v14 = vpop.eup %10476  ;;  %9849 = vmatpush3.msra.mxu1 %v4956_v1 }
0x1a1f   :  { %9812 = vmatmul.mubr.msk.f32.gmra.mxu1 %vm645_vm5, %v10477_v14  ;;  %9850 = vmatprep.subr.mxu1 %v10624_v52  ;;  %v4833_v48 = vsel %vm645_vm5, %v10477_v14, 0.0 }
0x1a20   :  { %9814 = vmatprep.mubr.msk.f32.mxu1 %vm10625_vm3, %v10624_v52  ;;  %9851 = vmatpush3.msra.mxu1 %v4955_v18 }
0x1a21   :  { %9852 = vmatprep.subr.mxu1 %v10624_v52 }
0x1a22   :  { %v10479_v27 = vpop.eup %10478  ;;  %9853 = vmatpush3.msra.mxu1 %v4954_v25 }
0x1a23   :  { %9815 = vmatmul.mubr.msk.f32.gmra.mxu1 %vm645_vm5, %v10479_v27  ;;  %9894 = vmatprep.subr.mxu1 %v10624_v52  ;;  %v4836_v50 = vsel %vm645_vm5, %v10479_v27, 0.0 }
0x1a24   :  { %9817 = vmatprep.mubr.msk.f32.mxu1 %vm10625_vm3, %v10624_v52 }
0x1a26   :  { %v10481_v34 = vpop.eup %10480 }
0x1a27   :  { %9818 = vmatmul.mubr.msk.f32.gmra.mxu1 %vm645_vm5, %v10481_v34  ;;  %v4839_v9 = vsel %vm645_vm5, %v10481_v34, 0.0 }
0x1a28   :  { %9820 = vmatprep.mubr.msk.f32.mxu1 %vm10625_vm3, %v10624_v52 }
0x1a2a   :  { %v10483_v29 = vpop.eup %10482 }
0x1a2b   :  { %9821 = vmatmul.mubr.msk.f32.gmra.mxu1 %vm645_vm5, %v10483_v29  ;;  %v4842_v41 = vsel %vm658_vm6, %v10483_v29, 0.0 }
0x1a2c   :  { %9854 = vmatprep.mubr.msk.f32.mxu1 %vm10625_vm3, %v10624_v52 }
0x1a2f   :  { %9855 = vmatmul.mubr.msk.f32.vlgmr.msra.gmra.mxu1 %vm122_vm1, %v12279_v7 }
0x1a30   :  { %9857 = vmatprep.mubr.msk.f32.mxu1 %vm10625_vm3, %v10624_v52 }
0x1a33   :  { %9858 = vmatmul.mubr.msk.f32.gmra.mxu1 %vm122_vm1, %v12285_v63 }
0x1a34   :  { %9860 = vmatprep.mubr.msk.f32.mxu1 %vm10625_vm3, %v10624_v52 }
0x1a37   :  { %9861 = vmatmul.mubr.msk.f32.gmra.mxu1 %vm122_vm1, %v12292_v57 }
0x1a38   :  { %9863 = vmatprep.mubr.msk.f32.mxu1 %vm10625_vm3, %v10624_v52 }
0x1a3b   :  { %9864 = vmatmul.mubr.msk.f32.gmra.mxu1 %vm122_vm1, %v12303_v4 }
0x1a3c   :  { %9866 = vmatprep.mubr.msk.f32.mxu1 %vm10625_vm3, %v10624_v52 }
0x1a3f   :  { %9867 = vmatmul.mubr.msk.f32.gmra.mxu1 %vm122_vm1, %v12312_v16 }
0x1a40   :  { %9904 = vmatprep.mubr.msk.f32.mxu1 %vm10625_vm3, %v10624_v52 }
0x1a75   :  { %v5134_v7 = vpop.f32.mrf.mxu0 }
0x1a76   :  { %v12579_v63 = vmul.f32 0.25, %v5134_v7 }
0x1a77   :  { %v9881_v11 = vpop.f32.mrf.mxu0 }
0x1a78   :  { %v5163_v57 = vsel %vm645_vm5, %v12579_v63, -inf }
0x1a79   :  { %5164 = vmax.xlane.f32.xlu0 %v5163_v57  ;;  %v5139_v15 = vpop.f32.mrf.mxu0 }
0x1a7a   :  { %v12583_v39 = vmul.f32 0.25, %v5139_v15 }
0x1a7b   :  { %v9884_v4 = vpop.f32.mrf.mxu0 }
0x1a7c   :  { %v5166_v32 = vsel %vm645_vm5, %v12583_v39, -inf }
0x1a7d   :  { %5167 = vmax.xlane.f32.xlu1 %v5166_v32  ;;  %v5144_v16 = vpop.f32.mrf.mxu0 }
0x1a7e   :  { %v12587_v40 = vmul.f32 0.25, %v5144_v16 }
0x1a7f   :  { %v9887_v38 = vpop.f32.mrf.mxu0 }
0x1a80   :  { %v5169_v20 = vsel %vm645_vm5, %v12587_v40, -inf }
0x1a81   :  { %5170 = vmax.xlane.f32.xlu0 %v5169_v20  ;;  %v5149_v43 = vpop.f32.mrf.mxu0 }
0x1a82   :  { %v12591_v24 = vmul.f32 0.25, %v5149_v43 }
0x1a83   :  { %v9890_v44 = vpop.f32.mrf.mxu0 }
0x1a84   :  { %v5172_v36 = vsel %vm645_vm5, %v12591_v24, -inf }
0x1a85   :  { %5173 = vmax.xlane.f32.xlu1 %v5172_v36  ;;  %v5154_v31 = vpop.f32.mrf.mxu0 }
0x1a86   :  { %v12595_v58 = vmul.f32 0.25, %v5154_v31 }
0x1a87   :  { %v9893_v55 = vpop.f32.mrf.mxu0 }
0x1a88   :  { %v5175_v19 = vsel %vm658_vm6, %v12595_v58, -inf  ;;  %v5334_v55 = vld [vmem:[%s13718_s2 + $0x110] sm:$0xff] }
0x1a89   :  { %4831 = vadd.xlane.f32.xlu1 %v4830_v49  ;;  %5176 = vmax.xlane.f32.xlu0 %v5175_v19  ;;  %v5333_v49 = vld [vmem:[%s13718_s2 + $0x108] sm:$0xff]  ;;  %v5332_v19 = vld [vmem:[%s13718_s2 + $0x100] sm:$0xff] }
0x1a8a   :  { %9920 = vmatpush3.msra.mxu0 %v5334_v55 }
0x1a8b   :  { %9921 = vmatprep.subr.mxu0 %v10624_v52 }
0x1a8c   :  { %9922 = vmatpush3.msra.mxu0 %v5333_v49 }
0x1a8d   :  { %4834 = vadd.xlane.f32.xlu1 %v4833_v48  ;;  %9923 = vmatprep.subr.mxu0 %v10624_v52  ;;  %v5331_v48 = vld [vmem:[%s13718_s2 + $0xf8] sm:$0xff] }
0x1a8e   :  { %9924 = vmatpush3.msra.mxu0 %v5332_v19  ;;  %v10620_v19 = vld [vmem:[%s13718_s2 + $0x40] sm:$0xff] }
0x1a8f   :  { %9925 = vmatprep.subr.mxu0 %v10624_v52 }
0x1a90   :  { %9926 = vmatpush3.msra.mxu0 %v5331_v48 }
0x1a91   :  { %4837 = vadd.xlane.f32.xlu1 %v4836_v50  ;;  %9965 = vmatprep.subr.mxu0 %v10624_v52 }
0x1a95   :  { %4840 = vadd.xlane.f32.xlu1 %v4839_v9 }
0x1a99   :  { %4843 = vadd.xlane.f32.xlu1 %v4842_v41 }
0x1adb   :  { %v12604_v61 = vpop.f32.mrf.mxu1 }
0x1add   :  { %v9810_v30 = vpop.f32.mrf.mxu1 }
0x1adf   :  { %v12606_v5 = vpop.f32.mrf.mxu1 }
0x1ae1   :  { %v9813_v21 = vpop.f32.mrf.mxu1 }
0x1ae3   :  { %v12608_v2 = vpop.f32.mrf.mxu1 }
0x1ae5   :  { %v9816_v28 = vpop.f32.mrf.mxu1 }
0x1ae7   :  { %v12610_v6 = vpop.f32.mrf.mxu1 }
0x1ae9   :  { %v9819_v12 = vpop.f32.mrf.mxu1 }
0x1aeb   :  { %v12612_v3 = vpop.f32.mrf.mxu1 }
0x1aed   :  { %v9822_v47 = vpop.f32.mrf.mxu1 }
0x1aef   :  { %v5029_v59 = vpop.f32.mrf.mxu1 }
0x1af0   :  { %v5030_v27 = vadd.f32 %v8397_v60, %v5029_v59 }
0x1af1   :  { %v9856_v35 = vpop.f32.mrf.mxu1 }
0x1af3   :  { %v5034_v33 = vpop.f32.mrf.mxu1 }
0x1af4   :  { %v5035_v18 = vadd.f32 %v8397_v60, %v5034_v33 }
0x1af5   :  { %v9859_v0 = vpop.f32.mrf.mxu1 }
0x1af7   :  { %v5039_v62 = vpop.f32.mrf.mxu1 }
0x1af8   :  { %v5040_v54 = vadd.f32 %v8397_v60, %v5039_v62 }
0x1af9   :  { %v9862_v26 = vpop.f32.mrf.mxu1 }
0x1afb   :  { %v5044_v46 = vpop.f32.mrf.mxu1 }
0x1afc   :  { %v5045_v8 = vadd.f32 %v8397_v60, %v5044_v46 }
0x1afd   :  { %v9865_v23 = vpop.f32.mrf.mxu1 }
0x1aff   :  { %v5049_v13 = vpop.f32.mrf.mxu1 }
0x1b00   :  { %v5050_v37 = vadd.f32 %v8397_v60, %v5049_v13 }
0x1b01   :  { %v9868_v10 = vpop.f32.mrf.mxu1 }
0x1b02   :  { %v5165_v51 = vpop.xlane.xlu0 %5164  ;;  %9895 = vmatpush3.msk.msra.mxu1 %vm692_vm4, %v5050_v37 }
0x1b03   :  { %v5178_v53 = vsub.f32 %v12579_v63, %v5165_v51  ;;  %9896 = vmatprep.subr.mxu1 %v10624_v52 }
0x1b04   :  { %9897 = vmatpush3.msra.mxu1 %v5045_v8 }
0x1b05   :  { %v5183_v1 = vmul.f32 1.442695, %v5178_v53  ;;  %9898 = vmatprep.subr.mxu1 %v10624_v52 }
0x1b06   :  { %v5168_v14 = vpop.xlane.xlu1 %5167  ;;  %9899 = vmatpush3.msra.mxu1 %v5040_v54 }
0x1b07   :  { %10484 = vpow2.f32 %v5183_v1  ;;  %v5179_v25 = vsub.f32 %v12583_v39, %v5168_v14  ;;  %9900 = vmatprep.subr.mxu1 %v10624_v52 }
0x1b08   :  { %9901 = vmatpush3.msra.mxu1 %v5035_v18 }
0x1b09   :  { %v5185_v34 = vmul.f32 1.442695, %v5179_v25  ;;  %9902 = vmatprep.subr.mxu1 %v10624_v52 }
0x1b0a   :  { %v5171_v29 = vpop.xlane.xlu0 %5170  ;;  %9903 = vmatpush3.msra.mxu1 %v5030_v27 }
0x1b0b   :  { %10486 = vpow2.f32 %v5185_v34  ;;  %v5180_v7 = vsub.f32 %v12587_v40, %v5171_v29  ;;  %9942 = vmatprep.subr.mxu1 %v10624_v52 }
0x1b0d   :  { %v5187_v63 = vmul.f32 1.442695, %v5180_v7 }
0x1b0e   :  { %v5174_v11 = vpop.xlane.xlu1 %5173 }
0x1b0f   :  { %10488 = vpow2.f32 %v5187_v63  ;;  %v5181_v57 = vsub.f32 %v12591_v24, %v5174_v11 }
0x1b11   :  { %v5189_v15 = vmul.f32 1.442695, %v5181_v57 }
0x1b12   :  { %v5177_v39 = vpop.xlane.xlu0 %5176  ;;  %v4832_v50 = vpop.xlane.xlu1 %4831 }
0x1b13   :  { %10490 = vpow2.f32 %v5189_v15  ;;  %v5182_v4 = vsub.f32 %v12595_v58, %v5177_v39 }
0x1b14   :  { %v10485_v32 = vpop.eup %10484 }
0x1b15   :  { %v5191_v16 = vmul.f32 1.442695, %v5182_v4  ;;  %9905 = vmatmul.mubr.msk.f32.vlgmr.msra.gmra.mxu1 %vm645_vm5, %v10485_v32  ;;  %v5301_v38 = vsel %vm645_vm5, %v10485_v32, 0.0 }
0x1b16   :  { %5302 = vadd.xlane.f32.xlu0 %v5301_v38  ;;  %9907 = vmatprep.mubr.msk.f32.mxu1 %vm10625_vm3, %v10624_v52  ;;  %v4835_v41 = vpop.xlane.xlu1 %4834 }
0x1b17   :  { %10492 = vpow2.f32 %v5191_v16 }
0x1b18   :  { %v10487_v40 = vpop.eup %10486  ;;  %10494 = vrcp.f32 %v4832_v50 }
0x1b19   :  { %9908 = vmatmul.mubr.msk.f32.gmra.mxu1 %vm645_vm5, %v10487_v40  ;;  %v5304_v20 = vsel %vm645_vm5, %v10487_v40, 0.0 }
0x1b1a   :  { %5305 = vadd.xlane.f32.xlu0 %v5304_v20  ;;  %9910 = vmatprep.mubr.msk.f32.mxu1 %vm10625_vm3, %v10624_v52  ;;  %v4838_v21 = vpop.xlane.xlu1 %4837  ;;  %v8424_v20 = vld [vmem:[%s13720_s3 + $0x8] ss:$0 sm:$0xff] }
0x1b1c   :  { %v10489_v43 = vpop.eup %10488 }
0x1b1d   :  { %9911 = vmatmul.mubr.msk.f32.gmra.mxu1 %vm645_vm5, %v10489_v43  ;;  %v5307_v24 = vsel %vm645_vm5, %v10489_v43, 0.0 }
0x1b1e   :  { %5308 = vadd.xlane.f32.xlu0 %v5307_v24  ;;  %9913 = vmatprep.mubr.msk.f32.mxu1 %vm10625_vm3, %v10624_v52  ;;  %v4841_v12 = vpop.xlane.xlu1 %4840 }
0x1b20   :  { %v10491_v44 = vpop.eup %10490 }
0x1b21   :  { %9914 = vmatmul.mubr.msk.f32.gmra.mxu1 %vm645_vm5, %v10491_v44  ;;  %v5310_v36 = vsel %vm645_vm5, %v10491_v44, 0.0 }
0x1b22   :  { %5311 = vadd.xlane.f32.xlu0 %v5310_v36  ;;  %9916 = vmatprep.mubr.msk.f32.mxu1 %vm10625_vm3, %v10624_v52  ;;  %v4844_v35 = vpop.xlane.xlu1 %4843 }
0x1b24   :  { %v10493_v31 = vpop.eup %10492 }
0x1b25   :  { %9917 = vmatmul.mubr.msk.f32.gmra.mxu1 %vm645_vm5, %v10493_v31  ;;  %v5313_v58 = vsel %vm658_vm6, %v10493_v31, 0.0  ;;  %v10495_v59 = vpop.eup %10494 }
0x1b26   :  { %5314 = vadd.xlane.f32.xlu0 %v5313_v58  ;;  %9950 = vmatprep.mubr.msk.f32.mxu1 %vm10625_vm3, %v10624_v52  ;;  %v4850_v26 = vmul.f32 %v10495_v59, %v12604_v61  ;;  %v10622_v59 = vld [vmem:[%s13718_s2 + $0x50] sm:$0x7] }
0x1b9f   :  { %v5303_v9 = vpop.xlane.xlu0 %5302 }
0x1ba0   :  { %10496 = vrcp.f32 %v5303_v9 }
0x1ba1   :  { %10498 = vrcp.f32 %v4835_v41  ;;  %v10621_v41 = vld [vmem:[%s13718_s2 + $0x48] sm:$0xff] }
0x1ba3   :  { %v5306_v30 = vpop.xlane.xlu0 %5305 }
0x1ba4   :  { %10500 = vrcp.f32 %v5306_v30 }
0x1ba5   :  { %10502 = vrcp.f32 %v4838_v21 }
0x1ba7   :  { %v5309_v28 = vpop.xlane.xlu0 %5308 }
0x1ba8   :  { %10504 = vrcp.f32 %v5309_v28 }
0x1ba9   :  { %10506 = vrcp.f32 %v4841_v12 }
0x1bab   :  { %v5312_v47 = vpop.xlane.xlu0 %5311 }
0x1bac   :  { %10508 = vrcp.f32 %v5312_v47 }
0x1bad   :  { %v10497_v33 = vpop.eup %10496  ;;  %10510 = vrcp.f32 %v4844_v35 }
0x1bae   :  { %v10499_v23 = vpop.eup %10498 }
0x1baf   :  { %v5315_v0 = vpop.xlane.xlu0 %5314  ;;  %v4851_v8 = vmul.f32 %v10499_v23, %v12606_v5 }
0x1bb0   :  { %10512 = vrcp.f32 %v5315_v0 }
0x1bb1   :  { %v10501_v37 = vpop.eup %10500 }
0x1bb2   :  { %v10503_v53 = vpop.eup %10502 }
0x1bb3   :  { %v4852_v14 = vmul.f32 %v10503_v53, %v12608_v2 }
0x1bb5   :  { %v10505_v18 = vpop.eup %10504 }
0x1bb6   :  { %v10507_v27 = vpop.eup %10506 }
0x1bb7   :  { %v4853_v63 = vmul.f32 %v10507_v27, %v12610_v6 }
0x1bb9   :  { %v10509_v29 = vpop.eup %10508 }
0x1bba   :  { %v10511_v57 = vpop.eup %10510 }
0x1bbb   :  { %v4854_v32 = vmul.f32 %v10511_v57, %v12612_v3 }
0x1bbd   :  { %v10513_v39 = vpop.eup %10512 }
0x1bd5   :  { %v5277_v62 = vpop.f32.mrf.mxu1 }
0x1bd6   :  { %v5321_v46 = vmul.f32 %v10497_v33, %v5277_v62 }
0x1bd7   :  { %v9906_v60 = vpop.f32.mrf.mxu1 }
0x1bd8   :  { %v5326_v13 = vadd.f32 %v5321_v46, %v4850_v26 }
0x1bd9   :  { %v5282_v10 = vpop.f32.mrf.mxu1 }
0x1bda   :  { %v5322_v51 = vmul.f32 %v10501_v37, %v5282_v10  ;;  %9928 = vmatmul.mubr.msk.f32.vlgmr.msra.gmra.mxu0 %vm122_vm1, %v5326_v13 }
0x1bdb   :  { %v9909_v54 = vpop.f32.mrf.mxu1  ;;  %9930 = vmatprep.mubr.msk.f32.mxu0 %vm10625_vm3, %v10624_v52 }
0x1bdc   :  { %v5327_v1 = vadd.f32 %v5322_v51, %v4851_v8 }
0x1bdd   :  { %v5287_v61 = vpop.f32.mrf.mxu1 }
0x1bde   :  { %v5323_v25 = vmul.f32 %v10505_v18, %v5287_v61  ;;  %9931 = vmatmul.mubr.msk.f32.gmra.mxu0 %vm122_vm1, %v5327_v1 }
0x1bdf   :  { %v9912_v34 = vpop.f32.mrf.mxu1  ;;  %9933 = vmatprep.mubr.msk.f32.mxu0 %vm10625_vm3, %v10624_v52 }
0x1be0   :  { %v5328_v5 = vadd.f32 %v5323_v25, %v4852_v14 }
0x1be1   :  { %v5292_v7 = vpop.f32.mrf.mxu1 }
0x1be2   :  { %v5324_v11 = vmul.f32 %v10509_v29, %v5292_v7  ;;  %9934 = vmatmul.mubr.msk.f32.gmra.mxu0 %vm122_vm1, %v5328_v5 }
0x1be3   :  { %v9915_v15 = vpop.f32.mrf.mxu1  ;;  %9936 = vmatprep.mubr.msk.f32.mxu0 %vm10625_vm3, %v10624_v52 }
0x1be4   :  { %v5329_v2 = vadd.f32 %v5324_v11, %v4853_v63 }
0x1be5   :  { %v5297_v4 = vpop.f32.mrf.mxu1 }
0x1be6   :  { %v5325_v16 = vmul.f32 %v10513_v39, %v5297_v4  ;;  %9937 = vmatmul.mubr.msk.f32.gmra.mxu0 %vm122_vm1, %v5329_v2  ;;  %v5543_v39 = vld [vmem:[%s13718_s2 + $0x130] sm:$0xff]  ;;  %v5542_v4 = vld [vmem:[%s13718_s2 + $0x128] sm:$0xff] }
0x1be7   :  { %v9918_v38 = vpop.f32.mrf.mxu1  ;;  %9939 = vmatprep.mubr.msk.f32.mxu0 %vm10625_vm3, %v10624_v52  ;;  %9943 = vmatpush3.msra.mxu1 %v5543_v39 }
0x1be8   :  { %v5330_v6 = vadd.f32 %v5325_v16, %v4854_v32  ;;  %9944 = vmatprep.subr.mxu1 %v10624_v52  ;;  %v5541_v32 = vld [vmem:[%s13718_s2 + $0x120] sm:$0xff]  ;;  %v5540_v16 = vld [vmem:[%s13718_s2 + $0x118] sm:$0xff]  ;;  %v5666_v38 = vld [vmem:[%s13718_s2 + $0x170] sm:$0xff] }
0x1be9   :  { %9945 = vmatpush3.msra.mxu1 %v5542_v4  ;;  %9966 = vmatpush3.msra.mxu0 %v5666_v38 }
0x1bea   :  { %9940 = vmatmul.mubr.msk.f32.gmra.mxu0 %vm122_vm1, %v5330_v6  ;;  %9946 = vmatprep.subr.mxu1 %v10624_v52  ;;  %v5665_v6 = vld [vmem:[%s13718_s2 + $0x168] sm:$0xff] }
0x1beb   :  { %9981 = vmatprep.mubr.msk.f32.mxu0 %vm10625_vm3, %v10624_v52  ;;  %9947 = vmatpush3.msra.mxu1 %v5541_v32 }
0x1bec   :  { %9948 = vmatprep.subr.mxu1 %v10624_v52  ;;  %9967 = vmatprep.subr.mxu0 %v10624_v52 }
0x1bed   :  { %9949 = vmatpush3.msra.mxu1 %v5540_v16  ;;  %9968 = vmatpush3.msra.mxu0 %v5665_v6 }
0x1bee   :  { %9996 = vmatprep.subr.mxu1 %v10624_v52  ;;  %9969 = vmatprep.subr.mxu0 %v10624_v52 }
0x1c9a   :  { %v5416_v40 = vpop.f32.mrf.mxu0 }
0x1c9b   :  { %v5440_v3 = vadd.f32 %v5416_v40, %v12217_v22  ;;  %v5664_v40 = vld [vmem:[%s13718_s2 + $0x160] sm:$0xff] }
0x1c9c   :  { %v9929_v43 = vpop.f32.mrf.mxu0  ;;  %9970 = vmatpush3.msra.mxu0 %v5664_v40 }
0x1c9d   :  { %v12688_v24 = vadd.f32 %v8424_v20, %v5440_v3  ;;  %9971 = vmatprep.subr.mxu0 %v10624_v52  ;;  %v5662_v3 = vld [vmem:[%s13718_s2 + $0x150] sm:$0xff]  ;;  %v5661_v43 = vld [vmem:[%s13718_s2 + $0x148] sm:$0xff] }
0x1c9e   :  { %v5421_v44 = vpop.f32.mrf.mxu0 }
0x1c9f   :  { %v5441_v36 = vadd.f32 %v5421_v44, %v12222_v56  ;;  %v5457_v31 = vsel %vm122_vm1, %v12688_v24, 0.0 }
0x1ca0   :  { %5458 = vadd.xlane.f32.xlu1 %v5457_v31  ;;  %v9932_v58 = vpop.f32.mrf.mxu0 }
0x1ca1   :  { %v12693_v55 = vadd.f32 %v8424_v20, %v5441_v36 }
0x1ca2   :  { %v5426_v49 = vpop.f32.mrf.mxu0 }
0x1ca3   :  { %v5442_v48 = vadd.f32 %v10620_v19, %v5426_v49  ;;  %v5460_v22 = vsel %vm122_vm1, %v12693_v55, 0.0 }
0x1ca4   :  { %5461 = vadd.xlane.f32.xlu0 %v5460_v22  ;;  %v9935_v50 = vpop.f32.mrf.mxu0 }
0x1ca5   :  { %v12700_v9 = vadd.f32 %v8424_v20, %v5442_v48 }
0x1ca6   :  { %v5431_v56 = vpop.f32.mrf.mxu0 }
0x1ca7   :  { %v5443_v30 = vadd.f32 %v10621_v41, %v5431_v56  ;;  %v5463_v21 = vsel %vm122_vm1, %v12700_v9, 0.0 }
0x1ca8   :  { %5464 = vadd.xlane.f32.xlu1 %v5463_v21  ;;  %v9938_v28 = vpop.f32.mrf.mxu0 }
0x1ca9   :  { %v12707_v12 = vadd.f32 %v8424_v20, %v5443_v30 }
0x1caa   :  { %v5436_v47 = vpop.f32.mrf.mxu0 }
0x1cab   :  { %v5444_v35 = vadd.f32 %v10622_v59, %v5436_v47  ;;  %v5466_v33 = vsel %vm122_vm1, %v12707_v12, 0.0  ;;  %v8425_v59 = vld [vmem:[%s13720_s3 + $0x9] ss:$0 sm:$0xff] }
0x1cac   :  { %5467 = vadd.xlane.f32.xlu0 %v5466_v33  ;;  %v9941_v0 = vpop.f32.mrf.mxu0 }
0x1cad   :  { %v12714_v62 = vadd.f32 %v8424_v20, %v5444_v35  ;;  %v5663_v20 = vld [vmem:[%s13718_s2 + $0x158] sm:$0xff]  ;;  %v8426_v0 = vld [vmem:[%s13720_s3 + $0xa] ss:$0 sm:$0xff] }
0x1cae   :  { %9972 = vmatpush3.msra.mxu0 %v5663_v20 }
0x1caf   :  { %v5469_v26 = vsel %vm135_vm2, %v12714_v62, 0.0  ;;  %9973 = vmatprep.subr.mxu0 %v10624_v52 }
0x1cb0   :  { %5470 = vadd.xlane.f32.xlu1 %v5469_v26  ;;  %9974 = vmatpush3.msra.mxu0 %v5662_v3 }
0x1cb1   :  { %9975 = vmatprep.subr.mxu0 %v10624_v52 }
0x1cb2   :  { %9976 = vmatpush3.msra.mxu0 %v5661_v43 }
0x1cb3   :  { %9977 = vmatprep.subr.mxu0 %v10624_v52 }
0x1d29   :  { %v5459_v46 = vpop.xlane.xlu1 %5458 }
0x1d2a   :  { %v5472_v23 = vmul.f32 0.03125, %v5459_v46 }
0x1d2c   :  { %v12719_v60 = vsub.f32 %v12688_v24, %v5472_v23 }
0x1d2d   :  { %v5462_v13 = vpop.xlane.xlu0 %5461 }
0x1d2e   :  { %v5473_v37 = vmul.f32 0.03125, %v5462_v13  ;;  %v5482_v10 = vmul.f32 %v12719_v60, %v12719_v60 }
0x1d30   :  { %v12724_v8 = vsub.f32 %v12693_v55, %v5473_v37  ;;  %v5487_v51 = vsel %vm122_vm1, %v5482_v10, 0.0 }
0x1d31   :  { %v5465_v53 = vpop.xlane.xlu1 %5464  ;;  %5488 = vadd.xlane.f32.xlu0 %v5487_v51 }
0x1d32   :  { %v5474_v54 = vmul.f32 0.03125, %v5465_v53  ;;  %v5483_v1 = vmul.f32 %v12724_v8, %v12724_v8 }
0x1d34   :  { %v12730_v18 = vsub.f32 %v12700_v9, %v5474_v54  ;;  %v5490_v61 = vsel %vm122_vm1, %v5483_v1, 0.0 }
0x1d35   :  { %v5468_v14 = vpop.xlane.xlu0 %5467  ;;  %5491 = vadd.xlane.f32.xlu1 %v5490_v61 }
0x1d36   :  { %v5475_v25 = vmul.f32 0.03125, %v5468_v14  ;;  %v5484_v27 = vmul.f32 %v12730_v18, %v12730_v18 }
0x1d38   :  { %v12736_v34 = vsub.f32 %v12707_v12, %v5475_v25  ;;  %v5493_v5 = vsel %vm122_vm1, %v5484_v27, 0.0 }
0x1d39   :  { %5494 = vadd.xlane.f32.xlu0 %v5493_v5  ;;  %v5471_v29 = vpop.xlane.xlu1 %5470 }
0x1d3a   :  { %v5476_v7 = vmul.f32 0.03125, %v5471_v29  ;;  %v5485_v63 = vmul.f32 %v12736_v34, %v12736_v34  ;;  %v5659_v29 = vld [vmem:[%s13718_s2 + $0x138] sm:$0xff] }
0x1d3c   :  { %v12742_v11 = vsub.f32 %v12714_v62, %v5476_v7  ;;  %v5496_v57 = vsel %vm122_vm1, %v5485_v63, 0.0  ;;  %v8427_v7 = vld [vmem:[%s13720_s3 + $0xb] ss:$0 sm:$0xff] }
0x1d3d   :  { %5497 = vadd.xlane.f32.xlu1 %v5496_v57 }
0x1d3e   :  { %v5486_v15 = vmul.f32 %v12742_v11, %v12742_v11 }
0x1d40   :  { %v5499_v2 = vsel %vm135_vm2, %v5486_v15, 0.0 }
0x1d41   :  { %5500 = vadd.xlane.f32.xlu0 %v5499_v2 }
0x1dba   :  { %v5489_v44 = vpop.xlane.xlu0 %5488 }
0x1dbb   :  { %v5502_v36 = vmul.f32 0.03125, %v5489_v44 }
0x1dbd   :  { %v5507_v31 = vadd.f32 1e-05, %v5502_v36 }
0x1dbe   :  { %v5492_v58 = vpop.xlane.xlu1 %5491 }
0x1dbf   :  { %10514 = vrsqrt.f32 %v5507_v31  ;;  %v5503_v49 = vmul.f32 0.03125, %v5492_v58 }
0x1dc1   :  { %v5508_v19 = vadd.f32 1e-05, %v5503_v49 }
0x1dc2   :  { %v5495_v48 = vpop.xlane.xlu0 %5494 }
0x1dc3   :  { %10516 = vrsqrt.f32 %v5508_v19  ;;  %v5504_v22 = vmul.f32 0.03125, %v5495_v48  ;;  %v8438_v48 = vld [vmem:[%s13720_s3 + $0xc] ss:$0 sm:$0xff] }
0x1dc5   :  { %v5509_v50 = vadd.f32 1e-05, %v5504_v22 }
0x1dc6   :  { %v5498_v56 = vpop.xlane.xlu1 %5497 }
0x1dc7   :  { %10518 = vrsqrt.f32 %v5509_v50  ;;  %v5505_v41 = vmul.f32 0.03125, %v5498_v56 }
0x1dc9   :  { %v5510_v30 = vadd.f32 1e-05, %v5505_v41 }
0x1dca   :  { %v5501_v21 = vpop.xlane.xlu0 %5500 }
0x1dcb   :  { %10520 = vrsqrt.f32 %v5510_v30  ;;  %v5506_v28 = vmul.f32 0.03125, %v5501_v21 }
0x1dcc   :  { %v10515_v47 = vpop.eup %10514 }
0x1dcd   :  { %v5517_v35 = vmul.f32 %v10515_v47, %v12719_v60  ;;  %v5511_v33 = vadd.f32 1e-05, %v5506_v28 }
0x1dcf   :  { %v5526_v26 = vmul.f32 %v8425_v59, %v5517_v35  ;;  %10522 = vrsqrt.f32 %v5511_v33 }
0x1dd0   :  { %v10517_v46 = vpop.eup %10516 }
0x1dd1   :  { %v5535_v23 = vadd.f32 %v8426_v0, %v5526_v26  ;;  %v5518_v13 = vmul.f32 %v10517_v46, %v12724_v8 }
0x1dd3   :  { %9951 = vmatmul.mubr.msk.f32.vlgmr.msra.gmra.mxu1 %vm122_vm1, %v5535_v23  ;;  %v5527_v37 = vmul.f32 %v8425_v59, %v5518_v13 }
0x1dd4   :  { %v10519_v10 = vpop.eup %10518  ;;  %9953 = vmatprep.mubr.msk.f32.mxu1 %vm10625_vm3, %v10624_v52 }
0x1dd5   :  { %v5519_v60 = vmul.f32 %v10519_v10, %v12730_v18  ;;  %v5536_v51 = vadd.f32 %v8426_v0, %v5527_v37 }
0x1dd7   :  { %9954 = vmatmul.mubr.msk.f32.gmra.mxu1 %vm122_vm1, %v5536_v51  ;;  %v5528_v53 = vmul.f32 %v8425_v59, %v5519_v60 }
0x1dd8   :  { %v10521_v54 = vpop.eup %10520  ;;  %9956 = vmatprep.mubr.msk.f32.mxu1 %vm10625_vm3, %v10624_v52 }
0x1dd9   :  { %v5520_v1 = vmul.f32 %v10521_v54, %v12736_v34  ;;  %v5537_v8 = vadd.f32 %v8426_v0, %v5528_v53  ;;  %v5660_v34 = vld [vmem:[%s13718_s2 + $0x140] sm:$0xff] }
0x1dda   :  { %9978 = vmatpush3.msra.mxu0 %v5660_v34 }
0x1ddb   :  { %9957 = vmatmul.mubr.msk.f32.gmra.mxu1 %vm122_vm1, %v5537_v8  ;;  %v5529_v61 = vmul.f32 %v8425_v59, %v5520_v1  ;;  %9979 = vmatprep.subr.mxu0 %v10624_v52 }
0x1ddc   :  { %v10523_v14 = vpop.eup %10522  ;;  %9959 = vmatprep.mubr.msk.f32.mxu1 %vm10625_vm3, %v10624_v52  ;;  %9980 = vmatpush3.msra.mxu0 %v5659_v29 }
0x1ddd   :  { %v5521_v18 = vmul.f32 %v10523_v14, %v12742_v11  ;;  %v5538_v25 = vadd.f32 %v8426_v0, %v5529_v61  ;;  %10019 = vmatprep.subr.mxu0 %v10624_v52 }
0x1ddf   :  { %9960 = vmatmul.mubr.msk.f32.gmra.mxu1 %vm122_vm1, %v5538_v25  ;;  %v5530_v27 = vmul.f32 %v8425_v59, %v5521_v18 }
0x1de0   :  { %9962 = vmatprep.mubr.msk.f32.mxu1 %vm10625_vm3, %v10624_v52 }
0x1de1   :  { %v5539_v5 = vadd.f32 %v8426_v0, %v5530_v27 }
0x1de3   :  { %9963 = vmatmul.mubr.msk.f32.gmra.mxu1 %vm122_vm1, %v5539_v5 }
0x1de4   :  { %10004 = vmatprep.mubr.msk.f32.mxu1 %vm10625_vm3, %v10624_v52 }
0x1e93   :  { %v5630_v63 = vpop.f32.mrf.mxu1 }
0x1e94   :  { %v5631_v11 = vadd.f32 %v8427_v7, %v5630_v63 }
0x1e95   :  { %v9952_v57 = vpop.f32.mrf.mxu1 }
0x1e96   :  { %v5654_v15 = vmax.f32 %v5631_v11, 0.0 }
0x1e97   :  { %v5635_v2 = vpop.f32.mrf.mxu1 }
0x1e98   :  { %v5636_v39 = vadd.f32 %v8427_v7, %v5635_v2  ;;  %9982 = vmatmul.mubr.msk.f32.vlgmr.msra.gmra.mxu0 %vm1623_vm7, %v5654_v15 }
0x1e99   :  { %v9955_v4 = vpop.f32.mrf.mxu1  ;;  %9984 = vmatprep.mubr.msk.f32.mxu0 %vm10625_vm3, %v10624_v52 }
0x1e9a   :  { %v5655_v32 = vmax.f32 %v5636_v39, 0.0 }
0x1e9b   :  { %v5640_v16 = vpop.f32.mrf.mxu1 }
0x1e9c   :  { %v5641_v38 = vadd.f32 %v8427_v7, %v5640_v16  ;;  %9985 = vmatmul.mubr.msk.f32.gmra.mxu0 %vm1623_vm7, %v5655_v32 }
0x1e9d   :  { %v9958_v6 = vpop.f32.mrf.mxu1  ;;  %9987 = vmatprep.mubr.msk.f32.mxu0 %vm10625_vm3, %v10624_v52 }
0x1e9e   :  { %v5656_v40 = vmax.f32 %v5641_v38, 0.0 }
0x1e9f   :  { %v5645_v20 = vpop.f32.mrf.mxu1 }
0x1ea0   :  { %v5646_v3 = vadd.f32 %v8427_v7, %v5645_v20  ;;  %9988 = vmatmul.mubr.msk.f32.gmra.mxu0 %vm1623_vm7, %v5656_v40  ;;  %v5989_v40 = vld [vmem:[%s13718_s2 + $0x1b0] sm:$0xff] }
0x1ea1   :  { %v9961_v43 = vpop.f32.mrf.mxu1  ;;  %9990 = vmatprep.mubr.msk.f32.mxu0 %vm10625_vm3, %v10624_v52  ;;  %v5875_v20 = vld [vmem:[%s13718_s2 + $0x190] sm:$0xff]  ;;  %10020 = vmatpush3.msra.mxu0 %v5989_v40 }
0x1ea2   :  { %v5657_v44 = vmax.f32 %v5646_v3, 0.0  ;;  %9997 = vmatpush3.msra.mxu1 %v5875_v20  ;;  %10021 = vmatprep.subr.mxu0 %v10624_v52  ;;  %v5988_v3 = vld [vmem:[%s13718_s2 + $0x1a8] sm:$0xff] }
0x1ea3   :  { %v5650_v36 = vpop.f32.mrf.mxu1  ;;  %9998 = vmatprep.subr.mxu1 %v10624_v52  ;;  %v5874_v43 = vld [vmem:[%s13718_s2 + $0x188] sm:$0xff]  ;;  %10022 = vmatpush3.msra.mxu0 %v5988_v3 }
0x1ea4   :  { %v5651_v31 = vadd.f32 %v8427_v7, %v5650_v36  ;;  %9991 = vmatmul.mubr.msk.f32.gmra.mxu0 %vm1623_vm7, %v5657_v44  ;;  %9999 = vmatpush3.msra.mxu1 %v5874_v43  ;;  %v5987_v44 = vld [vmem:[%s13718_s2 + $0x1a0] sm:$0xff] }
0x1ea5   :  { %v9964_v58 = vpop.f32.mrf.mxu1  ;;  %9993 = vmatprep.mubr.msk.f32.mxu0 %vm10625_vm3, %v10624_v52  ;;  %10023 = vmatprep.subr.mxu0 %v10624_v52  ;;  %v5873_v36 = vld [vmem:[%s13718_s2 + $0x180] sm:$0xff] }
0x1ea6   :  { %v5658_v49 = vmax.f32 %v5651_v31, 0.0  ;;  %10000 = vmatprep.subr.mxu1 %v10624_v52  ;;  %10024 = vmatpush3.msra.mxu0 %v5987_v44  ;;  %v5986_v31 = vld [vmem:[%s13718_s2 + $0x198] sm:$0xff] }
0x1ea7   :  { %10001 = vmatpush3.msra.mxu1 %v5873_v36  ;;  %10025 = vmatprep.subr.mxu0 %v10624_v52  ;;  %v5872_v58 = vld [vmem:[%s13718_s2 + $0x178] sm:$0xff] }
0x1ea8   :  { %9994 = vmatmul.mubr.msk.f32.gmra.mxu0 %vm1623_vm7, %v5658_v49  ;;  %10002 = vmatprep.subr.mxu1 %v10624_v52 }
0x1ea9   :  { %10027 = vmatprep.mubr.msk.f32.mxu0 %vm10625_vm3, %v10624_v52  ;;  %10026 = vmatpush3.msra.mxu0 %v5986_v31 }
0x1eaa   :  { %10003 = vmatpush3.msra.mxu1 %v5872_v58  ;;  %10065 = vmatprep.subr.mxu0 %v10624_v52 }
0x1eab   :  { %10042 = vmatprep.subr.mxu1 %v10624_v52 }
0x1f58   :  { %v5748_v19 = vpop.f32.mrf.mxu0 }
0x1f59   :  { %v5772_v22 = vadd.f32 %v5748_v19, %v12688_v24 }
0x1f5a   :  { %v9983_v50 = vpop.f32.mrf.mxu0 }
0x1f5b   :  { %v12844_v56 = vadd.f32 %v8438_v48, %v5772_v22 }
0x1f5c   :  { %v5753_v41 = vpop.f32.mrf.mxu0 }
0x1f5d   :  { %v5773_v30 = vadd.f32 %v5753_v41, %v12693_v55  ;;  %v5789_v21 = vsel %vm122_vm1, %v12844_v56, 0.0 }
0x1f5e   :  { %5790 = vadd.xlane.f32.xlu1 %v5789_v21  ;;  %v9986_v28 = vpop.f32.mrf.mxu0 }
0x1f5f   :  { %v12849_v47 = vadd.f32 %v8438_v48, %v5773_v30 }
0x1f60   :  { %v5758_v59 = vpop.f32.mrf.mxu0 }
0x1f61   :  { %v5774_v35 = vadd.f32 %v5758_v59, %v12700_v9  ;;  %v5792_v33 = vsel %vm122_vm1, %v12849_v47, 0.0 }
0x1f62   :  { %5793 = vadd.xlane.f32.xlu0 %v5792_v33  ;;  %v9989_v24 = vpop.f32.mrf.mxu0 }
0x1f63   :  { %v12854_v0 = vadd.f32 %v8438_v48, %v5774_v35 }
0x1f64   :  { %v5763_v26 = vpop.f32.mrf.mxu0 }
0x1f65   :  { %v5775_v55 = vadd.f32 %v5763_v26, %v12707_v12  ;;  %v5795_v46 = vsel %vm122_vm1, %v12854_v0, 0.0 }
0x1f66   :  { %5796 = vadd.xlane.f32.xlu1 %v5795_v46  ;;  %v9992_v23 = vpop.f32.mrf.mxu0  ;;  %v8439_v46 = vld [vmem:[%s13720_s3 + $0xd] ss:$0 sm:$0xff] }
0x1f67   :  { %v12859_v13 = vadd.f32 %v8438_v48, %v5775_v55 }
0x1f68   :  { %v5768_v37 = vpop.f32.mrf.mxu0 }
0x1f69   :  { %v5776_v9 = vadd.f32 %v5768_v37, %v12714_v62  ;;  %v5798_v10 = vsel %vm122_vm1, %v12859_v13, 0.0 }
0x1f6a   :  { %5799 = vadd.xlane.f32.xlu0 %v5798_v10  ;;  %v9995_v60 = vpop.f32.mrf.mxu0 }
0x1f6b   :  { %v12864_v51 = vadd.f32 %v8438_v48, %v5776_v9  ;;  %v8440_v9 = vld [vmem:[%s13720_s3 + $0xe] ss:$0 sm:$0xff] }
0x1f6d   :  { %v5801_v12 = vsel %vm135_vm2, %v12864_v51, 0.0 }
0x1f6e   :  { %5802 = vadd.xlane.f32.xlu1 %v5801_v12 }
0x1fe7   :  { %v5791_v53 = vpop.xlane.xlu1 %5790 }
0x1fe8   :  { %v5804_v54 = vmul.f32 0.03125, %v5791_v53 }
0x1fea   :  { %v12869_v1 = vsub.f32 %v12844_v56, %v5804_v54  ;;  %v6088_v54 = vld [vmem:[%s13718_s2 + $0x1d0] sm:$0xff] }
0x1feb   :  { %v5794_v8 = vpop.xlane.xlu0 %5793 }
0x1fec   :  { %v5805_v61 = vmul.f32 0.03125, %v5794_v8  ;;  %v5814_v62 = vmul.f32 %v12869_v1, %v12869_v1 }
0x1fee   :  { %v12874_v14 = vsub.f32 %v12849_v47, %v5805_v61  ;;  %v5819_v18 = vsel %vm122_vm1, %v5814_v62, 0.0 }
0x1fef   :  { %v5797_v25 = vpop.xlane.xlu1 %5796  ;;  %5820 = vadd.xlane.f32.xlu0 %v5819_v18 }
0x1ff0   :  { %v5806_v27 = vmul.f32 0.03125, %v5797_v25  ;;  %v5815_v5 = vmul.f32 %v12874_v14, %v12874_v14 }
0x1ff2   :  { %v12880_v34 = vsub.f32 %v12854_v0, %v5806_v27  ;;  %v5822_v29 = vsel %vm122_vm1, %v5815_v5, 0.0 }
0x1ff3   :  { %v5800_v7 = vpop.xlane.xlu0 %5799  ;;  %5823 = vadd.xlane.f32.xlu1 %v5822_v29 }
0x1ff4   :  { %v5807_v63 = vmul.f32 0.03125, %v5800_v7  ;;  %v5816_v11 = vmul.f32 %v12880_v34, %v12880_v34 }
0x1ff6   :  { %v12886_v57 = vsub.f32 %v12859_v13, %v5807_v63  ;;  %v5825_v15 = vsel %vm122_vm1, %v5816_v11, 0.0 }
0x1ff7   :  { %5826 = vadd.xlane.f32.xlu0 %v5825_v15  ;;  %v5803_v2 = vpop.xlane.xlu1 %5802 }
0x1ff8   :  { %v5808_v39 = vmul.f32 0.03125, %v5803_v2  ;;  %v5817_v4 = vmul.f32 %v12886_v57, %v12886_v57 }
0x1ffa   :  { %v12892_v32 = vsub.f32 %v12864_v51, %v5808_v39  ;;  %v5828_v16 = vsel %vm122_vm1, %v5817_v4, 0.0 }
0x1ffb   :  { %5829 = vadd.xlane.f32.xlu1 %v5828_v16 }
0x1ffc   :  { %v5818_v38 = vmul.f32 %v12892_v32, %v12892_v32 }
0x1ffe   :  { %v5831_v6 = vsel %vm135_vm2, %v5818_v38, 0.0 }
0x1fff   :  { %5832 = vadd.xlane.f32.xlu0 %v5831_v6 }
0x2078   :  { %v5821_v49 = vpop.xlane.xlu0 %5820 }
0x2079   :  { %v5834_v19 = vmul.f32 0.03125, %v5821_v49 }
0x207b   :  { %v5839_v48 = vadd.f32 1e-05, %v5834_v19 }
0x207c   :  { %v5824_v22 = vpop.xlane.xlu1 %5823 }
0x207d   :  { %10524 = vrsqrt.f32 %v5839_v48  ;;  %v5835_v50 = vmul.f32 0.03125, %v5824_v22  ;;  %v8447_v48 = vld [vmem:[%s13720_s3 + $0x10] ss:$0 sm:$0xff] }
0x207f   :  { %v5840_v41 = vadd.f32 1e-05, %v5835_v50 }
0x2080   :  { %v5827_v30 = vpop.xlane.xlu0 %5826 }
0x2081   :  { %10526 = vrsqrt.f32 %v5840_v41  ;;  %v5836_v21 = vmul.f32 0.03125, %v5827_v30 }
0x2083   :  { %v5841_v28 = vadd.f32 1e-05, %v5836_v21 }
0x2084   :  { %v5830_v59 = vpop.xlane.xlu1 %5829 }
0x2085   :  { %10528 = vrsqrt.f32 %v5841_v28  ;;  %v5837_v35 = vmul.f32 0.03125, %v5830_v59 }
0x2087   :  { %v5842_v33 = vadd.f32 1e-05, %v5837_v35 }
0x2088   :  { %v5833_v24 = vpop.xlane.xlu0 %5832 }
0x2089   :  { %10530 = vrsqrt.f32 %v5842_v33  ;;  %v5838_v26 = vmul.f32 0.03125, %v5833_v24 }
0x208a   :  { %v10525_v55 = vpop.eup %10524 }
0x208b   :  { %v5849_v23 = vmul.f32 %v10525_v55, %v12869_v1  ;;  %v5843_v37 = vadd.f32 1e-05, %v5838_v26 }
0x208d   :  { %v5858_v10 = vmul.f32 %v8439_v46, %v5849_v23  ;;  %10532 = vrsqrt.f32 %v5843_v37 }
0x208e   :  { %v10527_v60 = vpop.eup %10526 }
0x208f   :  { %v12937_v12 = vadd.f32 %v8440_v9, %v5858_v10  ;;  %v5850_v53 = vmul.f32 %v10527_v60, %v12874_v14  ;;  %v6087_v14 = vld [vmem:[%s13718_s2 + $0x1c8] sm:$0xff] }
0x2091   :  { %10005 = vmatmul.mubr.msk.f32.vlgmr.msra.gmra.mxu1 %vm122_vm1, %v12937_v12  ;;  %10028 = vmatmul.mubr.msk.f32.vlgmr.msra.gmra.mxu0 %vm122_vm1, %v12937_v12  ;;  %v5859_v1 = vmul.f32 %v8439_v46, %v5850_v53 }
0x2092   :  { %v10529_v8 = vpop.eup %10528  ;;  %10007 = vmatprep.mubr.msk.f32.mxu1 %vm10625_vm3, %v10624_v52  ;;  %10030 = vmatprep.mubr.msk.f32.mxu0 %vm10625_vm3, %v10624_v52 }
0x2093   :  { %v5851_v61 = vmul.f32 %v10529_v8, %v12880_v34  ;;  %v12952_v62 = vadd.f32 %v8440_v9, %v5859_v1  ;;  %10043 = vmatpush3.msra.mxu1 %v6088_v54  ;;  %v6086_v34 = vld [vmem:[%s13718_s2 + $0x1c0] sm:$0xff]  ;;  %v8453_v54 = vld [vmem:[%s13720_s3 + $0x11] ss:$0 sm:$0xff] }
0x2094   :  { %10044 = vmatprep.subr.mxu1 %v10624_v52  ;;  %v6475_v8 = vld [vmem:[%s13718_s2 + $0x1f0] sm:$0xff] }
0x2095   :  { %10008 = vmatmul.mubr.msk.f32.gmra.mxu1 %vm122_vm1, %v12952_v62  ;;  %10031 = vmatmul.mubr.msk.f32.gmra.mxu0 %vm122_vm1, %v12952_v62  ;;  %v5860_v18 = vmul.f32 %v8439_v46, %v5851_v61 }
0x2096   :  { %v10531_v25 = vpop.eup %10530  ;;  %10010 = vmatprep.mubr.msk.f32.mxu1 %vm10625_vm3, %v10624_v52  ;;  %10033 = vmatprep.mubr.msk.f32.mxu0 %vm10625_vm3, %v10624_v52 }
0x2097   :  { %v5852_v27 = vmul.f32 %v10531_v25, %v12886_v57  ;;  %v12967_v5 = vadd.f32 %v8440_v9, %v5860_v18  ;;  %10045 = vmatpush3.msra.mxu1 %v6087_v14  ;;  %v6085_v57 = vld [vmem:[%s13718_s2 + $0x1b8] sm:$0xff] }
0x2098   :  { %10046 = vmatprep.subr.mxu1 %v10624_v52 }
0x2099   :  { %10011 = vmatmul.mubr.msk.f32.gmra.mxu1 %vm122_vm1, %v12967_v5  ;;  %10034 = vmatmul.mubr.msk.f32.gmra.mxu0 %vm122_vm1, %v12967_v5  ;;  %v5861_v29 = vmul.f32 %v8439_v46, %v5852_v27  ;;  %v6474_v27 = vld [vmem:[%s13718_s2 + $0x1e8] sm:$0xff] }
0x209a   :  { %v10533_v7 = vpop.eup %10532  ;;  %10013 = vmatprep.mubr.msk.f32.mxu1 %vm10625_vm3, %v10624_v52  ;;  %10036 = vmatprep.mubr.msk.f32.mxu0 %vm10625_vm3, %v10624_v52 }
0x209b   :  { %v5853_v63 = vmul.f32 %v10533_v7, %v12892_v32  ;;  %v12982_v11 = vadd.f32 %v8440_v9, %v5861_v29  ;;  %10047 = vmatpush3.msra.mxu1 %v6086_v34 }
0x209c   :  { %10048 = vmatprep.subr.mxu1 %v10624_v52 }
0x209d   :  { %10014 = vmatmul.mubr.msk.f32.gmra.mxu1 %vm122_vm1, %v12982_v11  ;;  %10037 = vmatmul.mubr.msk.f32.gmra.mxu0 %vm122_vm1, %v12982_v11  ;;  %v5862_v15 = vmul.f32 %v8439_v46, %v5853_v63 }
0x209e   :  { %10016 = vmatprep.mubr.msk.f32.mxu1 %vm10625_vm3, %v10624_v52  ;;  %10039 = vmatprep.mubr.msk.f32.mxu0 %vm10625_vm3, %v10624_v52 }
0x209f   :  { %v12996_v2 = vadd.f32 %v8440_v9, %v5862_v15  ;;  %10049 = vmatpush3.msra.mxu1 %v6085_v57  ;;  %v8441_v9 = vld [vmem:[%s13720_s3 + $0xf] ss:$0 sm:$0xff]  ;;  %v6473_v57 = vld [vmem:[%s13718_s2 + $0x1e0] sm:$0xff] }
0x20a0   :  { %10090 = vmatprep.subr.mxu1 %v10624_v52 }
0x20a1   :  { %10017 = vmatmul.mubr.msk.f32.gmra.mxu1 %vm122_vm1, %v12996_v2  ;;  %10040 = vmatmul.mubr.msk.f32.gmra.mxu0 %vm122_vm1, %v12996_v2 }
0x20a2   :  { %10050 = vmatprep.mubr.msk.f32.mxu1 %vm10625_vm3, %v10624_v52  ;;  %10075 = vmatprep.mubr.msk.f32.mxu0 %vm10625_vm3, %v10624_v52 }
0x20a5   :  { %10051 = vmatmul.mubr.msk.f32.vlgmr.msra.gmra.mxu1 %vm122_vm1, %v12937_v12 }
0x20a6   :  { %10053 = vmatprep.mubr.msk.f32.mxu1 %vm10625_vm3, %v10624_v52 }
0x20a9   :  { %10054 = vmatmul.mubr.msk.f32.gmra.mxu1 %vm122_vm1, %v12952_v62 }
0x20aa   :  { %10056 = vmatprep.mubr.msk.f32.mxu1 %vm10625_vm3, %v10624_v52 }
0x20ad   :  { %10057 = vmatmul.mubr.msk.f32.gmra.mxu1 %vm122_vm1, %v12967_v5 }
0x20ae   :  { %10059 = vmatprep.mubr.msk.f32.mxu1 %vm10625_vm3, %v10624_v52 }
0x20b1   :  { %10060 = vmatmul.mubr.msk.f32.gmra.mxu1 %vm122_vm1, %v12982_v11 }
0x20b2   :  { %10062 = vmatprep.mubr.msk.f32.mxu1 %vm10625_vm3, %v10624_v52 }
0x20b5   :  { %10063 = vmatmul.mubr.msk.f32.gmra.mxu1 %vm122_vm1, %v12996_v2 }
0x20b6   :  { %10100 = vmatprep.mubr.msk.f32.mxu1 %vm10625_vm3, %v10624_v52 }
0x2151   :  { %v5962_v39 = vpop.f32.mrf.mxu1  ;;  %v6061_v4 = vpop.f32.mrf.mxu0 }
0x2152   :  { %v6062_v10 = vadd.f32 %v8447_v48, %v6061_v4  ;;  %v13046_v53 = vadd.f32 %v8441_v9, %v5962_v39  ;;  %v6472_v39 = vld [vmem:[%s13718_s2 + $0x1d8] sm:$0xff] }
0x2153   :  { %v10006_v32 = vpop.f32.mrf.mxu1  ;;  %v10029_v16 = vpop.f32.mrf.mxu0 }
0x2155   :  { %v5967_v38 = vpop.f32.mrf.mxu1  ;;  %v6066_v6 = vpop.f32.mrf.mxu0 }
0x2156   :  { %v6067_v46 = vadd.f32 %v8447_v48, %v6066_v6  ;;  %v13058_v25 = vadd.f32 %v8441_v9, %v5967_v38 }
0x2157   :  { %v10009_v40 = vpop.f32.mrf.mxu1  ;;  %v10032_v20 = vpop.f32.mrf.mxu0 }
0x2159   :  { %v5972_v3 = vpop.f32.mrf.mxu1  ;;  %v6071_v43 = vpop.f32.mrf.mxu0 }
0x215a   :  { %v6072_v24 = vadd.f32 %v8447_v48, %v6071_v43  ;;  %v13070_v7 = vadd.f32 %v8441_v9, %v5972_v3 }
0x215b   :  { %v10012_v44 = vpop.f32.mrf.mxu1  ;;  %v10035_v36 = vpop.f32.mrf.mxu0 }
0x215d   :  { %v13027_v31 = vpop.f32.mrf.mxu1  ;;  %v6076_v58 = vpop.f32.mrf.mxu0 }
0x215e   :  { %v6077_v59 = vadd.f32 %v8447_v48, %v6076_v58  ;;  %v13085_v15 = vadd.f32 %v8441_v9, %v13027_v31 }
0x215f   :  { %v10015_v49 = vpop.f32.mrf.mxu1  ;;  %v10038_v19 = vpop.f32.mrf.mxu0 }
0x2161   :  { %v13032_v22 = vpop.f32.mrf.mxu1  ;;  %v6081_v50 = vpop.f32.mrf.mxu0 }
0x2162   :  { %v6082_v41 = vadd.f32 %v8447_v48, %v6081_v50  ;;  %v13097_v4 = vadd.f32 %v8441_v9, %v13032_v22 }
0x2163   :  { %v10018_v30 = vpop.f32.mrf.mxu1  ;;  %v10041_v21 = vpop.f32.mrf.mxu0 }
0x2164   :  { %10066 = vmatpush3.xpose.msk.msra.mxu0 %vm122_vm1, %v6082_v41 }
0x2165   :  { %v6160_v28 = vpop.f32.mrf.mxu1  ;;  %10067 = vmatprep.subr.mxu0 %v10624_v52 }
0x2166   :  { %v6161_v63 = vadd.f32 %v8453_v54, %v6160_v28 }
0x2167   :  { %v10052_v35 = vpop.f32.mrf.mxu1 }
0x2168   :  { %10068 = vmatpush3.xpose.msk.msra.mxu0 %vm122_vm1, %v6077_v59 }
0x2169   :  { %v6165_v33 = vpop.f32.mrf.mxu1  ;;  %10069 = vmatprep.subr.mxu0 %v10624_v52 }
0x216a   :  { %v6166_v29 = vadd.f32 %v8453_v54, %v6165_v33 }
0x216b   :  { %v10055_v26 = vpop.f32.mrf.mxu1 }
0x216c   :  { %10070 = vmatpush3.xpose.msk.msra.mxu0 %vm122_vm1, %v6072_v24 }
0x216d   :  { %v6170_v55 = vpop.f32.mrf.mxu1  ;;  %10071 = vmatprep.subr.mxu0 %v10624_v52 }
0x216e   :  { %v6171_v34 = vadd.f32 %v8453_v54, %v6170_v55 }
0x216f   :  { %v10058_v23 = vpop.f32.mrf.mxu1 }
0x2170   :  { %10072 = vmatpush3.xpose.msk.msra.mxu0 %vm122_vm1, %v6067_v46  ;;  %v8475_v23 = vld [vmem:[%s13720_s3 + $0x12] ss:$0 sm:$0xff] }
0x2171   :  { %v6175_v37 = vpop.f32.mrf.mxu1  ;;  %10073 = vmatprep.subr.mxu0 %v10624_v52 }
0x2172   :  { %v6176_v18 = vadd.f32 %v8453_v54, %v6175_v37 }
0x2173   :  { %v10061_v60 = vpop.f32.mrf.mxu1 }
0x2174   :  { %10074 = vmatpush3.xpose.msk.msra.mxu0 %vm122_vm1, %v6062_v10 }
0x2175   :  { %v6180_v1 = vpop.f32.mrf.mxu1  ;;  %10115 = vmatprep.subr.mxu0 %v10624_v52 }
0x2176   :  { %v6181_v61 = vadd.f32 %v8453_v54, %v6180_v1 }
0x2177   :  { %v10064_v14 = vpop.f32.mrf.mxu1  ;;  %10076 = vmatmul.mubr.msk.f32.vlgmr.msra.gmra.mxu0 %vm122_vm1, %v13046_v53 }
0x2178   :  { %10091 = vmatpush3.msk.msra.mxu1 %vm692_vm4, %v6181_v61  ;;  %10116 = vmatpush3.msra.mxu0 %v6475_v8 }
0x2179   :  { %10092 = vmatprep.subr.mxu1 %v10624_v52  ;;  %10078 = vmatprep.mubr.msk.f32.mxu0 %vm10625_vm3, %v10624_v52 }
0x217a   :  { %10093 = vmatpush3.msra.mxu1 %v6176_v18  ;;  %10117 = vmatprep.subr.mxu0 %v10624_v52 }
0x217b   :  { %10079 = vmatmul.mubr.msk.f32.gmra.mxu0 %vm122_vm1, %v13058_v25  ;;  %10094 = vmatprep.subr.mxu1 %v10624_v52 }
0x217c   :  { %10095 = vmatpush3.msra.mxu1 %v6171_v34  ;;  %10118 = vmatpush3.msra.mxu0 %v6474_v27 }
0x217d   :  { %10096 = vmatprep.subr.mxu1 %v10624_v52  ;;  %10081 = vmatprep.mubr.msk.f32.mxu0 %vm10625_vm3, %v10624_v52 }
0x217e   :  { %10097 = vmatpush3.msra.mxu1 %v6166_v29  ;;  %10119 = vmatprep.subr.mxu0 %v10624_v52 }
0x217f   :  { %10082 = vmatmul.mubr.msk.f32.gmra.mxu0 %vm122_vm1, %v13070_v7  ;;  %10098 = vmatprep.subr.mxu1 %v10624_v52 }
0x2180   :  { %10099 = vmatpush3.msra.mxu1 %v6161_v63  ;;  %10084 = vmatprep.mubr.msk.f32.mxu0 %vm10625_vm3, %v10624_v52 }
0x2181   :  { %10120 = vmatpush3.msra.mxu0 %v6473_v57  ;;  %10138 = vmatprep.subr.mxu1 %v10624_v52 }
0x2182   :  { %10121 = vmatprep.subr.mxu0 %v10624_v52 }
0x2183   :  { %10085 = vmatmul.mubr.msk.f32.gmra.mxu0 %vm122_vm1, %v13085_v15 }
0x2184   :  { %10087 = vmatprep.mubr.msk.f32.mxu0 %vm10625_vm3, %v10624_v52  ;;  %10122 = vmatpush3.msra.mxu0 %v6472_v39 }
0x2185   :  { %10161 = vmatprep.subr.mxu0 %v10624_v52 }
0x2187   :  { %10088 = vmatmul.mubr.msk.f32.gmra.mxu0 %vm122_vm1, %v13097_v4 }
0x2188   :  { %10123 = vmatprep.mubr.msk.f32.mxu0 %vm10625_vm3, %v10624_v52 }
0x218b   :  { %10124 = vmatmul.mubr.msk.f32.vlgmr.msra.gmra.mxu0 %vm122_vm1, %v12937_v12 }
0x218c   :  { %10126 = vmatprep.mubr.msk.f32.mxu0 %vm10625_vm3, %v10624_v52 }
0x218f   :  { %10127 = vmatmul.mubr.msk.f32.gmra.mxu0 %vm122_vm1, %v12952_v62 }
0x2190   :  { %10129 = vmatprep.mubr.msk.f32.mxu0 %vm10625_vm3, %v10624_v52 }
0x2193   :  { %10130 = vmatmul.mubr.msk.f32.gmra.mxu0 %vm122_vm1, %v12967_v5 }
0x2194   :  { %10132 = vmatprep.mubr.msk.f32.mxu0 %vm10625_vm3, %v10624_v52 }
0x2197   :  { %10133 = vmatmul.mubr.msk.f32.gmra.mxu0 %vm122_vm1, %v12982_v11 }
0x2198   :  { %10135 = vmatprep.mubr.msk.f32.mxu0 %vm10625_vm3, %v10624_v52 }
0x219b   :  { %10136 = vmatmul.mubr.msk.f32.gmra.mxu0 %vm122_vm1, %v12996_v2 }
0x219c   :  { %10171 = vmatprep.mubr.msk.f32.mxu0 %vm10625_vm3, %v10624_v52 }
0x2237   :  { %v6280_v32 = vpop.f32.mrf.mxu0 }
0x2238   :  { %v6304_v16 = vmul.f32 0.25, %v6280_v32  ;;  %v6574_v32 = vld [vmem:[%s13718_s2 + $0x210] sm:$0xff] }
0x2239   :  { %v10077_v38 = vpop.f32.mrf.mxu0 }
0x223a   :  { %v6309_v6 = vsel %vm645_vm5, %v6304_v16, -inf }
0x223b   :  { %6310 = vmax.xlane.f32.xlu1 %v6309_v6  ;;  %v6285_v40 = vpop.f32.mrf.mxu0  ;;  %v6573_v6 = vld [vmem:[%s13718_s2 + $0x208] sm:$0xff] }
0x223c   :  { %v6305_v20 = vmul.f32 0.25, %v6285_v40  ;;  %v6572_v40 = vld [vmem:[%s13718_s2 + $0x200] sm:$0xff] }
0x223d   :  { %v10080_v3 = vpop.f32.mrf.mxu0 }
0x223e   :  { %v6312_v43 = vsel %vm645_vm5, %v6305_v20, -inf  ;;  %v6571_v3 = vld [vmem:[%s13718_s2 + $0x1f8] sm:$0xff] }
0x223f   :  { %6313 = vmax.xlane.f32.xlu0 %v6312_v43  ;;  %v6290_v44 = vpop.f32.mrf.mxu0 }
0x2240   :  { %v6306_v36 = vmul.f32 0.25, %v6290_v44 }
0x2241   :  { %v10083_v31 = vpop.f32.mrf.mxu0 }
0x2242   :  { %v6315_v58 = vsel %vm645_vm5, %v6306_v36, -inf }
0x2243   :  { %6316 = vmax.xlane.f32.xlu1 %v6315_v58  ;;  %v6295_v49 = vpop.f32.mrf.mxu0 }
0x2244   :  { %v6307_v19 = vmul.f32 0.25, %v6295_v49 }
0x2245   :  { %v10086_v48 = vpop.f32.mrf.mxu0 }
0x2246   :  { %v6318_v22 = vsel %vm645_vm5, %v6307_v19, -inf }
0x2247   :  { %6319 = vmax.xlane.f32.xlu0 %v6318_v22  ;;  %v6300_v50 = vpop.f32.mrf.mxu0 }
0x2248   :  { %v6308_v41 = vmul.f32 0.25, %v6300_v50 }
0x2249   :  { %v10089_v30 = vpop.f32.mrf.mxu0 }
0x224a   :  { %v6321_v21 = vsel %vm658_vm6, %v6308_v41, -inf }
0x224b   :  { %6322 = vmax.xlane.f32.xlu1 %v6321_v21  ;;  %v6547_v28 = vpop.f32.mrf.mxu0 }
0x224c   :  { %v6548_v8 = vadd.f32 %v8475_v23, %v6547_v28 }
0x224d   :  { %v10125_v59 = vpop.f32.mrf.mxu0 }
0x224f   :  { %v6552_v35 = vpop.f32.mrf.mxu0 }
0x2250   :  { %v6553_v1 = vadd.f32 %v8475_v23, %v6552_v35 }
0x2251   :  { %v10128_v33 = vpop.f32.mrf.mxu0 }
0x2253   :  { %v6557_v24 = vpop.f32.mrf.mxu0 }
0x2254   :  { %v6558_v54 = vadd.f32 %v8475_v23, %v6557_v24 }
0x2255   :  { %v10131_v26 = vpop.f32.mrf.mxu0 }
0x2257   :  { %v6562_v55 = vpop.f32.mrf.mxu0 }
0x2258   :  { %v6563_v60 = vadd.f32 %v8475_v23, %v6562_v55 }
0x2259   :  { %v10134_v46 = vpop.f32.mrf.mxu0 }
0x225b   :  { %v6567_v37 = vpop.f32.mrf.mxu0 }
0x225c   :  { %v6568_v9 = vadd.f32 %v8475_v23, %v6567_v37 }
0x225d   :  { %v10137_v10 = vpop.f32.mrf.mxu0 }
0x225e   :  { %10162 = vmatpush3.xpose.msk.msra.mxu0 %vm122_vm1, %v6568_v9 }
0x225f   :  { %10163 = vmatprep.subr.mxu0 %v10624_v52 }
0x2262   :  { %10164 = vmatpush3.xpose.msk.msra.mxu0 %vm122_vm1, %v6563_v60 }
0x2263   :  { %10165 = vmatprep.subr.mxu0 %v10624_v52 }
0x2266   :  { %10166 = vmatpush3.xpose.msk.msra.mxu0 %vm122_vm1, %v6558_v54 }
0x2267   :  { %10167 = vmatprep.subr.mxu0 %v10624_v52 }
0x226a   :  { %10168 = vmatpush3.xpose.msk.msra.mxu0 %vm122_vm1, %v6553_v1 }
0x226b   :  { %10169 = vmatprep.subr.mxu0 %v10624_v52 }
0x226e   :  { %10170 = vmatpush3.xpose.msk.msra.mxu0 %vm122_vm1, %v6548_v8 }
0x226f   :  { %10211 = vmatprep.subr.mxu0 %v10624_v52 }
0x2271   :  { %10172 = vmatmul.mubr.msk.f32.vlgmr.msra.gmra.mxu0 %vm122_vm1, %v13046_v53 }
0x2272   :  { %10174 = vmatprep.mubr.msk.f32.mxu0 %vm10625_vm3, %v10624_v52 }
0x2275   :  { %10175 = vmatmul.mubr.msk.f32.gmra.mxu0 %vm122_vm1, %v13058_v25 }
0x2276   :  { %10177 = vmatprep.mubr.msk.f32.mxu0 %vm10625_vm3, %v10624_v52 }
0x2279   :  { %10178 = vmatmul.mubr.msk.f32.gmra.mxu0 %vm122_vm1, %v13070_v7 }
0x227a   :  { %10180 = vmatprep.mubr.msk.f32.mxu0 %vm10625_vm3, %v10624_v52 }
0x227d   :  { %10181 = vmatmul.mubr.msk.f32.gmra.mxu0 %vm122_vm1, %v13085_v15 }
0x227e   :  { %10183 = vmatprep.mubr.msk.f32.mxu0 %vm10625_vm3, %v10624_v52 }
0x2281   :  { %10184 = vmatmul.mubr.msk.f32.gmra.mxu0 %vm122_vm1, %v13097_v4 }
0x2282   :  { %10219 = vmatprep.mubr.msk.f32.mxu0 %vm10625_vm3, %v10624_v52 }
0x22c4   :  { %v6311_v53 = vpop.xlane.xlu1 %6310 }
0x22c5   :  { %v6324_v61 = vsub.f32 %v6304_v16, %v6311_v53 }
0x22c7   :  { %v6329_v14 = vmul.f32 1.442695, %v6324_v61 }
0x22c8   :  { %v6314_v18 = vpop.xlane.xlu0 %6313 }
0x22c9   :  { %10534 = vpow2.f32 %v6329_v14  ;;  %v6325_v25 = vsub.f32 %v6305_v20, %v6314_v18 }
0x22cb   :  { %v6331_v27 = vmul.f32 1.442695, %v6325_v25 }
0x22cc   :  { %v6317_v34 = vpop.xlane.xlu1 %6316 }
0x22cd   :  { %10536 = vpow2.f32 %v6331_v27  ;;  %v6326_v29 = vsub.f32 %v6306_v36, %v6317_v34 }
0x22cf   :  { %v6333_v7 = vmul.f32 1.442695, %v6326_v29 }
0x22d0   :  { %v6320_v63 = vpop.xlane.xlu0 %6319 }
0x22d1   :  { %10538 = vpow2.f32 %v6333_v7  ;;  %v6327_v57 = vsub.f32 %v6307_v19, %v6320_v63  ;;  %v8481_v7 = vld [vmem:[%s13720_s3 + $0x13] ss:$0 sm:$0xff] }
0x22d3   :  { %v6335_v15 = vmul.f32 1.442695, %v6327_v57 }
0x22d4   :  { %v6323_v39 = vpop.xlane.xlu1 %6322 }
0x22d5   :  { %10540 = vpow2.f32 %v6335_v15  ;;  %v6328_v4 = vsub.f32 %v6308_v41, %v6323_v39 }
0x22d6   :  { %v10535_v16 = vpop.eup %10534 }
0x22d7   :  { %v6337_v38 = vmul.f32 1.442695, %v6328_v4  ;;  %10101 = vmatmul.mubr.msk.f32.vlgmr.msra.gmra.mxu1 %vm645_vm5, %v10535_v16 }
0x22d8   :  { %10103 = vmatprep.mubr.msk.f32.mxu1 %vm10625_vm3, %v10624_v52  ;;  %10139 = vmatpush3.msra.mxu1 %v6574_v32 }
0x22d9   :  { %10542 = vpow2.f32 %v6337_v38  ;;  %10140 = vmatprep.subr.mxu1 %v10624_v52 }
0x22da   :  { %v10537_v20 = vpop.eup %10536  ;;  %10141 = vmatpush3.msra.mxu1 %v6573_v6 }
0x22db   :  { %10104 = vmatmul.mubr.msk.f32.gmra.mxu1 %vm645_vm5, %v10537_v20  ;;  %10142 = vmatprep.subr.mxu1 %v10624_v52  ;;  %v6450_v28 = vsel %vm645_vm5, %v10537_v20, 0.0 }
0x22dc   :  { %10106 = vmatprep.mubr.msk.f32.mxu1 %vm10625_vm3, %v10624_v52  ;;  %10143 = vmatpush3.msra.mxu1 %v6572_v40 }
0x22dd   :  { %10144 = vmatprep.subr.mxu1 %v10624_v52 }
0x22de   :  { %v10539_v43 = vpop.eup %10538  ;;  %10145 = vmatpush3.msra.mxu1 %v6571_v3 }
0x22df   :  { %10107 = vmatmul.mubr.msk.f32.gmra.mxu1 %vm645_vm5, %v10539_v43  ;;  %10186 = vmatprep.subr.mxu1 %v10624_v52  ;;  %v6453_v24 = vsel %vm645_vm5, %v10539_v43, 0.0 }
0x22e0   :  { %10109 = vmatprep.mubr.msk.f32.mxu1 %vm10625_vm3, %v10624_v52 }
0x22e2   :  { %v13187_v44 = vpop.eup %10540 }
0x22e3   :  { %10110 = vmatmul.mubr.msk.f32.gmra.mxu1 %vm645_vm5, %v13187_v44 }
0x22e4   :  { %10112 = vmatprep.mubr.msk.f32.mxu1 %vm10625_vm3, %v10624_v52 }
0x22e6   :  { %v13193_v36 = vpop.eup %10542 }
0x22e7   :  { %10113 = vmatmul.mubr.msk.f32.gmra.mxu1 %vm645_vm5, %v13193_v36 }
0x22e8   :  { %10146 = vmatprep.mubr.msk.f32.mxu1 %vm10625_vm3, %v10624_v52 }
0x22eb   :  { %10147 = vmatmul.mubr.msk.f32.vlgmr.msra.gmra.mxu1 %vm122_vm1, %v12937_v12 }
0x22ec   :  { %10149 = vmatprep.mubr.msk.f32.mxu1 %vm10625_vm3, %v10624_v52 }
0x22ef   :  { %10150 = vmatmul.mubr.msk.f32.gmra.mxu1 %vm122_vm1, %v12952_v62 }
0x22f0   :  { %10152 = vmatprep.mubr.msk.f32.mxu1 %vm10625_vm3, %v10624_v52 }
0x22f3   :  { %10153 = vmatmul.mubr.msk.f32.gmra.mxu1 %vm122_vm1, %v12967_v5 }
0x22f4   :  { %10155 = vmatprep.mubr.msk.f32.mxu1 %vm10625_vm3, %v10624_v52 }
0x22f7   :  { %10156 = vmatmul.mubr.msk.f32.gmra.mxu1 %vm122_vm1, %v12982_v11 }
0x22f8   :  { %10158 = vmatprep.mubr.msk.f32.mxu1 %vm10625_vm3, %v10624_v52 }
0x22fb   :  { %10159 = vmatmul.mubr.msk.f32.gmra.mxu1 %vm122_vm1, %v12996_v2  ;;  %v6447_v2 = vsel %vm645_vm5, %v10535_v16, 0.0 }
0x22fc   :  { %10196 = vmatprep.mubr.msk.f32.mxu1 %vm10625_vm3, %v10624_v52 }
0x2331   :  { %v6751_v12 = vpop.f32.mrf.mxu0 }
0x2332   :  { %v6775_v62 = vmul.f32 0.25, %v6751_v12 }
0x2333   :  { %v10173_v31 = vpop.f32.mrf.mxu0 }
0x2334   :  { %v6780_v5 = vsel %vm645_vm5, %v6775_v62, -inf }
0x2335   :  { %6781 = vmax.xlane.f32.xlu0 %v6780_v5  ;;  %v6756_v58 = vpop.f32.mrf.mxu0 }
0x2336   :  { %v6776_v49 = vmul.f32 0.25, %v6756_v58 }
0x2337   :  { %v10176_v19 = vpop.f32.mrf.mxu0 }
0x2338   :  { %v6783_v11 = vsel %vm645_vm5, %v6776_v49, -inf }
0x2339   :  { %6784 = vmax.xlane.f32.xlu1 %v6783_v11  ;;  %v6761_v48 = vpop.f32.mrf.mxu0 }
0x233a   :  { %v13221_v22 = vmul.f32 0.25, %v6761_v48 }
0x233b   :  { %v10179_v50 = vpop.f32.mrf.mxu0 }
0x233c   :  { %v6786_v41 = vsel %vm645_vm5, %v13221_v22, -inf }
0x233d   :  { %6448 = vadd.xlane.f32.xlu1 %v6447_v2  ;;  %6787 = vmax.xlane.f32.xlu0 %v6786_v41  ;;  %v6766_v30 = vpop.f32.mrf.mxu0 }
0x233e   :  { %v13229_v33 = vmul.f32 0.25, %v6766_v30 }
0x233f   :  { %v10182_v21 = vpop.f32.mrf.mxu0 }
0x2340   :  { %v6789_v26 = vsel %vm645_vm5, %v13229_v33, -inf }
0x2341   :  { %6451 = vadd.xlane.f32.xlu1 %v6450_v28  ;;  %v13227_v59 = vpop.f32.mrf.mxu0 }
0x2343   :  { %v10185_v35 = vpop.f32.mrf.mxu0 }
0x2345   :  { %6454 = vadd.xlane.f32.xlu1 %v6453_v24 }
0x2349   :  { %6790 = vmax.xlane.f32.xlu1 %v6789_v26 }
0x2397   :  { %v13234_v55 = vpop.f32.mrf.mxu1 }
0x2399   :  { %v10102_v46 = vpop.f32.mrf.mxu1 }
0x239a   :  { %v6779_v46 = vmul.f32 0.25, %v13227_v59  ;;  %v6951_v59 = vld [vmem:[%s13718_s2 + $0x230] sm:$0xff] }
0x239b   :  { %v13236_v23 = vpop.f32.mrf.mxu1  ;;  %10212 = vmatpush3.msra.mxu0 %v6951_v59 }
0x239c   :  { %10213 = vmatprep.subr.mxu0 %v10624_v52 }
0x239d   :  { %v10105_v37 = vpop.f32.mrf.mxu1 }
0x239e   :  { %v6456_v37 = vsel %vm645_vm5, %v13187_v44, 0.0  ;;  %v6950_v44 = vld [vmem:[%s13718_s2 + $0x228] sm:$0xff] }
0x239f   :  { %v13238_v9 = vpop.f32.mrf.mxu1  ;;  %10214 = vmatpush3.msra.mxu0 %v6950_v44 }
0x23a0   :  { %10215 = vmatprep.subr.mxu0 %v10624_v52 }
0x23a1   :  { %v10108_v10 = vpop.f32.mrf.mxu1 }
0x23a2   :  { %v6792_v10 = vsel %vm658_vm6, %v6779_v46, -inf }
0x23a3   :  { %v13240_v60 = vpop.f32.mrf.mxu1 }
0x23a5   :  { %v10111_v54 = vpop.f32.mrf.mxu1 }
0x23a7   :  { %v13242_v1 = vpop.f32.mrf.mxu1 }
0x23a9   :  { %v10114_v8 = vpop.f32.mrf.mxu1 }
0x23ab   :  { %v6646_v53 = vpop.f32.mrf.mxu1 }
0x23ac   :  { %v6647_v3 = vadd.f32 %v8481_v7, %v6646_v53 }
0x23ad   :  { %v10148_v61 = vpop.f32.mrf.mxu1 }
0x23af   :  { %v6651_v14 = vpop.f32.mrf.mxu1 }
0x23b0   :  { %v6652_v6 = vadd.f32 %v8481_v7, %v6651_v14 }
0x23b1   :  { %v10151_v18 = vpop.f32.mrf.mxu1 }
0x23b3   :  { %v6656_v25 = vpop.f32.mrf.mxu1 }
0x23b4   :  { %v6657_v16 = vadd.f32 %v8481_v7, %v6656_v25 }
0x23b5   :  { %v10154_v27 = vpop.f32.mrf.mxu1 }
0x23b7   :  { %v6661_v34 = vpop.f32.mrf.mxu1 }
0x23b8   :  { %v6662_v39 = vadd.f32 %v8481_v7, %v6661_v34 }
0x23b9   :  { %v10157_v29 = vpop.f32.mrf.mxu1 }
0x23bb   :  { %v6666_v63 = vpop.f32.mrf.mxu1 }
0x23bc   :  { %v6667_v57 = vadd.f32 %v8481_v7, %v6666_v63 }
0x23bd   :  { %v10160_v15 = vpop.f32.mrf.mxu1 }
0x23be   :  { %v6782_v4 = vpop.xlane.xlu0 %6781  ;;  %10187 = vmatpush3.msk.msra.mxu1 %vm692_vm4, %v6667_v57 }
0x23bf   :  { %v6795_v32 = vsub.f32 %v6775_v62, %v6782_v4  ;;  %10188 = vmatprep.subr.mxu1 %v10624_v52 }
0x23c0   :  { %10189 = vmatpush3.msra.mxu1 %v6662_v39 }
0x23c1   :  { %v6800_v38 = vmul.f32 1.442695, %v6795_v32  ;;  %10190 = vmatprep.subr.mxu1 %v10624_v52 }
0x23c2   :  { %v6785_v40 = vpop.xlane.xlu1 %6784  ;;  %10191 = vmatpush3.msra.mxu1 %v6657_v16 }
0x23c3   :  { %10544 = vpow2.f32 %v6800_v38  ;;  %v6796_v20 = vsub.f32 %v6776_v49, %v6785_v40  ;;  %10192 = vmatprep.subr.mxu1 %v10624_v52 }
0x23c4   :  { %10193 = vmatpush3.msra.mxu1 %v6652_v6 }
0x23c5   :  { %v6802_v43 = vmul.f32 1.442695, %v6796_v20  ;;  %10194 = vmatprep.subr.mxu1 %v10624_v52 }
0x23c6   :  { %v6449_v12 = vpop.xlane.xlu1 %6448  ;;  %v6788_v62 = vpop.xlane.xlu0 %6787  ;;  %10195 = vmatpush3.msra.mxu1 %v6647_v3 }
0x23c7   :  { %10546 = vpow2.f32 %v6802_v43  ;;  %v6797_v31 = vsub.f32 %v13221_v22, %v6788_v62  ;;  %10234 = vmatprep.subr.mxu1 %v10624_v52 }
0x23c8   :  { %10548 = vrcp.f32 %v6449_v12 }
0x23c9   :  { %v6804_v5 = vmul.f32 1.442695, %v6797_v31 }
0x23ca   :  { %v6452_v58 = vpop.xlane.xlu1 %6451 }
0x23cb   :  { %10550 = vpow2.f32 %v6804_v5 }
0x23cc   :  { %10552 = vrcp.f32 %v6452_v58 }
0x23ce   :  { %v6455_v49 = vpop.xlane.xlu1 %6454 }
0x23cf   :  { %10554 = vrcp.f32 %v6455_v49 }
0x23d0   :  { %v10545_v19 = vpop.eup %10544 }
0x23d1   :  { %10197 = vmatmul.mubr.msk.f32.vlgmr.msra.gmra.mxu1 %vm645_vm5, %v10545_v19  ;;  %v6918_v11 = vsel %vm645_vm5, %v10545_v19, 0.0 }
0x23d2   :  { %6919 = vadd.xlane.f32.xlu0 %v6918_v11  ;;  %v6791_v48 = vpop.xlane.xlu1 %6790  ;;  %10199 = vmatprep.mubr.msk.f32.mxu1 %vm10625_vm3, %v10624_v52 }
0x23d3   :  { %v6798_v22 = vsub.f32 %v13229_v33, %v6791_v48 }
0x23d4   :  { %v10547_v50 = vpop.eup %10546 }
0x23d5   :  { %v10549_v2 = vpop.eup %10548  ;;  %v6806_v41 = vmul.f32 1.442695, %v6798_v22  ;;  %10200 = vmatmul.mubr.msk.f32.gmra.mxu1 %vm645_vm5, %v10547_v50  ;;  %v6921_v30 = vsel %vm645_vm5, %v10547_v50, 0.0 }
0x23d6   :  { %6922 = vadd.xlane.f32.xlu0 %v6921_v30  ;;  %10202 = vmatprep.mubr.msk.f32.mxu1 %vm10625_vm3, %v10624_v52  ;;  %v6467_v21 = vmul.f32 %v10549_v2, %v13234_v55 }
0x23d7   :  { %10556 = vpow2.f32 %v6806_v41  ;;  %v13318_v41 = vld [vmem:[%s13720_s3 + $0x14] ss:$0 sm:$0xff] }
0x23d8   :  { %v10551_v28 = vpop.eup %10550 }
0x23d9   :  { %v10553_v35 = vpop.eup %10552  ;;  %10203 = vmatmul.mubr.msk.f32.gmra.mxu1 %vm645_vm5, %v10551_v28  ;;  %v6924_v33 = vsel %vm645_vm5, %v10551_v28, 0.0 }
0x23da   :  { %6925 = vadd.xlane.f32.xlu0 %v6924_v33  ;;  %10205 = vmatprep.mubr.msk.f32.mxu1 %vm10625_vm3, %v10624_v52  ;;  %v6468_v24 = vmul.f32 %v10553_v35, %v13236_v23  ;;  %v6949_v23 = vld [vmem:[%s13718_s2 + $0x220] sm:$0xff] }
0x23db   :  { %10216 = vmatpush3.msra.mxu0 %v6949_v23 }
0x23dc   :  { %v10555_v26 = vpop.eup %10554  ;;  %10217 = vmatprep.subr.mxu0 %v10624_v52 }
0x23dd   :  { %v6469_v55 = vmul.f32 %v10555_v26, %v13238_v9  ;;  %v6948_v9 = vld [vmem:[%s13718_s2 + $0x218] sm:$0xff] }
0x23de   :  { %6457 = vadd.xlane.f32.xlu0 %v6456_v37  ;;  %10218 = vmatpush3.msra.mxu0 %v6948_v9 }
0x23df   :  { %10257 = vmatprep.subr.mxu0 %v10624_v52 }
0x23e2   :  { %6793 = vmax.xlane.f32.xlu0 %v6792_v10 }
0x23e4   :  { %v10557_v54 = vpop.eup %10556 }
0x23e5   :  { %10206 = vmatmul.mubr.msk.f32.gmra.mxu1 %vm645_vm5, %v10557_v54  ;;  %v6927_v8 = vsel %vm645_vm5, %v10557_v54, 0.0 }
0x23e6   :  { %6928 = vadd.xlane.f32.xlu1 %v6927_v8  ;;  %10208 = vmatprep.mubr.msk.f32.mxu1 %vm10625_vm3, %v10624_v52 }
0x245b   :  { %v6920_v53 = vpop.xlane.xlu0 %6919 }
0x245f   :  { %v6923_v61 = vpop.xlane.xlu0 %6922 }
0x2463   :  { %v6926_v14 = vpop.xlane.xlu0 %6925 }
0x2467   :  { %v6458_v18 = vpop.xlane.xlu0 %6457 }
0x246b   :  { %v6794_v25 = vpop.xlane.xlu0 %6793 }
0x246c   :  { %v6799_v27 = vsub.f32 %v6779_v46, %v6794_v25 }
0x246e   :  { %v6808_v34 = vmul.f32 1.442695, %v6799_v27 }
0x246f   :  { %v6929_v32 = vpop.xlane.xlu1 %6928 }
0x2470   :  { %10558 = vpow2.f32 %v6808_v34 }
0x2471   :  { %10560 = vrcp.f32 %v6920_v53 }
0x2472   :  { %10562 = vrcp.f32 %v6923_v61 }
0x2473   :  { %10564 = vrcp.f32 %v6926_v14 }
0x2474   :  { %10566 = vrcp.f32 %v6458_v18 }
0x2475   :  { %10568 = vrcp.f32 %v6929_v32 }
0x247d   :  { %v13294_v29 = vpop.eup %10558 }
0x247e   :  { %10209 = vmatmul.mubr.msk.f32.gmra.mxu1 %vm645_vm5, %v13294_v29  ;;  %v10561_v7 = vpop.eup %10560  ;;  %v6930_v32 = vsel %vm658_vm6, %v13294_v29, 0.0  ;;  %v7158_v29 = vld [vmem:[%s13718_s2 + $0x240] sm:$0xff] }
0x247f   :  { %10242 = vmatprep.mubr.msk.f32.mxu1 %vm10625_vm3, %v10624_v52  ;;  %v10563_v4 = vpop.eup %10562 }
0x2480   :  { %v10565_v20 = vpop.eup %10564 }
0x2481   :  { %v10567_v31 = vpop.eup %10566 }
0x2482   :  { %v10569_v5 = vpop.eup %10568  ;;  %v6470_v49 = vmul.f32 %v10567_v31, %v13240_v60 }
0x2491   :  { %v6894_v63 = vpop.f32.mrf.mxu1 }
0x2492   :  { %v6938_v57 = vmul.f32 %v10561_v7, %v6894_v63 }
0x2493   :  { %v10198_v15 = vpop.f32.mrf.mxu1 }
0x2494   :  { %v6943_v39 = vadd.f32 %v6938_v57, %v6467_v21 }
0x2495   :  { %v6899_v16 = vpop.f32.mrf.mxu1 }
0x2496   :  { %v6939_v38 = vmul.f32 %v10563_v4, %v6899_v16  ;;  %10220 = vmatmul.mubr.msk.f32.vlgmr.msra.gmra.mxu0 %vm122_vm1, %v6943_v39  ;;  %v6459_v39 = vsel %vm658_vm6, %v13193_v36, 0.0  ;;  %v7160_v16 = vld [vmem:[%s13718_s2 + $0x250] sm:$0xff]  ;;  %v7159_v36 = vld [vmem:[%s13718_s2 + $0x248] sm:$0xff] }
0x2497   :  { %v10201_v6 = vpop.f32.mrf.mxu1  ;;  %10222 = vmatprep.mubr.msk.f32.mxu0 %vm10625_vm3, %v10624_v52  ;;  %10235 = vmatpush3.msra.mxu1 %v7160_v16 }
0x2498   :  { %v6944_v40 = vadd.f32 %v6939_v38, %v6468_v24  ;;  %10236 = vmatprep.subr.mxu1 %v10624_v52  ;;  %v7157_v38 = vld [vmem:[%s13718_s2 + $0x238] sm:$0xff] }
0x2499   :  { %v6904_v3 = vpop.f32.mrf.mxu1  ;;  %10237 = vmatpush3.msra.mxu1 %v7159_v36 }
0x249a   :  { %v6940_v43 = vmul.f32 %v10565_v20, %v6904_v3  ;;  %10223 = vmatmul.mubr.msk.f32.gmra.mxu0 %vm122_vm1, %v6944_v40  ;;  %10238 = vmatprep.subr.mxu1 %v10624_v52 }
0x249b   :  { %v10204_v12 = vpop.f32.mrf.mxu1  ;;  %10225 = vmatprep.mubr.msk.f32.mxu0 %vm10625_vm3, %v10624_v52  ;;  %10239 = vmatpush3.msra.mxu1 %v7158_v29 }
0x249c   :  { %v6945_v62 = vadd.f32 %v6940_v43, %v6469_v55  ;;  %10240 = vmatprep.subr.mxu1 %v10624_v52 }
0x249d   :  { %10241 = vmatpush3.msra.mxu1 %v7157_v38 }
0x249e   :  { %10226 = vmatmul.mubr.msk.f32.gmra.mxu0 %vm122_vm1, %v6945_v62  ;;  %10288 = vmatprep.subr.mxu1 %v10624_v52 }
0x249f   :  { %10228 = vmatprep.mubr.msk.f32.mxu0 %vm10625_vm3, %v10624_v52 }
0x24a5   :  { %v6909_v58 = vpop.f32.mrf.mxu1 }
0x24a6   :  { %v6941_v19 = vmul.f32 %v10569_v5, %v6909_v58 }
0x24a7   :  { %v10207_v11 = vpop.f32.mrf.mxu1 }
0x24a8   :  { %v6946_v48 = vadd.f32 %v6941_v19, %v6470_v49 }
0x24aa   :  { %10229 = vmatmul.mubr.msk.f32.gmra.mxu0 %vm122_vm1, %v6946_v48 }
0x24ab   :  { %10231 = vmatprep.mubr.msk.f32.mxu0 %vm10625_vm3, %v10624_v52 }
0x253e   :  { %v13313_v22 = vpop.f32.mrf.mxu1 }
0x2540   :  { %v10210_v50 = vpop.f32.mrf.mxu1 }
0x2556   :  { %v7033_v2 = vpop.f32.mrf.mxu0 }
0x2557   :  { %v7057_v30 = vadd.f32 %v7033_v2, %v12844_v56 }
0x2558   :  { %v10221_v60 = vpop.f32.mrf.mxu0 }
0x2559   :  { %v7067_v21 = vadd.f32 %v13318_v41, %v7057_v30  ;;  %v13366_v30 = vld [vmem:[%s13720_s3 + $0x15] ss:$0 sm:$0xff] }
0x255a   :  { %v7038_v28 = vpop.f32.mrf.mxu0 }
0x255b   :  { %v7058_v35 = vadd.f32 %v7038_v28, %v12849_v47  ;;  %v7074_v33 = vsel %vm122_vm1, %v7067_v21, 0.0  ;;  %v13372_v28 = vld [vmem:[%s13720_s3 + $0x16] ss:$0 sm:$0xff] }
0x255c   :  { %7075 = vadd.xlane.f32.xlu1 %v7074_v33  ;;  %v10224_v24 = vpop.f32.mrf.mxu0 }
0x255d   :  { %v7068_v26 = vadd.f32 %v13318_v41, %v7058_v35 }
0x255e   :  { %v7043_v46 = vpop.f32.mrf.mxu0 }
0x255f   :  { %v7059_v37 = vadd.f32 %v7043_v46, %v12854_v0  ;;  %v7077_v55 = vsel %vm122_vm1, %v7068_v26, 0.0 }
0x2560   :  { %7078 = vadd.xlane.f32.xlu0 %v7077_v55  ;;  %v10227_v10 = vpop.f32.mrf.mxu0 }
0x2561   :  { %v13328_v56 = vadd.f32 %v13318_v41, %v7059_v37 }
0x2563   :  { %v7080_v54 = vsel %vm122_vm1, %v13328_v56, 0.0 }
0x2564   :  { %7081 = vadd.xlane.f32.xlu1 %v7080_v54 }
0x256a   :  { %v7048_v47 = vpop.f32.mrf.mxu0 }
0x256b   :  { %v7060_v34 = vadd.f32 %v7048_v47, %v12859_v13 }
0x256c   :  { %v10230_v8 = vpop.f32.mrf.mxu0 }
0x256d   :  { %v13337_v15 = vadd.f32 %v13318_v41, %v7060_v34 }
0x256f   :  { %v7083_v13 = vsel %vm122_vm1, %v13337_v15, 0.0 }
0x25e5   :  { %v7076_v59 = vpop.xlane.xlu1 %7075 }
0x25e6   :  { %v7089_v44 = vmul.f32 0.03125, %v7076_v59 }
0x25e8   :  { %v7094_v23 = vsub.f32 %v7067_v21, %v7089_v44 }
0x25e9   :  { %v7079_v9 = vpop.xlane.xlu0 %7078 }
0x25ea   :  { %v7090_v53 = vmul.f32 0.03125, %v7079_v9  ;;  %v7099_v61 = vmul.f32 %v7094_v23, %v7094_v23 }
0x25ec   :  { %v7095_v0 = vsub.f32 %v7068_v26, %v7090_v53  ;;  %v7104_v14 = vsel %vm122_vm1, %v7099_v61, 0.0  ;;  %v7281_v53 = vld [vmem:[%s13718_s2 + $0x280] sm:$0xff]  ;;  %v7280_v61 = vld [vmem:[%s13718_s2 + $0x278] sm:$0xff] }
0x25ed   :  { %7105 = vadd.xlane.f32.xlu0 %v7104_v14  ;;  %v7082_v18 = vpop.xlane.xlu1 %7081  ;;  %v7278_v14 = vld [vmem:[%s13718_s2 + $0x268] sm:$0xff] }
0x25ee   :  { %v7091_v25 = vmul.f32 0.03125, %v7082_v18  ;;  %v7100_v27 = vmul.f32 %v7095_v0, %v7095_v0  ;;  %v7277_v18 = vld [vmem:[%s13718_s2 + $0x260] sm:$0xff] }
0x25f0   :  { %v7096_v7 = vsub.f32 %v13328_v56, %v7091_v25  ;;  %v7107_v63 = vsel %vm122_vm1, %v7100_v27, 0.0  ;;  %v7276_v25 = vld [vmem:[%s13718_s2 + $0x258] sm:$0xff] }
0x25f1   :  { %7108 = vadd.xlane.f32.xlu1 %v7107_v63 }
0x25f2   :  { %v7101_v57 = vmul.f32 %v7096_v7, %v7096_v7 }
0x25f4   :  { %v7110_v4 = vsel %vm122_vm1, %v7101_v57, 0.0 }
0x25f5   :  { %6460 = vadd.xlane.f32.xlu1 %v6459_v39  ;;  %7111 = vadd.xlane.f32.xlu0 %v7110_v4 }
0x25f9   :  { %6931 = vadd.xlane.f32.xlu0 %v6930_v32  ;;  %7084 = vadd.xlane.f32.xlu1 %v7083_v13  ;;  %v13434_v32 = vld [vmem:[%s13720_s3 + $0x17] ss:$0 sm:$0xff] }
0x2676   :  { %v7106_v6 = vpop.xlane.xlu0 %7105 }
0x2677   :  { %v7119_v40 = vmul.f32 0.03125, %v7106_v6 }
0x2679   :  { %v7124_v20 = vadd.f32 1e-05, %v7119_v40 }
0x267a   :  { %v7109_v3 = vpop.xlane.xlu1 %7108 }
0x267b   :  { %10570 = vrsqrt.f32 %v7124_v20  ;;  %v7120_v43 = vmul.f32 0.03125, %v7109_v3 }
0x267d   :  { %v7125_v12 = vadd.f32 1e-05, %v7120_v43 }
0x267e   :  { %v7112_v62 = vpop.xlane.xlu0 %7111  ;;  %v6461_v31 = vpop.xlane.xlu1 %6460 }
0x267f   :  { %10572 = vrsqrt.f32 %v7125_v12  ;;  %v7121_v5 = vmul.f32 0.03125, %v7112_v62 }
0x2680   :  { %10574 = vrcp.f32 %v6461_v31 }
0x2681   :  { %v7126_v58 = vadd.f32 1e-05, %v7121_v5 }
0x2682   :  { %v6932_v49 = vpop.xlane.xlu0 %6931  ;;  %v7085_v19 = vpop.xlane.xlu1 %7084 }
0x2683   :  { %10576 = vrsqrt.f32 %v7126_v58  ;;  %v7092_v11 = vmul.f32 0.03125, %v7085_v19 }
0x2684   :  { %10578 = vrcp.f32 %v6932_v49 }
0x2685   :  { %v7097_v48 = vsub.f32 %v13337_v15, %v7092_v11 }
0x2687   :  { %v7102_v50 = vmul.f32 %v7097_v48, %v7097_v48 }
0x2688   :  { %v10571_v2 = vpop.eup %10570 }
0x2689   :  { %v7134_v60 = vmul.f32 %v10571_v2, %v7094_v23  ;;  %v7113_v21 = vsel %vm122_vm1, %v7102_v50, 0.0 }
0x268a   :  { %7114 = vadd.xlane.f32.xlu0 %v7113_v21 }
0x268b   :  { %v7143_v35 = vmul.f32 %v13366_v30, %v7134_v60 }
0x268c   :  { %v10573_v33 = vpop.eup %10572 }
0x268d   :  { %v7152_v24 = vadd.f32 %v13372_v28, %v7143_v35  ;;  %v7135_v26 = vmul.f32 %v10573_v33, %v7095_v0  ;;  %v10575_v46 = vpop.eup %10574  ;;  %v7279_v0 = vld [vmem:[%s13718_s2 + $0x270] sm:$0xff] }
0x268e   :  { %v6471_v8 = vmul.f32 %v10575_v46, %v13242_v1  ;;  %v7283_v1 = vld [vmem:[%s13718_s2 + $0x290] sm:$0xff] }
0x268f   :  { %10243 = vmatmul.mubr.msk.f32.vlgmr.msra.gmra.mxu1 %vm122_vm1, %v7152_v24  ;;  %v7144_v37 = vmul.f32 %v13366_v30, %v7135_v26  ;;  %10258 = vmatpush3.msra.mxu0 %v7283_v1 }
0x2690   :  { %v10577_v55 = vpop.eup %10576  ;;  %10245 = vmatprep.mubr.msk.f32.mxu1 %vm10625_vm3, %v10624_v52  ;;  %10259 = vmatprep.subr.mxu0 %v10624_v52 }
0x2691   :  { %v10579_v10 = vpop.eup %10578  ;;  %v7136_v54 = vmul.f32 %v10577_v55, %v7096_v7  ;;  %v7153_v47 = vadd.f32 %v13372_v28, %v7144_v37  ;;  %v13463_v55 = vld [vmem:[%s13720_s3 + $0x18] ss:$0 sm:$0xff] }
0x2692   :  { %v6942_v59 = vmul.f32 %v10579_v10, %v13313_v22  ;;  %v7282_v22 = vld [vmem:[%s13718_s2 + $0x288] sm:$0xff] }
0x2693   :  { %10246 = vmatmul.mubr.msk.f32.gmra.mxu1 %vm122_vm1, %v7153_v47  ;;  %v7145_v44 = vmul.f32 %v13366_v30, %v7136_v54  ;;  %10260 = vmatpush3.msra.mxu0 %v7282_v22 }
0x2694   :  { %v6947_v23 = vadd.f32 %v6942_v59, %v6471_v8  ;;  %10248 = vmatprep.mubr.msk.f32.mxu1 %vm10625_vm3, %v10624_v52  ;;  %10261 = vmatprep.subr.mxu0 %v10624_v52 }
0x2695   :  { %v7154_v9 = vadd.f32 %v13372_v28, %v7145_v44  ;;  %10262 = vmatpush3.msra.mxu0 %v7281_v53 }
0x2696   :  { %10232 = vmatmul.mubr.msk.f32.gmra.mxu0 %vm122_vm1, %v6947_v23  ;;  %10263 = vmatprep.subr.mxu0 %v10624_v52 }
0x2697   :  { %10249 = vmatmul.mubr.msk.f32.gmra.mxu1 %vm122_vm1, %v7154_v9  ;;  %10273 = vmatprep.mubr.msk.f32.mxu0 %vm10625_vm3, %v10624_v52 }
0x2698   :  { %10251 = vmatprep.mubr.msk.f32.mxu1 %vm10625_vm3, %v10624_v52  ;;  %10264 = vmatpush3.msra.mxu0 %v7280_v61 }
0x2699   :  { %10265 = vmatprep.subr.mxu0 %v10624_v52 }
0x269a   :  { %10266 = vmatpush3.msra.mxu0 %v7279_v0 }
0x269b   :  { %10267 = vmatprep.subr.mxu0 %v10624_v52 }
0x269c   :  { %10268 = vmatpush3.msra.mxu0 %v7278_v14 }
0x269d   :  { %10269 = vmatprep.subr.mxu0 %v10624_v52 }
0x269e   :  { %10270 = vmatpush3.msra.mxu0 %v7277_v18 }
0x269f   :  { %10271 = vmatprep.subr.mxu0 %v10624_v52 }
0x26a0   :  { %10272 = vmatpush3.msra.mxu0 %v7276_v25 }
0x26a1   :  { %10299 = vmatprep.subr.mxu0 %v10624_v52 }
0x2713   :  { %v7115_v27 = vpop.xlane.xlu0 %7114 }
0x2714   :  { %v7122_v34 = vmul.f32 0.03125, %v7115_v27 }
0x2716   :  { %v7127_v7 = vadd.f32 1e-05, %v7122_v34 }
0x2718   :  { %10580 = vrsqrt.f32 %v7127_v7  ;;  %v7426_v7 = vld [vmem:[%s13718_s2 + $0x2b0] sm:$0xff] }
0x2719   :  { %10289 = vmatpush3.msra.mxu1 %v7426_v7 }
0x271a   :  { %10290 = vmatprep.subr.mxu1 %v10624_v52 }
0x2725   :  { %v10581_v63 = vpop.eup %10580 }
0x2726   :  { %v7137_v57 = vmul.f32 %v10581_v63, %v7097_v48  ;;  %v7424_v63 = vld [vmem:[%s13718_s2 + $0x2a0] sm:$0xff] }
0x2728   :  { %v7146_v39 = vmul.f32 %v13366_v30, %v7137_v57  ;;  %v7423_v57 = vld [vmem:[%s13718_s2 + $0x298] sm:$0xff] }
0x272a   :  { %v7155_v4 = vadd.f32 %v13372_v28, %v7146_v39 }
0x272c   :  { %10252 = vmatmul.mubr.msk.f32.gmra.mxu1 %vm122_vm1, %v7155_v4 }
0x272d   :  { %10254 = vmatprep.mubr.msk.f32.mxu1 %vm10625_vm3, %v10624_v52 }
0x274f   :  { %v7247_v13 = vpop.f32.mrf.mxu1 }
0x2750   :  { %v7248_v16 = vadd.f32 %v13434_v32, %v7247_v13 }
0x2751   :  { %v10244_v36 = vpop.f32.mrf.mxu1 }
0x2752   :  { %v7271_v29 = vmax.f32 %v7248_v16, 0.0 }
0x2753   :  { %v7252_v38 = vpop.f32.mrf.mxu1 }
0x2754   :  { %v7253_v6 = vadd.f32 %v13434_v32, %v7252_v38  ;;  %10274 = vmatmul.mubr.msk.f32.vlgmr.msra.gmra.mxu0 %vm1623_vm7, %v7271_v29 }
0x2755   :  { %v10247_v40 = vpop.f32.mrf.mxu1  ;;  %10276 = vmatprep.mubr.msk.f32.mxu0 %vm10625_vm3, %v10624_v52 }
0x2756   :  { %v7272_v20 = vmax.f32 %v7253_v6, 0.0  ;;  %v7053_v3 = vpop.f32.mrf.mxu0 }
0x2757   :  { %v7061_v43 = vadd.f32 %v7053_v3, %v12864_v51  ;;  %v7257_v12 = vpop.f32.mrf.mxu1 }
0x2758   :  { %v10233_v62 = vpop.f32.mrf.mxu0  ;;  %v7258_v31 = vadd.f32 %v13434_v32, %v7257_v12  ;;  %10277 = vmatmul.mubr.msk.f32.gmra.mxu0 %vm1623_vm7, %v7272_v20  ;;  %v8523_v20 = vld [vmem:[%s13720_s3 + $0x19] ss:$0 sm:$0xff] }
0x2759   :  { %v13445_v5 = vadd.f32 %v13318_v41, %v7061_v43  ;;  %v10250_v58 = vpop.f32.mrf.mxu1  ;;  %10279 = vmatprep.mubr.msk.f32.mxu0 %vm10625_vm3, %v10624_v52 }
0x275a   :  { %v7273_v49 = vmax.f32 %v7258_v31, 0.0 }
0x275b   :  { %v7086_v19 = vsel %vm135_vm2, %v13445_v5, 0.0 }
0x275c   :  { %7087 = vadd.xlane.f32.xlu1 %v7086_v19  ;;  %10280 = vmatmul.mubr.msk.f32.gmra.mxu0 %vm1623_vm7, %v7273_v49  ;;  %v10623_v19 = vld.sshfl [vmem:[%s13721_s1] sm:$0x33 pattern:$0x76325410] }
0x275d   :  { %10282 = vmatprep.mubr.msk.f32.mxu0 %vm10625_vm3, %v10624_v52 }
0x27e5   :  { %v7088_v51 = vpop.xlane.xlu1 %7087 }
0x27e6   :  { %v7093_v11 = vmul.f32 0.03125, %v7088_v51  ;;  %v7701_v51 = vld [vmem:[%s13718_s2 + $0x308] sm:$0xff] }
0x27e8   :  { %v7098_v48 = vsub.f32 %v13445_v5, %v7093_v11  ;;  %v7700_v11 = vld [vmem:[%s13718_s2 + $0x300] sm:$0xff] }
0x27ea   :  { %v7103_v41 = vmul.f32 %v7098_v48, %v7098_v48 }
0x27ec   :  { %v7116_v50 = vsel %vm135_vm2, %v7103_v41, 0.0  ;;  %v7262_v2 = vpop.f32.mrf.mxu1 }
0x27ed   :  { %7117 = vadd.xlane.f32.xlu0 %v7116_v50  ;;  %v7263_v60 = vadd.f32 %v13434_v32, %v7262_v2 }
0x27ee   :  { %v10253_v21 = vpop.f32.mrf.mxu1 }
0x27ef   :  { %v7274_v35 = vmax.f32 %v7263_v60, 0.0  ;;  %v8533_v21 = vld [vmem:[%s13720_s3 + $0x1c] ss:$0 sm:$0xff] }
0x27f1   :  { %10283 = vmatmul.mubr.msk.f32.gmra.mxu0 %vm1623_vm7, %v7274_v35 }
0x27f2   :  { %10285 = vmatprep.mubr.msk.f32.mxu0 %vm10625_vm3, %v10624_v52 }
0x2814   :  { %v7365_v33 = vpop.f32.mrf.mxu0 }
0x2815   :  { %v8534_v33 = vld [vmem:[%s13720_s3 + $0x1d] ss:$0 sm:$0xff] }
0x2816   :  { %v10275_v24 = vpop.f32.mrf.mxu0 }
0x2818   :  { %v7369_v26 = vpop.f32.mrf.mxu0 }
0x281a   :  { %v10278_v46 = vpop.f32.mrf.mxu0 }
0x281b   :  { %v8525_v46 = vld [vmem:[%s13720_s3 + $0x1b] ss:$0 sm:$0xff] }
0x281c   :  { %v7373_v37 = vpop.f32.mrf.mxu0 }
0x281d   :  { %v7387_v10 = vadd.f32 %v7373_v37, %v13328_v56 }
0x281e   :  { %v10281_v54 = vpop.f32.mrf.mxu0 }
0x281f   :  { %v7395_v47 = vadd.f32 %v13463_v55, %v7387_v10  ;;  %v7506_v10 = vld [vmem:[%s13718_s2 + $0x2c0] sm:$0xff] }
0x2821   :  { %v7400_v8 = vsel %vm122_vm1, %v7395_v47, 0.0 }
0x2822   :  { %7401 = vadd.xlane.f32.xlu1 %v7400_v8  ;;  %v7508_v8 = vld [vmem:[%s13718_s2 + $0x2d0] sm:$0xff] }
0x2876   :  { %v7118_v59 = vpop.xlane.xlu0 %7117 }
0x2877   :  { %v7123_v44 = vmul.f32 0.03125, %v7118_v59  ;;  %v7507_v59 = vld [vmem:[%s13718_s2 + $0x2c8] sm:$0xff] }
0x2879   :  { %v7128_v23 = vadd.f32 1e-05, %v7123_v44 }
0x287b   :  { %10582 = vrsqrt.f32 %v7128_v23 }
0x2888   :  { %v10583_v9 = vpop.eup %10582 }
0x2889   :  { %v7138_v1 = vmul.f32 %v10583_v9, %v7098_v48  ;;  %v7699_v48 = vld [vmem:[%s13718_s2 + $0x2f8] sm:$0xff] }
0x288b   :  { %v7147_v22 = vmul.f32 %v13366_v30, %v7138_v1 }
0x288d   :  { %v7156_v53 = vadd.f32 %v13372_v28, %v7147_v22 }
0x288f   :  { %10255 = vmatmul.mubr.msk.f32.gmra.mxu1 %vm122_vm1, %v7156_v53 }
0x2890   :  { %10296 = vmatprep.mubr.msk.f32.mxu1 %vm10625_vm3, %v10624_v52 }
0x28ab   :  { %v7402_v56 = vpop.xlane.xlu1 %7401 }
0x28ac   :  { %v7403_v61 = vmul.f32 0.03125, %v7402_v56 }
0x28ae   :  { %v7404_v0 = vsub.f32 %v7395_v47, %v7403_v61  ;;  %v7505_v47 = vld [vmem:[%s13718_s2 + $0x2b8] sm:$0xff] }
0x28b0   :  { %v7405_v14 = vmul.f32 %v7404_v0, %v7404_v0 }
0x28b1   :  { %v7378_v18 = vpop.f32.mrf.mxu0 }
0x28b2   :  { %v7388_v25 = vadd.f32 %v7378_v18, %v13337_v15  ;;  %v7406_v27 = vsel %vm122_vm1, %v7405_v14, 0.0  ;;  %v7425_v15 = vld [vmem:[%s13718_s2 + $0x2a8] sm:$0xff] }
0x28b3   :  { %7407 = vadd.xlane.f32.xlu0 %v7406_v27  ;;  %v10284_v34 = vpop.f32.mrf.mxu0  ;;  %10291 = vmatpush3.msra.mxu1 %v7425_v15  ;;  %v7544_v15 = vld [vmem:[%s13718_s2 + $0x2f0] sm:$0xff] }
0x28b4   :  { %v7396_v30 = vadd.f32 %v13463_v55, %v7388_v25  ;;  %10292 = vmatprep.subr.mxu1 %v10624_v52 }
0x28b5   :  { %10293 = vmatpush3.msra.mxu1 %v7424_v63 }
0x28b6   :  { %v7676_v28 = vsel %vm122_vm1, %v7396_v30, 0.0  ;;  %10294 = vmatprep.subr.mxu1 %v10624_v52 }
0x28b7   :  { %7677 = vadd.xlane.f32.xlu1 %v7676_v28  ;;  %10295 = vmatpush3.msra.mxu1 %v7423_v57 }
0x28b8   :  { %8527 = vmatprep.subr.msk.mxu1 %vm3544_vm9, %v12059_v45  ;;  %v8524_v45 = vld [vmem:[%s13720_s3 + $0x1a] ss:$0 sm:$0xff] }
0x293c   :  { %v7408_v39 = vpop.xlane.xlu0 %7407 }
0x293d   :  { %v7409_v4 = vmul.f32 0.03125, %v7408_v39 }
0x293f   :  { %v7410_v13 = vadd.f32 1e-05, %v7409_v4 }
0x2940   :  { %v7678_v16 = vpop.xlane.xlu1 %7677 }
0x2941   :  { %10584 = vrsqrt.f32 %v7410_v13  ;;  %v7679_v36 = vmul.f32 0.03125, %v7678_v16  ;;  %v7781_v16 = vld [vmem:[%s13718_s2 + $0x318] sm:$0xff] }
0x2943   :  { %v7680_v29 = vsub.f32 %v7396_v30, %v7679_v36  ;;  %v7783_v36 = vld [vmem:[%s13718_s2 + $0x328] sm:$0xff] }
0x2945   :  { %v7681_v38 = vmul.f32 %v7680_v29, %v7680_v29 }
0x2947   :  { %v7682_v6 = vsel %vm122_vm1, %v7681_v38, 0.0 }
0x2948   :  { %7683 = vadd.xlane.f32.xlu0 %v7682_v6 }
0x294e   :  { %v10585_v40 = vpop.eup %10584 }
0x294f   :  { %v7412_v3 = vmul.f32 %v10585_v40, %v7404_v0  ;;  %v7267_v43 = vpop.f32.mrf.mxu1 }
0x2950   :  { %v7268_v12 = vadd.f32 %v13434_v32, %v7267_v43  ;;  %v7702_v32 = vld [vmem:[%s13718_s2 + $0x310] sm:$0xff] }
0x2951   :  { %v7417_v62 = vmul.f32 %v8523_v20, %v7412_v3  ;;  %v10256_v31 = vpop.f32.mrf.mxu1  ;;  %10300 = vmatpush3.msra.mxu0 %v7702_v32 }
0x2952   :  { %v7275_v58 = vmax.f32 %v7268_v12, 0.0  ;;  %10301 = vmatprep.subr.mxu0 %v10624_v52 }
0x2953   :  { %v7422_v49 = vadd.f32 %v8524_v45, %v7417_v62  ;;  %10302 = vmatpush3.msra.mxu0 %v7701_v51  ;;  %v7782_v62 = vld [vmem:[%s13718_s2 + $0x320] sm:$0xff] }
0x2954   :  { %10286 = vmatmul.mubr.msk.f32.gmra.mxu0 %vm1623_vm7, %v7275_v58  ;;  %10303 = vmatprep.subr.mxu0 %v10624_v52 }
0x2955   :  { %10297 = vmatmul.mubr.msk.f32.vlgmr.msra.gmra.mxu1 %vm122_vm1, %v7422_v49  ;;  %10307 = vmatprep.mubr.msk.f32.mxu0 %vm10625_vm3, %v10624_v52 }
0x2956   :  { %8528 = vmatpush1.msk.msra.mxu1 %vm3544_vm9, %v10623_v19  ;;  %7641 = vmatprep.mubr.f32.mxu1 %v10624_v52 }
0x2957   :  { %10310 = vmatprep.subr.mxu1 %v10624_v52  ;;  %10304 = vmatpush3.msra.mxu0 %v7700_v11  ;;  %v7784_v11 = vld [vmem:[%s13718_s2 + $0x330] sm:$0xff] }
0x2958   :  { %10305 = vmatprep.subr.mxu0 %v10624_v52 }
0x2959   :  { %10306 = vmatpush3.msra.mxu0 %v7699_v48 }
0x29d1   :  { %v7684_v41 = vpop.xlane.xlu0 %7683 }
0x29d2   :  { %v7685_v50 = vmul.f32 0.03125, %v7684_v41 }
0x29d4   :  { %v7686_v2 = vadd.f32 1e-05, %v7685_v50 }
0x29d6   :  { %10586 = vrsqrt.f32 %v7686_v2 }
0x29e3   :  { %v10587_v60 = vpop.eup %10586 }
0x29e4   :  { %v7688_v35 = vmul.f32 %v10587_v60, %v7680_v29 }
0x29e6   :  { %v7693_v24 = vmul.f32 %v8533_v21, %v7688_v35 }
0x29e8   :  { %v7698_v26 = vadd.f32 %v8534_v33, %v7693_v24 }
0x29ea   :  { %10308 = vmatmul.mubr.msk.f32.vlgmr.msra.gmra.mxu0 %vm122_vm1, %v7698_v26 }
0x29eb   :  { %7917 = vmatprep.mubr.f32.mxu0 %v10624_v52 }
0x2a14   :  { %v7383_v37 = vpop.f32.mrf.mxu0 }
0x2a15   :  { %v7501_v54 = vpop.f32.mrf.mxu1  ;;  %v7389_v14 = vadd.f32 %v7383_v37, %v13445_v5 }
0x2a16   :  { %v10287_v44 = vpop.f32.mrf.mxu0  ;;  %v7502_v23 = vadd.f32 %v8525_v46, %v7501_v54 }
0x2a17   :  { %v10298_v9 = vpop.f32.mrf.mxu1  ;;  %v7397_v30 = vadd.f32 %v13463_v55, %v7389_v14  ;;  %v8535_v55 = vld [vmem:[%s13720_s3 + $0x1e] ss:$0 sm:$0xff] }
0x2a18   :  { %v13550_v1 = vmul.f32 %v7506_v10, %v7502_v23  ;;  %v7509_v22 = vmul.f32 %v7505_v47, %v7502_v23  ;;  %v13552_v53 = vmul.f32 %v7508_v8, %v7502_v23  ;;  %v13554_v56 = vmul.f32 %v7507_v59, %v7502_v23  ;;  %v7542_v59 = vld [vmem:[%s13718_s2 + $0x2e0] sm:$0xff]  ;;  %v7541_v44 = vld [vmem:[%s13718_s2 + $0x2d8] sm:$0xff]  ;;  %v7820_v23 = vld [vmem:[%s13718_s2 + $0x350] sm:$0xff] }
0x2a19   :  { %v7952_v5 = vsel %vm135_vm2, %v7397_v30, 0.0  ;;  %v7819_v9 = vld [vmem:[%s13718_s2 + $0x348] sm:$0xff]  ;;  %v7817_v14 = vld [vmem:[%s13718_s2 + $0x338] sm:$0xff] }
0x2a1a   :  { %v7514_v61 = vmul.f32 %v13550_v1, %v13550_v1  ;;  %v7513_v0 = vmul.f32 %v7509_v22, %v7509_v22  ;;  %v7516_v27 = vmul.f32 %v13552_v53, %v13552_v53  ;;  %v7515_v34 = vmul.f32 %v13554_v56, %v13554_v56 }
0x2a1c   :  { %v7520_v18 = vsel %vm3474_vm8, %v7514_v61, 0.0  ;;  %v7517_v25 = vsel %vm3474_vm8, %v7513_v0, 0.0  ;;  %v7526_v28 = vsel %vm3474_vm8, %v7516_v27, 0.0  ;;  %v7523_v7 = vsel %vm3474_vm8, %v7515_v34, 0.0  ;;  %v7976_v61 = vld [vmem:[%s13718_s2 + $0x360] sm:$0xff]  ;;  %v7975_v0 = vld [vmem:[%s13718_s2 + $0x358] sm:$0xff] }
0x2a1d   :  { %7521 = vadd.xlane.f32.xlu0 %v7520_v18  ;;  %7518 = vadd.xlane.f32.xlu1 %v7517_v25  ;;  %v4038_v18 = vld [vmem:[%s13718_s2 + $0x380] sm:$0x7] }
0x2a1e   :  { %v8066_v25 = vld [vmem:[%s13718_s2 + $0x380] sm:$0x7] }
0x2a21   :  { %7527 = vadd.xlane.f32.xlu0 %v7526_v28  ;;  %7524 = vadd.xlane.f32.xlu1 %v7523_v7 }
0x2a25   :  { %7953 = vadd.xlane.f32.xlu1 %v7952_v5 }
0x2a36   :  { %7562 = vperm.xlu1 %10325, %v7544_v15  }
0x2aa6   :  { %v7522_v63 = vpop.xlane.xlu0 %7521  ;;  %v7519_v57 = vpop.xlane.xlu1 %7518 }
0x2aa7   :  { %v7529_v39 = vmax.f32 %v7519_v57, 1e-24  ;;  %v7530_v4 = vmax.f32 %v7522_v63, 1e-24 }
0x2aa9   :  { %10588 = vrsqrt.f32 %v7529_v39 }
0x2aaa   :  { %v7777_v13 = vpop.f32.mrf.mxu0  ;;  %v7525_v38 = vpop.xlane.xlu1 %7524  ;;  %10590 = vrsqrt.f32 %v7530_v4 }
0x2aab   :  { %v7778_v29 = vadd.f32 %v8535_v55, %v7777_v13  ;;  %v7531_v6 = vmax.f32 %v7525_v38, 1e-24  ;;  %v7528_v20 = vpop.xlane.xlu0 %7527  ;;  %v8541_v55 = vld [vmem:[%s13720_s3 + $0x1f] ss:$0 sm:$0xff] }
0x2aac   :  { %v10309_v40 = vpop.f32.mrf.mxu0  ;;  %v7532_v31 = vmax.f32 %v7528_v20, 1e-24 }
0x2aad   :  { %v13581_v3 = vmul.f32 %v7781_v16, %v7778_v29  ;;  %v13583_v43 = vmul.f32 %v7783_v36, %v7778_v29  ;;  %10592 = vrsqrt.f32 %v7531_v6  ;;  %v13595_v51 = vmul.f32 %v7782_v62, %v7778_v29  ;;  %v8542_v36 = vld [vmem:[%s13720_s3 + $0x20] ss:$0 sm:$0xff] }
0x2aae   :  { %v7954_v45 = vpop.xlane.xlu1 %7953  ;;  %10594 = vrsqrt.f32 %v7532_v31  ;;  %v13606_v60 = vmul.f32 %v7784_v11, %v7778_v29 }
0x2aaf   :  { %v7789_v12 = vmul.f32 %v13581_v3, %v13581_v3  ;;  %v7955_v58 = vmul.f32 0.03125, %v7954_v45  ;;  %v7791_v19 = vmul.f32 %v13583_v43, %v13583_v43  ;;  %v7790_v2 = vmul.f32 %v13595_v51, %v13595_v51 }
0x2ab0   :  { %v7792_v26 = vmul.f32 %v13606_v60, %v13606_v60 }
0x2ab1   :  { %v7793_v49 = vsel %vm122_vm1, %v7789_v12, 0.0  ;;  %v13593_v32 = vsub.f32 %v7397_v30, %v7955_v58  ;;  %v7799_v41 = vsel %vm122_vm1, %v7791_v19, 0.0  ;;  %v7796_v24 = vsel %vm122_vm1, %v7790_v2, 0.0 }
0x2ab2   :  { %7794 = vadd.xlane.f32.xlu1 %v7793_v49  ;;  %v7802_v10 = vsel %vm122_vm1, %v7792_v26, 0.0  ;;  %v7563_v27 = vpop.permute.xlu1 %7562 }
0x2ab3   :  { %v7957_v48 = vmul.f32 %v13593_v32, %v13593_v32 }
0x2ab5   :  { %v7958_v50 = vsel %vm135_vm2, %v7957_v48, 0.0 }
0x2ab6   :  { %7800 = vadd.xlane.f32.xlu1 %v7799_v41  ;;  %v10589_v21 = vpop.eup %10588  ;;  %7959 = vadd.xlane.f32.xlu0 %v7958_v50 }
0x2ab7   :  { %v7537_v35 = vmul.f32 %v10589_v21, %v7509_v22  ;;  %v10591_v33 = vpop.eup %10590  ;;  %v7543_v22 = vld [vmem:[%s13718_s2 + $0x2e8] sm:$0xff] }
0x2ab8   :  { %v7538_v46 = vmul.f32 %v10591_v33, %v13550_v1  ;;  %v7978_v1 = vld [vmem:[%s13718_s2 + $0x370] sm:$0xff] }
0x2ab9   :  { %8529 = vmatmul.mubr.msk.f32.vlgmr.msra.gmra.mxu1 %vm3474_vm8, %v7537_v35 }
0x2aba   :  { %7797 = vadd.xlane.f32.xlu0 %v7796_v24  ;;  %7647 = vmatprep.mubr.f32.mxu1 %v10624_v52  ;;  %v10593_v37 = vpop.eup %10592 }
0x2abb   :  { %v7539_v54 = vmul.f32 %v10593_v37, %v13554_v56  ;;  %v10595_v47 = vpop.eup %10594  ;;  %10311 = vmatpush3.msra.mxu1 %v7978_v1  ;;  %v7818_v56 = vld [vmem:[%s13718_s2 + $0x340] sm:$0xff] }
0x2abc   :  { %v7540_v8 = vmul.f32 %v10595_v47, %v13552_v53  ;;  %10312 = vmatprep.subr.mxu1 %v10624_v52  ;;  %v7977_v53 = vld [vmem:[%s13718_s2 + $0x368] sm:$0xff] }
0x2abd   :  { %8530 = vmatmul.mubr.msk.f32.gmra.mxu1 %vm3474_vm8, %v7538_v46 }
0x2abe   :  { %7803 = vadd.xlane.f32.xlu0 %v7802_v10  ;;  %7653 = vmatprep.mubr.f32.mxu1 %v10624_v52 }
0x2abf   :  { %10313 = vmatpush3.msra.mxu1 %v7977_v53 }
0x2ac0   :  { %10314 = vmatprep.subr.mxu1 %v10624_v52 }
0x2ac1   :  { %8531 = vmatmul.mubr.msk.f32.gmra.mxu1 %vm3474_vm8, %v7539_v54 }
0x2ac2   :  { %7659 = vmatprep.mubr.f32.mxu1 %v10624_v52  ;;  %10315 = vmatpush3.msra.mxu1 %v7976_v61 }
0x2ac3   :  { %10316 = vmatprep.subr.mxu1 %v10624_v52 }
0x2ac4   :  { %10317 = vmatpush3.msra.mxu1 %v7975_v0 }
0x2ac5   :  { %8532 = vmatmul.mubr.msk.f32.gmra.mxu1 %vm3474_vm8, %v7540_v8 }
0x2ac6   :  { %10318 = vmatprep.mubr.msk.f32.mxu1 %vm10625_vm3, %v10624_v52 }
0x2ac7   :  { %7552 = vperm.xlu1 %10325, %v7542_v59  }
0x2acb   :  { %7547 = vperm.xlu1 %10325, %v7541_v44  }
0x2acf   :  { %7838 = vperm.xlu1 %10325, %v7820_v23  }
0x2ad3   :  { %7833 = vperm.xlu1 %10325, %v7819_v9  }
0x2ad4   :  { %7557 = vperm.xlu0 %10324, %v7543_v22  }
0x2ad7   :  { %7828 = vperm.xlu1 %10325, %v7818_v56  }
0x2adb   :  { %7823 = vperm.xlu1 %10325, %v7817_v14  }
0x2adf   :  { %4041 = vperm.xlu1 %10325, %v4038_v18  }
0x2ae3   :  { %8069 = vperm.xlu1 %10325, %v8066_v25  }
0x2b3b   :  { %v7795_v34 = vpop.xlane.xlu1 %7794 }
0x2b3c   :  { %v7805_v19 = vmax.f32 %v7795_v34, 1e-24 }
0x2b3f   :  { %v7801_v30 = vpop.xlane.xlu1 %7800  ;;  %v7960_v28 = vpop.xlane.xlu0 %7959 }
0x2b40   :  { %v7961_v7 = vmul.f32 0.03125, %v7960_v28 }
0x2b42   :  { %v7962_v5 = vadd.f32 1e-05, %v7961_v7 }
0x2b43   :  { %v7553_v15 = vpop.permute.xlu1 %7552  ;;  %v7798_v58 = vpop.xlane.xlu0 %7797 }
0x2b44   :  { %10596 = vrsqrt.f32 %v7962_v5  ;;  %v7806_v48 = vmax.f32 %v7798_v58, 1e-24 }
0x2b45   :  { %10598 = vrsqrt.f32 %v7805_v19 }
0x2b46   :  { %10600 = vrsqrt.f32 %v7806_v48 }
0x2b47   :  { %v7548_v63 = vpop.permute.xlu1 %7547  ;;  %v7804_v41 = vpop.xlane.xlu0 %7803 }
0x2b48   :  { %v7808_v46 = vmax.f32 %v7804_v41, 1e-24 }
0x2b4b   :  { %v13666_v57 = vpop.permute.xlu1 %7838 }
0x2b4f   :  { %v13668_v39 = vpop.permute.xlu1 %7833 }
0x2b51   :  { %v10597_v4 = vpop.eup %10596 }
0x2b52   :  { %v7964_v13 = vmul.f32 %v10597_v4, %v13593_v32  ;;  %v10599_v1 = vpop.eup %10598 }
0x2b53   :  { %v13674_v16 = vpop.permute.xlu1 %7828  ;;  %v7813_v61 = vmul.f32 %v10599_v1, %v13581_v3  ;;  %v10601_v0 = vpop.eup %10600 }
0x2b54   :  { %v7969_v29 = vmul.f32 %v8541_v55, %v7964_v13  ;;  %v7814_v14 = vmul.f32 %v10601_v0, %v13595_v51  ;;  %v8543_v51 = vld [vmem:[%s13720_s3 + $0x21] ss:$0 sm:$0xff] }
0x2b56   :  { %v7974_v38 = vadd.f32 %v8542_v36, %v7969_v29 }
0x2b57   :  { %v13679_v6 = vpop.permute.xlu1 %7823 }
0x2b58   :  { %10319 = vmatmul.mubr.msk.f32.vlgmr.msra.gmra.mxu1 %vm122_vm1, %v7974_v38 }
0x2b59   :  { %8139 = vmatprep.mubr.f32.mxu1 %v10624_v52 }
0x2b5b   :  { %v4042_v40 = vpop.permute.xlu1 %4041 }
0x2b5c   :  { %v4114_v20 = vadd.f32 %v12400_v42, %v4042_v40  ;;  %v4116_v45 = vadd.f32 %v12404_v17, %v4042_v40  ;;  %v7807_v42 = vmax.f32 %v7801_v30, 1e-24  ;;  %v7558_v17 = vpop.permute.xlu0 %7557  ;;  %v8057_v30 = vld [vmem:[%s13718_s2 + $0x378] sm:$0x7] }
0x2b5e   :  { %v4120_v12 = vcombine.low %v4114_v20, %v4116_v45  ;;  %10602 = vrsqrt.f32 %v7807_v42 }
0x2b5f   :  { %10604 = vrsqrt.f32 %v7808_v46 }
0x2b60   :  { %4122 = vst [vmem:[%s13722_s4] sm:$0x77] %v4120_v12 }
0x2b6b   :  { %v10603_v18 = vpop.eup %10602 }
0x2b6c   :  { %v7815_v25 = vmul.f32 %v10603_v18, %v13583_v43 }
0x2b79   :  { %v7643_v62 = vpop.f32.mrf.mxu1 }
0x2b7a   :  { %v7644_v44 = vadd.f32 %v7643_v62, %v7548_v63 }
0x2b7b   :  { %v7645_v31 = vpop.f32.mrf.mxu1 }
0x2b7c   :  { %v7646_v8 = vadd.f32 %v7645_v31, %v7548_v63  ;;  %v7666_v56 = vmax.f32 %v7644_v44, 0.0 }
0x2b7d   :  { %v7649_v49 = vpop.f32.mrf.mxu1 }
0x2b7e   :  { %v7650_v54 = vadd.f32 %v7649_v49, %v7553_v15  ;;  %v7667_v53 = vmax.f32 %v7646_v8, 0.0 }
0x2b7f   :  { %v7651_v32 = vpop.f32.mrf.mxu1 }
0x2b80   :  { %v7652_v37 = vadd.f32 %v7651_v32, %v7553_v15  ;;  %v7668_v22 = vmax.f32 %v7650_v54, 0.0 }
0x2b81   :  { %v7655_v11 = vpop.f32.mrf.mxu1 }
0x2b82   :  { %v7656_v26 = vadd.f32 %v7655_v11, %v7558_v17  ;;  %v7669_v9 = vmax.f32 %v7652_v37, 0.0 }
0x2b83   :  { %v7657_v50 = vpop.f32.mrf.mxu1 }
0x2b84   :  { %v7658_v33 = vadd.f32 %v7657_v50, %v7558_v17  ;;  %v7670_v23 = vmax.f32 %v7656_v26, 0.0  ;;  %v8070_v17 = vpop.permute.xlu1 %8069 }
0x2b85   :  { %v7661_v2 = vpop.f32.mrf.mxu1 }
0x2b86   :  { %v7662_v21 = vadd.f32 %v7661_v2, %v7563_v27  ;;  %v7671_v59 = vmax.f32 %v7658_v33, 0.0 }
0x2b87   :  { %v7663_v35 = vpop.f32.mrf.mxu1 }
0x2b88   :  { %v7664_v24 = vadd.f32 %v7663_v35, %v7563_v27  ;;  %v7672_v47 = vmax.f32 %v7662_v21, 0.0  ;;  %v10605_v27 = vpop.eup %10604 }
0x2b89   :  { %v7816_v3 = vmul.f32 %v10605_v27, %v13606_v60 }
0x2b8a   :  { %v7673_v10 = vmax.f32 %v7664_v24, 0.0 }
0x2b8c   :  { %7877 = vmatprep.subr.mxu0 %v7673_v10 }
0x2b8d   :  { %7878 = vmatpush1.msra.mxu0 %v7672_v47 }
0x2b8e   :  { %7879 = vmatprep.subr.mxu0 %v7671_v59 }
0x2b8f   :  { %7880 = vmatpush1.msra.mxu0 %v7670_v23 }
0x2b90   :  { %7881 = vmatprep.subr.mxu0 %v7669_v9 }
0x2b91   :  { %7882 = vmatpush1.msra.mxu0 %v7668_v22 }
0x2b92   :  { %7883 = vmatprep.subr.mxu0 %v7667_v53 }
0x2b93   :  { %7884 = vmatpush1.msra.mxu0 %v7666_v56 }
0x2b94   :  { %8537 = vmatmul.mubr.msk.f32.vlgmr.msra.gmra.mxu0 %vm122_vm1, %v7813_v61 }
0x2b95   :  { %7923 = vmatprep.mubr.f32.mxu0 %v10624_v52 }
0x2b98   :  { %8538 = vmatmul.mubr.msk.f32.gmra.mxu0 %vm122_vm1, %v7814_v14 }
0x2b99   :  { %7929 = vmatprep.mubr.f32.mxu0 %v10624_v52 }
0x2b9c   :  { %8539 = vmatmul.mubr.msk.f32.gmra.mxu0 %vm122_vm1, %v7815_v25 }
0x2b9d   :  { %7935 = vmatprep.mubr.f32.mxu0 %v10624_v52 }
0x2ba0   :  { %8540 = vmatmul.mubr.msk.f32.gmra.mxu0 %vm122_vm1, %v7816_v3 }
0x2c18   :  { %v8053_v34 = vpop.f32.mrf.mxu1 }
0x2c19   :  { %v8054_v28 = vadd.f32 %v8543_v51, %v8053_v34 }
0x2c1a   :  { %v10320_v43 = vpop.f32.mrf.mxu1 }
0x2c1b   :  { %v8058_v7 = vmul.f32 %v8057_v30, %v8054_v28 }
0x2c1d   :  { %v8059_v5 = vmul.f32 %v8058_v7, %v8058_v7 }
0x2c1f   :  { %v8060_v15 = vsel %vm135_vm2, %v8059_v5, 0.0 }
0x2c20   :  { %8061 = vadd.xlane.f32.xlu0 %v8060_v15 }
0x2c54   :  { %v7919_v52 = vpop.f32.mrf.mxu0 }
0x2c55   :  { %v7920_v32 = vadd.f32 %v7919_v52, %v13679_v6 }
0x2c56   :  { %v7921_v60 = vpop.f32.mrf.mxu0 }
0x2c57   :  { %v7922_v49 = vadd.f32 %v7921_v60, %v13679_v6 }
0x2c58   :  { %v7925_v63 = vpop.f32.mrf.mxu0 }
0x2c59   :  { %v7926_v31 = vadd.f32 %v7925_v63, %v13674_v16 }
0x2c5a   :  { %v7927_v4 = vpop.f32.mrf.mxu0 }
0x2c5b   :  { %v7928_v12 = vadd.f32 %v7927_v4, %v13674_v16  ;;  %v7944_v41 = vmax.f32 %v7926_v31, 0.0 }
0x2c5c   :  { %v7931_v55 = vpop.f32.mrf.mxu0 }
0x2c5d   :  { %v7932_v45 = vadd.f32 %v7931_v55, %v13668_v39  ;;  %v7945_v48 = vmax.f32 %v7928_v12, 0.0 }
0x2c5e   :  { %v7933_v13 = vpop.f32.mrf.mxu0 }
0x2c5f   :  { %v7934_v40 = vadd.f32 %v7933_v13, %v13668_v39  ;;  %v7946_v11 = vmax.f32 %v7932_v45, 0.0  ;;  %v7942_v39 = vmax.f32 %v7920_v32, 0.0 }
0x2c60   :  { %v7937_v36 = vpop.f32.mrf.mxu0 }
0x2c61   :  { %v7938_v29 = vadd.f32 %v7937_v36, %v13666_v57  ;;  %v7947_v19 = vmax.f32 %v7934_v40, 0.0 }
0x2c62   :  { %v7939_v38 = vpop.f32.mrf.mxu0 }
0x2c63   :  { %v7940_v20 = vadd.f32 %v7939_v38, %v13666_v57  ;;  %v7948_v58 = vmax.f32 %v7938_v29, 0.0  ;;  %v7943_v57 = vmax.f32 %v7922_v49, 0.0 }
0x2c65   :  { %v7949_v62 = vmax.f32 %v7940_v20, 0.0 }
0x2c67   :  { %8099 = vmatprep.subr.mxu1 %v7949_v62 }
0x2c68   :  { %8100 = vmatpush1.msra.mxu1 %v7948_v58 }
0x2c69   :  { %8101 = vmatprep.subr.mxu1 %v7947_v19 }
0x2c6a   :  { %8102 = vmatpush1.msra.mxu1 %v7946_v11 }
0x2c6b   :  { %8103 = vmatprep.subr.mxu1 %v7945_v48 }
0x2c6c   :  { %8104 = vmatpush1.msra.mxu1 %v7944_v41 }
0x2c6d   :  { %8105 = vmatprep.subr.mxu1 %v7943_v57 }
0x2c6e   :  { %8106 = vmatpush1.msra.mxu1 %v7942_v39 }
0x2ca9   :  { %v8062_v16 = vpop.xlane.xlu0 %8061 }
0x2caa   :  { %v8063_v50 = vmax.f32 %v8062_v16, 1e-24 }
0x2cac   :  { %10606 = vrsqrt.f32 %v8063_v50 }
0x2cb9   :  { %v10607_v2 = vpop.eup %10606 }
0x2cba   :  { %v8065_v42 = vmul.f32 %v10607_v2, %v8058_v7 }
0x2cbc   :  { %8545 = vmatmul.mubr.msk.f32.vlgmr.msra.gmra.mxu1 %vm122_vm1, %v8065_v42 }
0x2d7c   :  { %v8141_v6 = vpop.f32.mrf.mxu1 }
0x2d7d   :  { %v8142_v35 = vadd.f32 %v8141_v6, %v8070_v17 }
0x2d7e   :  { %v8143_v21 = vpop.f32.mrf.mxu1 }
0x2d7f   :  { %v8144_v33 = vadd.f32 %v8143_v21, %v8070_v17 }
0x2d81   :  { %v8148_v24 = vcombine.low %v8142_v35, %v8144_v33 }
0x2d83   :  { %8546 = vst [vmem:[%s13722_s4 + $0x8] sm:$0x77] %v8148_v24 }

</bundles_post_ra>
